<compile_context>
chip_gen: v5e
topology: v5e:2x2
jax: 0.10.0
libtpu: 0.0.40
codegen_flags: <defaults>
</compile_context>

<pallas_src>
import numpy as np
import jax
import jax.numpy as jnp
from jax.experimental import pallas as pl
from jax.experimental.pallas import tpu as pltpu

NUM_CLASSES = 3
CPAD = 128            # lane-padded channel width for every activation / weight


# --------------------- constant operator matrices (numpy, one-time) -----------------

def _adaptive_pool_matrix(in_size, out_size):
    """PyTorch AdaptiveAvgPool1d weights as an (out, in) matrix."""
    A = np.zeros((out_size, in_size), np.float32)
    for i in range(out_size):
        s = (i * in_size) // out_size
        e = -(-((i + 1) * in_size) // out_size)          # ceil
        A[i, s:e] = 1.0 / (e - s)
    return A


def _conv3_selection():
    """(9, 100, 289) 0/1 matrices: tap (i,j) of the k=3,s=2,p=2 conv on a 17x17 map."""
    S = np.zeros((9, 10 * 10, 17 * 17), np.float32)
    for i in range(3):
        for j in range(3):
            t = i * 3 + j
            for oy in range(10):
                for ox in range(10):
                    y = 2 * oy + i - 2
                    x = 2 * ox + j - 2
                    if 0 <= y < 17 and 0 <= x < 17:
                        S[t, oy * 10 + ox, y * 17 + x] = 1.0
    return S


def _maxpool_selection():
    """(4, 100, 324) 0/1 matrices: the 4 candidates of MaxPool2d(k=2,s=2,p=1) on 18x18."""
    S = np.zeros((4, 10 * 10, 18 * 18), np.float32)
    for di in range(2):
        for dj in range(2):
            t = di * 2 + dj
            for i in range(10):
                for j in range(10):
                    r = 2 * i - 1 + di
                    c = 2 * j - 1 + dj
                    if 0 <= r < 18 and 0 <= c < 18:
                        S[t, i * 10 + j, r * 18 + c] = 1.0
    return S


# ------------------------------ model params / prep ---------------------------------

def init_params(key, num_classes=NUM_CLASSES):
    ks = jax.random.split(key, 18)
    p = {}
    p["w1"] = jax.random.normal(ks[0], (16, 3, 2, 2), jnp.float32) * 0.2
    p["bn1_gamma"] = jax.random.uniform(ks[1], (16,), jnp.float32, 0.5, 1.5)
    p["bn1_beta"] = jax.random.normal(ks[2], (16,), jnp.float32) * 0.1
    p["bn1_mean"] = jax.random.normal(ks[3], (16,), jnp.float32) * 0.1
    p["bn1_var"] = jax.random.uniform(ks[4], (16,), jnp.float32, 0.5, 1.5)

    p["w2"] = jax.random.normal(ks[5], (8, 3, 3, 3), jnp.float32) * 0.2
    p["b2"] = jax.random.normal(ks[6], (8,), jnp.float32) * 0.1
    p["bn2_gamma"] = jax.random.uniform(ks[7], (8,), jnp.float32, 0.5, 1.5)
    p["bn2_beta"] = jax.random.normal(ks[8], (8,), jnp.float32) * 0.1
    p["bn2_mean"] = jax.random.normal(ks[9], (8,), jnp.float32) * 0.1
    p["bn2_var"] = jax.random.uniform(ks[10], (8,), jnp.float32, 0.5, 1.5)

    p["w3"] = jax.random.normal(ks[11], (16, 8, 3, 3), jnp.float32) * 0.2
    p["b3"] = jax.random.normal(ks[12], (16,), jnp.float32) * 0.1

    p["fc_w"] = jax.random.normal(ks[13], (num_classes, 1600), jnp.float32) * 0.05
    p["fc_b"] = jax.random.normal(ks[14], (num_classes,), jnp.float32) * 0.1
    return p


def prepare_constants(params, num_classes=NUM_CLASSES, eps=1e-5):
    """One-time (non-traced) prep: fold BN, reshape/pad all weights to 128 lanes,
    build the constant selection / pooling operator matrices."""
    C = CPAD
    # conv1 (bias-free) + bn1 folded
    s1 = params["bn1_gamma"] / jnp.sqrt(params["bn1_var"] + eps)
    t1 = params["bn1_beta"] - params["bn1_mean"] * s1
    w1 = params["w1"] * s1[:, None, None, None]                       # (16,3,2,2)
    w1m = jnp.transpose(w1, (2, 3, 1, 0)).reshape(12, 16)             # (kh*kw*cin, cout)
    w1p = jnp.zeros((12, C), jnp.float32).at[:, :16].set(w1m)
    t1p = jnp.zeros((1, C), jnp.float32).at[0, :16].set(t1)

    # conv2 + bn2 folded
    s2 = params["bn2_gamma"] / jnp.sqrt(params["bn2_var"] + eps)
    t2 = params["bn2_beta"] - params["bn2_mean"] * s2
    w2 = params["w2"] * s2[:, None, None, None]                       # (8,3,3,3)
    w2m = jnp.transpose(w2, (2, 3, 1, 0)).reshape(27, 8)
    b2 = params["b2"] * s2 + t2
    w2p = jnp.zeros((27, C), jnp.float32).at[:, :8].set(w2m)
    b2p = jnp.zeros((1, C), jnp.float32).at[0, :8].set(b2)

    # conv3: one padded (cin, cout) matrix per (kh, kw) tap
    w3 = params["w3"]                                                 # (16,8,3,3)
    w3p = jnp.zeros((9, C, C), jnp.float32)
    for i in range(3):
        for j in range(3):
            w3p = w3p.at[i * 3 + j, :8, :16].set(jnp.transpose(w3[:, :, i, j], (1, 0)))
    b3p = jnp.zeros((1, C), jnp.float32).at[0, :16].set(params["b3"])

    # fc weight reordered to (class, spatial=h*10+w, channel) slabs, channel-padded
    wfc = params["fc_w"].reshape(num_classes, 16, 100)                # flat = c*100 + s
    wfc_r = jnp.zeros((num_classes, 100, C), jnp.float32).at[:, :, :16].set(
        jnp.transpose(wfc, (0, 2, 1)))
    bfc_p = jnp.zeros((1, C), jnp.float32).at[0, :num_classes].set(params["fc_b"])

    A = _adaptive_pool_matrix(10, 18)                                 # (18,10)
    return dict(
        w1p=w1p, t1p=t1p, w2p=w2p, b2p=b2p,
        s3=jnp.asarray(_conv3_selection()),                           # (9,100,289)
        w3p=w3p, b3p=b3p,
        pool=jnp.asarray(np.kron(A, A)),                              # (324,100)
        s4=jnp.asarray(_maxpool_selection()),                         # (4,100,324)
        wfc=wfc_r, bfc=bfc_p,
    )


# ----------------------------------- fused kernel -----------------------------------

def _fused_forward_kernel(cols1_ref, cols2_ref, w1_ref, t1_ref, w2_ref, b2_ref,
                          s3_ref, w3_ref, b3_ref, pool_ref, s4_ref,
                          wfc_ref, bfc_ref, o_ref):
    f32 = jnp.float32

    # conv1 (+ folded BN1): (324,12)@(12,128) -> rows = 18x18 spatial, cols = channels
    a1 = jnp.dot(cols1_ref[0], w1_ref[...], preferred_element_type=f32) + t1_ref[...]

    # conv2 (+ folded BN2): (289,27)@(27,128) -> 17x17 spatial
    a2 = jnp.dot(cols2_ref[0], w2_ref[...], preferred_element_type=f32) + b2_ref[...]

    # conv3: stride-2 im2col expressed as 9 constant 0/1 spatial-selection matmuls
    acc3 = jnp.zeros((100, CPAD), f32)
    for t in range(9):
        p_t = jnp.dot(s3_ref[t], a2, preferred_element_type=f32)       # (100,128)
        acc3 = acc3 + jnp.dot(p_t, w3_ref[t], preferred_element_type=f32)
    out3 = acc3 + b3_ref[...]                                          # (100,128)

    # AdaptiveAvgPool2d(18): single spatial matmul 10x10 -> 18x18
    pooled = jnp.dot(pool_ref[...], out3, preferred_element_type=f32)  # (324,128)

    # add + ReLU (channels padded beyond 16 stay exactly 0)
    x = jnp.maximum(a1 + pooled, 0.0)                                  # (324,128)

    # MaxPool2d(2,2,pad=1): max over 4 spatial selections (valid since x >= 0)
    m = jnp.dot(s4_ref[0], x, preferred_element_type=f32)              # (100,128)
    for t in range(1, 4):
        m = jnp.maximum(m, jnp.dot(s4_ref[t], x, preferred_element_type=f32))

    # fc over the NCHW-flattened 1600 features: per-class Frobenius inner product,
    # scalars placed into lanes 0..num_classes-1 via an iota select (lane-dense store).
    lane = jax.lax.broadcasted_iota(jnp.int32, (1, CPAD), 1)
    y = bfc_ref[...]                                                   # (1,128)
    for k in range(NUM_CLASSES):
        yk = jnp.sum(m * wfc_ref[k], keepdims=True)                    # (1,1)
        y = y + jnp.where(lane == k, yk, 0.0)
    o_ref[0] = jnp.broadcast_to(y, (8, CPAD))


# --------------------------------- forward wrapper ----------------------------------

def two_inputs_forward(consts, in0_nchw, in1_nchw, num_classes=NUM_CLASSES):
    n = in0_nchw.shape[0]
    f32 = jnp.float32

    # ---- pure data-rearrangement glue (NCHW->NHWC, pad, im2col) ----
    x0 = jnp.transpose(in0_nchw.astype(f32), (0, 2, 3, 1))
    x0 = jnp.pad(x0, ((0, 0), (2, 2), (2, 2), (0, 0)))                 # (N,36,36,3)
    # conv1 k=2,s=2: non-overlapping patches -> im2col is a pure reshape
    cols1 = x0.reshape(n, 18, 2, 18, 2, 3).transpose(0, 1, 3, 2, 4, 5).reshape(n, 324, 12)

    x1 = jnp.transpose(in1_nchw.astype(f32), (0, 2, 3, 1))
    x1 = jnp.pad(x1, ((0, 0), (2, 2), (2, 2), (0, 0)))                 # (N,36,36,3)
    patches = [x1[:, i:i + 33:2, j:j + 33:2, :] for i in range(3) for j in range(3)]
    cols2 = jnp.stack(patches, axis=3).reshape(n, 289, 27)

    def const_spec(arr):
        nd = arr.ndim
        return pl.BlockSpec(arr.shape, lambda b, _nd=nd: (0,) * _nd)

    grid_spec = pltpu.PrefetchScalarGridSpec(
        num_scalar_prefetch=0,
        grid=(n,),
        in_specs=[
            pl.BlockSpec((1, 324, 12), lambda b: (b, 0, 0)),
            pl.BlockSpec((1, 289, 27), lambda b: (b, 0, 0)),
            const_spec(consts["w1p"]), const_spec(consts["t1p"]),
            const_spec(consts["w2p"]), const_spec(consts["b2p"]),
            const_spec(consts["s3"]), const_spec(consts["w3p"]),
            const_spec(consts["b3p"]), const_spec(consts["pool"]),
            const_spec(consts["s4"]), const_spec(consts["wfc"]),
            const_spec(consts["bfc"]),
        ],
        out_specs=pl.BlockSpec((1, 8, CPAD), lambda b: (b, 0, 0)),
    )

    out = pl.pallas_call(
        _fused_forward_kernel,
        out_shape=jax.ShapeDtypeStruct((n, 8, CPAD), f32),
        grid_spec=grid_spec,
        compiler_params=pltpu.CompilerParams(
            dimension_semantics=("parallel",)),
    )(cols1, cols2, consts["w1p"], consts["t1p"], consts["w2p"], consts["b2p"],
      consts["s3"], consts["w3p"], consts["b3p"], consts["pool"], consts["s4"],
      consts["wfc"], consts["bfc"])

    return out[:, 0, :num_classes]


if __name__ == "__main__":
    key = jax.random.PRNGKey(0)
    kp, k0, k1 = jax.random.split(key, 3)
    params = init_params(kp)
    consts = prepare_constants(params)

    # Both inputs are NCHW (2,3,32,32): conv1 -> 18x18; conv2 -> 17x17 -> conv3 -> 10x10.
    in0 = jax.random.normal(k0, (2, 3, 32, 32), jnp.float32)
    in1 = jax.random.normal(k1, (2, 3, 32, 32), jnp.float32)

    fwd = jax.jit(two_inputs_forward)
    out = jax.block_until_ready(fwd(consts, in0, in1))
    assert out.shape == (2, NUM_CLASSES), out.shape
    assert bool(jnp.all(jnp.isfinite(out)))
    print("KERNEL_OK")
</pallas_src>

<mosaic_0001>
module attributes {stable_mosaic.version = 11 : i64} {
  func.func @_fused_forward_kernel(%arg0: i32, %arg1: memref<1x324x12xf32, #tpu.memory_space<vmem>>, %arg2: memref<1x289x27xf32, #tpu.memory_space<vmem>>, %arg3: memref<12x128xf32, #tpu.memory_space<vmem>>, %arg4: memref<1x128xf32, #tpu.memory_space<vmem>>, %arg5: memref<27x128xf32, #tpu.memory_space<vmem>>, %arg6: memref<1x128xf32, #tpu.memory_space<vmem>>, %arg7: memref<9x100x289xf32, #tpu.memory_space<vmem>>, %arg8: memref<9x128x128xf32, #tpu.memory_space<vmem>>, %arg9: memref<1x128xf32, #tpu.memory_space<vmem>>, %arg10: memref<324x100xf32, #tpu.memory_space<vmem>>, %arg11: memref<4x100x324xf32, #tpu.memory_space<vmem>>, %arg12: memref<3x100x128xf32, #tpu.memory_space<vmem>>, %arg13: memref<1x128xf32, #tpu.memory_space<vmem>>, %arg14: memref<1x8x128xf32, #tpu.memory_space<vmem>>) attributes {dimension_semantics = [#tpu.dimension_semantics<parallel>], iteration_bounds = array<i64: 2>, scalar_prefetch = 0 : i64, scratch_operands = 0 : i64, tpu.core_type = #tpu.core_type<tc>, window_params = [{transform_indices = @transform_0, window_bounds = array<i64: 1, 324, 12>}, {transform_indices = @transform_1, window_bounds = array<i64: 1, 289, 27>}, {pipeline_mode = #tpu.pipeline_mode<synchronous>, transform_indices = @transform_2, window_bounds = array<i64: 12, 128>}, {pipeline_mode = #tpu.pipeline_mode<synchronous>, transform_indices = @transform_3, window_bounds = array<i64: 1, 128>}, {pipeline_mode = #tpu.pipeline_mode<synchronous>, transform_indices = @transform_4, window_bounds = array<i64: 27, 128>}, {pipeline_mode = #tpu.pipeline_mode<synchronous>, transform_indices = @transform_5, window_bounds = array<i64: 1, 128>}, {pipeline_mode = #tpu.pipeline_mode<synchronous>, transform_indices = @transform_6, window_bounds = array<i64: 9, 100, 289>}, {pipeline_mode = #tpu.pipeline_mode<synchronous>, transform_indices = @transform_7, window_bounds = array<i64: 9, 128, 128>}, {pipeline_mode = #tpu.pipeline_mode<synchronous>, transform_indices = @transform_8, window_bounds = array<i64: 1, 128>}, {pipeline_mode = #tpu.pipeline_mode<synchronous>, transform_indices = @transform_9, window_bounds = array<i64: 324, 100>}, {pipeline_mode = #tpu.pipeline_mode<synchronous>, transform_indices = @transform_10, window_bounds = array<i64: 4, 100, 324>}, {pipeline_mode = #tpu.pipeline_mode<synchronous>, transform_indices = @transform_11, window_bounds = array<i64: 3, 100, 128>}, {pipeline_mode = #tpu.pipeline_mode<synchronous>, transform_indices = @transform_12, window_bounds = array<i64: 1, 128>}, {transform_indices = @transform_13, window_bounds = array<i64: 1, 8, 128>}]} {
    %c0 = arith.constant 0 : index
    %c0_0 = arith.constant 0 : index
    %c0_1 = arith.constant 0 : index
    %0 = vector.load %arg1[%c0, %c0_0, %c0_1] : memref<1x324x12xf32, #tpu.memory_space<vmem>>, vector<1x324x12xf32>
    %1 = vector.shape_cast %0 : vector<1x324x12xf32> to vector<324x12xf32>
    %c0_2 = arith.constant 0 : index
    %c0_3 = arith.constant 0 : index
    %2 = vector.load %arg3[%c0_2, %c0_3] : memref<12x128xf32, #tpu.memory_space<vmem>>, vector<12x128xf32>
    %cst = arith.constant dense<0.000000e+00> : vector<324x128xf32>
    %3 = tpu.matmul %1, %2, %cst {dimension_numbers = #tpu.dot_dimension_numbers<[1], [0], [0], [1], [0, 0, 1, 1], [], []>} : vector<324x12xf32>, vector<12x128xf32>, vector<324x128xf32> -> vector<324x128xf32>
    %c0_4 = arith.constant 0 : index
    %c0_5 = arith.constant 0 : index
    %4 = vector.load %arg4[%c0_4, %c0_5] : memref<1x128xf32, #tpu.memory_space<vmem>>, vector<1x128xf32>
    %5 = vector.broadcast %4 : vector<1x128xf32> to vector<324x128xf32>
    %6 = arith.addf %3, %5 : vector<324x128xf32>
    %c0_6 = arith.constant 0 : index
    %c0_7 = arith.constant 0 : index
    %c0_8 = arith.constant 0 : index
    %7 = vector.load %arg2[%c0_6, %c0_7, %c0_8] : memref<1x289x27xf32, #tpu.memory_space<vmem>>, vector<1x289x27xf32>
    %8 = vector.shape_cast %7 : vector<1x289x27xf32> to vector<289x27xf32>
    %c0_9 = arith.constant 0 : index
    %c0_10 = arith.constant 0 : index
    %9 = vector.load %arg5[%c0_9, %c0_10] : memref<27x128xf32, #tpu.memory_space<vmem>>, vector<27x128xf32>
    %cst_11 = arith.constant dense<0.000000e+00> : vector<289x128xf32>
    %10 = tpu.matmul %8, %9, %cst_11 {dimension_numbers = #tpu.dot_dimension_numbers<[1], [0], [0], [1], [0, 0, 1, 1], [], []>} : vector<289x27xf32>, vector<27x128xf32>, vector<289x128xf32> -> vector<289x128xf32>
    %c0_12 = arith.constant 0 : index
    %c0_13 = arith.constant 0 : index
    %11 = vector.load %arg6[%c0_12, %c0_13] : memref<1x128xf32, #tpu.memory_space<vmem>>, vector<1x128xf32>
    %12 = vector.broadcast %11 : vector<1x128xf32> to vector<289x128xf32>
    %13 = arith.addf %10, %12 : vector<289x128xf32>
    %cst_14 = arith.constant 0.000000e+00 : f32
    %14 = vector.broadcast %cst_14 : f32 to vector<100x128xf32>
    %c0_15 = arith.constant 0 : index
    %c0_16 = arith.constant 0 : index
    %c0_17 = arith.constant 0 : index
    %15 = vector.load %arg7[%c0_15, %c0_16, %c0_17] : memref<9x100x289xf32, #tpu.memory_space<vmem>>, vector<1x100x289xf32>
    %16 = vector.shape_cast %15 : vector<1x100x289xf32> to vector<100x289xf32>
    %cst_18 = arith.constant dense<0.000000e+00> : vector<100x128xf32>
    %17 = tpu.matmul %16, %13, %cst_18 {dimension_numbers = #tpu.dot_dimension_numbers<[1], [0], [0], [1], [0, 0, 1, 1], [], []>} : vector<100x289xf32>, vector<289x128xf32>, vector<100x128xf32> -> vector<100x128xf32>
    %c0_19 = arith.constant 0 : index
    %c0_20 = arith.constant 0 : index
    %c0_21 = arith.constant 0 : index
    %18 = vector.load %arg8[%c0_19, %c0_20, %c0_21] : memref<9x128x128xf32, #tpu.memory_space<vmem>>, vector<1x128x128xf32>
    %19 = vector.shape_cast %18 : vector<1x128x128xf32> to vector<128x128xf32>
    %cst_22 = arith.constant dense<0.000000e+00> : vector<100x128xf32>
    %20 = tpu.matmul %17, %19, %cst_22 {dimension_numbers = #tpu.dot_dimension_numbers<[1], [0], [0], [1], [0, 0, 1, 1], [], []>} : vector<100x128xf32>, vector<128x128xf32>, vector<100x128xf32> -> vector<100x128xf32>
    %21 = arith.addf %14, %20 : vector<100x128xf32>
    %c1 = arith.constant 1 : index
    %c0_23 = arith.constant 0 : index
    %c0_24 = arith.constant 0 : index
    %22 = vector.load %arg7[%c1, %c0_23, %c0_24] : memref<9x100x289xf32, #tpu.memory_space<vmem>>, vector<1x100x289xf32>
    %23 = vector.shape_cast %22 : vector<1x100x289xf32> to vector<100x289xf32>
    %cst_25 = arith.constant dense<0.000000e+00> : vector<100x128xf32>
    %24 = tpu.matmul %23, %13, %cst_25 {dimension_numbers = #tpu.dot_dimension_numbers<[1], [0], [0], [1], [0, 0, 1, 1], [], []>} : vector<100x289xf32>, vector<289x128xf32>, vector<100x128xf32> -> vector<100x128xf32>
    %c1_26 = arith.constant 1 : index
    %c0_27 = arith.constant 0 : index
    %c0_28 = arith.constant 0 : index
    %25 = vector.load %arg8[%c1_26, %c0_27, %c0_28] : memref<9x128x128xf32, #tpu.memory_space<vmem>>, vector<1x128x128xf32>
    %26 = vector.shape_cast %25 : vector<1x128x128xf32> to vector<128x128xf32>
    %cst_29 = arith.constant dense<0.000000e+00> : vector<100x128xf32>
    %27 = tpu.matmul %24, %26, %cst_29 {dimension_numbers = #tpu.dot_dimension_numbers<[1], [0], [0], [1], [0, 0, 1, 1], [], []>} : vector<100x128xf32>, vector<128x128xf32>, vector<100x128xf32> -> vector<100x128xf32>
    %28 = arith.addf %21, %27 : vector<100x128xf32>
    %c2 = arith.constant 2 : index
    %c0_30 = arith.constant 0 : index
    %c0_31 = arith.constant 0 : index
    %29 = vector.load %arg7[%c2, %c0_30, %c0_31] : memref<9x100x289xf32, #tpu.memory_space<vmem>>, vector<1x100x289xf32>
    %30 = vector.shape_cast %29 : vector<1x100x289xf32> to vector<100x289xf32>
    %cst_32 = arith.constant dense<0.000000e+00> : vector<100x128xf32>
    %31 = tpu.matmul %30, %13, %cst_32 {dimension_numbers = #tpu.dot_dimension_numbers<[1], [0], [0], [1], [0, 0, 1, 1], [], []>} : vector<100x289xf32>, vector<289x128xf32>, vector<100x128xf32> -> vector<100x128xf32>
    %c2_33 = arith.constant 2 : index
    %c0_34 = arith.constant 0 : index
    %c0_35 = arith.constant 0 : index
    %32 = vector.load %arg8[%c2_33, %c0_34, %c0_35] : memref<9x128x128xf32, #tpu.memory_space<vmem>>, vector<1x128x128xf32>
    %33 = vector.shape_cast %32 : vector<1x128x128xf32> to vector<128x128xf32>
    %cst_36 = arith.constant dense<0.000000e+00> : vector<100x128xf32>
    %34 = tpu.matmul %31, %33, %cst_36 {dimension_numbers = #tpu.dot_dimension_numbers<[1], [0], [0], [1], [0, 0, 1, 1], [], []>} : vector<100x128xf32>, vector<128x128xf32>, vector<100x128xf32> -> vector<100x128xf32>
    %35 = arith.addf %28, %34 : vector<100x128xf32>
    %c3 = arith.constant 3 : index
    %c0_37 = arith.constant 0 : index
    %c0_38 = arith.constant 0 : index
    %36 = vector.load %arg7[%c3, %c0_37, %c0_38] : memref<9x100x289xf32, #tpu.memory_space<vmem>>, vector<1x100x289xf32>
    %37 = vector.shape_cast %36 : vector<1x100x289xf32> to vector<100x289xf32>
    %cst_39 = arith.constant dense<0.000000e+00> : vector<100x128xf32>
    %38 = tpu.matmul %37, %13, %cst_39 {dimension_numbers = #tpu.dot_dimension_numbers<[1], [0], [0], [1], [0, 0, 1, 1], [], []>} : vector<100x289xf32>, vector<289x128xf32>, vector<100x128xf32> -> vector<100x128xf32>
    %c3_40 = arith.constant 3 : index
    %c0_41 = arith.constant 0 : index
    %c0_42 = arith.constant 0 : index
    %39 = vector.load %arg8[%c3_40, %c0_41, %c0_42] : memref<9x128x128xf32, #tpu.memory_space<vmem>>, vector<1x128x128xf32>
    %40 = vector.shape_cast %39 : vector<1x128x128xf32> to vector<128x128xf32>
    %cst_43 = arith.constant dense<0.000000e+00> : vector<100x128xf32>
    %41 = tpu.matmul %38, %40, %cst_43 {dimension_numbers = #tpu.dot_dimension_numbers<[1], [0], [0], [1], [0, 0, 1, 1], [], []>} : vector<100x128xf32>, vector<128x128xf32>, vector<100x128xf32> -> vector<100x128xf32>
    %42 = arith.addf %35, %41 : vector<100x128xf32>
    %c4 = arith.constant 4 : index
    %c0_44 = arith.constant 0 : index
    %c0_45 = arith.constant 0 : index
    %43 = vector.load %arg7[%c4, %c0_44, %c0_45] : memref<9x100x289xf32, #tpu.memory_space<vmem>>, vector<1x100x289xf32>
    %44 = vector.shape_cast %43 : vector<1x100x289xf32> to vector<100x289xf32>
    %cst_46 = arith.constant dense<0.000000e+00> : vector<100x128xf32>
    %45 = tpu.matmul %44, %13, %cst_46 {dimension_numbers = #tpu.dot_dimension_numbers<[1], [0], [0], [1], [0, 0, 1, 1], [], []>} : vector<100x289xf32>, vector<289x128xf32>, vector<100x128xf32> -> vector<100x128xf32>
    %c4_47 = arith.constant 4 : index
    %c0_48 = arith.constant 0 : index
    %c0_49 = arith.constant 0 : index
    %46 = vector.load %arg8[%c4_47, %c0_48, %c0_49] : memref<9x128x128xf32, #tpu.memory_space<vmem>>, vector<1x128x128xf32>
    %47 = vector.shape_cast %46 : vector<1x128x128xf32> to vector<128x128xf32>
    %cst_50 = arith.constant dense<0.000000e+00> : vector<100x128xf32>
    %48 = tpu.matmul %45, %47, %cst_50 {dimension_numbers = #tpu.dot_dimension_numbers<[1], [0], [0], [1], [0, 0, 1, 1], [], []>} : vector<100x128xf32>, vector<128x128xf32>, vector<100x128xf32> -> vector<100x128xf32>
    %49 = arith.addf %42, %48 : vector<100x128xf32>
    %c5 = arith.constant 5 : index
    %c0_51 = arith.constant 0 : index
    %c0_52 = arith.constant 0 : index
    %50 = vector.load %arg7[%c5, %c0_51, %c0_52] : memref<9x100x289xf32, #tpu.memory_space<vmem>>, vector<1x100x289xf32>
    %51 = vector.shape_cast %50 : vector<1x100x289xf32> to vector<100x289xf32>
    %cst_53 = arith.constant dense<0.000000e+00> : vector<100x128xf32>
    %52 = tpu.matmul %51, %13, %cst_53 {dimension_numbers = #tpu.dot_dimension_numbers<[1], [0], [0], [1], [0, 0, 1, 1], [], []>} : vector<100x289xf32>, vector<289x128xf32>, vector<100x128xf32> -> vector<100x128xf32>
    %c5_54 = arith.constant 5 : index
    %c0_55 = arith.constant 0 : index
    %c0_56 = arith.constant 0 : index
    %53 = vector.load %arg8[%c5_54, %c0_55, %c0_56] : memref<9x128x128xf32, #tpu.memory_space<vmem>>, vector<1x128x128xf32>
    %54 = vector.shape_cast %53 : vector<1x128x128xf32> to vector<128x128xf32>
    %cst_57 = arith.constant dense<0.000000e+00> : vector<100x128xf32>
    %55 = tpu.matmul %52, %54, %cst_57 {dimension_numbers = #tpu.dot_dimension_numbers<[1], [0], [0], [1], [0, 0, 1, 1], [], []>} : vector<100x128xf32>, vector<128x128xf32>, vector<100x128xf32> -> vector<100x128xf32>
    %56 = arith.addf %49, %55 : vector<100x128xf32>
    %c6 = arith.constant 6 : index
    %c0_58 = arith.constant 0 : index
    %c0_59 = arith.constant 0 : index
    %57 = vector.load %arg7[%c6, %c0_58, %c0_59] : memref<9x100x289xf32, #tpu.memory_space<vmem>>, vector<1x100x289xf32>
    %58 = vector.shape_cast %57 : vector<1x100x289xf32> to vector<100x289xf32>
    %cst_60 = arith.constant dense<0.000000e+00> : vector<100x128xf32>
    %59 = tpu.matmul %58, %13, %cst_60 {dimension_numbers = #tpu.dot_dimension_numbers<[1], [0], [0], [1], [0, 0, 1, 1], [], []>} : vector<100x289xf32>, vector<289x128xf32>, vector<100x128xf32> -> vector<100x128xf32>
    %c6_61 = arith.constant 6 : index
    %c0_62 = arith.constant 0 : index
    %c0_63 = arith.constant 0 : index
    %60 = vector.load %arg8[%c6_61, %c0_62, %c0_63] : memref<9x128x128xf32, #tpu.memory_space<vmem>>, vector<1x128x128xf32>
    %61 = vector.shape_cast %60 : vector<1x128x128xf32> to vector<128x128xf32>
    %cst_64 = arith.constant dense<0.000000e+00> : vector<100x128xf32>
    %62 = tpu.matmul %59, %61, %cst_64 {dimension_numbers = #tpu.dot_dimension_numbers<[1], [0], [0], [1], [0, 0, 1, 1], [], []>} : vector<100x128xf32>, vector<128x128xf32>, vector<100x128xf32> -> vector<100x128xf32>
    %63 = arith.addf %56, %62 : vector<100x128xf32>
    %c7 = arith.constant 7 : index
    %c0_65 = arith.constant 0 : index
    %c0_66 = arith.constant 0 : index
    %64 = vector.load %arg7[%c7, %c0_65, %c0_66] : memref<9x100x289xf32, #tpu.memory_space<vmem>>, vector<1x100x289xf32>
    %65 = vector.shape_cast %64 : vector<1x100x289xf32> to vector<100x289xf32>
    %cst_67 = arith.constant dense<0.000000e+00> : vector<100x128xf32>
    %66 = tpu.matmul %65, %13, %cst_67 {dimension_numbers = #tpu.dot_dimension_numbers<[1], [0], [0], [1], [0, 0, 1, 1], [], []>} : vector<100x289xf32>, vector<289x128xf32>, vector<100x128xf32> -> vector<100x128xf32>
    %c7_68 = arith.constant 7 : index
    %c0_69 = arith.constant 0 : index
    %c0_70 = arith.constant 0 : index
    %67 = vector.load %arg8[%c7_68, %c0_69, %c0_70] : memref<9x128x128xf32, #tpu.memory_space<vmem>>, vector<1x128x128xf32>
    %68 = vector.shape_cast %67 : vector<1x128x128xf32> to vector<128x128xf32>
    %cst_71 = arith.constant dense<0.000000e+00> : vector<100x128xf32>
    %69 = tpu.matmul %66, %68, %cst_71 {dimension_numbers = #tpu.dot_dimension_numbers<[1], [0], [0], [1], [0, 0, 1, 1], [], []>} : vector<100x128xf32>, vector<128x128xf32>, vector<100x128xf32> -> vector<100x128xf32>
    %70 = arith.addf %63, %69 : vector<100x128xf32>
    %c8 = arith.constant 8 : index
    %c0_72 = arith.constant 0 : index
    %c0_73 = arith.constant 0 : index
    %71 = vector.load %arg7[%c8, %c0_72, %c0_73] : memref<9x100x289xf32, #tpu.memory_space<vmem>>, vector<1x100x289xf32>
    %72 = vector.shape_cast %71 : vector<1x100x289xf32> to vector<100x289xf32>
    %cst_74 = arith.constant dense<0.000000e+00> : vector<100x128xf32>
    %73 = tpu.matmul %72, %13, %cst_74 {dimension_numbers = #tpu.dot_dimension_numbers<[1], [0], [0], [1], [0, 0, 1, 1], [], []>} : vector<100x289xf32>, vector<289x128xf32>, vector<100x128xf32> -> vector<100x128xf32>
    %c8_75 = arith.constant 8 : index
    %c0_76 = arith.constant 0 : index
    %c0_77 = arith.constant 0 : index
    %74 = vector.load %arg8[%c8_75, %c0_76, %c0_77] : memref<9x128x128xf32, #tpu.memory_space<vmem>>, vector<1x128x128xf32>
    %75 = vector.shape_cast %74 : vector<1x128x128xf32> to vector<128x128xf32>
    %cst_78 = arith.constant dense<0.000000e+00> : vector<100x128xf32>
    %76 = tpu.matmul %73, %75, %cst_78 {dimension_numbers = #tpu.dot_dimension_numbers<[1], [0], [0], [1], [0, 0, 1, 1], [], []>} : vector<100x128xf32>, vector<128x128xf32>, vector<100x128xf32> -> vector<100x128xf32>
    %77 = arith.addf %70, %76 : vector<100x128xf32>
    %c0_79 = arith.constant 0 : index
    %c0_80 = arith.constant 0 : index
    %78 = vector.load %arg9[%c0_79, %c0_80] : memref<1x128xf32, #tpu.memory_space<vmem>>, vector<1x128xf32>
    %79 = vector.broadcast %78 : vector<1x128xf32> to vector<100x128xf32>
    %80 = arith.addf %77, %79 : vector<100x128xf32>
    %c0_81 = arith.constant 0 : index
    %c0_82 = arith.constant 0 : index
    %81 = vector.load %arg10[%c0_81, %c0_82] : memref<324x100xf32, #tpu.memory_space<vmem>>, vector<324x100xf32>
    %cst_83 = arith.constant dense<0.000000e+00> : vector<324x128xf32>
    %82 = tpu.matmul %81, %80, %cst_83 {dimension_numbers = #tpu.dot_dimension_numbers<[1], [0], [0], [1], [0, 0, 1, 1], [], []>} : vector<324x100xf32>, vector<100x128xf32>, vector<324x128xf32> -> vector<324x128xf32>
    %83 = arith.addf %6, %82 : vector<324x128xf32>
    %cst_84 = arith.constant 0.000000e+00 : f32
    %84 = vector.broadcast %cst_84 : f32 to vector<324x128xf32>
    %85 = arith.maximumf %83, %84 : vector<324x128xf32>
    %c0_85 = arith.constant 0 : index
    %c0_86 = arith.constant 0 : index
    %c0_87 = arith.constant 0 : index
    %86 = vector.load %arg11[%c0_85, %c0_86, %c0_87] : memref<4x100x324xf32, #tpu.memory_space<vmem>>, vector<1x100x324xf32>
    %87 = vector.shape_cast %86 : vector<1x100x324xf32> to vector<100x324xf32>
    %cst_88 = arith.constant dense<0.000000e+00> : vector<100x128xf32>
    %88 = tpu.matmul %87, %85, %cst_88 {dimension_numbers = #tpu.dot_dimension_numbers<[1], [0], [0], [1], [0, 0, 1, 1], [], []>} : vector<100x324xf32>, vector<324x128xf32>, vector<100x128xf32> -> vector<100x128xf32>
    %c1_89 = arith.constant 1 : index
    %c0_90 = arith.constant 0 : index
    %c0_91 = arith.constant 0 : index
    %89 = vector.load %arg11[%c1_89, %c0_90, %c0_91] : memref<4x100x324xf32, #tpu.memory_space<vmem>>, vector<1x100x324xf32>
    %90 = vector.shape_cast %89 : vector<1x100x324xf32> to vector<100x324xf32>
    %cst_92 = arith.constant dense<0.000000e+00> : vector<100x128xf32>
    %91 = tpu.matmul %90, %85, %cst_92 {dimension_numbers = #tpu.dot_dimension_numbers<[1], [0], [0], [1], [0, 0, 1, 1], [], []>} : vector<100x324xf32>, vector<324x128xf32>, vector<100x128xf32> -> vector<100x128xf32>
    %92 = arith.maximumf %88, %91 : vector<100x128xf32>
    %c2_93 = arith.constant 2 : index
    %c0_94 = arith.constant 0 : index
    %c0_95 = arith.constant 0 : index
    %93 = vector.load %arg11[%c2_93, %c0_94, %c0_95] : memref<4x100x324xf32, #tpu.memory_space<vmem>>, vector<1x100x324xf32>
    %94 = vector.shape_cast %93 : vector<1x100x324xf32> to vector<100x324xf32>
    %cst_96 = arith.constant dense<0.000000e+00> : vector<100x128xf32>
    %95 = tpu.matmul %94, %85, %cst_96 {dimension_numbers = #tpu.dot_dimension_numbers<[1], [0], [0], [1], [0, 0, 1, 1], [], []>} : vector<100x324xf32>, vector<324x128xf32>, vector<100x128xf32> -> vector<100x128xf32>
    %96 = arith.maximumf %92, %95 : vector<100x128xf32>
    %c3_97 = arith.constant 3 : index
    %c0_98 = arith.constant 0 : index
    %c0_99 = arith.constant 0 : index
    %97 = vector.load %arg11[%c3_97, %c0_98, %c0_99] : memref<4x100x324xf32, #tpu.memory_space<vmem>>, vector<1x100x324xf32>
    %98 = vector.shape_cast %97 : vector<1x100x324xf32> to vector<100x324xf32>
    %cst_100 = arith.constant dense<0.000000e+00> : vector<100x128xf32>
    %99 = tpu.matmul %98, %85, %cst_100 {dimension_numbers = #tpu.dot_dimension_numbers<[1], [0], [0], [1], [0, 0, 1, 1], [], []>} : vector<100x324xf32>, vector<324x128xf32>, vector<100x128xf32> -> vector<100x128xf32>
    %100 = arith.maximumf %96, %99 : vector<100x128xf32>
    %101 = tpu.iota {dimensions = array<i32: 1>} : vector<1x128xi32>
    %c0_101 = arith.constant 0 : index
    %c0_102 = arith.constant 0 : index
    %102 = vector.load %arg13[%c0_101, %c0_102] : memref<1x128xf32, #tpu.memory_space<vmem>>, vector<1x128xf32>
    %c0_103 = arith.constant 0 : index
    %c0_104 = arith.constant 0 : index
    %c0_105 = arith.constant 0 : index
    %103 = vector.load %arg12[%c0_103, %c0_104, %c0_105] : memref<3x100x128xf32, #tpu.memory_space<vmem>>, vector<1x100x128xf32>
    %104 = vector.shape_cast %103 : vector<1x100x128xf32> to vector<100x128xf32>
    %105 = arith.mulf %100, %104 : vector<100x128xf32>
    %106 = vector.shape_cast %105 : vector<100x128xf32> to vector<1x100x128xf32>
    %cst_106 = arith.constant dense<0.000000e+00> : vector<1xf32>
    %107 = vector.multi_reduction <add>, %106, %cst_106 [1, 2] : vector<1x100x128xf32> to vector<1xf32>
    %108 = vector.shape_cast %107 : vector<1xf32> to vector<1x1x1xf32>
    %109 = vector.extract %108[0, 0, 0] : f32 from vector<1x1x1xf32>
    %110 = vector.broadcast %109 : f32 to vector<1x1xf32>
    %c0_i32 = arith.constant 0 : i32
    %111 = vector.broadcast %c0_i32 : i32 to vector<1x128xi32>
    %112 = arith.cmpi eq, %101, %111 : vector<1x128xi32>
    %cst_107 = arith.constant 0.000000e+00 : f32
    %113 = vector.shape_cast %110 : vector<1x1xf32> to vector<1x1xf32>
    %114 = vector.broadcast %113 : vector<1x1xf32> to vector<1x128xf32>
    %115 = vector.broadcast %cst_107 : f32 to vector<1x128xf32>
    %116 = arith.select %112, %114, %115 : vector<1x128xi1>, vector<1x128xf32>
    %117 = arith.addf %102, %116 : vector<1x128xf32>
    %c1_108 = arith.constant 1 : index
    %c0_109 = arith.constant 0 : index
    %c0_110 = arith.constant 0 : index
    %118 = vector.load %arg12[%c1_108, %c0_109, %c0_110] : memref<3x100x128xf32, #tpu.memory_space<vmem>>, vector<1x100x128xf32>
    %119 = vector.shape_cast %118 : vector<1x100x128xf32> to vector<100x128xf32>
    %120 = arith.mulf %100, %119 : vector<100x128xf32>
    %121 = vector.shape_cast %120 : vector<100x128xf32> to vector<1x100x128xf32>
    %cst_111 = arith.constant dense<0.000000e+00> : vector<1xf32>
    %122 = vector.multi_reduction <add>, %121, %cst_111 [1, 2] : vector<1x100x128xf32> to vector<1xf32>
    %123 = vector.shape_cast %122 : vector<1xf32> to vector<1x1x1xf32>
    %124 = vector.extract %123[0, 0, 0] : f32 from vector<1x1x1xf32>
    %125 = vector.broadcast %124 : f32 to vector<1x1xf32>
    %c1_i32 = arith.constant 1 : i32
    %126 = vector.broadcast %c1_i32 : i32 to vector<1x128xi32>
    %127 = arith.cmpi eq, %101, %126 : vector<1x128xi32>
    %cst_112 = arith.constant 0.000000e+00 : f32
    %128 = vector.shape_cast %125 : vector<1x1xf32> to vector<1x1xf32>
    %129 = vector.broadcast %128 : vector<1x1xf32> to vector<1x128xf32>
    %130 = vector.broadcast %cst_112 : f32 to vector<1x128xf32>
    %131 = arith.select %127, %129, %130 : vector<1x128xi1>, vector<1x128xf32>
    %132 = arith.addf %117, %131 : vector<1x128xf32>
    %c2_113 = arith.constant 2 : index
    %c0_114 = arith.constant 0 : index
    %c0_115 = arith.constant 0 : index
    %133 = vector.load %arg12[%c2_113, %c0_114, %c0_115] : memref<3x100x128xf32, #tpu.memory_space<vmem>>, vector<1x100x128xf32>
    %134 = vector.shape_cast %133 : vector<1x100x128xf32> to vector<100x128xf32>
    %135 = arith.mulf %100, %134 : vector<100x128xf32>
    %136 = vector.shape_cast %135 : vector<100x128xf32> to vector<1x100x128xf32>
    %cst_116 = arith.constant dense<0.000000e+00> : vector<1xf32>
    %137 = vector.multi_reduction <add>, %136, %cst_116 [1, 2] : vector<1x100x128xf32> to vector<1xf32>
    %138 = vector.shape_cast %137 : vector<1xf32> to vector<1x1x1xf32>
    %139 = vector.extract %138[0, 0, 0] : f32 from vector<1x1x1xf32>
    %140 = vector.broadcast %139 : f32 to vector<1x1xf32>
    %c2_i32 = arith.constant 2 : i32
    %141 = vector.broadcast %c2_i32 : i32 to vector<1x128xi32>
    %142 = arith.cmpi eq, %101, %141 : vector<1x128xi32>
    %cst_117 = arith.constant 0.000000e+00 : f32
    %143 = vector.shape_cast %140 : vector<1x1xf32> to vector<1x1xf32>
    %144 = vector.broadcast %143 : vector<1x1xf32> to vector<1x128xf32>
    %145 = vector.broadcast %cst_117 : f32 to vector<1x128xf32>
    %146 = arith.select %142, %144, %145 : vector<1x128xi1>, vector<1x128xf32>
    %147 = arith.addf %132, %146 : vector<1x128xf32>
    %148 = vector.shape_cast %147 : vector<1x128xf32> to vector<1x128xf32>
    %149 = vector.broadcast %148 : vector<1x128xf32> to vector<8x128xf32>
    %c0_118 = arith.constant 0 : index
    %c0_119 = arith.constant 0 : index
    %c0_120 = arith.constant 0 : index
    %150 = vector.load %arg14[%c0_118, %c0_119, %c0_120] : memref<1x8x128xf32, #tpu.memory_space<vmem>>, vector<1x8x128xf32>
    %151 = vector.shape_cast %150 : vector<1x8x128xf32> to vector<8x128xf32>
    %152 = vector.shape_cast %149 : vector<8x128xf32> to vector<1x8x128xf32>
    tpu.vector_store %arg14[%c0_118, %c0_119, %c0_120], %152 {strides = array<i32>} : memref<1x8x128xf32, #tpu.memory_space<vmem>>, vector<1x8x128xf32>,
    return
  }
  func.func @transform_0(%arg0: i32) -> (i32, i32, i32) {
    %c0_i32 = arith.constant 0 : i32
    %c0_i32_0 = arith.constant 0 : i32
    %c0_i32_1 = arith.constant 0 : i32
    return %arg0, %c0_i32, %c0_i32_0 : i32, i32, i32
  }
  func.func @transform_1(%arg0: i32) -> (i32, i32, i32) {
    %c0_i32 = arith.constant 0 : i32
    %c0_i32_0 = arith.constant 0 : i32
    %c0_i32_1 = arith.constant 0 : i32
    return %arg0, %c0_i32, %c0_i32_0 : i32, i32, i32
  }
  func.func @transform_2(%arg0: i32) -> (i32, i32) {
    %c0_i32 = arith.constant 0 : i32
    %c0_i32_0 = arith.constant 0 : i32
    %c0_i32_1 = arith.constant 0 : i32
    return %c0_i32, %c0_i32_0 : i32, i32
  }
  func.func @transform_3(%arg0: i32) -> (i32, i32) {
    %c0_i32 = arith.constant 0 : i32
    %c0_i32_0 = arith.constant 0 : i32
    %c0_i32_1 = arith.constant 0 : i32
    return %c0_i32, %c0_i32_0 : i32, i32
  }
  func.func @transform_4(%arg0: i32) -> (i32, i32) {
    %c0_i32 = arith.constant 0 : i32
    %c0_i32_0 = arith.constant 0 : i32
    %c0_i32_1 = arith.constant 0 : i32
    return %c0_i32, %c0_i32_0 : i32, i32
  }
  func.func @transform_5(%arg0: i32) -> (i32, i32) {
    %c0_i32 = arith.constant 0 : i32
    %c0_i32_0 = arith.constant 0 : i32
    %c0_i32_1 = arith.constant 0 : i32
    return %c0_i32, %c0_i32_0 : i32, i32
  }
  func.func @transform_6(%arg0: i32) -> (i32, i32, i32) {
    %c0_i32 = arith.constant 0 : i32
    %c0_i32_0 = arith.constant 0 : i32
    %c0_i32_1 = arith.constant 0 : i32
    %c0_i32_2 = arith.constant 0 : i32
    return %c0_i32, %c0_i32_0, %c0_i32_1 : i32, i32, i32
  }
  func.func @transform_7(%arg0: i32) -> (i32, i32, i32) {
    %c0_i32 = arith.constant 0 : i32
    %c0_i32_0 = arith.constant 0 : i32
    %c0_i32_1 = arith.constant 0 : i32
    %c0_i32_2 = arith.constant 0 : i32
    return %c0_i32, %c0_i32_0, %c0_i32_1 : i32, i32, i32
  }
  func.func @transform_8(%arg0: i32) -> (i32, i32) {
    %c0_i32 = arith.constant 0 : i32
    %c0_i32_0 = arith.constant 0 : i32
    %c0_i32_1 = arith.constant 0 : i32
    return %c0_i32, %c0_i32_0 : i32, i32
  }
  func.func @transform_9(%arg0: i32) -> (i32, i32) {
    %c0_i32 = arith.constant 0 : i32
    %c0_i32_0 = arith.constant 0 : i32
    %c0_i32_1 = arith.constant 0 : i32
    return %c0_i32, %c0_i32_0 : i32, i32
  }
  func.func @transform_10(%arg0: i32) -> (i32, i32, i32) {
    %c0_i32 = arith.constant 0 : i32
    %c0_i32_0 = arith.constant 0 : i32
    %c0_i32_1 = arith.constant 0 : i32
    %c0_i32_2 = arith.constant 0 : i32
    return %c0_i32, %c0_i32_0, %c0_i32_1 : i32, i32, i32
  }
  func.func @transform_11(%arg0: i32) -> (i32, i32, i32) {
    %c0_i32 = arith.constant 0 : i32
    %c0_i32_0 = arith.constant 0 : i32
    %c0_i32_1 = arith.constant 0 : i32
    %c0_i32_2 = arith.constant 0 : i32
    return %c0_i32, %c0_i32_0, %c0_i32_1 : i32, i32, i32
  }
  func.func @transform_12(%arg0: i32) -> (i32, i32) {
    %c0_i32 = arith.constant 0 : i32
    %c0_i32_0 = arith.constant 0 : i32
    %c0_i32_1 = arith.constant 0 : i32
    return %c0_i32, %c0_i32_0 : i32, i32
  }
  func.func @transform_13(%arg0: i32) -> (i32, i32, i32) {
    %c0_i32 = arith.constant 0 : i32
    %c0_i32_0 = arith.constant 0 : i32
    %c0_i32_1 = arith.constant 0 : i32
    return %arg0, %c0_i32, %c0_i32_0 : i32, i32, i32
  }
}

</mosaic_0001>

<bundles_post_ra>
// kernel: two_inputs_forward.1
= control target key start
LH: loop header
LB: loop body
LE: loop exit
PB: predicated region body
PF: predicated region fallthrough
CT: control target
= control target key end

     0   :  { %s6711_s25 = smov 0   ;;  %s11417_s0 = inlined_call_operand.vmem [shape: f32[2,324,12], index: 0, kind: input, shape index: {}]   ;;  %s11418_s1 = inlined_call_operand.vmem [shape: f32[2,289,27], index: 1, kind: input, shape index: {}]   ;;  %s11419_s2 = inlined_call_operand.vmem [shape: f32[12,128], index: 2, kind: input, shape index: {}]   ;;  %s11420_s3 = inlined_call_operand.vmem [shape: f32[1,128], index: 3, kind: input, shape index: {}]   ;;  %s11421_s4 = inlined_call_operand.vmem [shape: f32[27,128], index: 4, kind: input, shape index: {}]   ;;  %s11422_s5 = inlined_call_operand.vmem [shape: f32[1,128], index: 5, kind: input, shape index: {}]   ;;  %s11423_s6 = inlined_call_operand.vmem [shape: f32[9,100,289], index: 6, kind: input, shape index: {}]   ;;  %s11424_s7 = inlined_call_operand.vmem [shape: f32[9,128,128], index: 7, kind: input, shape index: {}]   ;;  %s11425_s8 = inlined_call_operand.vmem [shape: f32[1,128], index: 8, kind: input, shape index: {}]   ;;  %s11426_s9 = inlined_call_operand.vmem [shape: f32[324,100], index: 9, kind: input, shape index: {}]   ;;  %s11427_s10 = inlined_call_operand.vmem [shape: f32[4,100,324], index: 10, kind: input, shape index: {}]   ;;  %s11428_s11 = inlined_call_operand.vmem [shape: f32[3,100,128], index: 11, kind: input, shape index: {}]   ;;  %s11429_s12 = inlined_call_operand.vmem [shape: f32[1,128], index: 12, kind: input, shape index: {}]   ;;  %s11430_s13 = inlined_call_operand.vmem [shape: f32[2,8,128], index: 13, kind: output, shape index: {}]  }
   0x1 LB: > { %s5704_s26 = sadd.s32 4294967295, %s6639_s25   ;;  %p5708_p0 = scmp.ge.s32.totalorder %s6639_s25, 1  ;;  %s6639_s25 = sphi %s6711_s25, %s23_s25  }
   0x2   : > { %p397_p1 = scmp.lt.s32.totalorder %s6639_s25, 3 }
   0x4   : > { %p398_p2 = pnand %p5708_p0, %p397_p1 }
   0x6   : > { %401 = sbr.rel (%p398_p2) target bundleno = 3022 (0xbce), region = 72 }
   0xb   : > { %v814_v0 = vld [vmem:[%s11421_s4 + $0x18] sm:$0x7]  ;;  %vm931_vm0 = vcmask 1042432   ;;  %v813_v1 = vld [vmem:[%s11421_s4 + $0x10] sm:$0xff]  ;;  %p445_p3 = scmp.lt.s32.totalorder %s5704_s26, 1  ;;  %v812_v2 = vld [vmem:[%s11421_s4 + $0x8] sm:$0xff] }
   0xc   : > { %5754 = vmatpush.msk.msra.mxu1 %vm931_vm0, %v814_v0  ;;  %6601 = vmatpush.msk.msra.mxu3 %vm931_vm0, %v814_v0  ;;  %v811_v3 = vld [vmem:[%s11421_s4] sm:$0xff]  ;;  %vm819_vm1 = vcmask 220160   ;;  %v501_v36 = vld [vmem:[%s11419_s2 + $0x8] sm:$0xf]  ;;  %vm630_vm2 = vcmask 1043456   ;;  %vm506_vm3 = vcmask 97280  }
   0xd   : > { %s11701_s26 = smov (!%p445_p3, %s5704_s26), 1  ;;  %5712 = vmatpush.msk.msra.mxu0 %vm630_vm2, %v501_v36  ;;  %v500_v39 = vld [vmem:[%s11419_s2] sm:$0xff]  ;;  %v1072_v36 = vld [vmem:[%s11423_s6 + $0x48] sm:$0xff]  ;;  %vm1142_vm4 = vcmask 1040384   ;;  %vm1102_vm5 = vcmask 269312   ;;  %vm4095_vm6 = vcmask 818176  }
   0xe   : > { %948 = vmatpush.msra.mxu1 %v813_v1  ;;  %6602 = vmatpush.msra.mxu3 %v813_v1  ;;  %s6615_s18 = smul.u32 296, %s11701_s26  ;;  %v6859_v1 = vld [vmem:[%s11422_s5] ss:$0 sm:$0xff]  ;;  %vm4483_vm7 = vcmask 556032   ;;  %s5711_s30 = sshll.u32 %s11701_s26, 3 }
   0xf   : > { %s6614_s22 = smul.u32 328, %s11701_s26  ;;  %649 = vmatpush.msra.mxu0 %v500_v39  ;;  %s458_s16 = scalar_lea.vmem %s11430_s13, %s5711_s30 }
  0x10   : > { %949 = vmatpush.msra.mxu1 %v812_v2  ;;  %6603 = vmatpush.msra.mxu3 %v812_v2  ;;  %s6737_s21 = scalar_lea.vmem %s11418_s1, %s6615_s18 }
  0x11   : > { %v774_v4 = vld [vmem:[%s6737_s21] sm:$0xff]  ;;  %v775_v5 = vld [vmem:[%s6737_s21 + $0x8] sm:$0xff]  ;;  %v776_v6 = vld [vmem:[%s6737_s21 + $0x10] sm:$0xff]  ;;  %s6811_s29 = scalar_lea.vmem %s11417_s0, %s6614_s22 }
  0x12   : > { %950 = vmatpush.msra.mxu1 %v811_v3  ;;  %6604 = vmatpush.msra.mxu3 %v811_v3  ;;  %v777_v7 = vld [vmem:[%s6737_s21 + $0x18] sm:$0xff]  ;;  %v778_v8 = vld [vmem:[%s6737_s21 + $0x20] sm:$0xff]  ;;  %v779_v9 = vld [vmem:[%s6737_s21 + $0x28] sm:$0xff] }
  0x13   : > { %5755 = vmatmul.msk.f32.vlgmr.msra.gmra.mxu1 %vm819_vm1, %v774_v4  ;;  %v780_v10 = vld [vmem:[%s6737_s21 + $0x30] sm:$0xff]  ;;  %v781_v11 = vld [vmem:[%s6737_s21 + $0x38] sm:$0xff]  ;;  %v782_v12 = vld [vmem:[%s6737_s21 + $0x40] sm:$0xff] }
  0x14   : > { %v783_v13 = vld [vmem:[%s6737_s21 + $0x48] sm:$0xff]  ;;  %v784_v14 = vld [vmem:[%s6737_s21 + $0x50] sm:$0xff]  ;;  %v785_v15 = vld [vmem:[%s6737_s21 + $0x58] sm:$0xff] }
  0x15   : > { %v786_v16 = vld [vmem:[%s6737_s21 + $0x60] sm:$0xff]  ;;  %v787_v17 = vld [vmem:[%s6737_s21 + $0x68] sm:$0xff]  ;;  %v788_v18 = vld [vmem:[%s6737_s21 + $0x70] sm:$0xff] }
  0x16   : > { %v789_v19 = vld [vmem:[%s6737_s21 + $0x78] sm:$0xff]  ;;  %v790_v21 = vld [vmem:[%s6737_s21 + $0x80] sm:$0xff]  ;;  %v791_v23 = vld [vmem:[%s6737_s21 + $0x88] sm:$0xff] }
  0x17   : > { %v792_v25 = vld [vmem:[%s6737_s21 + $0x90] sm:$0xff]  ;;  %v793_v27 = vld [vmem:[%s6737_s21 + $0x98] sm:$0xff]  ;;  %v794_v29 = vld [vmem:[%s6737_s21 + $0xa0] sm:$0xff] }
  0x18   : > { %v795_v31 = vld [vmem:[%s6737_s21 + $0xa8] sm:$0xff]  ;;  %v806_v32 = vld [vmem:[%s6737_s21 + $0x100] sm:$0xff]  ;;  %v796_v34 = vld [vmem:[%s6737_s21 + $0xb0] sm:$0xff] }
  0x19   : > { %5787 = vmatmul.msk.f32.vlgmr.msra.gmra.mxu3 %vm819_vm1, %v806_v32  ;;  %v807_v35 = vld [vmem:[%s6737_s21 + $0x108] sm:$0xff]  ;;  %v797_v38 = vld [vmem:[%s6737_s21 + $0xb8] sm:$0xff]  ;;  %v459_v40 = vld [vmem:[%s6811_s29] sm:$0xff] }
  0x1a   : > { %5713 = vmatmul.msk.f32.vlgmr.msra.gmra.mxu0 %vm506_vm3, %v459_v40  ;;  %v808_v41 = vld [vmem:[%s6737_s21 + $0x110] sm:$0xff]  ;;  %v798_v43 = vld [vmem:[%s6737_s21 + $0xc0] sm:$0xff]  ;;  %v460_v44 = vld [vmem:[%s6811_s29 + $0x8] sm:$0xff] }
  0x1b   : > { %5756 = vmatmul.msk.f32.gmra.mxu1 %vm819_vm1, %v775_v5  ;;  %v809_v45 = vld [vmem:[%s6737_s21 + $0x118] sm:$0xff]  ;;  %v799_v47 = vld [vmem:[%s6737_s21 + $0xc8] sm:$0xff]  ;;  %v461_v48 = vld [vmem:[%s6811_s29 + $0x10] sm:$0xff] }
  0x1c   : > { %v810_v49 = vld [vmem:[%s6737_s21 + $0x120] sm:$0x1]  ;;  %v800_v51 = vld [vmem:[%s6737_s21 + $0xd0] sm:$0xff]  ;;  %v462_v52 = vld [vmem:[%s6811_s29 + $0x18] sm:$0xff] }
  0x1d   : > { %v801_v54 = vld [vmem:[%s6737_s21 + $0xd8] sm:$0xff]  ;;  %v463_v55 = vld [vmem:[%s6811_s29 + $0x20] sm:$0xff]  ;;  %v464_v58 = vld [vmem:[%s6811_s29 + $0x28] sm:$0xff] }
  0x1e   : > { %v802_v57 = vld [vmem:[%s6737_s21 + $0xe0] sm:$0xff]  ;;  %v803_v60 = vld [vmem:[%s6737_s21 + $0xe8] sm:$0xff]  ;;  %v465_v61 = vld [vmem:[%s6811_s29 + $0x30] sm:$0xff] }
  0x1f   : > { %v804_v63 = vld [vmem:[%s6737_s21 + $0xf0] sm:$0xff]  ;;  %v466_v0 = vld [vmem:[%s6811_s29 + $0x38] sm:$0xff]  ;;  %v467_v5 = vld [vmem:[%s6811_s29 + $0x40] sm:$0xff] }
  0x20   : > { %v805_v3 = vld [vmem:[%s6737_s21 + $0xf8] sm:$0xff]  ;;  %v472_v32 = vld [vmem:[%s6811_s29 + $0x68] sm:$0xff]  ;;  %v1075_v40 = vld [vmem:[%s11423_s6 + $0x60] sm:$0xff] }
  0x21   : > { %5788 = vmatmul.msk.f32.gmra.mxu3 %vm819_vm1, %v807_v35  ;;  %v473_v35 = vld [vmem:[%s6811_s29 + $0x70] sm:$0xff]  ;;  %v474_v39 = vld [vmem:[%s6811_s29 + $0x78] sm:$0xff] }
  0x22   : > { %5714 = vmatmul.msk.f32.gmra.mxu0 %vm506_vm3, %v460_v44  ;;  %v1078_v44 = vld [vmem:[%s11423_s6 + $0x78] sm:$0xff] }
  0x23   : > { %5757 = vmatmul.msk.f32.gmra.mxu1 %vm819_vm1, %v776_v6 }
  0x29   : > { %5789 = vmatmul.msk.f32.gmra.mxu3 %vm819_vm1, %v808_v41 }
  0x2a   : > { %5715 = vmatmul.msk.f32.gmra.mxu0 %vm506_vm3, %v461_v48  ;;  %v1081_v48 = vld [vmem:[%s11423_s6 + $0x90] sm:$0xff] }
  0x2b   : > { %5758 = vmatmul.msk.f32.gmra.mxu1 %vm819_vm1, %v777_v7 }
  0x31   : > { %5790 = vmatmul.msk.f32.gmra.mxu3 %vm819_vm1, %v809_v45 }
  0x32   : > { %5716 = vmatmul.msk.f32.gmra.mxu0 %vm506_vm3, %v462_v52  ;;  %v1084_v52 = vld [vmem:[%s11423_s6 + $0xa8] sm:$0xff] }
  0x33   : > { %5759 = vmatmul.msk.f32.gmra.mxu1 %vm819_vm1, %v778_v8 }
  0x39   : > { %5791 = vmatmul.msk.f32.gmra.mxu3 %vm819_vm1, %v810_v49 }
  0x3a   : > { %5717 = vmatmul.msk.f32.gmra.mxu0 %vm506_vm3, %v463_v55 }
  0x3b   : > { %5760 = vmatmul.msk.f32.gmra.mxu1 %vm819_vm1, %v779_v9 }
  0x42   : > { %5718 = vmatmul.msk.f32.gmra.mxu0 %vm506_vm3, %v464_v58 }
  0x43   : > { %5761 = vmatmul.msk.f32.gmra.mxu1 %vm819_vm1, %v780_v10 }
  0x4a   : > { %5719 = vmatmul.msk.f32.gmra.mxu0 %vm506_vm3, %v465_v61  ;;  %v1087_v61 = vld [vmem:[%s11423_s6 + $0xc0] sm:$0xff] }
  0x4b   : > { %5762 = vmatmul.msk.f32.gmra.mxu1 %vm819_vm1, %v781_v11  ;;  %v468_v11 = vld [vmem:[%s6811_s29 + $0x48] sm:$0xff] }
  0x52   : > { %5720 = vmatmul.msk.f32.gmra.mxu0 %vm506_vm3, %v466_v0 }
  0x53   : > { %5763 = vmatmul.msk.f32.gmra.mxu1 %vm819_vm1, %v782_v12 }
  0x5a   : > { %5721 = vmatmul.msk.f32.gmra.mxu0 %vm506_vm3, %v467_v5  ;;  %v480_v5 = vld [vmem:[%s6811_s29 + $0xa8] sm:$0xff] }
  0x5b   : > { %5764 = vmatmul.msk.f32.gmra.mxu1 %vm819_vm1, %v783_v13 }
  0x62   : > { %5722 = vmatmul.msk.f32.gmra.mxu0 %vm506_vm3, %v468_v11 }
  0x63   : > { %5765 = vmatmul.msk.f32.gmra.mxu1 %vm819_vm1, %v784_v14 }
  0x6b   : > { %5766 = vmatmul.msk.f32.gmra.mxu1 %vm819_vm1, %v785_v15 }
  0x73   : > { %5767 = vmatmul.msk.f32.gmra.mxu1 %vm819_vm1, %v786_v16 }
  0x7b   : > { %5768 = vmatmul.msk.f32.gmra.mxu1 %vm819_vm1, %v787_v17  ;;  %v469_v17 = vld [vmem:[%s6811_s29 + $0x50] sm:$0xff] }
  0x7c   : > { %5723 = vmatmul.msk.f32.gmra.mxu0 %vm506_vm3, %v469_v17  ;;  %v1093_v17 = vld [vmem:[%s11423_s6 + $0xf0] sm:$0xff] }
  0x83   : > { %5769 = vmatmul.msk.f32.gmra.mxu1 %vm819_vm1, %v788_v18 }
  0x8b   : > { %5770 = vmatmul.msk.f32.gmra.mxu1 %vm819_vm1, %v789_v19 }
  0x90   : > { %v6771_v20 = vpop.f32.mrf.mxu1 }
  0x93   : > { %5771 = vmatmul.msk.f32.gmra.mxu1 %vm819_vm1, %v790_v21 }
  0x97   : > { %v7031_v0 = vpop.f32.mrf.mxu0 }
  0x98   : > { %v6775_v22 = vpop.f32.mrf.mxu1  ;;  %11446 = vst [vmem:[#allocation7_spill] sm:$0xff] %v7031_v0  ;;  %v1101_v0 = vld [vmem:[%s11423_s6 + $0x130] sm:$0xf] }
  0x9b   : > { %5772 = vmatmul.msk.f32.gmra.mxu1 %vm819_vm1, %v791_v23 }
  0x9f   : > { %v7038_v11 = vpop.f32.mrf.mxu0 }
  0xa0   : > { %v6779_v24 = vpop.f32.mrf.mxu1  ;;  %11447 = vst [vmem:[#allocation8_spill] sm:$0xff] %v7038_v11  ;;  %v496_v11 = vld [vmem:[%s6811_s29 + $0x128] sm:$0xff] }
  0xa3   : > { %5773 = vmatmul.msk.f32.gmra.mxu1 %vm819_vm1, %v792_v25 }
  0xa8   : > { %v6783_v26 = vpop.f32.mrf.mxu1 }
  0xa9   : > { %v6928_v25 = vadd.f32 %v6859_v1, %v6783_v26  ;;  %v6945_v26 = vadd.f32 %v6859_v1, %v6771_v20  ;;  %v1066_v20 = vld [vmem:[%s11423_s6 + $0x18] sm:$0xff] }
  0xab   : > { %5774 = vmatmul.msk.f32.gmra.mxu1 %vm819_vm1, %v793_v27  ;;  %v470_v27 = vld [vmem:[%s6811_s29 + $0x58] sm:$0xff] }
  0xac   : > { %5724 = vmatmul.msk.f32.gmra.mxu0 %vm506_vm3, %v470_v27 }
  0xb0   : > { %v6787_v28 = vpop.f32.mrf.mxu1 }
  0xb1   : > { %v6921_v21 = vadd.f32 %v6859_v1, %v6787_v28  ;;  %v6940_v28 = vadd.f32 %v6859_v1, %v6775_v22 }
  0xb3   : > { %5775 = vmatmul.msk.f32.gmra.mxu1 %vm819_vm1, %v794_v29  ;;  %v6935_v29 = vadd.f32 %v6859_v1, %v6779_v24  ;;  %v1063_v24 = vld [vmem:[%s11423_s6] sm:$0xff] }
  0xb8   : > { %v6791_v30 = vpop.f32.mrf.mxu1 }
  0xb9   : > { %v6916_v19 = vadd.f32 %v6859_v1, %v6791_v30 }
  0xbb   : > { %5776 = vmatmul.msk.f32.gmra.mxu1 %vm819_vm1, %v795_v31  ;;  %v471_v31 = vld [vmem:[%s6811_s29 + $0x60] sm:$0xff] }
  0xbc   : > { %5725 = vmatmul.msk.f32.gmra.mxu0 %vm506_vm3, %v471_v31  ;;  %v1096_v31 = vld [vmem:[%s11423_s6 + $0x108] sm:$0xff] }
  0xc0   : > { %v6797_v33 = vpop.f32.mrf.mxu1 }
  0xc1   : > { %v6911_v18 = vadd.f32 %v6859_v1, %v6797_v33  ;;  %v1069_v33 = vld [vmem:[%s11423_s6 + $0x30] sm:$0xff] }
  0xc3   : > { %5777 = vmatmul.msk.f32.gmra.mxu1 %vm819_vm1, %v796_v34 }
  0xc4   : > { %5726 = vmatmul.msk.f32.gmra.mxu0 %vm506_vm3, %v472_v32 }
  0xc8   : > { %v6813_v37 = vpop.f32.mrf.mxu1 }
  0xc9   : > { %v6904_v16 = vadd.f32 %v6859_v1, %v6813_v37  ;;  %v1048_v37 = vpop.f32.mrf.mxu3 }
  0xcb   : > { %5778 = vmatmul.msk.f32.gmra.mxu1 %vm819_vm1, %v797_v38 }
  0xcc   : > { %5727 = vmatmul.msk.f32.gmra.mxu0 %vm506_vm3, %v473_v35  ;;  %v1099_v35 = vld [vmem:[%s11423_s6 + $0x120] sm:$0xf] }
  0xd0   : > { %v976_v42 = vpop.f32.mrf.mxu1 }
  0xd1   : > { %v6897_v14 = vadd.f32 %v6859_v1, %v976_v42  ;;  %v1051_v41 = vpop.f32.mrf.mxu3 }
  0xd3   : > { %5779 = vmatmul.msk.f32.gmra.mxu1 %vm819_vm1, %v798_v43  ;;  %v475_v43 = vld [vmem:[%s6811_s29 + $0x80] sm:$0xff] }
  0xd4   : > { %5728 = vmatmul.msk.f32.gmra.mxu0 %vm506_vm3, %v474_v39  ;;  %v483_v39 = vld [vmem:[%s6811_s29 + $0xc0] sm:$0xff] }
  0xd8   : > { %v979_v46 = vpop.f32.mrf.mxu1 }
  0xd9   : > { %v6893_v13 = vadd.f32 %v6859_v1, %v979_v46  ;;  %v1054_v45 = vpop.f32.mrf.mxu3 }
  0xda   : > { %v7012_v58 = vadd.f32 %v6859_v1, %v1054_v45  ;;  %v1065_v45 = vld [vmem:[%s11423_s6 + $0x10] sm:$0xff] }
  0xdb   : > { %5780 = vmatmul.msk.f32.gmra.mxu1 %vm819_vm1, %v799_v47  ;;  %v476_v47 = vld [vmem:[%s6811_s29 + $0x88] sm:$0xff] }
  0xdc   : > { %5729 = vmatmul.msk.f32.gmra.mxu0 %vm506_vm3, %v475_v43  ;;  %11443 = vst [vmem:[#allocation4_spill] sm:$0xff] %v7012_v58 }
  0xe0   : > { %v982_v50 = vpop.f32.mrf.mxu1 }
  0xe1   : > { %v6889_v12 = vadd.f32 %v6859_v1, %v982_v50  ;;  %v1057_v49 = vpop.f32.mrf.mxu3 }
  0xe3   : > { %5781 = vmatmul.msk.f32.gmra.mxu1 %vm819_vm1, %v800_v51  ;;  %v477_v51 = vld [vmem:[%s6811_s29 + $0x90] sm:$0xff] }
  0xe4   : > { %5730 = vmatmul.msk.f32.gmra.mxu0 %vm506_vm3, %v476_v47 }
  0xe8   : > { %v985_v53 = vpop.f32.mrf.mxu1 }
  0xe9   : > { %v6883_v10 = vadd.f32 %v6859_v1, %v985_v53  ;;  %v1060_v53 = vpop.f32.mrf.mxu3 }
  0xea   : > { %v7004_v55 = vadd.f32 %v6859_v1, %v1060_v53 }
  0xeb   : > { %5782 = vmatmul.msk.f32.gmra.mxu1 %vm819_vm1, %v801_v54 }
  0xec   : > { %5731 = vmatmul.msk.f32.gmra.mxu0 %vm506_vm3, %v477_v51  ;;  %11441 = vst [vmem:[#allocation2_spill] sm:$0xff] %v7004_v55 }
  0xf0   : > { %v988_v56 = vpop.f32.mrf.mxu1 }
  0xf1   : > { %v6877_v8 = vadd.f32 %v6859_v1, %v988_v56  ;;  %v7007_v56 = vadd.f32 %v6859_v1, %v1057_v49  ;;  %v484_v49 = vld [vmem:[%s6811_s29 + $0xc8] sm:$0xff] }
  0xf3   : > { %5783 = vmatmul.msk.f32.gmra.mxu1 %vm819_vm1, %v802_v57  ;;  %11442 = vst [vmem:[#allocation3_spill] sm:$0xff] %v7007_v56  ;;  %v478_v57 = vld [vmem:[%s6811_s29 + $0x98] sm:$0xff] }
  0xf4   : > { %5732 = vmatmul.msk.f32.gmra.mxu0 %vm506_vm3, %v478_v57 }
  0xf8   : > { %v991_v59 = vpop.f32.mrf.mxu1 }
  0xf9   : > { %v6873_v7 = vadd.f32 %v6859_v1, %v991_v59  ;;  %v7017_v59 = vadd.f32 %v6859_v1, %v1051_v41 }
  0xfb   : > { %5784 = vmatmul.msk.f32.gmra.mxu1 %vm819_vm1, %v803_v60  ;;  %11444 = vst [vmem:[#allocation5_spill] sm:$0xff] %v7017_v59  ;;  %v7021_v60 = vadd.f32 %v6859_v1, %v1048_v37 }
  0xfd   : > { %11445 = vst [vmem:[#allocation6_spill] sm:$0xff] %v7021_v60 }
 0x100   : > { %v994_v62 = vpop.f32.mrf.mxu1 }
 0x101   : > { %v6868_v6 = vadd.f32 %v6859_v1, %v994_v62 }
 0x103   : > { %5785 = vmatmul.msk.f32.gmra.mxu1 %vm819_vm1, %v804_v63  ;;  %v479_v63 = vld [vmem:[%s6811_s29 + $0xa0] sm:$0xff] }
 0x104   : > { %5733 = vmatmul.msk.f32.gmra.mxu0 %vm506_vm3, %v479_v63 }
 0x108   : > { %v997_v2 = vpop.f32.mrf.mxu1 }
 0x109   : > { %v6863_v4 = vadd.f32 %v6859_v1, %v997_v2  ;;  %v1090_v2 = vld [vmem:[%s11423_s6 + $0xd8] sm:$0xff] }
 0x10b   : > { %5786 = vmatmul.msk.f32.gmra.mxu1 %vm819_vm1, %v805_v3  ;;  %1146 = vmatpush.msra.mxu2 %v6863_v4 }
 0x10c   : > { %5734 = vmatmul.msk.f32.gmra.mxu0 %vm506_vm3, %v480_v5 }
 0x10d   : > { %1147 = vmatpush.msra.mxu2 %v6868_v6 }
 0x10f   : > { %1148 = vmatpush.msra.mxu2 %v6873_v7 }
 0x110   : > { %v6880_v9 = vpop.f32.mrf.mxu1 }
 0x111   : > { %1149 = vmatpush.msra.mxu2 %v6877_v8 }
 0x113   : > { %1150 = vmatpush.msra.mxu2 %v6883_v10 }
 0x115   : > { %1151 = vmatpush.msra.mxu2 %v6889_v12 }
 0x117   : > { %1152 = vmatpush.msra.mxu2 %v6893_v13 }
 0x118   : > { %v6900_v15 = vpop.f32.mrf.mxu1 }
 0x119   : > { %1153 = vmatpush.msra.mxu2 %v6897_v14 }
 0x11b   : > { %1154 = vmatpush.msra.mxu2 %v6904_v16 }
 0x11d   : > { %1155 = vmatpush.msra.mxu2 %v6911_v18 }
 0x11f   : > { %1156 = vmatpush.msra.mxu2 %v6916_v19 }
 0x120   : > { %v6924_v23 = vpop.f32.mrf.mxu1 }
 0x121   : > { %1157 = vmatpush.msra.mxu2 %v6921_v21 }
 0x123   : > { %1158 = vmatpush.msra.mxu2 %v6928_v25 }
 0x125   : > { %1159 = vmatpush.msra.mxu2 %v6935_v29 }
 0x127   : > { %1160 = vmatpush.msra.mxu2 %v6940_v28 }
 0x128   : > { %v6951_v30 = vpop.f32.mrf.mxu1 }
 0x129   : > { %1161 = vmatpush.msra.mxu2 %v6945_v26 }
 0x12a   : > { %1162 = vmatmul.f32.vlgmr.msra.gmra.mxu2 %v1063_v24  ;;  %v481_v24 = vld [vmem:[%s6811_s29 + $0xb0] sm:$0xff] }
 0x12b   : > { %5792 = vmatpush.msk.msrb.mxu2 %vm1142_vm4, %v7004_v55  ;;  %5735 = vmatmul.msk.f32.gmra.mxu0 %vm506_vm3, %v481_v24  ;;  %v5867_v24 = vld [vmem:[%s11424_s7 + $0xc0] sm:$0xff] }
 0x12d   : > { %1270 = vmatpush.msrb.mxu2 %v7007_v56 }
 0x12f   : > { %1271 = vmatpush.msrb.mxu2 %v7012_v58 }
 0x130   : > { %v6959_v22 = vpop.f32.mrf.mxu1 }
 0x131   : > { %1272 = vmatpush.msrb.mxu2 %v7017_v59 }
 0x132   : > { %1165 = vmatmul.f32.gmra.mxu2 %v1066_v20  ;;  %v7048_v20 = vpop.f32.mrf.mxu0 }
 0x133   : > { %1273 = vmatpush.msrb.mxu2 %v7021_v60  ;;  %11448 = vst [vmem:[#allocation9_spill] sm:$0xff] %v7048_v20  ;;  %v1094_v20 = vld [vmem:[%s11423_s6 + $0xf8] sm:$0xff] }
 0x138   : > { %v6966_v34 = vpop.f32.mrf.mxu1 }
 0x139   : > { %v7146_v5 = vadd.f32 %v6859_v1, %v6966_v34  ;;  %v1071_v34 = vld [vmem:[%s11423_s6 + $0x40] sm:$0xff] }
 0x13a   : > { %1168 = vmatmul.f32.gmra.mxu2 %v1069_v33  ;;  %v482_v33 = vld [vmem:[%s6811_s29 + $0xb8] sm:$0xff] }
 0x13b   : > { %5736 = vmatmul.msk.f32.gmra.mxu0 %vm506_vm3, %v482_v33  ;;  %v7180_v33 = vadd.f32 %v6859_v1, %v6924_v23  ;;  %v5864_v23 = vld [vmem:[%s11424_s7 + $0xa8] sm:$0xff] }
 0x140   : > { %v6973_v38 = vpop.f32.mrf.mxu1 }
 0x142   : > { %1171 = vmatmul.f32.gmra.mxu2 %v1072_v36 }
 0x143   : > { %5737 = vmatmul.msk.f32.gmra.mxu0 %vm506_vm3, %v483_v39  ;;  %v1074_v39 = vld [vmem:[%s11423_s6 + $0x58] sm:$0xff] }
 0x148   : > { %v6980_v42 = vpop.f32.mrf.mxu1 }
 0x149   : > { %v7125_v63 = vadd.f32 %v6859_v1, %v6980_v42  ;;  %v5869_v42 = vld [vmem:[%s11424_s7 + $0xd0] sm:$0xff] }
 0x14a   : > { %1174 = vmatmul.f32.gmra.mxu2 %v1075_v40  ;;  %v7059_v40 = vpop.f32.mrf.mxu0 }
 0x14b   : > { %11449 = vst [vmem:[#allocation10_spill] sm:$0xff] %v7059_v40  ;;  %5738 = vmatmul.msk.f32.gmra.mxu0 %vm506_vm3, %v484_v49  ;;  %v5861_v49 = vld [vmem:[%s11424_s7 + $0x90] sm:$0xff] }
 0x14c   : > { %v497_v40 = vld [vmem:[%s6811_s29 + $0x130] sm:$0xff] }
 0x150   : > { %v6987_v46 = vpop.f32.mrf.mxu1 }
 0x152   : > { %1177 = vmatmul.f32.gmra.mxu2 %v1078_v44  ;;  %v7099_v53 = vpop.f32.mrf.mxu0 }
 0x153   : > { %11450 = vst [vmem:[#allocation11_spill] sm:$0xff] %v7099_v53  ;;  %v498_v53 = vld [vmem:[%s6811_s29 + $0x138] sm:$0xff] }
 0x158   : > { %v6994_v50 = vpop.f32.mrf.mxu1 }
 0x159   : > { %v7104_v57 = vadd.f32 %v6859_v1, %v6994_v50  ;;  %v1068_v50 = vld [vmem:[%s11423_s6 + $0x28] sm:$0xff] }
 0x15a   : > { %1180 = vmatmul.f32.gmra.mxu2 %v1081_v48  ;;  %v5874_v48 = vld [vmem:[%s11424_s7 + $0xf8] sm:$0xff] }
 0x15b   : > { %1594 = vmatpush.msrb.mxu1 %v5874_v48 }
 0x160   : > { %v7001_v54 = vpop.f32.mrf.mxu1 }
 0x161   : > { %v7092_v51 = vadd.f32 %v6859_v1, %v7001_v54  ;;  %v5872_v54 = vld [vmem:[%s11424_s7 + $0xe8] sm:$0xff] }
 0x162   : > { %1183 = vmatmul.f32.gmra.mxu2 %v1084_v52  ;;  %v5873_v52 = vld [vmem:[%s11424_s7 + $0xf0] sm:$0xff] }
 0x163   : > { %1595 = vmatpush.msrb.mxu1 %v5873_v52 }
 0x165   : > { %1596 = vmatpush.msrb.mxu1 %v5872_v54  ;;  %v5860_v54 = vld [vmem:[%s11424_s7 + $0x88] sm:$0xff] }
 0x168   : > { %v1033_v62 = vpop.f32.mrf.mxu1 }
 0x169   : > { %v7081_v47 = vadd.f32 %v6859_v1, %v1033_v62  ;;  %v5871_v62 = vld [vmem:[%s11424_s7 + $0xe0] sm:$0xff] }
 0x16a   : > { %1186 = vmatmul.f32.gmra.mxu2 %v1087_v61  ;;  %v7113_v61 = vadd.f32 %v6859_v1, %v6987_v46  ;;  %1597 = vmatpush.msrb.mxu1 %v5871_v62  ;;  %v5870_v46 = vld [vmem:[%s11424_s7 + $0xd8] sm:$0xff]  ;;  %v1077_v62 = vld [vmem:[%s11423_s6 + $0x70] sm:$0xff] }
 0x16c   : > { %1598 = vmatpush.msrb.mxu1 %v5870_v46  ;;  %v5859_v46 = vld [vmem:[%s11424_s7 + $0x80] sm:$0xff] }
 0x16e   : > { %1599 = vmatpush.msrb.mxu1 %v5869_v42 }
 0x170   : > { %v1036_v3 = vpop.f32.mrf.mxu1 }
 0x171   : > { %v7073_v44 = vadd.f32 %v6859_v1, %v1036_v3  ;;  %v7136_v3 = vadd.f32 %v6859_v1, %v6973_v38  ;;  %v5868_v38 = vld [vmem:[%s11424_s7 + $0xc8] sm:$0xff] }
 0x172   : > { %1189 = vmatmul.f32.gmra.mxu2 %v1090_v2  ;;  %v485_v2 = vld [vmem:[%s6811_s29 + $0xd0] sm:$0xff]  ;;  %1600 = vmatpush.msrb.mxu1 %v5868_v38 }
 0x173   : > { %5739 = vmatmul.msk.f32.gmra.mxu0 %vm506_vm3, %v485_v2  ;;  %v488_v2 = vld [vmem:[%s6811_s29 + $0xe8] sm:$0xff] }
 0x174   : > { %1601 = vmatpush.msrb.mxu1 %v5867_v24  ;;  %v1080_v24 = vld [vmem:[%s11423_s6 + $0x88] sm:$0xff] }
 0x178   : > { %v1039_v27 = vpop.f32.mrf.mxu1 }
 0x179   : > { %v7068_v43 = vadd.f32 %v6859_v1, %v1039_v27  ;;  %v7157_v27 = vadd.f32 %v6859_v1, %v6959_v22  ;;  %v5866_v22 = vld [vmem:[%s11424_s7 + $0xb8] sm:$0xff] }
 0x17a   : > { %1192 = vmatmul.f32.gmra.mxu2 %v1093_v17  ;;  %v7153_v17 = vpop.f32.mrf.mxu0  ;;  %1602 = vmatpush.msrb.mxu1 %v5866_v22  ;;  %v489_v22 = vld [vmem:[%s6811_s29 + $0xf0] sm:$0xff] }
 0x17b   : > { %11451 = vst [vmem:[#allocation12_spill] sm:$0xff] %v7153_v17 }
 0x180   : > { %v1042_v32 = vpop.f32.mrf.mxu1 }
 0x181   : > { %v7063_v41 = vadd.f32 %v6859_v1, %v1042_v32  ;;  %v486_v32 = vld [vmem:[%s6811_s29 + $0xd8] sm:$0xff] }
 0x182   : > { %1195 = vmatmul.f32.gmra.mxu2 %v1096_v31  ;;  %v7169_v31 = vadd.f32 %v6859_v1, %v6951_v30  ;;  %v5865_v30 = vld [vmem:[%s11424_s7 + $0xb0] sm:$0xff]  ;;  %5740 = vmatmul.msk.f32.gmra.mxu0 %vm506_vm3, %v486_v32  ;;  %v7212_v48 = vpop.f32.mrf.mxu0 }
 0x183   : > { %1603 = vmatpush.msrb.mxu1 %v5865_v30  ;;  %11452 = vst [vmem:[#allocation13_spill] sm:$0xff] %v7212_v48  ;;  %v499_v48 = vld [vmem:[%s6811_s29 + $0x140] sm:$0xf] }
 0x185   : > { %1604 = vmatpush.msrb.mxu1 %v5864_v23  ;;  %v1073_v23 = vld [vmem:[%s11423_s6 + $0x50] sm:$0xff] }
 0x188   : > { %v1045_v36 = vpop.f32.mrf.mxu1 }
 0x189   : > { %v7056_v37 = vadd.f32 %v6859_v1, %v1045_v36  ;;  %v7199_v36 = vadd.f32 %v6859_v1, %v6880_v9  ;;  %v487_v9 = vld [vmem:[%s6811_s29 + $0xe0] sm:$0xff] }
 0x18a   : > { %1198 = vmatmul.f32.gmra.mxu2 %v1099_v35  ;;  %v7190_v35 = vadd.f32 %v6859_v1, %v6900_v15  ;;  %v1064_v15 = vld [vmem:[%s11423_s6 + $0x8] sm:$0xff]  ;;  %v5862_v1 = vld [vmem:[%s11424_s7 + $0x98] sm:$0xff]  ;;  %5741 = vmatmul.msk.f32.gmra.mxu0 %vm506_vm3, %v487_v9  ;;  %v7248_v42 = vpop.f32.mrf.mxu0 }
 0x18b   : > { %1202 = vmatpush.msrb.mxu3 %v7056_v37  ;;  %1465 = vmatpush.msra.mxu2 %v7056_v37  ;;  %11453 = vst [vmem:[#allocation14_spill] sm:$0xff] %v7248_v42  ;;  %v1076_v9 = vld [vmem:[%s11423_s6 + $0x68] sm:$0xff] }
 0x18d   : > { %1203 = vmatpush.msrb.mxu3 %v7063_v41  ;;  %1466 = vmatpush.msra.mxu2 %v7063_v41 }
 0x18f   : > { %1204 = vmatpush.msrb.mxu3 %v7068_v43  ;;  %1467 = vmatpush.msra.mxu2 %v7068_v43 }
 0x191   : > { %1205 = vmatpush.msrb.mxu3 %v7073_v44  ;;  %1468 = vmatpush.msra.mxu2 %v7073_v44 }
 0x192   : > { %5793 = vmatmul.msk.f32.vlgmr.msrb.gmra.mxu2 %vm1102_vm5, %v1065_v45  ;;  %v5863_v45 = vld [vmem:[%s11424_s7 + $0xa0] sm:$0xff]  ;;  %5742 = vmatmul.msk.f32.gmra.mxu0 %vm506_vm3, %v488_v2  ;;  %v7275_v32 = vpop.f32.mrf.mxu0 }
 0x193   : > { %1206 = vmatpush.msrb.mxu3 %v7081_v47  ;;  %1469 = vmatpush.msra.mxu2 %v7081_v47  ;;  %11454 = vst [vmem:[#allocation15_spill] sm:$0xff] %v7275_v32  ;;  %v5822_v32 = vld [vmem:[%s11423_s6 + $0x1b8] sm:$0xff] }
 0x194   : > { %1605 = vmatpush.msrb.mxu1 %v5863_v45 }
 0x195   : > { %1207 = vmatpush.msrb.mxu3 %v7092_v51  ;;  %1470 = vmatpush.msra.mxu2 %v7092_v51 }
 0x196   : > { %1606 = vmatpush.msrb.mxu1 %v5862_v1 }
 0x197   : > { %1208 = vmatpush.msrb.mxu3 %v7104_v57  ;;  %1471 = vmatpush.msra.mxu2 %v7104_v57 }
 0x198   : > { %1607 = vmatpush.msrb.mxu1 %v5861_v49  ;;  %v1086_v49 = vld [vmem:[%s11423_s6 + $0xb8] sm:$0xff] }
 0x199   : > { %1209 = vmatpush.msrb.mxu3 %v7113_v61  ;;  %1472 = vmatpush.msra.mxu2 %v7113_v61 }
 0x19a   : > { %5794 = vmatmul.msk.f32.gmra.mxu2 %vm1102_vm5, %v1068_v50  ;;  %v1067_v50 = vld [vmem:[%s11423_s6 + $0x20] sm:$0xff]  ;;  %1608 = vmatpush.msrb.mxu1 %v5860_v54  ;;  %v7304_v1 = vpop.f32.mrf.mxu0 }
 0x19b   : > { %1210 = vmatpush.msrb.mxu3 %v7125_v63  ;;  %1473 = vmatpush.msra.mxu2 %v7125_v63  ;;  %11455 = vst [vmem:[#allocation16_spill] sm:$0xff] %v7304_v1  ;;  %v491_v54 = vld [vmem:[%s6811_s29 + $0x100] sm:$0xff]  ;;  %v5825_v1 = vld [vmem:[%s11423_s6 + $0x1d0] sm:$0xff] }
 0x19c   : > { %1609 = vmatpush.msrb.mxu1 %v5859_v46  ;;  %5743 = vmatmul.msk.f32.gmra.mxu0 %vm506_vm3, %v489_v22  ;;  %v1089_v46 = vld [vmem:[%s11423_s6 + $0xd0] sm:$0xff]  ;;  %v1082_v22 = vld [vmem:[%s11423_s6 + $0x98] sm:$0xff] }
 0x19d   : > { %1211 = vmatpush.msrb.mxu3 %v7136_v3  ;;  %1474 = vmatpush.msra.mxu2 %v7136_v3 }
 0x19e   : > { %5914 = vmatpush.msk.msra.mxu1 %vm1142_vm4, %v7004_v55 }
 0x19f   : > { %1212 = vmatpush.msrb.mxu3 %v7146_v5  ;;  %1475 = vmatpush.msra.mxu2 %v7146_v5 }
 0x1a0   : > { %1909 = vmatpush.msra.mxu1 %v7007_v56 }
 0x1a1   : > { %1213 = vmatpush.msrb.mxu3 %v7157_v27  ;;  %1476 = vmatpush.msra.mxu2 %v7157_v27 }
 0x1a2   : > { %5795 = vmatmul.msk.f32.gmra.mxu2 %vm1102_vm5, %v1071_v34  ;;  %v1070_v34 = vld [vmem:[%s11423_s6 + $0x38] sm:$0xff]  ;;  %1910 = vmatpush.msra.mxu1 %v7012_v58  ;;  %v7331_v2 = vpop.f32.mrf.mxu0 }
 0x1a3   : > { %1214 = vmatpush.msrb.mxu3 %v7169_v31  ;;  %1477 = vmatpush.msra.mxu2 %v7169_v31  ;;  %11456 = vst [vmem:[#allocation17_spill] sm:$0xff] %v7331_v2 }
 0x1a4   : > { %1911 = vmatpush.msra.mxu1 %v7017_v59 }
 0x1a5   : > { %1215 = vmatpush.msrb.mxu3 %v7180_v33  ;;  %1478 = vmatpush.msra.mxu2 %v7180_v33 }
 0x1a6   : > { %1912 = vmatpush.msra.mxu1 %v7021_v60 }
 0x1a7   : > { %1216 = vmatpush.msrb.mxu3 %v7190_v35  ;;  %1479 = vmatpush.msra.mxu2 %v7190_v35 }
 0x1a9   : > { %1217 = vmatpush.msrb.mxu3 %v7199_v36  ;;  %1480 = vmatpush.msra.mxu2 %v7199_v36 }
 0x1aa   : > { %1218 = vmatmul.f32.vlgmr.msrb.gmra.mxu3 %v1064_v15  ;;  %5796 = vmatmul.msk.f32.gmra.mxu2 %vm1102_vm5, %v1074_v39  ;;  %v1083_v15 = vld [vmem:[%s11423_s6 + $0xa0] sm:$0xff]  ;;  %v490_v39 = vld [vmem:[%s6811_s29 + $0xf8] sm:$0xff] }
 0x1ab   : > { %1409 = vmatpush.msra.mxu3 %v6863_v4  ;;  %1785 = vmatpush.msrb.mxu2 %v6863_v4 }
 0x1ac   : > { %5744 = vmatmul.msk.f32.gmra.mxu0 %vm506_vm3, %v490_v39  ;;  %v7347_v39 = vpop.f32.mrf.mxu0 }
 0x1ad   : > { %1410 = vmatpush.msra.mxu3 %v6868_v6  ;;  %1786 = vmatpush.msrb.mxu2 %v6868_v6  ;;  %v7229_v52 = vpop.f32.mrf.mxu2  ;;  %11457 = vst [vmem:[#allocation18_spill] sm:$0xff] %v7347_v39  ;;  %v5818_v39 = vld [vmem:[%s11423_s6 + $0x198] sm:$0xff] }
 0x1af   : > { %1411 = vmatpush.msra.mxu3 %v6873_v7  ;;  %1787 = vmatpush.msrb.mxu2 %v6873_v7 }
 0x1b1   : > { %1412 = vmatpush.msra.mxu3 %v6877_v8  ;;  %1788 = vmatpush.msrb.mxu2 %v6877_v8 }
 0x1b2   : > { %1221 = vmatmul.f32.gmra.mxu3 %v1067_v50  ;;  %5797 = vmatmul.msk.f32.gmra.mxu2 %vm1102_vm5, %v1077_v62  ;;  %v1079_v62 = vld [vmem:[%s11423_s6 + $0x80] sm:$0xff] }
 0x1b3   : > { %1413 = vmatpush.msra.mxu3 %v6883_v10  ;;  %1789 = vmatpush.msrb.mxu2 %v6883_v10 }
 0x1b4   : > { %5745 = vmatmul.msk.f32.gmra.mxu0 %vm506_vm3, %v491_v54  ;;  %v1095_v54 = vld [vmem:[%s11423_s6 + $0x100] sm:$0xff] }
 0x1b5   : > { %1414 = vmatpush.msra.mxu3 %v6889_v12  ;;  %1790 = vmatpush.msrb.mxu2 %v6889_v12  ;;  %v7256_v38 = vpop.f32.mrf.mxu2 }
 0x1b7   : > { %1415 = vmatpush.msra.mxu3 %v6893_v13  ;;  %1791 = vmatpush.msrb.mxu2 %v6893_v13 }
 0x1b9   : > { %1416 = vmatpush.msra.mxu3 %v6897_v14  ;;  %1792 = vmatpush.msrb.mxu2 %v6897_v14 }
 0x1ba   : > { %1224 = vmatmul.f32.gmra.mxu3 %v1070_v34  ;;  %5798 = vmatmul.msk.f32.gmra.mxu2 %vm1102_vm5, %v1080_v24  ;;  %v492_v34 = vld [vmem:[%s6811_s29 + $0x108] sm:$0xff] }
 0x1bb   : > { %1417 = vmatpush.msra.mxu3 %v6904_v16  ;;  %1793 = vmatpush.msrb.mxu2 %v6904_v16 }
 0x1bc   : > { %5746 = vmatmul.msk.f32.gmra.mxu0 %vm506_vm3, %v492_v34 }
 0x1bd   : > { %1418 = vmatpush.msra.mxu3 %v6911_v18  ;;  %1794 = vmatpush.msrb.mxu2 %v6911_v18  ;;  %v7281_v30 = vpop.f32.mrf.mxu2 }
 0x1bf   : > { %1419 = vmatpush.msra.mxu3 %v6916_v19  ;;  %1795 = vmatpush.msrb.mxu2 %v6916_v19 }
 0x1c1   : > { %1420 = vmatpush.msra.mxu3 %v6921_v21  ;;  %1796 = vmatpush.msrb.mxu2 %v6921_v21 }
 0x1c2   : > { %1227 = vmatmul.f32.gmra.mxu3 %v1073_v23  ;;  %5799 = vmatmul.msk.f32.gmra.mxu2 %vm1102_vm5, %v1083_v15  ;;  %v1092_v23 = vld [vmem:[%s11423_s6 + $0xe8] sm:$0xff]  ;;  %v493_v15 = vld [vmem:[%s6811_s29 + $0x110] sm:$0xff] }
 0x1c3   : > { %1421 = vmatpush.msra.mxu3 %v6928_v25  ;;  %1797 = vmatpush.msrb.mxu2 %v6928_v25 }
 0x1c4   : > { %5747 = vmatmul.msk.f32.gmra.mxu0 %vm506_vm3, %v493_v15  ;;  %v495_v15 = vld [vmem:[%s6811_s29 + $0x120] sm:$0xff] }
 0x1c5   : > { %1422 = vmatpush.msra.mxu3 %v6935_v29  ;;  %1798 = vmatpush.msrb.mxu2 %v6935_v29  ;;  %v7302_v45 = vpop.f32.mrf.mxu2 }
 0x1c7   : > { %1423 = vmatpush.msra.mxu3 %v6940_v28  ;;  %1799 = vmatpush.msrb.mxu2 %v6940_v28 }
 0x1c9   : > { %1424 = vmatpush.msra.mxu3 %v6945_v26  ;;  %1800 = vmatpush.msrb.mxu2 %v6945_v26 }
 0x1ca   : > { %1230 = vmatmul.f32.gmra.mxu3 %v1076_v9  ;;  %5800 = vmatmul.msk.f32.gmra.mxu2 %vm1102_vm5, %v1086_v49  ;;  %v1085_v49 = vld [vmem:[%s11423_s6 + $0xb0] sm:$0xff] }
 0x1cb   : > { %5845 = vmatpush.msk.msrb.mxu3 %vm1142_vm4, %v7004_v55 }
 0x1cd   : > { %1533 = vmatpush.msrb.mxu3 %v7007_v56  ;;  %v7322_v50 = vpop.f32.mrf.mxu2 }
 0x1cf   : > { %1534 = vmatpush.msrb.mxu3 %v7012_v58 }
 0x1d1   : > { %1535 = vmatpush.msrb.mxu3 %v7017_v59 }
 0x1d2   : > { %1233 = vmatmul.f32.gmra.mxu3 %v1079_v62  ;;  %5801 = vmatmul.msk.f32.gmra.mxu2 %vm1102_vm5, %v1089_v46  ;;  %v494_v62 = vld [vmem:[%s6811_s29 + $0x118] sm:$0xff]  ;;  %v7361_v46 = vpop.f32.mrf.mxu0 }
 0x1d3   : > { %1536 = vmatpush.msrb.mxu3 %v7021_v60  ;;  %11458 = vst [vmem:[#allocation19_spill] sm:$0xff] %v7361_v46  ;;  %5748 = vmatmul.msk.f32.gmra.mxu0 %vm506_vm3, %v494_v62  ;;  %v1091_v62 = vld [vmem:[%s11423_s6 + $0xe0] sm:$0xff] }
 0x1d5   : > { %v7338_v24 = vpop.f32.mrf.mxu2 }
 0x1da   : > { %1236 = vmatmul.f32.gmra.mxu3 %v1082_v22  ;;  %5802 = vmatmul.msk.f32.gmra.mxu2 %vm1102_vm5, %v1092_v23  ;;  %v1088_v22 = vld [vmem:[%s11423_s6 + $0xc8] sm:$0xff]  ;;  %v1098_v23 = vld [vmem:[%s11423_s6 + $0x118] sm:$0xff] }
 0x1db   : > { %5749 = vmatmul.msk.f32.gmra.mxu0 %vm506_vm3, %v495_v15  ;;  %v1328_v15 = vld [vmem:[%s11424_s7 + $0x70] sm:$0xff] }
 0x1dd   : > { %v7351_v9 = vpop.f32.mrf.mxu2 }
 0x1e2   : > { %1239 = vmatmul.f32.gmra.mxu3 %v1085_v49  ;;  %5803 = vmatmul.msk.f32.gmra.mxu2 %vm1102_vm5, %v1095_v54  ;;  %v7377_v54 = vpop.f32.mrf.mxu0 }
 0x1e3   : > { %11459 = vst [vmem:[#allocation20_spill] sm:$0xff] %v7377_v54  ;;  %5750 = vmatmul.msk.f32.gmra.mxu0 %vm506_vm3, %v496_v11  ;;  %v1327_v11 = vld [vmem:[%s11424_s7 + $0x68] sm:$0xff]  ;;  %v5831_v54 = vld [vmem:[%s11423_s6 + $0x200] sm:$0xff] }
 0x1e5   : > { %v7364_v34 = vpop.f32.mrf.mxu2 }
 0x1ea   : > { %1242 = vmatmul.f32.gmra.mxu3 %v1088_v22  ;;  %5804 = vmatmul.msk.f32.gmra.mxu2 %vm1102_vm5, %v1098_v23  ;;  %v1329_v22 = vld [vmem:[%s11424_s7 + $0x78] sm:$0xff] }
 0x1eb   : > { %1650 = vmatpush.msrb.mxu0 %v1329_v22  ;;  %v1326_v22 = vld [vmem:[%s11424_s7 + $0x60] sm:$0xff] }
 0x1ed   : > { %v7375_v49 = vpop.f32.mrf.mxu2  ;;  %1651 = vmatpush.msrb.mxu0 %v1328_v15  ;;  %v1325_v15 = vld [vmem:[%s11424_s7 + $0x58] sm:$0xff] }
 0x1ef   : > { %1652 = vmatpush.msrb.mxu0 %v1327_v11 }
 0x1f1   : > { %1653 = vmatpush.msrb.mxu0 %v1326_v22  ;;  %v5810_v22 = vld [vmem:[%s11423_s6 + $0x158] sm:$0xff] }
 0x1f2   : > { %1245 = vmatmul.f32.gmra.mxu3 %v1091_v62  ;;  %5805 = vmatmul.msk.f32.gmra.mxu2 %vm1102_vm5, %v1101_v0  ;;  %v5807_v0 = vld [vmem:[%s11423_s6 + $0x140] sm:$0xff]  ;;  %v7405_v62 = vpop.f32.mrf.mxu0 }
 0x1f3   : > { %11460 = vst [vmem:[#allocation21_spill] sm:$0xff] %v7405_v62  ;;  %5751 = vmatmul.msk.f32.gmra.mxu0 %vm506_vm3, %v497_v40  ;;  %v1323_v40 = vld [vmem:[%s11424_s7 + $0x48] sm:$0xff] }
 0x1f4   : > { %1654 = vmatpush.msrb.mxu0 %v1325_v15  ;;  %v1322_v15 = vld [vmem:[%s11424_s7 + $0x40] sm:$0xff] }
 0x1f5   : > { %v7391_v23 = vpop.f32.mrf.mxu2 }
 0x1fa   : > { %1248 = vmatmul.f32.gmra.mxu3 %v1094_v20  ;;  %1481 = vmatmul.f32.vlgmr.msra.gmra.mxu2 %v5807_v0  ;;  %v1324_v20 = vld [vmem:[%s11424_s7 + $0x50] sm:$0xff]  ;;  %v7437_v17 = vpop.f32.mrf.mxu0 }
 0x1fb   : > { %2118 = vmatpush.msra.mxu2 %v6863_v4  ;;  %v1097_v0 = vld [vmem:[%s11423_s6 + $0x110] sm:$0xff]  ;;  %1655 = vmatpush.msrb.mxu0 %v1324_v20  ;;  %11461 = vst [vmem:[#allocation22_spill] sm:$0xff] %v7437_v17  ;;  %v1321_v20 = vld [vmem:[%s11424_s7 + $0x38] sm:$0xff] }
 0x1fc   : > { %5752 = vmatmul.msk.f32.gmra.mxu0 %vm506_vm3, %v498_v53  ;;  %v1319_v53 = vld [vmem:[%s11424_s7 + $0x28] sm:$0xff] }
 0x1fd   : > { %2119 = vmatpush.msra.mxu2 %v6868_v6  ;;  %v7417_v11 = vpop.f32.mrf.mxu2  ;;  %1656 = vmatpush.msrb.mxu0 %v1323_v40 }
 0x1ff   : > { %2120 = vmatpush.msra.mxu2 %v6873_v7  ;;  %1657 = vmatpush.msrb.mxu0 %v1322_v15  ;;  %v5813_v15 = vld [vmem:[%s11423_s6 + $0x170] sm:$0xff] }
 0x201   : > { %2121 = vmatpush.msra.mxu2 %v6877_v8  ;;  %1658 = vmatpush.msrb.mxu0 %v1321_v20  ;;  %v1318_v20 = vld [vmem:[%s11424_s7 + $0x20] sm:$0xff] }
 0x202   : > { %1251 = vmatmul.f32.gmra.mxu3 %v1097_v0  ;;  %1484 = vmatmul.f32.gmra.mxu2 %v5810_v22  ;;  %v1320_v0 = vld [vmem:[%s11424_s7 + $0x30] sm:$0xff]  ;;  %v1100_v22 = vld [vmem:[%s11423_s6 + $0x128] sm:$0xf]  ;;  %v7469_v42 = vpop.f32.mrf.mxu0 }
 0x203   : > { %2122 = vmatpush.msra.mxu2 %v6883_v10  ;;  %1659 = vmatpush.msrb.mxu0 %v1320_v0  ;;  %v1317_v0 = vld [vmem:[%s11424_s7 + $0x18] sm:$0xff]  ;;  %11462 = vst [vmem:[#allocation23_spill] sm:$0xff] %v7469_v42  ;;  %v5812_v42 = vld [vmem:[%s11423_s6 + $0x168] sm:$0xff] }
 0x204   : > { %5753 = vmatmul.msk.f32.gmra.mxu0 %vm506_vm3, %v499_v48  ;;  %v1315_v48 = vld [vmem:[%s11424_s7 + $0x8] sm:$0xff] }
 0x205   : > { %2123 = vmatpush.msra.mxu2 %v6889_v12  ;;  %v7445_v40 = vpop.f32.mrf.mxu2  ;;  %1660 = vmatpush.msrb.mxu0 %v1319_v53 }
 0x207   : > { %2124 = vmatpush.msra.mxu2 %v6893_v13  ;;  %1661 = vmatpush.msrb.mxu0 %v1318_v20  ;;  %v5816_v20 = vld [vmem:[%s11423_s6 + $0x188] sm:$0xff] }
 0x209   : > { %2125 = vmatpush.msra.mxu2 %v6897_v14  ;;  %1662 = vmatpush.msrb.mxu0 %v1317_v0  ;;  %v1314_v0 = vld [vmem:[%s11424_s7] sm:$0xff] }
 0x20a   : > { %1254 = vmatmul.f32.gmra.mxu3 %v1100_v22  ;;  %1487 = vmatmul.f32.gmra.mxu2 %v5813_v15  ;;  %v1316_v22 = vld [vmem:[%s11424_s7 + $0x10] sm:$0xff]  ;;  %v5806_v15 = vld [vmem:[%s11423_s6 + $0x138] sm:$0xff] }
 0x20b   : > { %2126 = vmatpush.msra.mxu2 %v6904_v16  ;;  %1663 = vmatpush.msrb.mxu0 %v1316_v22 }
 0x20d   : > { %2127 = vmatpush.msra.mxu2 %v6911_v18  ;;  %v7473_v53 = vpop.f32.mrf.mxu2  ;;  %1664 = vmatpush.msrb.mxu0 %v1315_v48  ;;  %v5809_v48 = vld [vmem:[%s11423_s6 + $0x150] sm:$0xff] }
 0x20f   : > { %2128 = vmatpush.msra.mxu2 %v6916_v19  ;;  %1665 = vmatpush.msrb.mxu0 %v1314_v0 }
 0x211   : > { %2129 = vmatpush.msra.mxu2 %v6921_v21 }
 0x212   : > { %1425 = vmatmul.f32.vlgmr.msra.gmra.mxu3 %v5806_v15  ;;  %1490 = vmatmul.f32.gmra.mxu2 %v5816_v20  ;;  %v5819_v15 = vld [vmem:[%s11423_s6 + $0x1a0] sm:$0xff]  ;;  %v7506_v20 = vpop.f32.mrf.mxu0 }
 0x213   : > { %1841 = vmatpush.msra.mxu3 %v7056_v37  ;;  %2130 = vmatpush.msra.mxu2 %v6928_v25  ;;  %11463 = vst [vmem:[#allocation24_spill] sm:$0xff] %v7506_v20  ;;  %v5815_v20 = vld [vmem:[%s11423_s6 + $0x180] sm:$0xff] }
 0x215   : > { %1842 = vmatpush.msra.mxu3 %v7063_v41  ;;  %2131 = vmatpush.msra.mxu2 %v6935_v29  ;;  %v1275_v22 = vpop.f32.mrf.mxu2 }
 0x217   : > { %1843 = vmatpush.msra.mxu3 %v7068_v43  ;;  %2132 = vmatpush.msra.mxu2 %v6940_v28 }
 0x219   : > { %1844 = vmatpush.msra.mxu3 %v7073_v44  ;;  %2133 = vmatpush.msra.mxu2 %v6945_v26 }
 0x21a   : > { %1428 = vmatmul.f32.gmra.mxu3 %v5809_v48  ;;  %1493 = vmatmul.f32.gmra.mxu2 %v5819_v15  ;;  %v7519_v48 = vpop.f32.mrf.mxu0 }
 0x21b   : > { %1845 = vmatpush.msra.mxu3 %v7081_v47  ;;  %11464 = vst [vmem:[#allocation25_spill] sm:$0xff] %v7519_v48 }
 0x21d   : > { %1846 = vmatpush.msra.mxu3 %v7092_v51  ;;  %v1278_v0 = vpop.f32.mrf.mxu2 }
 0x21f   : > { %1847 = vmatpush.msra.mxu3 %v7104_v57 }
 0x221   : > { %1848 = vmatpush.msra.mxu3 %v7113_v61 }
 0x222   : > { %1431 = vmatmul.f32.gmra.mxu3 %v5812_v42  ;;  %1496 = vmatmul.f32.gmra.mxu2 %v5822_v32  ;;  %v7532_v48 = vpop.f32.mrf.mxu0 }
 0x223   : > { %1849 = vmatpush.msra.mxu3 %v7125_v63  ;;  %11465 = vst [vmem:[#allocation26_spill] sm:$0xff] %v7532_v48 }
 0x225   : > { %1850 = vmatpush.msra.mxu3 %v7136_v3  ;;  %v1281_v15 = vpop.f32.mrf.mxu2 }
 0x227   : > { %1851 = vmatpush.msra.mxu3 %v7146_v5 }
 0x229   : > { %1852 = vmatpush.msra.mxu3 %v7157_v27 }
 0x22a   : > { %1434 = vmatmul.f32.gmra.mxu3 %v5815_v20  ;;  %1499 = vmatmul.f32.gmra.mxu2 %v5825_v1  ;;  %v5828_v1 = vld [vmem:[%s11423_s6 + $0x1e8] sm:$0xff]  ;;  %v7550_v17 = vpop.f32.mrf.mxu0 }
 0x22b   : > { %1853 = vmatpush.msra.mxu3 %v7169_v31  ;;  %11466 = vst [vmem:[#allocation27_spill] sm:$0xff] %v7550_v17 }
 0x22d   : > { %1854 = vmatpush.msra.mxu3 %v7180_v33  ;;  %v1219_v42 = vpop.f32.mrf.mxu3  ;;  %v1284_v32 = vpop.f32.mrf.mxu2 }
 0x22e   : > { %v1220_v2 = vadd.f32 %v1219_v42, %v7229_v52  ;;  %v5821_v42 = vld [vmem:[%s11423_s6 + $0x1b0] sm:$0xff] }
 0x22f   : > { %1855 = vmatpush.msra.mxu3 %v7190_v35 }
 0x230   : > { %v1276_v20 = vadd.f32 %v1275_v22, %v1220_v2 }
 0x231   : > { %1856 = vmatpush.msra.mxu3 %v7199_v36 }
 0x232   : > { %1437 = vmatmul.f32.gmra.mxu3 %v5818_v39  ;;  %1502 = vmatmul.f32.gmra.mxu2 %v5828_v1  ;;  %v7559_v62 = vpop.f32.mrf.mxu0 }
 0x233   : > { %1666 = vmatmul.f32.vlgmr.msrb.gmra.mxu0 %v1276_v20  ;;  %11467 = vst [vmem:[#allocation28_spill] sm:$0xff] %v7559_v62  ;;  %v5953_v62 = vld [vmem:[%s11423_s6 + $0x3f0] sm:$0xff] }
 0x235   : > { %v1222_v46 = vpop.f32.mrf.mxu3  ;;  %v1287_v48 = vpop.f32.mrf.mxu2 }
 0x236   : > { %v1223_v52 = vadd.f32 %v1222_v46, %v7256_v38  ;;  %v5824_v38 = vld [vmem:[%s11423_s6 + $0x1c8] sm:$0xff]  ;;  %v5834_v46 = vld [vmem:[%s11423_s6 + $0x218] sm:$0xff] }
 0x238   : > { %v1279_v2 = vadd.f32 %v1278_v0, %v1223_v52 }
 0x23a   : > { %1440 = vmatmul.f32.gmra.mxu3 %v5821_v42  ;;  %1505 = vmatmul.f32.gmra.mxu2 %v5831_v54  ;;  %v5837_v42 = vld [vmem:[%s11423_s6 + $0x230] sm:$0xff] }
 0x23b   : > { %1669 = vmatmul.f32.gmra.mxu0 %v1279_v2 }
 0x23d   : > { %v1225_v39 = vpop.f32.mrf.mxu3  ;;  %v1290_v22 = vpop.f32.mrf.mxu2 }
 0x23e   : > { %v1226_v1 = vadd.f32 %v1225_v39, %v7281_v30  ;;  %v5827_v30 = vld [vmem:[%s11423_s6 + $0x1e0] sm:$0xff] }
 0x240   : > { %v1282_v20 = vadd.f32 %v1281_v15, %v1226_v1  ;;  %v7568_v15 = vpop.f32.mrf.mxu0 }
 0x241   : > { %11468 = vst [vmem:[#allocation29_spill] sm:$0xff] %v7568_v15  ;;  %v5959_v15 = vld [vmem:[%s11423_s6 + $0x420] sm:$0xff] }
 0x242   : > { %1443 = vmatmul.f32.gmra.mxu3 %v5824_v38  ;;  %1508 = vmatmul.f32.gmra.mxu2 %v5834_v46  ;;  %v5840_v46 = vld [vmem:[%s11423_s6 + $0x248] sm:$0xff] }
 0x243   : > { %1672 = vmatmul.f32.gmra.mxu0 %v1282_v20 }
 0x245   : > { %v1228_v54 = vpop.f32.mrf.mxu3  ;;  %v1293_v0 = vpop.f32.mrf.mxu2 }
 0x246   : > { %v1229_v52 = vadd.f32 %v1228_v54, %v7302_v45  ;;  %v5830_v45 = vld [vmem:[%s11423_s6 + $0x1f8] sm:$0xff] }
 0x248   : > { %v1285_v2 = vadd.f32 %v1284_v32, %v1229_v52  ;;  %v7577_v52 = vpop.f32.mrf.mxu0 }
 0x249   : > { %11469 = vst [vmem:[#allocation30_spill] sm:$0xff] %v7577_v52  ;;  %v5962_v52 = vld [vmem:[%s11423_s6 + $0x438] sm:$0xff] }
 0x24a   : > { %1446 = vmatmul.f32.gmra.mxu3 %v5827_v30  ;;  %1511 = vmatmul.f32.gmra.mxu2 %v5837_v42  ;;  %v5843_v42 = vld [vmem:[%s11423_s6 + $0x260] sm:$0xf] }
 0x24b   : > { %1675 = vmatmul.f32.gmra.mxu0 %v1285_v2 }
 0x24d   : > { %v1231_v39 = vpop.f32.mrf.mxu3  ;;  %v1296_v1 = vpop.f32.mrf.mxu2 }
 0x24e   : > { %v1232_v38 = vadd.f32 %v1231_v39, %v7322_v50  ;;  %v5833_v50 = vld [vmem:[%s11423_s6 + $0x210] sm:$0xff] }
 0x250   : > { %v1288_v20 = vadd.f32 %v1287_v48, %v1232_v38 }
 0x252   : > { %1449 = vmatmul.f32.gmra.mxu3 %v5830_v45  ;;  %1514 = vmatmul.f32.gmra.mxu2 %v5840_v46  ;;  %v5875_v45 = vld [vmem:[%s11423_s6 + $0x270] sm:$0xff]  ;;  %v7593_v46 = vpop.f32.mrf.mxu0 }
 0x253   : > { %1678 = vmatmul.f32.gmra.mxu0 %v1288_v20  ;;  %11470 = vst [vmem:[#allocation31_spill] sm:$0xff] %v7593_v46  ;;  %v5966_v46 = vld [vmem:[%s11423_s6 + $0x458] sm:$0xff] }
 0x255   : > { %v1234_v32 = vpop.f32.mrf.mxu3  ;;  %v1299_v54 = vpop.f32.mrf.mxu2 }
 0x256   : > { %v1235_v30 = vadd.f32 %v1234_v32, %v7338_v24  ;;  %v5836_v24 = vld [vmem:[%s11423_s6 + $0x228] sm:$0xff] }
 0x258   : > { %v1291_v2 = vadd.f32 %v1290_v22, %v1235_v30  ;;  %v5839_v30 = vld [vmem:[%s11423_s6 + $0x240] sm:$0xff] }
 0x25a   : > { %1452 = vmatmul.f32.gmra.mxu3 %v5833_v50  ;;  %1517 = vmatmul.f32.gmra.mxu2 %v5843_v42  ;;  %v7606_v42 = vpop.f32.mrf.mxu0 }
 0x25b   : > { %1681 = vmatmul.f32.gmra.mxu0 %v1291_v2  ;;  %11471 = vst [vmem:[#allocation32_spill] sm:$0xff] %v7606_v42 }
 0x25d   : > { %v1237_v48 = vpop.f32.mrf.mxu3  ;;  %v1302_v39 = vpop.f32.mrf.mxu2 }
 0x25e   : > { %v1238_v38 = vadd.f32 %v1237_v48, %v7351_v9 }
 0x260   : > { %v1294_v20 = vadd.f32 %v1293_v0, %v1238_v38  ;;  %v5878_v0 = vld [vmem:[%s11423_s6 + $0x288] sm:$0xff]  ;;  %v5881_v38 = vld [vmem:[%s11423_s6 + $0x2a0] sm:$0xff] }
 0x262   : > { %1455 = vmatmul.f32.gmra.mxu3 %v5836_v24  ;;  %1801 = vmatmul.f32.vlgmr.msrb.gmra.mxu2 %v5875_v45  ;;  %v7620_v45 = vpop.f32.mrf.mxu0 }
 0x263   : > { %1684 = vmatmul.f32.gmra.mxu0 %v1294_v20  ;;  %2451 = vmatpush.msrb.mxu2 %v6863_v4  ;;  %11472 = vst [vmem:[#allocation33_spill] sm:$0xff] %v7620_v45 }
 0x265   : > { %2452 = vmatpush.msrb.mxu2 %v6868_v6  ;;  %v1240_v22 = vpop.f32.mrf.mxu3  ;;  %v1305_v9 = vpop.f32.mrf.mxu2 }
 0x266   : > { %v1241_v32 = vadd.f32 %v1240_v22, %v7364_v34 }
 0x267   : > { %2453 = vmatpush.msrb.mxu2 %v6873_v7 }
 0x268   : > { %v1297_v50 = vadd.f32 %v1296_v1, %v1241_v32  ;;  %v5842_v1 = vld [vmem:[%s11423_s6 + $0x258] sm:$0xf] }
 0x269   : > { %2454 = vmatpush.msrb.mxu2 %v6877_v8  ;;  %v5884_v32 = vld [vmem:[%s11423_s6 + $0x2b8] sm:$0xff] }
 0x26a   : > { %1458 = vmatmul.f32.gmra.mxu3 %v5839_v30  ;;  %1804 = vmatmul.f32.gmra.mxu2 %v5878_v0 }
 0x26b   : > { %1687 = vmatmul.f32.gmra.mxu0 %v1297_v50  ;;  %2455 = vmatpush.msrb.mxu2 %v6883_v10 }
 0x26d   : > { %2456 = vmatpush.msrb.mxu2 %v6889_v12  ;;  %v1243_v34 = vpop.f32.mrf.mxu3  ;;  %v1308_v2 = vpop.f32.mrf.mxu2 }
 0x26e   : > { %v1244_v48 = vadd.f32 %v1243_v34, %v7375_v49  ;;  %v5811_v34 = vld [vmem:[%s11423_s6 + $0x160] sm:$0xff] }
 0x26f   : > { %2457 = vmatpush.msrb.mxu2 %v6893_v13 }
 0x270   : > { %v1300_v24 = vadd.f32 %v1299_v54, %v1244_v48  ;;  %v5808_v54 = vld [vmem:[%s11423_s6 + $0x148] sm:$0xff] }
 0x271   : > { %2458 = vmatpush.msrb.mxu2 %v6897_v14 }
 0x272   : > { %1461 = vmatmul.f32.gmra.mxu3 %v5842_v1  ;;  %1807 = vmatmul.f32.gmra.mxu2 %v5881_v38  ;;  %v5887_v1 = vld [vmem:[%s11423_s6 + $0x2d0] sm:$0xff] }
 0x273   : > { %1690 = vmatmul.f32.gmra.mxu0 %v1300_v24  ;;  %2459 = vmatpush.msrb.mxu2 %v6904_v16 }
 0x275   : > { %2460 = vmatpush.msrb.mxu2 %v6911_v18  ;;  %v1246_v49 = vpop.f32.mrf.mxu3  ;;  %v1311_v20 = vpop.f32.mrf.mxu2 }
 0x276   : > { %v1247_v22 = vadd.f32 %v1246_v49, %v7391_v23  ;;  %v5814_v49 = vld [vmem:[%s11423_s6 + $0x178] sm:$0xff] }
 0x277   : > { %2461 = vmatpush.msrb.mxu2 %v6916_v19 }
 0x278   : > { %v1303_v30 = vadd.f32 %v1302_v39, %v1247_v22  ;;  %v7640_v39 = vpop.f32.mrf.mxu0 }
 0x279   : > { %2462 = vmatpush.msrb.mxu2 %v6921_v21  ;;  %11473 = vst [vmem:[#allocation34_spill] sm:$0xff] %v7640_v39  ;;  %v5889_v39 = vld [vmem:[%s11423_s6 + $0x2e0] sm:$0xff] }
 0x27a   : > { %5846 = vmatmul.msk.f32.vlgmr.msrb.gmra.mxu3 %vm1102_vm5, %v5808_v54  ;;  %1810 = vmatmul.f32.gmra.mxu2 %v5884_v32  ;;  %v5890_v54 = vld [vmem:[%s11423_s6 + $0x2e8] sm:$0xff] }
 0x27b   : > { %1693 = vmatmul.f32.gmra.mxu0 %v1303_v30  ;;  %2174 = vmatpush.msrb.mxu3 %v7056_v37 }
 0x27c   : > { %2463 = vmatpush.msrb.mxu2 %v6928_v25 }
 0x27d   : > { %2175 = vmatpush.msrb.mxu3 %v7063_v41  ;;  %v1249_v23 = vpop.f32.mrf.mxu3  ;;  %v7636_v0 = vpop.f32.mrf.mxu2 }
 0x27e   : > { %2464 = vmatpush.msrb.mxu2 %v6935_v29  ;;  %v1250_v50 = vadd.f32 %v1249_v23, %v7417_v11  ;;  %v5817_v23 = vld [vmem:[%s11423_s6 + $0x190] sm:$0xff] }
 0x27f   : > { %2176 = vmatpush.msrb.mxu3 %v7068_v43 }
 0x280   : > { %v1306_v48 = vadd.f32 %v1305_v9, %v1250_v50  ;;  %2465 = vmatpush.msrb.mxu2 %v6940_v28  ;;  %v7662_v22 = vpop.f32.mrf.mxu0  ;;  %v5893_v50 = vld [vmem:[%s11423_s6 + $0x300] sm:$0xff] }
 0x281   : > { %2177 = vmatpush.msrb.mxu3 %v7073_v44  ;;  %11474 = vst [vmem:[#allocation35_spill] sm:$0xff] %v7662_v22  ;;  %v6046_v22 = vld [vmem:[%s11423_s6 + $0x5e8] sm:$0xff] }
 0x282   : > { %2466 = vmatpush.msrb.mxu2 %v6945_v26  ;;  %5847 = vmatmul.msk.f32.gmra.mxu3 %vm1102_vm5, %v5811_v34 }
 0x283   : > { %1696 = vmatmul.f32.gmra.mxu0 %v1306_v48  ;;  %1813 = vmatmul.f32.gmra.mxu2 %v5887_v1  ;;  %v5896_v48 = vld [vmem:[%s11423_s6 + $0x318] sm:$0xff] }
 0x284   : > { %2178 = vmatpush.msrb.mxu3 %v7081_v47 }
 0x285   : > { %v1252_v11 = vpop.f32.mrf.mxu3  ;;  %v7654_v38 = vpop.f32.mrf.mxu2 }
 0x286   : > { %2179 = vmatpush.msrb.mxu3 %v7092_v51  ;;  %v1253_v9 = vadd.f32 %v1252_v11, %v7445_v40 }
 0x288   : > { %v1309_v24 = vadd.f32 %v1308_v2, %v1253_v9  ;;  %2180 = vmatpush.msrb.mxu3 %v7104_v57  ;;  %v7680_v34 = vpop.f32.mrf.mxu0  ;;  %v5823_v9 = vld [vmem:[%s11423_s6 + $0x1c0] sm:$0xff] }
 0x289   : > { %11475 = vst [vmem:[#allocation36_spill] sm:$0xff] %v7680_v34 }
 0x28a   : > { %2181 = vmatpush.msrb.mxu3 %v7113_v61 }
 0x28b   : > { %5848 = vmatmul.msk.f32.gmra.mxu3 %vm1102_vm5, %v5814_v49  ;;  %1699 = vmatmul.f32.gmra.mxu0 %v1309_v24  ;;  %v5899_v24 = vld [vmem:[%s11423_s6 + $0x330] sm:$0xff] }
 0x28c   : > { %1816 = vmatmul.f32.gmra.mxu2 %v5890_v54  ;;  %2182 = vmatpush.msrb.mxu3 %v7125_v63 }
 0x28d   : > { %v1255_v40 = vpop.f32.mrf.mxu3  ;;  %v1488_v32 = vpop.f32.mrf.mxu2 }
 0x28e   : > { %2183 = vmatpush.msrb.mxu3 %v7136_v3  ;;  %v1256_v2 = vadd.f32 %v1255_v40, %v7473_v53 }
 0x290   : > { %v1312_v30 = vadd.f32 %v1311_v20, %v1256_v2  ;;  %2184 = vmatpush.msrb.mxu3 %v7146_v5  ;;  %v5820_v20 = vld [vmem:[%s11423_s6 + $0x1a8] sm:$0xff]  ;;  %v5826_v2 = vld [vmem:[%s11423_s6 + $0x1d8] sm:$0xff] }
 0x292   : > { %2185 = vmatpush.msrb.mxu3 %v7157_v27 }
 0x293   : > { %5849 = vmatmul.msk.f32.gmra.mxu3 %vm1102_vm5, %v5817_v23  ;;  %1702 = vmatmul.f32.gmra.mxu0 %v1312_v30  ;;  %v5902_v30 = vld [vmem:[%s11423_s6 + $0x348] sm:$0xff] }
 0x294   : > { %1819 = vmatmul.f32.gmra.mxu2 %v5893_v50  ;;  %2186 = vmatpush.msrb.mxu3 %v7169_v31 }
 0x295   : > { %v7684_v53 = vpop.f32.mrf.mxu3  ;;  %v1491_v1 = vpop.f32.mrf.mxu2 }
 0x296   : > { %2187 = vmatpush.msrb.mxu3 %v7180_v33 }
 0x298   : > { %2188 = vmatpush.msrb.mxu3 %v7190_v35 }
 0x29a   : > { %2189 = vmatpush.msrb.mxu3 %v7199_v36 }
 0x29b   : > { %5850 = vmatmul.msk.f32.gmra.mxu3 %vm1102_vm5, %v5820_v20 }
 0x29c   : > { %1822 = vmatmul.f32.gmra.mxu2 %v5896_v48  ;;  %v5905_v48 = vld [vmem:[%s11423_s6 + $0x360] sm:$0xff] }
 0x29d   : > { %v7696_v11 = vpop.f32.mrf.mxu3  ;;  %v1494_v49 = vpop.f32.mrf.mxu2 }
 0x2a3   : > { %5851 = vmatmul.msk.f32.gmra.mxu3 %vm1102_vm5, %v5823_v9 }
 0x2a4   : > { %1825 = vmatmul.f32.gmra.mxu2 %v5899_v24 }
 0x2a5   : > { %v1432_v54 = vpop.f32.mrf.mxu3  ;;  %v1497_v50 = vpop.f32.mrf.mxu2 }
 0x2a6   : > { %v7705_v40 = vadd.f32 %v1488_v32, %v1432_v54  ;;  %v5829_v32 = vld [vmem:[%s11423_s6 + $0x1f0] sm:$0xff] }
 0x2ab   : > { %5852 = vmatmul.msk.f32.gmra.mxu3 %vm1102_vm5, %v5826_v2  ;;  %v5908_v2 = vld [vmem:[%s11423_s6 + $0x378] sm:$0xff] }
 0x2ac   : > { %1828 = vmatmul.f32.gmra.mxu2 %v5902_v30 }
 0x2ad   : > { %v1435_v23 = vpop.f32.mrf.mxu3  ;;  %v1500_v54 = vpop.f32.mrf.mxu2 }
 0x2ae   : > { %v7714_v20 = vadd.f32 %v1491_v1, %v1435_v23  ;;  %v5832_v1 = vld [vmem:[%s11423_s6 + $0x208] sm:$0xff] }
 0x2b3   : > { %5853 = vmatmul.msk.f32.gmra.mxu3 %vm1102_vm5, %v5829_v32  ;;  %v5911_v32 = vld [vmem:[%s11423_s6 + $0x390] sm:$0xf] }
 0x2b4   : > { %1831 = vmatmul.f32.gmra.mxu2 %v5905_v48 }
 0x2b5   : > { %v1438_v9 = vpop.f32.mrf.mxu3  ;;  %v1503_v48 = vpop.f32.mrf.mxu2 }
 0x2b6   : > { %v7723_v24 = vadd.f32 %v1494_v49, %v1438_v9  ;;  %v5835_v49 = vld [vmem:[%s11423_s6 + $0x220] sm:$0xff] }
 0x2bb   : > { %5854 = vmatmul.msk.f32.gmra.mxu3 %vm1102_vm5, %v5832_v1  ;;  %v5944_v1 = vld [vmem:[%s11423_s6 + $0x3a8] sm:$0xff] }
 0x2bc   : > { %1834 = vmatmul.f32.gmra.mxu2 %v5908_v2 }
 0x2bd   : > { %v1441_v30 = vpop.f32.mrf.mxu3  ;;  %v1506_v2 = vpop.f32.mrf.mxu2 }
 0x2be   : > { %v7732_v23 = vadd.f32 %v1497_v50, %v1441_v30  ;;  %v5838_v50 = vld [vmem:[%s11423_s6 + $0x238] sm:$0xff] }
 0x2c3   : > { %5855 = vmatmul.msk.f32.gmra.mxu3 %vm1102_vm5, %v5835_v49 }
 0x2c4   : > { %1837 = vmatmul.f32.gmra.mxu2 %v5911_v32  ;;  %v5947_v32 = vld [vmem:[%s11423_s6 + $0x3c0] sm:$0xff] }
 0x2c5   : > { %v1444_v9 = vpop.f32.mrf.mxu3 }
 0x2c6   : > { %v7741_v17 = vadd.f32 %v1500_v54, %v1444_v9  ;;  %v5841_v54 = vld [vmem:[%s11423_s6 + $0x250] sm:$0xff]  ;;  %v1509_v9 = vpop.f32.mrf.mxu2 }
 0x2cb   : > { %5856 = vmatmul.msk.f32.gmra.mxu3 %vm1102_vm5, %v5838_v50 }
 0x2cc   : > { %2134 = vmatmul.f32.vlgmr.msra.gmra.mxu2 %v5944_v1  ;;  %v5844_v1 = vld [vmem:[%s11423_s6 + $0x268] sm:$0xf] }
 0x2cd   : > { %2784 = vmatpush.msra.mxu2 %v6863_v4  ;;  %v1447_v30 = vpop.f32.mrf.mxu3 }
 0x2ce   : > { %v7751_v49 = vadd.f32 %v1503_v48, %v1447_v30  ;;  %v5950_v30 = vld [vmem:[%s11423_s6 + $0x3d8] sm:$0xff] }
 0x2cf   : > { %2785 = vmatpush.msra.mxu2 %v6868_v6 }
 0x2d1   : > { %2786 = vmatpush.msra.mxu2 %v6873_v7 }
 0x2d3   : > { %2787 = vmatpush.msra.mxu2 %v6877_v8  ;;  %5857 = vmatmul.msk.f32.gmra.mxu3 %vm1102_vm5, %v5841_v54 }
 0x2d4   : > { %2137 = vmatmul.f32.gmra.mxu2 %v5947_v32  ;;  %v1512_v32 = vpop.f32.mrf.mxu2 }
 0x2d5   : > { %2788 = vmatpush.msra.mxu2 %v6883_v10  ;;  %v1450_v48 = vpop.f32.mrf.mxu3 }
 0x2d6   : > { %v7764_v50 = vadd.f32 %v1506_v2, %v1450_v48  ;;  %v5876_v48 = vld [vmem:[%s11423_s6 + $0x278] sm:$0xff] }
 0x2d7   : > { %2789 = vmatpush.msra.mxu2 %v6889_v12 }
 0x2d9   : > { %2790 = vmatpush.msra.mxu2 %v6893_v13 }
 0x2db   : > { %2791 = vmatpush.msra.mxu2 %v6897_v14  ;;  %5858 = vmatmul.msk.f32.gmra.mxu3 %vm1102_vm5, %v5844_v1 }
 0x2dc   : > { %2140 = vmatmul.f32.gmra.mxu2 %v5950_v30  ;;  %v5879_v30 = vld [vmem:[%s11423_s6 + $0x290] sm:$0xff] }
 0x2dd   : > { %2792 = vmatpush.msra.mxu2 %v6904_v16  ;;  %v1453_v2 = vpop.f32.mrf.mxu3 }
 0x2de   : > { %v7777_v54 = vadd.f32 %v1509_v9, %v1453_v2  ;;  %v1515_v2 = vpop.f32.mrf.mxu2 }
 0x2df   : > { %2793 = vmatpush.msra.mxu2 %v6911_v18 }
 0x2e1   : > { %2794 = vmatpush.msra.mxu2 %v6916_v19 }
 0x2e3   : > { %2795 = vmatpush.msra.mxu2 %v6921_v21  ;;  %1857 = vmatmul.f32.vlgmr.msra.gmra.mxu3 %v5876_v48 }
 0x2e4   : > { %2143 = vmatmul.f32.gmra.mxu2 %v5953_v62  ;;  %2507 = vmatpush.msra.mxu3 %v7056_v37  ;;  %v5956_v62 = vld [vmem:[%s11423_s6 + $0x408] sm:$0xff] }
 0x2e5   : > { %2796 = vmatpush.msra.mxu2 %v6928_v25  ;;  %v1456_v9 = vpop.f32.mrf.mxu3 }
 0x2e6   : > { %2508 = vmatpush.msra.mxu3 %v7063_v41  ;;  %v7791_v1 = vadd.f32 %v1512_v32, %v1456_v9  ;;  %v5882_v9 = vld [vmem:[%s11423_s6 + $0x2a8] sm:$0xff] }
 0x2e7   : > { %2797 = vmatpush.msra.mxu2 %v6935_v29 }
 0x2e8   : > { %2509 = vmatpush.msra.mxu3 %v7068_v43 }
 0x2e9   : > { %2798 = vmatpush.msra.mxu2 %v6940_v28 }
 0x2ea   : > { %2510 = vmatpush.msra.mxu3 %v7073_v44 }
 0x2eb   : > { %2799 = vmatpush.msra.mxu2 %v6945_v26  ;;  %1860 = vmatmul.f32.gmra.mxu3 %v5879_v30  ;;  %v1518_v30 = vpop.f32.mrf.mxu2 }
 0x2ec   : > { %2146 = vmatmul.f32.gmra.mxu2 %v5956_v62  ;;  %2511 = vmatpush.msra.mxu3 %v7081_v47 }
 0x2ed   : > { %v1459_v32 = vpop.f32.mrf.mxu3 }
 0x2ee   : > { %2512 = vmatpush.msra.mxu3 %v7092_v51  ;;  %v7806_v48 = vadd.f32 %v1515_v2, %v1459_v32  ;;  %v5885_v32 = vld [vmem:[%s11423_s6 + $0x2c0] sm:$0xff] }
 0x2f0   : > { %2513 = vmatpush.msra.mxu3 %v7104_v57 }
 0x2f2   : > { %2514 = vmatpush.msra.mxu3 %v7113_v61 }
 0x2f3   : > { %1863 = vmatmul.f32.gmra.mxu3 %v5882_v9 }
 0x2f4   : > { %2149 = vmatmul.f32.gmra.mxu2 %v5959_v15  ;;  %2515 = vmatpush.msra.mxu3 %v7125_v63  ;;  %v1483_v15 = vadd.f32 %v7636_v0, %v7684_v53  ;;  %v7841_v0 = vpop.f32.mrf.mxu2  ;;  %v1486_v53 = vadd.f32 %v7654_v38, %v7696_v11 }
 0x2f5   : > { %v1462_v62 = vpop.f32.mrf.mxu3 }
 0x2f6   : > { %2516 = vmatpush.msra.mxu3 %v7136_v3  ;;  %v7818_v2 = vadd.f32 %v1518_v30, %v1462_v62  ;;  %v5888_v62 = vld [vmem:[%s11423_s6 + $0x2d8] sm:$0xff] }
 0x2f8   : > { %2517 = vmatpush.msra.mxu3 %v7146_v5 }
 0x2fa   : > { %2518 = vmatpush.msra.mxu3 %v7157_v27 }
 0x2fb   : > { %1866 = vmatmul.f32.gmra.mxu3 %v5885_v32 }
 0x2fc   : > { %2152 = vmatmul.f32.gmra.mxu2 %v5962_v52  ;;  %2519 = vmatpush.msra.mxu3 %v7169_v31  ;;  %v5965_v52 = vld [vmem:[%s11423_s6 + $0x450] sm:$0xff] }
 0x2fd   : > { %v1538_v9 = vpop.f32.mrf.mxu3 }
 0x2fe   : > { %2520 = vmatpush.msra.mxu3 %v7180_v33  ;;  %v1539_v30 = vadd.f32 %v1538_v9, %v1483_v15  ;;  %v5891_v9 = vld [vmem:[%s11423_s6 + $0x2f0] sm:$0xff] }
 0x300   : > { %2521 = vmatpush.msra.mxu3 %v7190_v35  ;;  %1610 = vmatmul.f32.vlgmr.msrb.gmra.mxu1 %v1539_v30  ;;  %v5968_v30 = vld [vmem:[%s11423_s6 + $0x468] sm:$0xff] }
 0x301   : > { %5983 = vmatpush.msk.msrb.mxu1 %vm1142_vm4, %v7004_v55 }
 0x302   : > { %2522 = vmatpush.msra.mxu3 %v7199_v36 }
 0x303   : > { %1869 = vmatmul.f32.gmra.mxu3 %v5888_v62  ;;  %2242 = vmatpush.msrb.mxu1 %v7007_v56  ;;  %v7856_v62 = vpop.f32.mrf.mxu2 }
 0x304   : > { %2155 = vmatmul.f32.gmra.mxu2 %v5965_v52  ;;  %v5894_v52 = vld [vmem:[%s11423_s6 + $0x308] sm:$0xff] }
 0x305   : > { %2243 = vmatpush.msrb.mxu1 %v7012_v58  ;;  %v1541_v32 = vpop.f32.mrf.mxu3 }
 0x306   : > { %v1542_v15 = vadd.f32 %v1541_v32, %v1486_v53  ;;  %v5971_v53 = vld [vmem:[%s11423_s6 + $0x480] sm:$0xff] }
 0x307   : > { %2244 = vmatpush.msrb.mxu1 %v7017_v59 }
 0x308   : > { %1613 = vmatmul.f32.gmra.mxu1 %v1542_v15 }
 0x309   : > { %2245 = vmatpush.msrb.mxu1 %v7021_v60 }
 0x30b   : > { %1872 = vmatmul.f32.gmra.mxu3 %v5891_v9  ;;  %v7865_v32 = vpop.f32.mrf.mxu2 }
 0x30c   : > { %2158 = vmatmul.f32.gmra.mxu2 %v5968_v30  ;;  %v5974_v30 = vld [vmem:[%s11423_s6 + $0x498] sm:$0xff] }
 0x30e   : > { %v1544_v38 = vpop.f32.mrf.mxu3 }
 0x30f   : > { %v1545_v11 = vadd.f32 %v1544_v38, %v7705_v40  ;;  %v5897_v40 = vld [vmem:[%s11423_s6 + $0x320] sm:$0xff] }
 0x311   : > { %1616 = vmatmul.f32.gmra.mxu1 %v1545_v11 }
 0x313   : > { %1875 = vmatmul.f32.gmra.mxu3 %v5894_v52  ;;  %v7874_v38 = vpop.f32.mrf.mxu2 }
 0x314   : > { %2161 = vmatmul.f32.gmra.mxu2 %v5971_v53  ;;  %v5977_v53 = vld [vmem:[%s11423_s6 + $0x4b0] sm:$0xff] }
 0x316   : > { %v1547_v15 = vpop.f32.mrf.mxu3 }
 0x317   : > { %v1548_v9 = vadd.f32 %v1547_v15, %v7714_v20  ;;  %v5900_v20 = vld [vmem:[%s11423_s6 + $0x338] sm:$0xff] }
 0x319   : > { %1619 = vmatmul.f32.gmra.mxu1 %v1548_v9 }
 0x31b   : > { %1878 = vmatmul.f32.gmra.mxu3 %v5897_v40  ;;  %v7883_v15 = vpop.f32.mrf.mxu2 }
 0x31c   : > { %2164 = vmatmul.f32.gmra.mxu2 %v5974_v30  ;;  %v5980_v30 = vld [vmem:[%s11423_s6 + $0x4c8] sm:$0xf] }
 0x31e   : > { %v1550_v11 = vpop.f32.mrf.mxu3 }
 0x31f   : > { %v1551_v52 = vadd.f32 %v1550_v11, %v7723_v24  ;;  %v5903_v24 = vld [vmem:[%s11423_s6 + $0x350] sm:$0xff] }
 0x321   : > { %1622 = vmatmul.f32.gmra.mxu1 %v1551_v52 }
 0x323   : > { %1881 = vmatmul.f32.gmra.mxu3 %v5900_v20  ;;  %v7892_v11 = vpop.f32.mrf.mxu2 }
 0x324   : > { %2167 = vmatmul.f32.gmra.mxu2 %v5977_v53  ;;  %v6013_v53 = vld [vmem:[%s11423_s6 + $0x4e0] sm:$0xff] }
 0x326   : > { %v1553_v9 = vpop.f32.mrf.mxu3 }
 0x327   : > { %v1554_v40 = vadd.f32 %v1553_v9, %v7732_v23  ;;  %v5906_v23 = vld [vmem:[%s11423_s6 + $0x368] sm:$0xff] }
 0x329   : > { %1625 = vmatmul.f32.gmra.mxu1 %v1554_v40 }
 0x32b   : > { %1884 = vmatmul.f32.gmra.mxu3 %v5903_v24  ;;  %v7901_v9 = vpop.f32.mrf.mxu2  ;;  %v5909_v24 = vld [vmem:[%s11423_s6 + $0x380] sm:$0xff] }
 0x32c   : > { %2170 = vmatmul.f32.gmra.mxu2 %v5980_v30  ;;  %v6016_v30 = vld [vmem:[%s11423_s6 + $0x4f8] sm:$0xff] }
 0x32e   : > { %v1556_v52 = vpop.f32.mrf.mxu3 }
 0x32f   : > { %v1557_v20 = vadd.f32 %v1556_v52, %v7741_v17 }
 0x331   : > { %1628 = vmatmul.f32.gmra.mxu1 %v1557_v20 }
 0x333   : > { %1887 = vmatmul.f32.gmra.mxu3 %v5906_v23  ;;  %v7914_v52 = vpop.f32.mrf.mxu2  ;;  %v5912_v23 = vld [vmem:[%s11423_s6 + $0x398] sm:$0xf] }
 0x334   : > { %2467 = vmatmul.f32.vlgmr.msrb.gmra.mxu2 %v6013_v53  ;;  %v6019_v53 = vld [vmem:[%s11423_s6 + $0x510] sm:$0xff] }
 0x335   : > { %3117 = vmatpush.msrb.mxu2 %v6863_v4 }
 0x336   : > { %v1559_v40 = vpop.f32.mrf.mxu3 }
 0x337   : > { %3118 = vmatpush.msrb.mxu2 %v6868_v6  ;;  %v1560_v17 = vadd.f32 %v1559_v40, %v7751_v49 }
 0x339   : > { %3119 = vmatpush.msrb.mxu2 %v6873_v7  ;;  %1631 = vmatmul.f32.gmra.mxu1 %v1560_v17 }
 0x33b   : > { %3120 = vmatpush.msrb.mxu2 %v6877_v8  ;;  %1890 = vmatmul.f32.gmra.mxu3 %v5909_v24  ;;  %v7927_v40 = vpop.f32.mrf.mxu2  ;;  %v5945_v24 = vld [vmem:[%s11423_s6 + $0x3b0] sm:$0xff] }
 0x33c   : > { %2470 = vmatmul.f32.gmra.mxu2 %v6016_v30  ;;  %v6022_v30 = vld [vmem:[%s11423_s6 + $0x528] sm:$0xff] }
 0x33d   : > { %3121 = vmatpush.msrb.mxu2 %v6883_v10 }
 0x33e   : > { %v1562_v49 = vpop.f32.mrf.mxu3 }
 0x33f   : > { %3122 = vmatpush.msrb.mxu2 %v6889_v12  ;;  %v1563_v20 = vadd.f32 %v1562_v49, %v7764_v50 }
 0x341   : > { %3123 = vmatpush.msrb.mxu2 %v6893_v13  ;;  %1634 = vmatmul.f32.gmra.mxu1 %v1563_v20 }
 0x343   : > { %3124 = vmatpush.msrb.mxu2 %v6897_v14  ;;  %1893 = vmatmul.f32.gmra.mxu3 %v5912_v23  ;;  %v7940_v49 = vpop.f32.mrf.mxu2  ;;  %v5948_v23 = vld [vmem:[%s11423_s6 + $0x3c8] sm:$0xff] }
 0x344   : > { %2473 = vmatmul.f32.gmra.mxu2 %v6019_v53  ;;  %v6025_v53 = vld [vmem:[%s11423_s6 + $0x540] sm:$0xff] }
 0x345   : > { %3125 = vmatpush.msrb.mxu2 %v6904_v16 }
 0x346   : > { %v1565_v50 = vpop.f32.mrf.mxu3 }
 0x347   : > { %3126 = vmatpush.msrb.mxu2 %v6911_v18  ;;  %v1566_v17 = vadd.f32 %v1565_v50, %v7777_v54 }
 0x349   : > { %3127 = vmatpush.msrb.mxu2 %v6916_v19  ;;  %1637 = vmatmul.f32.gmra.mxu1 %v1566_v17 }
 0x34b   : > { %3128 = vmatpush.msrb.mxu2 %v6921_v21  ;;  %2190 = vmatmul.f32.vlgmr.msrb.gmra.mxu3 %v5945_v24  ;;  %v7957_v50 = vpop.f32.mrf.mxu2  ;;  %v5951_v24 = vld [vmem:[%s11423_s6 + $0x3e0] sm:$0xff] }
 0x34c   : > { %2476 = vmatmul.f32.gmra.mxu2 %v6022_v30  ;;  %2840 = vmatpush.msrb.mxu3 %v7056_v37  ;;  %v6028_v30 = vld [vmem:[%s11423_s6 + $0x558] sm:$0xff] }
 0x34d   : > { %3129 = vmatpush.msrb.mxu2 %v6928_v25 }
 0x34e   : > { %2841 = vmatpush.msrb.mxu3 %v7063_v41  ;;  %v1568_v54 = vpop.f32.mrf.mxu3 }
 0x34f   : > { %3130 = vmatpush.msrb.mxu2 %v6935_v29  ;;  %v1569_v20 = vadd.f32 %v1568_v54, %v7791_v1 }
 0x350   : > { %2842 = vmatpush.msrb.mxu3 %v7068_v43 }
 0x351   : > { %3131 = vmatpush.msrb.mxu2 %v6940_v28  ;;  %1640 = vmatmul.f32.gmra.mxu1 %v1569_v20 }
 0x352   : > { %2843 = vmatpush.msrb.mxu3 %v7073_v44 }
 0x353   : > { %3132 = vmatpush.msrb.mxu2 %v6945_v26  ;;  %2193 = vmatmul.f32.gmra.mxu3 %v5948_v23  ;;  %v7970_v54 = vpop.f32.mrf.mxu2  ;;  %v5954_v23 = vld [vmem:[%s11423_s6 + $0x3f8] sm:$0xff] }
 0x354   : > { %2479 = vmatmul.f32.gmra.mxu2 %v6025_v53  ;;  %2844 = vmatpush.msrb.mxu3 %v7081_v47  ;;  %11476 = vst [vmem:[#allocation37_spill] sm:$0xff] %v7970_v54  ;;  %v6031_v53 = vld [vmem:[%s11423_s6 + $0x570] sm:$0xff]  ;;  %v5913_v54 = vld [vmem:[%s11423_s6 + $0x3a0] sm:$0xf] }
 0x356   : > { %2845 = vmatpush.msrb.mxu3 %v7092_v51  ;;  %v1571_v1 = vpop.f32.mrf.mxu3 }
 0x357   : > { %v1572_v17 = vadd.f32 %v1571_v1, %v7806_v48 }
 0x358   : > { %2846 = vmatpush.msrb.mxu3 %v7104_v57 }
 0x359   : > { %1643 = vmatmul.f32.gmra.mxu1 %v1572_v17  ;;  %v5957_v17 = vld [vmem:[%s11423_s6 + $0x410] sm:$0xff] }
 0x35a   : > { %2847 = vmatpush.msrb.mxu3 %v7113_v61 }
 0x35b   : > { %2196 = vmatmul.f32.gmra.mxu3 %v5951_v24  ;;  %v7983_v1 = vpop.f32.mrf.mxu2  ;;  %v6034_v24 = vld [vmem:[%s11423_s6 + $0x588] sm:$0xff] }
 0x35c   : > { %2482 = vmatmul.f32.gmra.mxu2 %v6028_v30  ;;  %2848 = vmatpush.msrb.mxu3 %v7125_v63  ;;  %11477 = vst [vmem:[#allocation38_spill] sm:$0xff] %v7983_v1 }
 0x35e   : > { %2849 = vmatpush.msrb.mxu3 %v7136_v3  ;;  %v1574_v48 = vpop.f32.mrf.mxu3 }
 0x35f   : > { %v1575_v20 = vadd.f32 %v1574_v48, %v7818_v2  ;;  %v5877_v2 = vld [vmem:[%s11423_s6 + $0x280] sm:$0xff]  ;;  %v5880_v48 = vld [vmem:[%s11423_s6 + $0x298] sm:$0xff] }
 0x360   : > { %2850 = vmatpush.msrb.mxu3 %v7146_v5 }
 0x361   : > { %1646 = vmatmul.f32.gmra.mxu1 %v1575_v20  ;;  %v5960_v20 = vld [vmem:[%s11423_s6 + $0x428] sm:$0xff] }
 0x362   : > { %2851 = vmatpush.msrb.mxu3 %v7157_v27 }
 0x363   : > { %2199 = vmatmul.f32.gmra.mxu3 %v5954_v23  ;;  %v8002_v30 = vpop.f32.mrf.mxu2  ;;  %v6037_v23 = vld [vmem:[%s11423_s6 + $0x5a0] sm:$0xff] }
 0x364   : > { %2485 = vmatmul.f32.gmra.mxu2 %v6031_v53  ;;  %2852 = vmatpush.msrb.mxu3 %v7169_v31  ;;  %11478 = vst [vmem:[#allocation39_spill] sm:$0xff] %v8002_v30  ;;  %v5883_v53 = vld [vmem:[%s11423_s6 + $0x2b0] sm:$0xff] }
 0x366   : > { %2853 = vmatpush.msrb.mxu3 %v7180_v33 }
 0x368   : > { %2854 = vmatpush.msrb.mxu3 %v7190_v35 }
 0x369   : > { %5915 = vmatmul.msk.f32.vlgmr.msra.gmra.mxu1 %vm1102_vm5, %v5877_v2 }
 0x36a   : > { %6052 = vmatpush.msk.msra.mxu1 %vm1142_vm4, %v7004_v55  ;;  %2855 = vmatpush.msrb.mxu3 %v7199_v36 }
 0x36b   : > { %2202 = vmatmul.f32.gmra.mxu3 %v5957_v17  ;;  %v8020_v2 = vpop.f32.mrf.mxu2  ;;  %v8022_v17 = vpop.f32.mrf.mxu0 }
 0x36c   : > { %2488 = vmatmul.f32.gmra.mxu2 %v6034_v24  ;;  %2575 = vmatpush.msra.mxu1 %v7007_v56  ;;  %11479 = vst [vmem:[#allocation40_spill] sm:$0xff] %v8020_v2  ;;  %v5963_v24 = vld [vmem:[%s11423_s6 + $0x440] sm:$0xff]  ;;  %v5939_v2 = vld [vmem:[%s11424_s7 + $0x158] sm:$0xff] }
 0x36d   : > { %11480 = vst [vmem:[#allocation41_spill] sm:$0xff] %v8022_v17  ;;  %v5892_v17 = vld [vmem:[%s11423_s6 + $0x2f8] sm:$0xff] }
 0x36e   : > { %2576 = vmatpush.msra.mxu1 %v7012_v58 }
 0x370   : > { %2577 = vmatpush.msra.mxu1 %v7017_v59 }
 0x371   : > { %5916 = vmatmul.msk.f32.gmra.mxu1 %vm1102_vm5, %v5880_v48  ;;  %v6040_v48 = vld [vmem:[%s11423_s6 + $0x5b8] sm:$0xff] }
 0x372   : > { %2578 = vmatpush.msra.mxu1 %v7021_v60 }
 0x373   : > { %2205 = vmatmul.f32.gmra.mxu3 %v5960_v20  ;;  %v8039_v42 = vpop.f32.mrf.mxu2 }
 0x374   : > { %2491 = vmatmul.f32.gmra.mxu2 %v6037_v23  ;;  %v5886_v23 = vld [vmem:[%s11423_s6 + $0x2c8] sm:$0xff]  ;;  %11482 = vst [vmem:[#allocation43_spill] sm:$0xff] %v8039_v42 }
 0x379   : > { %5917 = vmatmul.msk.f32.gmra.mxu1 %vm1102_vm5, %v5883_v53  ;;  %v6043_v53 = vld [vmem:[%s11423_s6 + $0x5d0] sm:$0xff] }
 0x37b   : > { %2208 = vmatmul.f32.gmra.mxu3 %v5963_v24  ;;  %v8045_v24 = vpop.f32.mrf.mxu0 }
 0x37c   : > { %2494 = vmatmul.f32.gmra.mxu2 %v6040_v48  ;;  %11483 = vst [vmem:[#allocation44_spill] sm:$0xff] %v8045_v24  ;;  %v8047_v48 = vpop.f32.mrf.mxu3 }
 0x37d   : > { %v8031_v20 = vpop.f32.mrf.mxu1 }
 0x37e   : > { %11481 = vst [vmem:[#allocation42_spill] sm:$0xff] %v8031_v20  ;;  %v5895_v20 = vld [vmem:[%s11423_s6 + $0x310] sm:$0xff] }
 0x381   : > { %5918 = vmatmul.msk.f32.gmra.mxu1 %vm1102_vm5, %v5886_v23  ;;  %v5969_v23 = vld [vmem:[%s11423_s6 + $0x470] sm:$0xff] }
 0x383   : > { %2211 = vmatmul.f32.gmra.mxu3 %v5966_v46  ;;  %v8061_v46 = vpop.f32.mrf.mxu2  ;;  %v8065_v34 = vpop.f32.mrf.mxu0 }
 0x384   : > { %2497 = vmatmul.f32.gmra.mxu2 %v6043_v53  ;;  %11485 = vst [vmem:[#allocation46_spill] sm:$0xff] %v8061_v46  ;;  %v8063_v53 = vpop.f32.mrf.mxu3 }
 0x385   : > { %v8049_v45 = vpop.f32.mrf.mxu1  ;;  %11486 = vst [vmem:[#allocation47_spill] sm:$0xff] %v8065_v34 }
 0x386   : > { %11484 = vst [vmem:[#allocation45_spill] sm:$0xff] %v8049_v45 }
 0x389   : > { %5919 = vmatmul.msk.f32.gmra.mxu1 %vm1102_vm5, %v5889_v39  ;;  %v5972_v39 = vld [vmem:[%s11423_s6 + $0x488] sm:$0xff] }
 0x38b   : > { %2214 = vmatmul.f32.gmra.mxu3 %v5969_v23  ;;  %v6049_v23 = vld [vmem:[%s11423_s6 + $0x600] sm:$0xf]  ;;  %v8083_v34 = vpop.f32.mrf.mxu0 }
 0x38c   : > { %2500 = vmatmul.f32.gmra.mxu2 %v6046_v22  ;;  %v8079_v45 = vpop.f32.mrf.mxu3  ;;  %v8081_v22 = vpop.f32.mrf.mxu2  ;;  %11489 = vst [vmem:[#allocation50_spill] sm:$0xff] %v8083_v34 }
 0x38d   : > { %11488 = vst [vmem:[#allocation49_spill] sm:$0xff] %v8081_v22 }
 0x38e   : > { %v8067_v24 = vpop.f32.mrf.mxu1 }
 0x38f   : > { %11487 = vst [vmem:[#allocation48_spill] sm:$0xff] %v8067_v24 }
 0x391   : > { %5920 = vmatmul.msk.f32.gmra.mxu1 %vm1102_vm5, %v5892_v17  ;;  %v5975_v17 = vld [vmem:[%s11423_s6 + $0x4a0] sm:$0xff] }
 0x393   : > { %2217 = vmatmul.f32.gmra.mxu3 %v5972_v39  ;;  %v6082_v39 = vld [vmem:[%s11423_s6 + $0x618] sm:$0xff] }
 0x394   : > { %2503 = vmatmul.f32.gmra.mxu2 %v6049_v23  ;;  %v8097_v23 = vpop.f32.mrf.mxu3  ;;  %v8105_v22 = vpop.f32.mrf.mxu2 }
 0x395   : > { %11492 = vst [vmem:[#allocation53_spill] sm:$0xff] %v8105_v22  ;;  %v5901_v22 = vld [vmem:[%s11423_s6 + $0x340] sm:$0xff] }
 0x396   : > { %v8085_v24 = vpop.f32.mrf.mxu1 }
 0x397   : > { %11490 = vst [vmem:[#allocation51_spill] sm:$0xff] %v8085_v24  ;;  %v5898_v24 = vld [vmem:[%s11423_s6 + $0x328] sm:$0xff] }
 0x399   : > { %5921 = vmatmul.msk.f32.gmra.mxu1 %vm1102_vm5, %v5895_v20  ;;  %v8108_v20 = vpop.f32.mrf.mxu0 }
 0x39a   : > { %11493 = vst [vmem:[#allocation54_spill] sm:$0xff] %v8108_v20 }
 0x39b   : > { %2220 = vmatmul.f32.gmra.mxu3 %v5975_v17  ;;  %v5978_v17 = vld [vmem:[%s11423_s6 + $0x4b8] sm:$0xff] }
 0x39c   : > { %2800 = vmatmul.f32.vlgmr.msra.gmra.mxu2 %v6082_v39  ;;  %v6085_v39 = vld [vmem:[%s11423_s6 + $0x630] sm:$0xff]  ;;  %v8131_v46 = vpop.f32.mrf.mxu2 }
 0x39d   : > { %3450 = vmatpush.msra.mxu2 %v6863_v4  ;;  %11495 = vst [vmem:[#allocation56_spill] sm:$0xff] %v8131_v46 }
 0x39e   : > { %v8100_v34 = vpop.f32.mrf.mxu1 }
 0x39f   : > { %11491 = vst [vmem:[#allocation52_spill] sm:$0xff] %v8100_v34  ;;  %3451 = vmatpush.msra.mxu2 %v6868_v6  ;;  %v8119_v34 = vpop.f32.mrf.mxu3 }
 0x3a1   : > { %3452 = vmatpush.msra.mxu2 %v6873_v7  ;;  %5922 = vmatmul.msk.f32.gmra.mxu1 %vm1102_vm5, %v5898_v24  ;;  %v5981_v24 = vld [vmem:[%s11423_s6 + $0x4d0] sm:$0xf] }
 0x3a3   : > { %3453 = vmatpush.msra.mxu2 %v6877_v8  ;;  %2223 = vmatmul.f32.gmra.mxu3 %v5978_v17  ;;  %v6088_v17 = vld [vmem:[%s11423_s6 + $0x648] sm:$0xff] }
 0x3a4   : > { %2803 = vmatmul.f32.gmra.mxu2 %v6085_v39  ;;  %v8138_v39 = vpop.f32.mrf.mxu0 }
 0x3a5   : > { %3454 = vmatpush.msra.mxu2 %v6883_v10  ;;  %11496 = vst [vmem:[#allocation57_spill] sm:$0xff] %v8138_v39  ;;  %v5904_v39 = vld [vmem:[%s11423_s6 + $0x358] sm:$0xff] }
 0x3a6   : > { %v8122_v20 = vpop.f32.mrf.mxu1 }
 0x3a7   : > { %11494 = vst [vmem:[#allocation55_spill] sm:$0xff] %v8122_v20  ;;  %3455 = vmatpush.msra.mxu2 %v6889_v12  ;;  %v5943_v20 = vld [vmem:[%s11424_s7 + $0x178] sm:$0xff]  ;;  %v8144_v42 = vpop.f32.mrf.mxu3 }
 0x3a8   : > { %1970 = vmatpush.msra.mxu0 %v5943_v20  ;;  %v6014_v20 = vld [vmem:[%s11423_s6 + $0x4e8] sm:$0xff] }
 0x3a9   : > { %3456 = vmatpush.msra.mxu2 %v6893_v13  ;;  %5923 = vmatmul.msk.f32.gmra.mxu1 %vm1102_vm5, %v5901_v22  ;;  %v5942_v22 = vld [vmem:[%s11424_s7 + $0x170] sm:$0xff] }
 0x3aa   : > { %1971 = vmatpush.msra.mxu0 %v5942_v22  ;;  %v6091_v22 = vld [vmem:[%s11423_s6 + $0x660] sm:$0xff] }
 0x3ab   : > { %3457 = vmatpush.msra.mxu2 %v6897_v14  ;;  %2226 = vmatmul.f32.gmra.mxu3 %v5981_v24  ;;  %v5941_v24 = vld [vmem:[%s11424_s7 + $0x168] sm:$0xff] }
 0x3ac   : > { %2806 = vmatmul.f32.gmra.mxu2 %v6088_v17  ;;  %1972 = vmatpush.msra.mxu0 %v5941_v24  ;;  %v5940_v17 = vld [vmem:[%s11424_s7 + $0x160] sm:$0xff]  ;;  %v8178_v30 = vpop.f32.mrf.mxu0 }
 0x3ad   : > { %3458 = vmatpush.msra.mxu2 %v6904_v16  ;;  %11499 = vst [vmem:[#allocation60_spill] sm:$0xff] %v8178_v30  ;;  %v6094_v30 = vld [vmem:[%s11423_s6 + $0x678] sm:$0xff] }
 0x3ae   : > { %v8150_v46 = vpop.f32.mrf.mxu1  ;;  %1973 = vmatpush.msra.mxu0 %v5940_v17 }
 0x3af   : > { %11497 = vst [vmem:[#allocation58_spill] sm:$0xff] %v8150_v46  ;;  %3459 = vmatpush.msra.mxu2 %v6911_v18  ;;  %v8170_v46 = vpop.f32.mrf.mxu2  ;;  %v8176_v24 = vpop.f32.mrf.mxu3 }
 0x3b0   : > { %11498 = vst [vmem:[#allocation59_spill] sm:$0xff] %v8170_v46  ;;  %1974 = vmatpush.msra.mxu0 %v5939_v2  ;;  %v6017_v2 = vld [vmem:[%s11423_s6 + $0x500] sm:$0xff]  ;;  %v5935_v46 = vld [vmem:[%s11424_s7 + $0x138] sm:$0xff] }
 0x3b1   : > { %3460 = vmatpush.msra.mxu2 %v6916_v19  ;;  %5924 = vmatmul.msk.f32.gmra.mxu1 %vm1102_vm5, %v5904_v39  ;;  %v5938_v39 = vld [vmem:[%s11424_s7 + $0x150] sm:$0xff] }
 0x3b2   : > { %1975 = vmatpush.msra.mxu0 %v5938_v39  ;;  %v5936_v39 = vld [vmem:[%s11424_s7 + $0x140] sm:$0xff] }
 0x3b3   : > { %3461 = vmatpush.msra.mxu2 %v6921_v21  ;;  %2523 = vmatmul.f32.vlgmr.msra.gmra.mxu3 %v6014_v20  ;;  %v5907_v20 = vld [vmem:[%s11423_s6 + $0x370] sm:$0xff] }
 0x3b4   : > { %2809 = vmatmul.f32.gmra.mxu2 %v6091_v22  ;;  %3173 = vmatpush.msra.mxu3 %v7056_v37  ;;  %v5937_v22 = vld [vmem:[%s11424_s7 + $0x148] sm:$0xff] }
 0x3b5   : > { %3462 = vmatpush.msra.mxu2 %v6928_v25  ;;  %1976 = vmatpush.msra.mxu0 %v5937_v22  ;;  %v8217_v22 = vpop.f32.mrf.mxu0 }
 0x3b6   : > { %3174 = vmatpush.msra.mxu3 %v7063_v41  ;;  %v8186_v17 = vpop.f32.mrf.mxu1  ;;  %11502 = vst [vmem:[#allocation63_spill] sm:$0xff] %v8217_v22  ;;  %v5933_v22 = vld [vmem:[%s11424_s7 + $0x128] sm:$0xff] }
 0x3b7   : > { %11500 = vst [vmem:[#allocation61_spill] sm:$0xff] %v8186_v17  ;;  %3463 = vmatpush.msra.mxu2 %v6935_v29  ;;  %v8209_v17 = vpop.f32.mrf.mxu3  ;;  %1977 = vmatpush.msra.mxu0 %v5936_v39  ;;  %v6020_v39 = vld [vmem:[%s11423_s6 + $0x518] sm:$0xff] }
 0x3b8   : > { %3175 = vmatpush.msra.mxu3 %v7068_v43 }
 0x3b9   : > { %3464 = vmatpush.msra.mxu2 %v6940_v28  ;;  %5925 = vmatmul.msk.f32.gmra.mxu1 %vm1102_vm5, %v5907_v20  ;;  %v8212_v20 = vpop.f32.mrf.mxu2 }
 0x3ba   : > { %3176 = vmatpush.msra.mxu3 %v7073_v44  ;;  %11501 = vst [vmem:[#allocation62_spill] sm:$0xff] %v8212_v20  ;;  %1978 = vmatpush.msra.mxu0 %v5935_v46  ;;  %v5932_v46 = vld [vmem:[%s11424_s7 + $0x120] sm:$0xff] }
 0x3bb   : > { %3465 = vmatpush.msra.mxu2 %v6945_v26  ;;  %2526 = vmatmul.f32.gmra.mxu3 %v6017_v2  ;;  %v5910_v2 = vld [vmem:[%s11423_s6 + $0x388] sm:$0xff] }
 0x3bc   : > { %2812 = vmatmul.f32.gmra.mxu2 %v6094_v30  ;;  %3177 = vmatpush.msra.mxu3 %v7081_v47  ;;  %v5934_v30 = vld [vmem:[%s11424_s7 + $0x130] sm:$0xff] }
 0x3bd   : > { %1979 = vmatpush.msra.mxu0 %v5934_v30 }
 0x3be   : > { %3178 = vmatpush.msra.mxu3 %v7092_v51  ;;  %v8220_v1 = vpop.f32.mrf.mxu1 }
 0x3bf   : > { %11503 = vst [vmem:[#allocation64_spill] sm:$0xff] %v8220_v1  ;;  %v6097_v1 = vld [vmem:[%s11423_s6 + $0x690] sm:$0xff]  ;;  %1980 = vmatpush.msra.mxu0 %v5933_v22  ;;  %v8243_v20 = vpop.f32.mrf.mxu3  ;;  %v8260_v22 = vpop.f32.mrf.mxu0 }
 0x3c0   : > { %3179 = vmatpush.msra.mxu3 %v7104_v57  ;;  %11506 = vst [vmem:[#allocation67_spill] sm:$0xff] %v8260_v22 }
 0x3c1   : > { %5926 = vmatmul.msk.f32.gmra.mxu1 %vm1102_vm5, %v5910_v2  ;;  %v5931_v2 = vld [vmem:[%s11424_s7 + $0x118] sm:$0xff]  ;;  %1981 = vmatpush.msra.mxu0 %v5932_v46  ;;  %v6023_v46 = vld [vmem:[%s11423_s6 + $0x530] sm:$0xff] }
 0x3c2   : > { %3180 = vmatpush.msra.mxu3 %v7113_v61 }
 0x3c3   : > { %2529 = vmatmul.f32.gmra.mxu3 %v6020_v39  ;;  %v8255_v39 = vpop.f32.mrf.mxu2  ;;  %1982 = vmatpush.msra.mxu0 %v5931_v2  ;;  %v5928_v2 = vld [vmem:[%s11424_s7 + $0x100] sm:$0xff] }
 0x3c4   : > { %2815 = vmatmul.f32.gmra.mxu2 %v6097_v1  ;;  %3181 = vmatpush.msra.mxu3 %v7125_v63  ;;  %11505 = vst [vmem:[#allocation66_spill] sm:$0xff] %v8255_v39  ;;  %v5930_v1 = vld [vmem:[%s11424_s7 + $0x110] sm:$0xff]  ;;  %v6100_v39 = vld [vmem:[%s11423_s6 + $0x6a8] sm:$0xff] }
 0x3c5   : > { %1983 = vmatpush.msra.mxu0 %v5930_v1  ;;  %v5946_v1 = vld [vmem:[%s11423_s6 + $0x3b8] sm:$0xff] }
 0x3c6   : > { %3182 = vmatpush.msra.mxu3 %v7136_v3  ;;  %v8250_v30 = vpop.f32.mrf.mxu1 }
 0x3c7   : > { %11504 = vst [vmem:[#allocation65_spill] sm:$0xff] %v8250_v30  ;;  %v5929_v30 = vld [vmem:[%s11424_s7 + $0x108] sm:$0xff]  ;;  %v8277_v22 = vpop.f32.mrf.mxu3 }
 0x3c8   : > { %3183 = vmatpush.msra.mxu3 %v7146_v5  ;;  %1984 = vmatpush.msra.mxu0 %v5929_v30  ;;  %v6026_v30 = vld [vmem:[%s11423_s6 + $0x548] sm:$0xff] }
 0x3c9   : > { %5927 = vmatmul.msk.f32.gmra.mxu1 %vm1102_vm5, %v5913_v54 }
 0x3ca   : > { %3184 = vmatpush.msra.mxu3 %v7157_v27  ;;  %1985 = vmatpush.msra.mxu0 %v5928_v2  ;;  %v8296_v2 = vpop.f32.mrf.mxu0 }
 0x3cb   : > { %2532 = vmatmul.f32.gmra.mxu3 %v6023_v46  ;;  %v8290_v46 = vpop.f32.mrf.mxu2  ;;  %11509 = vst [vmem:[#allocation70_spill] sm:$0xff] %v8296_v2  ;;  %v6029_v2 = vld [vmem:[%s11423_s6 + $0x560] sm:$0xff] }
 0x3cc   : > { %2818 = vmatmul.f32.gmra.mxu2 %v6100_v39  ;;  %3185 = vmatpush.msra.mxu3 %v7169_v31  ;;  %11508 = vst [vmem:[#allocation69_spill] sm:$0xff] %v8290_v46  ;;  %v6103_v39 = vld [vmem:[%s11423_s6 + $0x6c0] sm:$0xff]  ;;  %v5949_v46 = vld [vmem:[%s11423_s6 + $0x3d0] sm:$0xff] }
 0x3ce   : > { %3186 = vmatpush.msra.mxu3 %v7180_v33  ;;  %v8281_v54 = vpop.f32.mrf.mxu1 }
 0x3cf   : > { %11507 = vst [vmem:[#allocation68_spill] sm:$0xff] %v8281_v54  ;;  %v8301_v54 = vpop.f32.mrf.mxu3 }
 0x3d0   : > { %3187 = vmatpush.msra.mxu3 %v7190_v35 }
 0x3d1   : > { %5984 = vmatmul.msk.f32.vlgmr.msrb.gmra.mxu1 %vm1102_vm5, %v5946_v1 }
 0x3d2   : > { %6121 = vmatpush.msk.msrb.mxu1 %vm1142_vm4, %v7004_v55  ;;  %3188 = vmatpush.msra.mxu3 %v7199_v36 }
 0x3d3   : > { %2535 = vmatmul.f32.gmra.mxu3 %v6026_v30  ;;  %v6106_v30 = vld [vmem:[%s11423_s6 + $0x6d8] sm:$0xff] }
 0x3d4   : > { %2821 = vmatmul.f32.gmra.mxu2 %v6103_v39  ;;  %2908 = vmatpush.msrb.mxu1 %v7007_v56  ;;  %v8319_v39 = vpop.f32.mrf.mxu2  ;;  %v6032_v56 = vld [vmem:[%s11423_s6 + $0x578] sm:$0xff] }
 0x3d5   : > { %11511 = vst [vmem:[#allocation72_spill] sm:$0xff] %v8319_v39 }
 0x3d6   : > { %2909 = vmatpush.msrb.mxu1 %v7012_v58  ;;  %v8305_v1 = vpop.f32.mrf.mxu1  ;;  %v8323_v58 = vpop.f32.mrf.mxu0 }
 0x3d7   : > { %11510 = vst [vmem:[#allocation71_spill] sm:$0xff] %v8305_v1  ;;  %v8321_v1 = vpop.f32.mrf.mxu3 }
 0x3d8   : > { %2910 = vmatpush.msrb.mxu1 %v7017_v59  ;;  %11512 = vst [vmem:[#allocation73_spill] sm:$0xff] %v8321_v1  ;;  %v6035_v1 = vld [vmem:[%s11423_s6 + $0x590] sm:$0xff] }
 0x3d9   : > { %5985 = vmatmul.msk.f32.gmra.mxu1 %vm1102_vm5, %v5949_v46  ;;  %11513 = vst [vmem:[#allocation74_spill] sm:$0xff] %v8323_v58  ;;  %v5952_v46 = vld [vmem:[%s11423_s6 + $0x3e8] sm:$0xff]  ;;  %v1859_v58 = vadd.f32 %v8047_v48, %v7841_v0  ;;  %v1862_v0 = vadd.f32 %v8063_v53, %v7856_v62  ;;  %v6115_v62 = vld [vmem:[%s11423_s6 + $0x720] sm:$0xff]  ;;  %v1865_v53 = vadd.f32 %v8079_v45, %v7865_v32  ;;  %v6118_v45 = vld [vmem:[%s11423_s6 + $0x738] sm:$0xf] }
 0x3da   : > { %2911 = vmatpush.msrb.mxu1 %v7021_v60 }
 0x3db   : > { %2538 = vmatmul.f32.gmra.mxu3 %v6029_v2  ;;  %v6109_v2 = vld [vmem:[%s11423_s6 + $0x6f0] sm:$0xff] }
 0x3dc   : > { %2824 = vmatmul.f32.gmra.mxu2 %v6106_v30 }
 0x3de   : > { %v8325_v59 = vpop.f32.mrf.mxu1  ;;  %v8343_v39 = vpop.f32.mrf.mxu0 }
 0x3df   : > { %11514 = vst [vmem:[#allocation75_spill] sm:$0xff] %v8325_v59  ;;  %v8339_v30 = vpop.f32.mrf.mxu3  ;;  %v8341_v59 = vpop.f32.mrf.mxu2 }
 0x3e0   : > { %11515 = vst [vmem:[#allocation76_spill] sm:$0xff] %v8343_v39  ;;  %v6038_v39 = vld [vmem:[%s11423_s6 + $0x5a8] sm:$0xff] }
 0x3e1   : > { %5986 = vmatmul.msk.f32.gmra.mxu1 %vm1102_vm5, %v5952_v46  ;;  %v5955_v46 = vld [vmem:[%s11423_s6 + $0x400] sm:$0xff] }
 0x3e3   : > { %2541 = vmatmul.f32.gmra.mxu3 %v6032_v56  ;;  %v6112_v56 = vld [vmem:[%s11423_s6 + $0x708] sm:$0xff] }
 0x3e4   : > { %2827 = vmatmul.f32.gmra.mxu2 %v6109_v2 }
 0x3e6   : > { %v1914_v60 = vpop.f32.mrf.mxu1 }
 0x3e7   : > { %v1915_v55 = vadd.f32 %v1914_v60, %v1859_v58  ;;  %v8357_v48 = vpop.f32.mrf.mxu3  ;;  %v5958_v58 = vld [vmem:[%s11423_s6 + $0x418] sm:$0xff]  ;;  %v8362_v60 = vpop.f32.mrf.mxu2 }
 0x3e9   : > { %1986 = vmatmul.f32.vlgmr.msra.gmra.mxu0 %v1915_v55  ;;  %5987 = vmatmul.msk.f32.gmra.mxu1 %vm1102_vm5, %v5955_v46  ;;  %v8364_v46 = vpop.f32.mrf.mxu0 }
 0x3eb   : > { %2544 = vmatmul.f32.gmra.mxu3 %v6035_v1 }
 0x3ec   : > { %2830 = vmatmul.f32.gmra.mxu2 %v6112_v56 }
 0x3ee   : > { %v1917_v2 = vpop.f32.mrf.mxu1 }
 0x3ef   : > { %v1918_v55 = vadd.f32 %v1917_v2, %v1862_v0  ;;  %v8375_v1 = vpop.f32.mrf.mxu3  ;;  %v5961_v0 = vld [vmem:[%s11423_s6 + $0x430] sm:$0xff] }
 0x3f1   : > { %1989 = vmatmul.f32.gmra.mxu0 %v1918_v55  ;;  %5988 = vmatmul.msk.f32.gmra.mxu1 %vm1102_vm5, %v5958_v58  ;;  %v8380_v55 = vpop.f32.mrf.mxu2  ;;  %v6041_v58 = vld [vmem:[%s11423_s6 + $0x5c0] sm:$0xff]  ;;  %v8389_v32 = vpop.f32.mrf.mxu0 }
 0x3f3   : > { %2547 = vmatmul.f32.gmra.mxu3 %v6038_v39  ;;  %v1868_v39 = vadd.f32 %v8097_v23, %v7874_v38  ;;  %v6151_v38 = vld [vmem:[%s11423_s6 + $0x750] sm:$0xff] }
 0x3f4   : > { %2833 = vmatmul.f32.gmra.mxu2 %v6115_v62 }
 0x3f6   : > { %v1920_v56 = vpop.f32.mrf.mxu1 }
 0x3f7   : > { %v1921_v2 = vadd.f32 %v1920_v56, %v1865_v53  ;;  %v5964_v53 = vld [vmem:[%s11423_s6 + $0x448] sm:$0xff] }
 0x3f9   : > { %1992 = vmatmul.f32.gmra.mxu0 %v1921_v2  ;;  %5989 = vmatmul.msk.f32.gmra.mxu1 %vm1102_vm5, %v5961_v0  ;;  %v8396_v2 = vpop.f32.mrf.mxu3  ;;  %v6044_v0 = vld [vmem:[%s11423_s6 + $0x5d8] sm:$0xff]  ;;  %v8405_v23 = vpop.f32.mrf.mxu2 }
 0x3fb   : > { %2550 = vmatmul.f32.gmra.mxu3 %v6041_v58  ;;  %v1871_v58 = vadd.f32 %v8119_v34, %v7883_v15 }
 0x3fc   : > { %2836 = vmatmul.f32.gmra.mxu2 %v6118_v45  ;;  %v8409_v45 = vpop.f32.mrf.mxu0 }
 0x3fe   : > { %v1923_v62 = vpop.f32.mrf.mxu1 }
 0x3ff   : > { %v1924_v56 = vadd.f32 %v1923_v62, %v1868_v39 }
 0x401   : > { %1995 = vmatmul.f32.gmra.mxu0 %v1924_v56  ;;  %5990 = vmatmul.msk.f32.gmra.mxu1 %vm1102_vm5, %v5964_v53  ;;  %v5967_v53 = vld [vmem:[%s11423_s6 + $0x460] sm:$0xff]  ;;  %v6047_v56 = vld [vmem:[%s11423_s6 + $0x5f0] sm:$0xff]  ;;  %v8420_v34 = vpop.f32.mrf.mxu3 }
 0x403   : > { %2553 = vmatmul.f32.gmra.mxu3 %v6044_v0 }
 0x404   : > { %3133 = vmatmul.f32.vlgmr.msrb.gmra.mxu2 %v6151_v38  ;;  %v6050_v38 = vld [vmem:[%s11423_s6 + $0x608] sm:$0xf] }
 0x405   : > { %3783 = vmatpush.msrb.mxu2 %v6863_v4  ;;  %v1874_v4 = vadd.f32 %v8144_v42, %v7892_v11 }
 0x406   : > { %v1926_v39 = vpop.f32.mrf.mxu1 }
 0x407   : > { %3784 = vmatpush.msrb.mxu2 %v6868_v6  ;;  %v1927_v62 = vadd.f32 %v1926_v39, %v1871_v58  ;;  %v8427_v6 = vpop.f32.mrf.mxu0  ;;  %v6083_v58 = vld [vmem:[%s11423_s6 + $0x620] sm:$0xff]  ;;  %v6008_v39 = vld [vmem:[%s11424_s7 + $0x1d8] sm:$0xff] }
 0x409   : > { %3785 = vmatpush.msrb.mxu2 %v6873_v7  ;;  %1998 = vmatmul.f32.gmra.mxu0 %v1927_v62  ;;  %v5970_v7 = vld [vmem:[%s11423_s6 + $0x478] sm:$0xff]  ;;  %v6007_v62 = vld [vmem:[%s11424_s7 + $0x1d0] sm:$0xff] }
 0x40a   : > { %5991 = vmatmul.msk.f32.gmra.mxu1 %vm1102_vm5, %v5967_v53  ;;  %v6086_v53 = vld [vmem:[%s11423_s6 + $0x638] sm:$0xff] }
 0x40b   : > { %3786 = vmatpush.msrb.mxu2 %v6877_v8  ;;  %2556 = vmatmul.f32.gmra.mxu3 %v6047_v56  ;;  %v6012_v8 = vld [vmem:[%s11424_s7 + $0x1f8] sm:$0xff] }
 0x40c   : > { %2303 = vmatpush.msrb.mxu0 %v6012_v8  ;;  %v6001_v8 = vld [vmem:[%s11424_s7 + $0x1a0] sm:$0xff] }
 0x40d   : > { %3787 = vmatpush.msrb.mxu2 %v6883_v10  ;;  %v1877_v10 = vadd.f32 %v8176_v24, %v7901_v9  ;;  %v5973_v9 = vld [vmem:[%s11423_s6 + $0x490] sm:$0xff] }
 0x40e   : > { %v1929_v15 = vpop.f32.mrf.mxu1 }
 0x40f   : > { %3788 = vmatpush.msrb.mxu2 %v6889_v12  ;;  %v1930_v0 = vadd.f32 %v1929_v15, %v1874_v4  ;;  %v8444_v12 = vpop.f32.mrf.mxu3  ;;  %v8457_v24 = vpop.f32.mrf.mxu0  ;;  %v1883_v4 = vadd.f32 %v8243_v20, %v7927_v40  ;;  %v6003_v15 = vld [vmem:[%s11424_s7 + $0x1b0] sm:$0xff] }
 0x410   : > { %v6089_v20 = vld [vmem:[%s11423_s6 + $0x650] sm:$0xff] }
 0x411   : > { %3789 = vmatpush.msrb.mxu2 %v6893_v13  ;;  %2001 = vmatmul.f32.gmra.mxu0 %v1930_v0  ;;  %v6011_v13 = vld [vmem:[%s11424_s7 + $0x1f0] sm:$0xff] }
 0x412   : > { %5992 = vmatmul.msk.f32.gmra.mxu1 %vm1102_vm5, %v5970_v7  ;;  %2304 = vmatpush.msrb.mxu0 %v6011_v13 }
 0x413   : > { %3790 = vmatpush.msrb.mxu2 %v6897_v14  ;;  %2559 = vmatmul.f32.gmra.mxu3 %v6050_v38  ;;  %v6010_v14 = vld [vmem:[%s11424_s7 + $0x1e8] sm:$0xff] }
 0x414   : > { %2305 = vmatpush.msrb.mxu0 %v6010_v14  ;;  %v6002_v38 = vld [vmem:[%s11424_s7 + $0x1a8] sm:$0xff]  ;;  %v5982_v14 = vld [vmem:[%s11423_s6 + $0x4d8] sm:$0xf] }
 0x415   : > { %3791 = vmatpush.msrb.mxu2 %v6904_v16  ;;  %v6009_v16 = vld [vmem:[%s11424_s7 + $0x1e0] sm:$0xff] }
 0x416   : > { %v1932_v42 = vpop.f32.mrf.mxu1  ;;  %2306 = vmatpush.msrb.mxu0 %v6009_v16  ;;  %v5998_v16 = vld [vmem:[%s11424_s7 + $0x188] sm:$0xff] }
 0x417   : > { %3792 = vmatpush.msrb.mxu2 %v6911_v18  ;;  %v1933_v11 = vadd.f32 %v1932_v42, %v1877_v10  ;;  %v1880_v18 = vadd.f32 %v8209_v17, %v7914_v52  ;;  %v5976_v17 = vld [vmem:[%s11423_s6 + $0x4a8] sm:$0xff]  ;;  %v8496_v56 = vpop.f32.mrf.mxu0  ;;  %v1886_v10 = vadd.f32 %v8277_v22, %v7940_v49  ;;  %v6000_v42 = vld [vmem:[%s11424_s7 + $0x198] sm:$0xff]  ;;  %v5999_v22 = vld [vmem:[%s11424_s7 + $0x190] sm:$0xff] }
 0x418   : > { %2307 = vmatpush.msrb.mxu0 %v6008_v39  ;;  %v6092_v49 = vld [vmem:[%s11423_s6 + $0x668] sm:$0xff]  ;;  %v5997_v39 = vld [vmem:[%s11424_s7 + $0x180] sm:$0xff] }
 0x419   : > { %3793 = vmatpush.msrb.mxu2 %v6916_v19  ;;  %2004 = vmatmul.f32.gmra.mxu0 %v1933_v11  ;;  %v8475_v19 = vpop.f32.mrf.mxu3 }
 0x41a   : > { %5993 = vmatmul.msk.f32.gmra.mxu1 %vm1102_vm5, %v5973_v9  ;;  %2308 = vmatpush.msrb.mxu0 %v6007_v62 }
 0x41b   : > { %3794 = vmatpush.msrb.mxu2 %v6921_v21  ;;  %2856 = vmatmul.f32.vlgmr.msrb.gmra.mxu3 %v6083_v58 }
 0x41c   : > { %3506 = vmatpush.msrb.mxu3 %v7056_v37 }
 0x41d   : > { %3795 = vmatpush.msrb.mxu2 %v6928_v25  ;;  %v6006_v25 = vld [vmem:[%s11424_s7 + $0x1c8] sm:$0xff] }
 0x41e   : > { %3507 = vmatpush.msrb.mxu3 %v7063_v41  ;;  %v1935_v52 = vpop.f32.mrf.mxu1  ;;  %2309 = vmatpush.msrb.mxu0 %v6006_v25  ;;  %v11517_v25 = vld [vmem:[#allocation73_spill] sm:$0xff] }
 0x41f   : > { %3796 = vmatpush.msrb.mxu2 %v6935_v29  ;;  %v1936_v21 = vadd.f32 %v1935_v52, %v1880_v18  ;;  %v6005_v29 = vld [vmem:[%s11424_s7 + $0x1c0] sm:$0xff]  ;;  %v8530_v13 = vpop.f32.mrf.mxu0  ;;  %v1889_v18 = vadd.f32 %v8301_v54, %v7957_v50  ;;  %v11516_v54 = vld [vmem:[#allocation37_spill] sm:$0xff] }
 0x420   : > { %3508 = vmatpush.msrb.mxu3 %v7068_v43  ;;  %2310 = vmatpush.msrb.mxu0 %v6005_v29  ;;  %v6095_v50 = vld [vmem:[%s11423_s6 + $0x680] sm:$0xff] }
 0x421   : > { %3797 = vmatpush.msrb.mxu2 %v6940_v28  ;;  %2007 = vmatmul.f32.gmra.mxu0 %v1936_v21  ;;  %v6004_v28 = vld [vmem:[%s11424_s7 + $0x1b8] sm:$0xff]  ;;  %v8514_v40 = vpop.f32.mrf.mxu3  ;;  %v11518_v29 = vld [vmem:[#allocation2_spill] sm:$0xff] }
 0x422   : > { %5994 = vmatmul.msk.f32.gmra.mxu1 %vm1102_vm5, %v5976_v17  ;;  %3509 = vmatpush.msrb.mxu3 %v7073_v44  ;;  %v6015_v17 = vld [vmem:[%s11423_s6 + $0x4f0] sm:$0xff] }
 0x423   : > { %3798 = vmatpush.msrb.mxu2 %v6945_v26  ;;  %2859 = vmatmul.f32.gmra.mxu3 %v6086_v53  ;;  %v5979_v26 = vld [vmem:[%s11423_s6 + $0x4c0] sm:$0xff]  ;;  %v1892_v53 = vadd.f32 %v11517_v25, %v11516_v54  ;;  %v6104_v54 = vld [vmem:[%s11423_s6 + $0x6c8] sm:$0xff]  ;;  %v11525_v25 = vld [vmem:[#allocation40_spill] sm:$0xff] }
 0x424   : > { %3510 = vmatpush.msrb.mxu3 %v7081_v47  ;;  %2311 = vmatpush.msrb.mxu0 %v6004_v28  ;;  %v11519_v28 = vld [vmem:[#allocation3_spill] sm:$0xff] }
 0x426   : > { %3511 = vmatpush.msrb.mxu3 %v7092_v51  ;;  %v1938_v0 = vpop.f32.mrf.mxu1  ;;  %2312 = vmatpush.msrb.mxu0 %v6003_v15 }
 0x427   : > { %v1939_v7 = vadd.f32 %v1938_v0, %v1883_v4  ;;  %v8560_v62 = vpop.f32.mrf.mxu0  ;;  %v11520_v0 = vld [vmem:[#allocation4_spill] sm:$0xff] }
 0x428   : > { %3512 = vmatpush.msrb.mxu3 %v7104_v57  ;;  %2313 = vmatpush.msrb.mxu0 %v6002_v38  ;;  %v6098_v38 = vld [vmem:[%s11423_s6 + $0x698] sm:$0xff] }
 0x429   : > { %2010 = vmatmul.f32.gmra.mxu0 %v1939_v7  ;;  %v8547_v58 = vpop.f32.mrf.mxu3 }
 0x42a   : > { %5995 = vmatmul.msk.f32.gmra.mxu1 %vm1102_vm5, %v5979_v26  ;;  %3513 = vmatpush.msrb.mxu3 %v7113_v61  ;;  %v6018_v26 = vld [vmem:[%s11423_s6 + $0x508] sm:$0xff] }
 0x42b   : > { %2862 = vmatmul.f32.gmra.mxu3 %v6089_v20  ;;  %2314 = vmatpush.msrb.mxu0 %v6001_v8  ;;  %v11521_v8 = vld [vmem:[#allocation5_spill] sm:$0xff] }
 0x42c   : > { %3514 = vmatpush.msrb.mxu3 %v7125_v63 }
 0x42d   : > { %2315 = vmatpush.msrb.mxu0 %v6000_v42 }
 0x42e   : > { %3515 = vmatpush.msrb.mxu3 %v7136_v3  ;;  %v1941_v11 = vpop.f32.mrf.mxu1 }
 0x42f   : > { %v1942_v9 = vadd.f32 %v1941_v11, %v1886_v10  ;;  %2316 = vmatpush.msrb.mxu0 %v5999_v22  ;;  %v8583_v20 = vpop.f32.mrf.mxu0  ;;  %v11522_v10 = vld [vmem:[#allocation38_spill] sm:$0xff] }
 0x430   : > { %3516 = vmatpush.msrb.mxu3 %v7146_v5  ;;  %v1895_v42 = vadd.f32 %v8339_v30, %v11522_v10  ;;  %v11523_v11 = vld [vmem:[#allocation6_spill] sm:$0xff]  ;;  %v11524_v30 = vld [vmem:[#allocation39_spill] sm:$0xff] }
 0x431   : > { %2013 = vmatmul.f32.gmra.mxu0 %v1942_v9  ;;  %v8576_v4 = vpop.f32.mrf.mxu3  ;;  %v6021_v22 = vld [vmem:[%s11423_s6 + $0x520] sm:$0xff] }
 0x432   : > { %5996 = vmatmul.msk.f32.gmra.mxu1 %vm1102_vm5, %v5982_v14  ;;  %3517 = vmatpush.msrb.mxu3 %v7157_v27 }
 0x433   : > { %2865 = vmatmul.f32.gmra.mxu3 %v6092_v49  ;;  %2317 = vmatpush.msrb.mxu0 %v5998_v16  ;;  %v6101_v16 = vld [vmem:[%s11423_s6 + $0x6b0] sm:$0xff] }
 0x434   : > { %3518 = vmatpush.msrb.mxu3 %v7169_v31 }
 0x435   : > { %2318 = vmatpush.msrb.mxu0 %v5997_v39  ;;  %v2192_v39 = vadd.f32 %v8357_v48, %v11524_v30  ;;  %v6110_v30 = vld [vmem:[%s11423_s6 + $0x6f8] sm:$0xff] }
 0x436   : > { %3519 = vmatpush.msrb.mxu3 %v7180_v33  ;;  %v1944_v52 = vpop.f32.mrf.mxu1 }
 0x437   : > { %v1945_v21 = vadd.f32 %v1944_v52, %v1889_v18  ;;  %v8601_v18 = vpop.f32.mrf.mxu0 }
 0x438   : > { %3520 = vmatpush.msrb.mxu3 %v7190_v35 }
 0x439   : > { %2016 = vmatmul.f32.gmra.mxu0 %v1945_v21  ;;  %v8593_v9 = vpop.f32.mrf.mxu3 }
 0x43a   : > { %6053 = vmatmul.msk.f32.vlgmr.msra.gmra.mxu1 %vm1102_vm5, %v6015_v17  ;;  %3521 = vmatpush.msrb.mxu3 %v7199_v36  ;;  %v6024_v17 = vld [vmem:[%s11423_s6 + $0x538] sm:$0xff] }
 0x43b   : > { %6190 = vmatpush.msk.msra.mxu1 %vm1142_vm4, %v11518_v29  ;;  %2868 = vmatmul.f32.gmra.mxu3 %v6095_v50 }
 0x43d   : > { %3241 = vmatpush.msra.mxu1 %v11519_v28 }
 0x43e   : > { %v1947_v15 = vpop.f32.mrf.mxu1 }
 0x43f   : > { %3242 = vmatpush.msra.mxu1 %v11520_v0  ;;  %v1948_v7 = vadd.f32 %v1947_v15, %v1892_v53  ;;  %v2195_v53 = vadd.f32 %v8375_v1, %v11525_v25  ;;  %v8617_v48 = vpop.f32.mrf.mxu0  ;;  %v6033_v25 = vld [vmem:[%s11423_s6 + $0x580] sm:$0xff] }
 0x441   : > { %3243 = vmatpush.msra.mxu1 %v11521_v8  ;;  %2019 = vmatmul.f32.gmra.mxu0 %v1948_v7  ;;  %v8609_v50 = vpop.f32.mrf.mxu3 }
 0x442   : > { %6054 = vmatmul.msk.f32.gmra.mxu1 %vm1102_vm5, %v6018_v26  ;;  %v6027_v26 = vld [vmem:[%s11423_s6 + $0x550] sm:$0xff] }
 0x443   : > { %3244 = vmatpush.msra.mxu1 %v11523_v11  ;;  %2871 = vmatmul.f32.gmra.mxu3 %v6098_v38  ;;  %v6107_v38 = vld [vmem:[%s11423_s6 + $0x6e0] sm:$0xff] }
 0x446   : > { %v1950_v14 = vpop.f32.mrf.mxu1 }
 0x447   : > { %v1951_v49 = vadd.f32 %v1950_v14, %v1895_v42  ;;  %v11526_v42 = vld [vmem:[#allocation43_spill] sm:$0xff]  ;;  %v8630_v14 = vpop.f32.mrf.mxu0 }
 0x448   : > { %v2198_v1 = vadd.f32 %v8396_v2, %v11526_v42 }
 0x449   : > { %2022 = vmatmul.f32.gmra.mxu0 %v1951_v49  ;;  %v8625_v10 = vpop.f32.mrf.mxu3 }
 0x44a   : > { %6055 = vmatmul.msk.f32.gmra.mxu1 %vm1102_vm5, %v6021_v22 }
 0x44b   : > { %2874 = vmatmul.f32.gmra.mxu3 %v6101_v16  ;;  %v6030_v16 = vld [vmem:[%s11423_s6 + $0x568] sm:$0xff] }
 0x44e   : > { %v2247_v52 = vpop.f32.mrf.mxu1 }
 0x44f   : > { %v2248_v21 = vadd.f32 %v2247_v52, %v2192_v39  ;;  %v11527_v39 = vld [vmem:[#allocation46_spill] sm:$0xff] }
 0x450   : > { %v2201_v52 = vadd.f32 %v8420_v34, %v11527_v39 }
 0x451   : > { %2319 = vmatmul.f32.vlgmr.msrb.gmra.mxu0 %v2248_v21  ;;  %v8641_v2 = vpop.f32.mrf.mxu3 }
 0x452   : > { %6056 = vmatmul.msk.f32.gmra.mxu1 %vm1102_vm5, %v6024_v17 }
 0x453   : > { %2877 = vmatmul.f32.gmra.mxu3 %v6104_v54 }
 0x456   : > { %v2250_v15 = vpop.f32.mrf.mxu1 }
 0x457   : > { %v2251_v7 = vadd.f32 %v2250_v15, %v2195_v53  ;;  %v6113_v53 = vld [vmem:[%s11423_s6 + $0x710] sm:$0xff]  ;;  %v11529_v15 = vld [vmem:[#allocation49_spill] sm:$0xff] }
 0x458   : > { %v2204_v34 = vadd.f32 %v8444_v12, %v11529_v15  ;;  %v6080_v15 = vld [vmem:[%s11424_s7 + $0x270] sm:$0xff] }
 0x459   : > { %2322 = vmatmul.f32.gmra.mxu0 %v2251_v7  ;;  %v8654_v7 = vpop.f32.mrf.mxu3 }
 0x45a   : > { %6057 = vmatmul.msk.f32.gmra.mxu1 %vm1102_vm5, %v6027_v26 }
 0x45b   : > { %2880 = vmatmul.f32.gmra.mxu3 %v6107_v38 }
 0x45e   : > { %v2253_v49 = vpop.f32.mrf.mxu1 }
 0x45f   : > { %v2254_v22 = vadd.f32 %v2253_v49, %v2198_v1  ;;  %v6036_v1 = vld [vmem:[%s11423_s6 + $0x598] sm:$0xff]  ;;  %v6116_v49 = vld [vmem:[%s11423_s6 + $0x728] sm:$0xff] }
 0x461   : > { %2325 = vmatmul.f32.gmra.mxu0 %v2254_v22  ;;  %v11531_v22 = vld [vmem:[#allocation53_spill] sm:$0xff] }
 0x462   : > { %6058 = vmatmul.msk.f32.gmra.mxu1 %vm1102_vm5, %v6030_v16  ;;  %v2207_v12 = vadd.f32 %v8475_v19, %v11531_v22 }
 0x463   : > { %2883 = vmatmul.f32.gmra.mxu3 %v6110_v30 }
 0x466   : > { %v8643_v21 = vpop.f32.mrf.mxu0  ;;  %v2256_v17 = vpop.f32.mrf.mxu1 }
 0x467   : > { %11528 = vst [vmem:[#allocation37_spill] sm:$0xff] %v8643_v21  ;;  %v2257_v54 = vadd.f32 %v2256_v17, %v2201_v52  ;;  %v6039_v52 = vld [vmem:[%s11423_s6 + $0x5b0] sm:$0xff]  ;;  %v8672_v17 = vpop.f32.mrf.mxu3 }
 0x469   : > { %2328 = vmatmul.f32.gmra.mxu0 %v2257_v54  ;;  %v6119_v54 = vld [vmem:[%s11423_s6 + $0x740] sm:$0xf] }
 0x46a   : > { %6059 = vmatmul.msk.f32.gmra.mxu1 %vm1102_vm5, %v6033_v25  ;;  %v11533_v25 = vld [vmem:[#allocation56_spill] sm:$0xff] }
 0x46b   : > { %2886 = vmatmul.f32.gmra.mxu3 %v6113_v53  ;;  %v2210_v19 = vadd.f32 %v8514_v40, %v11533_v25  ;;  %v6081_v53 = vld [vmem:[%s11424_s7 + $0x278] sm:$0xff]  ;;  %v6079_v40 = vld [vmem:[%s11424_s7 + $0x268] sm:$0xff] }
 0x46c   : > { %2636 = vmatpush.msra.mxu0 %v6081_v53  ;;  %v6045_v53 = vld [vmem:[%s11423_s6 + $0x5e0] sm:$0xff] }
 0x46e   : > { %v8656_v26 = vpop.f32.mrf.mxu0  ;;  %v2259_v38 = vpop.f32.mrf.mxu1  ;;  %2637 = vmatpush.msra.mxu0 %v6080_v15  ;;  %v6073_v15 = vld [vmem:[%s11424_s7 + $0x238] sm:$0xff] }
 0x46f   : > { %11530 = vst [vmem:[#allocation73_spill] sm:$0xff] %v8656_v26  ;;  %v2260_v42 = vadd.f32 %v2259_v38, %v2204_v34  ;;  %v8697_v22 = vpop.f32.mrf.mxu3 }
 0x470   : > { %2638 = vmatpush.msra.mxu0 %v6079_v40  ;;  %v6048_v40 = vld [vmem:[%s11423_s6 + $0x5f8] sm:$0xff] }
 0x471   : > { %2331 = vmatmul.f32.gmra.mxu0 %v2260_v42 }
 0x472   : > { %6060 = vmatmul.msk.f32.gmra.mxu1 %vm1102_vm5, %v6036_v1  ;;  %v6042_v1 = vld [vmem:[%s11423_s6 + $0x5c8] sm:$0xff] }
 0x473   : > { %2889 = vmatmul.f32.gmra.mxu3 %v6116_v49  ;;  %v6152_v49 = vld [vmem:[%s11423_s6 + $0x758] sm:$0xff] }
 0x476   : > { %v8667_v16 = vpop.f32.mrf.mxu0  ;;  %v2262_v30 = vpop.f32.mrf.mxu1 }
 0x477   : > { %11532 = vst [vmem:[#allocation2_spill] sm:$0xff] %v8667_v16  ;;  %v2263_v39 = vadd.f32 %v2262_v30, %v2207_v12  ;;  %v6078_v12 = vld [vmem:[%s11424_s7 + $0x260] sm:$0xff]  ;;  %v6077_v30 = vld [vmem:[%s11424_s7 + $0x258] sm:$0xff] }
 0x478   : > { %2639 = vmatpush.msra.mxu0 %v6078_v12  ;;  %v11537_v12 = vld [vmem:[#allocation66_spill] sm:$0xff] }
 0x479   : > { %2334 = vmatmul.f32.gmra.mxu0 %v2263_v39  ;;  %v11535_v39 = vld [vmem:[#allocation59_spill] sm:$0xff] }
 0x47a   : > { %6061 = vmatmul.msk.f32.gmra.mxu1 %vm1102_vm5, %v6039_v52  ;;  %v2213_v52 = vadd.f32 %v8547_v58, %v11535_v39  ;;  %2640 = vmatpush.msra.mxu0 %v6077_v30  ;;  %v6075_v58 = vld [vmem:[%s11424_s7 + $0x248] sm:$0xff]  ;;  %v2219_v30 = vadd.f32 %v8593_v9, %v11537_v12  ;;  %v6068_v39 = vld [vmem:[%s11424_s7 + $0x210] sm:$0xff] }
 0x47b   : > { %2892 = vmatmul.f32.gmra.mxu3 %v6119_v54  ;;  %v6076_v54 = vld [vmem:[%s11424_s7 + $0x250] sm:$0xff]  ;;  %v6067_v9 = vld [vmem:[%s11424_s7 + $0x208] sm:$0xff] }
 0x47c   : > { %2641 = vmatpush.msra.mxu0 %v6076_v54 }
 0x47e   : > { %v8686_v34 = vpop.f32.mrf.mxu0  ;;  %v2265_v38 = vpop.f32.mrf.mxu1  ;;  %2642 = vmatpush.msra.mxu0 %v6075_v58 }
 0x47f   : > { %11534 = vst [vmem:[#allocation3_spill] sm:$0xff] %v8686_v34  ;;  %v2266_v42 = vadd.f32 %v2265_v38, %v2210_v19  ;;  %v11536_v38 = vld [vmem:[#allocation62_spill] sm:$0xff] }
 0x481   : > { %2337 = vmatmul.f32.gmra.mxu0 %v2266_v42  ;;  %v2216_v42 = vadd.f32 %v8576_v4, %v11536_v38  ;;  %v6071_v4 = vld [vmem:[%s11424_s7 + $0x228] sm:$0xff] }
 0x482   : > { %6062 = vmatmul.msk.f32.gmra.mxu1 %vm1102_vm5, %v6042_v1 }
 0x483   : > { %3189 = vmatmul.f32.vlgmr.msra.gmra.mxu3 %v6152_v49 }
 0x484   : > { %3839 = vmatpush.msra.mxu3 %v7056_v37 }
 0x486   : > { %3840 = vmatpush.msra.mxu3 %v7063_v41  ;;  %v8713_v25 = vpop.f32.mrf.mxu0  ;;  %v6074_v41 = vld [vmem:[%s11424_s7 + $0x240] sm:$0xff] }
 0x487   : > { %v2268_v19 = vpop.f32.mrf.mxu1  ;;  %2643 = vmatpush.msra.mxu0 %v6074_v41 }
 0x488   : > { %v2269_v37 = vadd.f32 %v2268_v19, %v2213_v52  ;;  %3841 = vmatpush.msra.mxu3 %v7068_v43  ;;  %v6072_v43 = vld [vmem:[%s11424_s7 + $0x230] sm:$0xff] }
 0x489   : > { %2644 = vmatpush.msra.mxu0 %v6073_v15  ;;  %v2533_v15 = vpop.f32.mrf.mxu3 }
 0x48a   : > { %2340 = vmatmul.f32.gmra.mxu0 %v2269_v37  ;;  %6063 = vmatmul.msk.f32.gmra.mxu1 %vm1102_vm5, %v6045_v53 }
 0x48b   : > { %3842 = vmatpush.msra.mxu3 %v7073_v44  ;;  %2645 = vmatpush.msra.mxu0 %v6072_v43  ;;  %v6090_v43 = vld [vmem:[%s11423_s6 + $0x658] sm:$0xff] }
 0x48d   : > { %3843 = vmatpush.msra.mxu3 %v7081_v47  ;;  %v6070_v47 = vld [vmem:[%s11424_s7 + $0x220] sm:$0xff]  ;;  %2646 = vmatpush.msra.mxu0 %v6071_v4 }
 0x48e   : > { %v8736_v1 = vpop.f32.mrf.mxu0 }
 0x48f   : > { %3844 = vmatpush.msra.mxu3 %v7092_v51  ;;  %v2271_v44 = vpop.f32.mrf.mxu1  ;;  %v6069_v51 = vld [vmem:[%s11424_s7 + $0x218] sm:$0xff]  ;;  %2647 = vmatpush.msra.mxu0 %v6070_v47 }
 0x490   : > { %v2272_v49 = vadd.f32 %v2271_v44, %v2216_v42 }
 0x491   : > { %3845 = vmatpush.msra.mxu3 %v7104_v57  ;;  %2648 = vmatpush.msra.mxu0 %v6069_v51  ;;  %v2536_v4 = vpop.f32.mrf.mxu3 }
 0x492   : > { %2343 = vmatmul.f32.gmra.mxu0 %v2272_v49  ;;  %6064 = vmatmul.msk.f32.gmra.mxu1 %vm1102_vm5, %v6048_v40  ;;  %v2525_v49 = vadd.f32 %v8654_v7, %v8362_v60  ;;  %v6096_v60 = vld [vmem:[%s11423_s6 + $0x688] sm:$0xff] }
 0x493   : > { %3846 = vmatpush.msra.mxu3 %v7113_v61  ;;  %v6051_v61 = vld [vmem:[%s11423_s6 + $0x610] sm:$0xf]  ;;  %2649 = vmatpush.msra.mxu0 %v6068_v39  ;;  %v2528_v39 = vadd.f32 %v8672_v17, %v8380_v55  ;;  %v6099_v55 = vld [vmem:[%s11423_s6 + $0x6a0] sm:$0xff] }
 0x495   : > { %3847 = vmatpush.msra.mxu3 %v7125_v63  ;;  %v6066_v63 = vld [vmem:[%s11424_s7 + $0x200] sm:$0xff]  ;;  %2650 = vmatpush.msra.mxu0 %v6067_v9 }
 0x496   : > { %v8760_v57 = vpop.f32.mrf.mxu0 }
 0x497   : > { %3848 = vmatpush.msra.mxu3 %v7136_v3  ;;  %v2274_v52 = vpop.f32.mrf.mxu1  ;;  %2651 = vmatpush.msra.mxu0 %v6066_v63  ;;  %v11538_v3 = vld [vmem:[#allocation69_spill] sm:$0xff]  ;;  %v2531_v63 = vadd.f32 %v8697_v22, %v8405_v23 }
 0x498   : > { %v2275_v54 = vadd.f32 %v2274_v52, %v2219_v30  ;;  %v2222_v19 = vadd.f32 %v8609_v50, %v11538_v3  ;;  %v6102_v23 = vld [vmem:[%s11423_s6 + $0x6b8] sm:$0xff] }
 0x499   : > { %3849 = vmatpush.msra.mxu3 %v7146_v5  ;;  %v6084_v5 = vld [vmem:[%s11423_s6 + $0x628] sm:$0xff]  ;;  %v2539_v30 = vpop.f32.mrf.mxu3 }
 0x49a   : > { %2346 = vmatmul.f32.gmra.mxu0 %v2275_v54  ;;  %6065 = vmatmul.msk.f32.gmra.mxu1 %vm1102_vm5, %v6051_v61 }
 0x49b   : > { %3850 = vmatpush.msra.mxu3 %v7157_v27  ;;  %v11539_v27 = vld [vmem:[#allocation72_spill] sm:$0xff] }
 0x49d   : > { %3851 = vmatpush.msra.mxu3 %v7169_v31  ;;  %v2225_v31 = vadd.f32 %v8625_v10, %v11539_v27  ;;  %v2228_v10 = vadd.f32 %v8641_v2, %v8341_v59  ;;  %v6093_v59 = vld [vmem:[%s11423_s6 + $0x670] sm:$0xff] }
 0x49e   : > { %v8778_v53 = vpop.f32.mrf.mxu0 }
 0x49f   : > { %3852 = vmatpush.msra.mxu3 %v7180_v33  ;;  %v2277_v58 = vpop.f32.mrf.mxu1 }
 0x4a0   : > { %v2278_v37 = vadd.f32 %v2277_v58, %v2222_v19 }
 0x4a1   : > { %3853 = vmatpush.msra.mxu3 %v7190_v35  ;;  %v6087_v35 = vld [vmem:[%s11423_s6 + $0x640] sm:$0xff]  ;;  %v2542_v54 = vpop.f32.mrf.mxu3 }
 0x4a2   : > { %2349 = vmatmul.f32.gmra.mxu0 %v2278_v37  ;;  %6122 = vmatmul.msk.f32.vlgmr.msrb.gmra.mxu1 %vm1102_vm5, %v6084_v5 }
 0x4a3   : > { %6259 = vmatpush.msk.msrb.mxu1 %vm1142_vm4, %v11518_v29  ;;  %3854 = vmatpush.msra.mxu3 %v7199_v36  ;;  %v2477_v36 = vpop.f32.mrf.mxu2 }
 0x4a4   : > { %v2534_v37 = vadd.f32 %v2533_v15, %v2477_v36  ;;  %v6105_v36 = vld [vmem:[%s11423_s6 + $0x6d0] sm:$0xff] }
 0x4a5   : > { %3574 = vmatpush.msrb.mxu1 %v11519_v28 }
 0x4a6   : > { %v8792_v33 = vpop.f32.mrf.mxu0 }
 0x4a7   : > { %3575 = vmatpush.msrb.mxu1 %v11520_v0  ;;  %v2280_v50 = vpop.f32.mrf.mxu1 }
 0x4a8   : > { %v2281_v41 = vadd.f32 %v2280_v50, %v2225_v31 }
 0x4a9   : > { %3576 = vmatpush.msrb.mxu1 %v11521_v8  ;;  %v2545_v5 = vpop.f32.mrf.mxu3 }
 0x4aa   : > { %2352 = vmatmul.f32.gmra.mxu0 %v2281_v41  ;;  %6123 = vmatmul.msk.f32.gmra.mxu1 %vm1102_vm5, %v6087_v35 }
 0x4ab   : > { %3577 = vmatpush.msrb.mxu1 %v11523_v11  ;;  %v2480_v40 = vpop.f32.mrf.mxu2 }
 0x4ac   : > { %v2537_v41 = vadd.f32 %v2536_v4, %v2480_v40  ;;  %v6108_v40 = vld [vmem:[%s11423_s6 + $0x6e8] sm:$0xff] }
 0x4ae   : > { %v8803_v38 = vpop.f32.mrf.mxu0 }
 0x4af   : > { %v2283_v42 = vpop.f32.mrf.mxu1 }
 0x4b0   : > { %v2284_v44 = vadd.f32 %v2283_v42, %v2228_v10 }
 0x4b1   : > { %v2548_v35 = vpop.f32.mrf.mxu3 }
 0x4b2   : > { %2355 = vmatmul.f32.gmra.mxu0 %v2284_v44  ;;  %6124 = vmatmul.msk.f32.gmra.mxu1 %vm1102_vm5, %v6090_v43 }
 0x4b3   : > { %v2483_v12 = vpop.f32.mrf.mxu2 }
 0x4b6   : > { %v8811_v47 = vpop.f32.mrf.mxu0 }
 0x4b7   : > { %v2580_v51 = vpop.f32.mrf.mxu1 }
 0x4b8   : > { %v2581_v2 = vadd.f32 %v2580_v51, %v2525_v49  ;;  %v2540_v49 = vadd.f32 %v2539_v30, %v2483_v12 }
 0x4b9   : > { %v8847_v44 = vpop.f32.mrf.mxu3 }
 0x4ba   : > { %2652 = vmatmul.f32.vlgmr.msra.gmra.mxu0 %v2581_v2  ;;  %6125 = vmatmul.msk.f32.gmra.mxu1 %vm1102_vm5, %v6093_v59  ;;  %v6150_v2 = vld [vmem:[%s11424_s7 + $0x2f8] sm:$0xff] }
 0x4bb   : > { %v2486_v9 = vpop.f32.mrf.mxu2  ;;  %2969 = vmatpush.msrb.mxu0 %v6150_v2 }
 0x4be   : > { %v8819_v52 = vpop.f32.mrf.mxu0 }
 0x4bf   : > { %v2583_v61 = vpop.f32.mrf.mxu1 }
 0x4c0   : > { %v2584_v7 = vadd.f32 %v2583_v61, %v2528_v39  ;;  %v6149_v39 = vld [vmem:[%s11424_s7 + $0x2f0] sm:$0xff]  ;;  %v2543_v61 = vadd.f32 %v2542_v54, %v2486_v9  ;;  %v6154_v9 = vld [vmem:[%s11423_s6 + $0x768] sm:$0xff] }
 0x4c1   : > { %v8863_v30 = vpop.f32.mrf.mxu3  ;;  %2970 = vmatpush.msrb.mxu0 %v6149_v39  ;;  %v6155_v54 = vld [vmem:[%s11423_s6 + $0x770] sm:$0xff]  ;;  %3136 = vmatmul.f32.gmra.mxu2 %v6154_v9  ;;  %v6160_v9 = vld [vmem:[%s11423_s6 + $0x798] sm:$0xff] }
 0x4c2   : > { %2655 = vmatmul.f32.gmra.mxu0 %v2584_v7  ;;  %6126 = vmatmul.msk.f32.gmra.mxu1 %vm1102_vm5, %v6096_v60  ;;  %v6141_v39 = vld [vmem:[%s11424_s7 + $0x2b0] sm:$0xff] }
 0x4c3   : > { %v2489_v58 = vpop.f32.mrf.mxu2  ;;  %3192 = vmatmul.f32.gmra.mxu3 %v6155_v54  ;;  %v6161_v54 = vld [vmem:[%s11423_s6 + $0x7a0] sm:$0xff] }
 0x4c6   : > { %v8827_v3 = vpop.f32.mrf.mxu0 }
 0x4c7   : > { %v2586_v19 = vpop.f32.mrf.mxu1 }
 0x4c8   : > { %v2587_v17 = vadd.f32 %v2586_v19, %v2531_v63  ;;  %v6111_v63 = vld [vmem:[%s11423_s6 + $0x700] sm:$0xff]  ;;  %v6148_v19 = vld [vmem:[%s11424_s7 + $0x2e8] sm:$0xff] }
 0x4c9   : > { %2971 = vmatpush.msrb.mxu0 %v6148_v19 }
 0x4ca   : > { %2658 = vmatmul.f32.gmra.mxu0 %v2587_v17  ;;  %6127 = vmatmul.msk.f32.gmra.mxu1 %vm1102_vm5, %v6099_v55  ;;  %v6147_v17 = vld [vmem:[%s11424_s7 + $0x2e0] sm:$0xff] }
 0x4cb   : > { %v2492_v50 = vpop.f32.mrf.mxu2  ;;  %2972 = vmatpush.msrb.mxu0 %v6147_v17  ;;  %v6139_v17 = vld [vmem:[%s11424_s7 + $0x2a0] sm:$0xff] }
 0x4cc   : > { %v2549_v2 = vadd.f32 %v2548_v35, %v2492_v50  ;;  %v6140_v50 = vld [vmem:[%s11424_s7 + $0x2a8] sm:$0xff] }
 0x4ce   : > { %v8833_v27 = vpop.f32.mrf.mxu0 }
 0x4cf   : > { %11540 = vst [vmem:[#allocation4_spill] sm:$0xff] %v8833_v27  ;;  %v2589_v31 = vpop.f32.mrf.mxu1 }
 0x4d0   : > { %v2590_v22 = vadd.f32 %v2589_v31, %v2534_v37  ;;  %v6146_v37 = vld [vmem:[%s11424_s7 + $0x2d8] sm:$0xff]  ;;  %v2546_v31 = vadd.f32 %v2545_v5, %v2489_v58  ;;  %v6144_v58 = vld [vmem:[%s11424_s7 + $0x2c8] sm:$0xff] }
 0x4d1   : > { %2973 = vmatpush.msrb.mxu0 %v6146_v37  ;;  %v6138_v37 = vld [vmem:[%s11424_s7 + $0x298] sm:$0xff] }
 0x4d2   : > { %2661 = vmatmul.f32.gmra.mxu0 %v2590_v22  ;;  %6128 = vmatmul.msk.f32.gmra.mxu1 %vm1102_vm5, %v6102_v23  ;;  %v8888_v22 = vpop.f32.mrf.mxu3 }
 0x4d3   : > { %v8845_v43 = vpop.f32.mrf.mxu2 }
 0x4d6   : > { %v8839_v10 = vpop.f32.mrf.mxu0 }
 0x4d7   : > { %11541 = vst [vmem:[#allocation5_spill] sm:$0xff] %v8839_v10  ;;  %v2592_v42 = vpop.f32.mrf.mxu1 }
 0x4d8   : > { %v2593_v15 = vadd.f32 %v2592_v42, %v2537_v41  ;;  %v6145_v41 = vld [vmem:[%s11424_s7 + $0x2d0] sm:$0xff] }
 0x4d9   : > { %2974 = vmatpush.msrb.mxu0 %v6145_v41  ;;  %v6137_v41 = vld [vmem:[%s11424_s7 + $0x290] sm:$0xff] }
 0x4da   : > { %2664 = vmatmul.f32.gmra.mxu0 %v2593_v15  ;;  %6129 = vmatmul.msk.f32.gmra.mxu1 %vm1102_vm5, %v6105_v36  ;;  %v6114_v15 = vld [vmem:[%s11423_s6 + $0x718] sm:$0xff] }
 0x4db   : > { %v8861_v12 = vpop.f32.mrf.mxu2  ;;  %2975 = vmatpush.msrb.mxu0 %v6144_v58 }
 0x4de   : > { %v8849_v51 = vpop.f32.mrf.mxu0 }
 0x4df   : > { %11542 = vst [vmem:[#allocation38_spill] sm:$0xff] %v8849_v51  ;;  %v2595_v59 = vpop.f32.mrf.mxu1 }
 0x4e0   : > { %v2596_v4 = vadd.f32 %v2595_v59, %v2540_v49  ;;  %v6143_v49 = vld [vmem:[%s11424_s7 + $0x2c0] sm:$0xff] }
 0x4e1   : > { %v6157_v59 = vld [vmem:[%s11423_s6 + $0x780] sm:$0xff]  ;;  %2976 = vmatpush.msrb.mxu0 %v6143_v49  ;;  %v6120_v49 = vld [vmem:[%s11423_s6 + $0x748] sm:$0xf] }
 0x4e2   : > { %2667 = vmatmul.f32.gmra.mxu0 %v2596_v4  ;;  %6130 = vmatmul.msk.f32.gmra.mxu1 %vm1102_vm5, %v6108_v40  ;;  %v6158_v40 = vld [vmem:[%s11423_s6 + $0x788] sm:$0xff]  ;;  %v6142_v4 = vld [vmem:[%s11424_s7 + $0x2b8] sm:$0xff] }
 0x4e3   : > { %v8886_v23 = vpop.f32.mrf.mxu2  ;;  %3139 = vmatmul.f32.gmra.mxu2 %v6157_v59  ;;  %3195 = vmatmul.f32.gmra.mxu3 %v6158_v40  ;;  %v6135_v59 = vld [vmem:[%s11424_s7 + $0x280] sm:$0xff]  ;;  %v6163_v40 = vld [vmem:[%s11423_s6 + $0x7b0] sm:$0xff] }
 0x4e4   : > { %2977 = vmatpush.msrb.mxu0 %v6142_v4  ;;  %v6164_v4 = vld [vmem:[%s11423_s6 + $0x7b8] sm:$0xff] }
 0x4e6   : > { %v8865_v60 = vpop.f32.mrf.mxu0  ;;  %2978 = vmatpush.msrb.mxu0 %v6141_v39 }
 0x4e7   : > { %11543 = vst [vmem:[#allocation6_spill] sm:$0xff] %v8865_v60  ;;  %v2598_v7 = vpop.f32.mrf.mxu1 }
 0x4e8   : > { %v2599_v55 = vadd.f32 %v2598_v7, %v2543_v61  ;;  %v8919_v7 = vpop.f32.mrf.mxu3  ;;  %2979 = vmatpush.msrb.mxu0 %v6140_v50 }
 0x4ea   : > { %2670 = vmatmul.f32.gmra.mxu0 %v2599_v55  ;;  %6131 = vmatmul.msk.f32.gmra.mxu1 %vm1102_vm5, %v6111_v63  ;;  %v6117_v55 = vld [vmem:[%s11423_s6 + $0x730] sm:$0xff] }
 0x4eb   : > { %v8917_v61 = vpop.f32.mrf.mxu2  ;;  %2980 = vmatpush.msrb.mxu0 %v6139_v17  ;;  %3142 = vmatmul.f32.gmra.mxu2 %v6160_v9  ;;  %v6166_v9 = vld [vmem:[%s11423_s6 + $0x7c8] sm:$0xff] }
 0x4ec   : > { %3198 = vmatmul.f32.gmra.mxu3 %v6161_v54 }
 0x4ed   : > { %2981 = vmatpush.msrb.mxu0 %v6138_v37 }
 0x4ee   : > { %v8893_v42 = vpop.f32.mrf.mxu0 }
 0x4ef   : > { %11544 = vst [vmem:[#allocation39_spill] sm:$0xff] %v8893_v42  ;;  %v2601_v36 = vpop.f32.mrf.mxu1  ;;  %2982 = vmatpush.msrb.mxu0 %v6137_v41 }
 0x4f0   : > { %v2602_v5 = vadd.f32 %v2601_v36, %v2546_v31  ;;  %v2552_v31 = vadd.f32 %v8847_v44, %v8845_v43  ;;  %v6136_v43 = vld [vmem:[%s11424_s7 + $0x288] sm:$0xff] }
 0x4f1   : > { %2983 = vmatpush.msrb.mxu0 %v6136_v43 }
 0x4f2   : > { %2673 = vmatmul.f32.gmra.mxu0 %v2602_v5  ;;  %6132 = vmatmul.msk.f32.gmra.mxu1 %vm1102_vm5, %v6114_v15  ;;  %v2857_v15 = vpop.f32.mrf.mxu3 }
 0x4f3   : > { %v2801_v36 = vpop.f32.mrf.mxu2  ;;  %2984 = vmatpush.msrb.mxu0 %v6135_v59  ;;  %3145 = vmatmul.f32.gmra.mxu2 %v6163_v40 }
 0x4f4   : > { %3201 = vmatmul.f32.gmra.mxu3 %v6164_v4 }
 0x4f6   : > { %v8921_v63 = vpop.f32.mrf.mxu0 }
 0x4f7   : > { %11545 = vst [vmem:[#allocation40_spill] sm:$0xff] %v8921_v63  ;;  %v2604_v19 = vpop.f32.mrf.mxu1 }
 0x4f8   : > { %v2605_v35 = vadd.f32 %v2604_v19, %v2549_v2  ;;  %v2555_v2 = vadd.f32 %v8863_v30, %v8861_v12  ;;  %v6167_v12 = vld [vmem:[%s11423_s6 + $0x7d0] sm:$0xff]  ;;  %v2558_v30 = vadd.f32 %v8888_v22, %v8886_v23 }
 0x4fa   : > { %2676 = vmatmul.f32.gmra.mxu0 %v2605_v35  ;;  %6133 = vmatmul.msk.f32.gmra.mxu1 %vm1102_vm5, %v6117_v55  ;;  %v2860_v19 = vpop.f32.mrf.mxu3  ;;  %v6153_v35 = vld [vmem:[%s11423_s6 + $0x760] sm:$0xff] }
 0x4fb   : > { %v2804_v39 = vpop.f32.mrf.mxu2  ;;  %3148 = vmatmul.f32.gmra.mxu2 %v6166_v9  ;;  %v6175_v9 = vld [vmem:[%s11423_s6 + $0x810] sm:$0xff] }
 0x4fc   : > { %3204 = vmatmul.f32.gmra.mxu3 %v6167_v12 }
 0x4fe   : > { %v8947_v58 = vpop.f32.mrf.mxu0 }
 0x4ff   : > { %v2607_v5 = vpop.f32.mrf.mxu1 }
 0x500   : > { %v2608_v44 = vadd.f32 %v2607_v5, %v2552_v31  ;;  %v6156_v5 = vld [vmem:[%s11423_s6 + $0x778] sm:$0xff] }
 0x502   : > { %2679 = vmatmul.f32.gmra.mxu0 %v2608_v44  ;;  %6134 = vmatmul.msk.f32.gmra.mxu1 %vm1102_vm5, %v6120_v49  ;;  %v2863_v37 = vpop.f32.mrf.mxu3  ;;  %v6159_v44 = vld [vmem:[%s11423_s6 + $0x790] sm:$0xff] }
 0x503   : > { %v2807_v54 = vpop.f32.mrf.mxu2 }
 0x507   : > { %v8967_v55 = vpop.f32.mrf.mxu0  ;;  %v2610_v50 = vpop.f32.mrf.mxu1 }
 0x508   : > { %v2611_v17 = vadd.f32 %v2610_v50, %v2555_v2 }
 0x50a   : > { %2682 = vmatmul.f32.gmra.mxu0 %v2611_v17  ;;  %6191 = vmatmul.msk.f32.vlgmr.msra.gmra.mxu1 %vm1102_vm5, %v6153_v35  ;;  %v6162_v35 = vld [vmem:[%s11423_s6 + $0x7a8] sm:$0xff] }
 0x50b   : > { %6328 = vmatpush.msk.msra.mxu1 %vm1142_vm4, %v11518_v29  ;;  %v6169_v29 = vld [vmem:[%s11423_s6 + $0x7e0] sm:$0xff]  ;;  %v2810_v23 = vpop.f32.mrf.mxu2 }
 0x50c   : > { %3151 = vmatmul.f32.gmra.mxu2 %v6169_v29 }
 0x50d   : > { %3907 = vmatpush.msra.mxu1 %v11519_v28  ;;  %v6170_v28 = vld [vmem:[%s11423_s6 + $0x7e8] sm:$0xff] }
 0x50e   : > { %3207 = vmatmul.f32.gmra.mxu3 %v6170_v28  ;;  %v6178_v28 = vld [vmem:[%s11423_s6 + $0x828] sm:$0xff] }
 0x50f   : > { %3908 = vmatpush.msra.mxu1 %v11520_v0  ;;  %v8985_v31 = vpop.f32.mrf.mxu0  ;;  %v2613_v41 = vpop.f32.mrf.mxu1  ;;  %v2561_v0 = vadd.f32 %v8919_v7, %v8917_v61  ;;  %v6173_v61 = vld [vmem:[%s11423_s6 + $0x800] sm:$0xff]  ;;  %v2858_v7 = vadd.f32 %v2857_v15, %v2801_v36  ;;  %v6176_v36 = vld [vmem:[%s11423_s6 + $0x818] sm:$0xff]  ;;  %v2861_v15 = vadd.f32 %v2860_v19, %v2804_v39  ;;  %v6179_v39 = vld [vmem:[%s11423_s6 + $0x830] sm:$0xff]  ;;  %v2864_v19 = vadd.f32 %v2863_v37, %v2807_v54 }
 0x510   : > { %v2614_v49 = vadd.f32 %v2613_v41, %v2558_v30  ;;  %v6182_v54 = vld [vmem:[%s11423_s6 + $0x848] sm:$0xff] }
 0x511   : > { %3909 = vmatpush.msra.mxu1 %v11521_v8  ;;  %v2866_v8 = vpop.f32.mrf.mxu3 }
 0x512   : > { %2685 = vmatmul.f32.gmra.mxu0 %v2614_v49  ;;  %6192 = vmatmul.msk.f32.gmra.mxu1 %vm1102_vm5, %v6156_v5  ;;  %v6165_v49 = vld [vmem:[%s11423_s6 + $0x7c0] sm:$0xff]  ;;  %v2867_v37 = vadd.f32 %v2866_v8, %v2810_v23 }
 0x513   : > { %3910 = vmatpush.msra.mxu1 %v11523_v11  ;;  %v6172_v11 = vld [vmem:[%s11423_s6 + $0x7f8] sm:$0xff]  ;;  %v2813_v40 = vpop.f32.mrf.mxu2  ;;  %v6185_v23 = vld [vmem:[%s11423_s6 + $0x860] sm:$0xff] }
 0x514   : > { %3154 = vmatmul.f32.gmra.mxu2 %v6172_v11  ;;  %v6168_v11 = vld [vmem:[%s11423_s6 + $0x7d8] sm:$0xff] }
 0x516   : > { %3210 = vmatmul.f32.gmra.mxu3 %v6173_v61 }
 0x517   : > { %v9001_v22 = vpop.f32.mrf.mxu0  ;;  %v2616_v43 = vpop.f32.mrf.mxu1 }
 0x518   : > { %v2617_v59 = vadd.f32 %v2616_v43, %v2561_v0 }
 0x519   : > { %v2869_v4 = vpop.f32.mrf.mxu3 }
 0x51a   : > { %2688 = vmatmul.f32.gmra.mxu0 %v2617_v59  ;;  %6193 = vmatmul.msk.f32.gmra.mxu1 %vm1102_vm5, %v6159_v44  ;;  %v2870_v8 = vadd.f32 %v2869_v4, %v2813_v40  ;;  %v6187_v40 = vld [vmem:[%s11423_s6 + $0x870] sm:$0xf]  ;;  %v6188_v4 = vld [vmem:[%s11423_s6 + $0x878] sm:$0xf] }
 0x51b   : > { %v2816_v12 = vpop.f32.mrf.mxu2 }
 0x51c   : > { %3157 = vmatmul.f32.gmra.mxu2 %v6175_v9 }
 0x51e   : > { %3213 = vmatmul.f32.gmra.mxu3 %v6176_v36  ;;  %v6171_v36 = vld [vmem:[%s11423_s6 + $0x7f0] sm:$0xff] }
 0x51f   : > { %v9013_v2 = vpop.f32.mrf.mxu0  ;;  %v2913_v50 = vpop.f32.mrf.mxu1 }
 0x520   : > { %v2914_v17 = vadd.f32 %v2913_v50, %v2858_v7  ;;  %v6181_v7 = vld [vmem:[%s11423_s6 + $0x840] sm:$0xff] }
 0x521   : > { %v2872_v30 = vpop.f32.mrf.mxu3 }
 0x522   : > { %2985 = vmatmul.f32.vlgmr.msrb.gmra.mxu0 %v2914_v17  ;;  %6194 = vmatmul.msk.f32.gmra.mxu1 %vm1102_vm5, %v6162_v35 }
 0x523   : > { %v2819_v0 = vpop.f32.mrf.mxu2 }
 0x524   : > { %3160 = vmatmul.f32.gmra.mxu2 %v6178_v28 }
 0x526   : > { %3216 = vmatmul.f32.gmra.mxu3 %v6179_v39 }
 0x527   : > { %v9025_v41 = vpop.f32.mrf.mxu0  ;;  %v2916_v5 = vpop.f32.mrf.mxu1 }
 0x528   : > { %v2917_v29 = vadd.f32 %v2916_v5, %v2861_v15  ;;  %v6184_v5 = vld [vmem:[%s11423_s6 + $0x858] sm:$0xff] }
 0x529   : > { %v2875_v43 = vpop.f32.mrf.mxu3 }
 0x52a   : > { %2988 = vmatmul.f32.gmra.mxu0 %v2917_v29  ;;  %6195 = vmatmul.msk.f32.gmra.mxu1 %vm1102_vm5, %v6165_v49 }
 0x52b   : > { %v2822_v50 = vpop.f32.mrf.mxu2 }
 0x52c   : > { %3163 = vmatmul.f32.gmra.mxu2 %v6181_v7 }
 0x52e   : > { %3219 = vmatmul.f32.gmra.mxu3 %v6182_v54 }
 0x52f   : > { %v9037_v44 = vpop.f32.mrf.mxu0  ;;  %v2919_v59 = vpop.f32.mrf.mxu1 }
 0x530   : > { %v2920_v61 = vadd.f32 %v2919_v59, %v2864_v19  ;;  %v6174_v19 = vld [vmem:[%s11423_s6 + $0x808] sm:$0xff] }
 0x531   : > { %v2878_v35 = vpop.f32.mrf.mxu3 }
 0x532   : > { %2991 = vmatmul.f32.gmra.mxu0 %v2920_v61  ;;  %6196 = vmatmul.msk.f32.gmra.mxu1 %vm1102_vm5, %v6168_v11  ;;  %v2873_v11 = vadd.f32 %v2872_v30, %v2816_v12  ;;  %v6220_v12 = vld [vmem:[%s11423_s6 + $0x888] sm:$0xff]  ;;  %v6221_v30 = vld [vmem:[%s11423_s6 + $0x890] sm:$0xff] }
 0x533   : > { %v9061_v49 = vpop.f32.mrf.mxu2 }
 0x534   : > { %3166 = vmatmul.f32.gmra.mxu2 %v6184_v5  ;;  %v6218_v5 = vld [vmem:[%s11424_s7 + $0x370] sm:$0xff] }
 0x536   : > { %3222 = vmatmul.f32.gmra.mxu3 %v6185_v23  ;;  %v2876_v23 = vadd.f32 %v2875_v43, %v2819_v0  ;;  %v6216_v0 = vld [vmem:[%s11424_s7 + $0x360] sm:$0xff] }
 0x537   : > { %v9049_v17 = vpop.f32.mrf.mxu0  ;;  %v2922_v9 = vpop.f32.mrf.mxu1  ;;  %v6223_v43 = vld [vmem:[%s11423_s6 + $0x8a0] sm:$0xff] }
 0x538   : > { %11546 = vst [vmem:[#allocation43_spill] sm:$0xff] %v9049_v17  ;;  %v2923_v15 = vadd.f32 %v2922_v9, %v2867_v37  ;;  %v6177_v9 = vld [vmem:[%s11423_s6 + $0x820] sm:$0xff] }
 0x539   : > { %v9063_v29 = vpop.f32.mrf.mxu3 }
 0x53a   : > { %2994 = vmatmul.f32.gmra.mxu0 %v2923_v15  ;;  %6197 = vmatmul.msk.f32.gmra.mxu1 %vm1102_vm5, %v6171_v36  ;;  %v6219_v15 = vld [vmem:[%s11424_s7 + $0x378] sm:$0xff] }
 0x53b   : > { %v9077_v61 = vpop.f32.mrf.mxu2  ;;  %3302 = vmatpush.msra.mxu0 %v6219_v15 }
 0x53c   : > { %3169 = vmatmul.f32.gmra.mxu2 %v6187_v40  ;;  %v6180_v40 = vld [vmem:[%s11423_s6 + $0x838] sm:$0xff] }
 0x53d   : > { %3303 = vmatpush.msra.mxu0 %v6218_v5 }
 0x53e   : > { %3225 = vmatmul.f32.gmra.mxu3 %v6188_v4  ;;  %v6217_v4 = vld [vmem:[%s11424_s7 + $0x368] sm:$0xff] }
 0x53f   : > { %v9065_v28 = vpop.f32.mrf.mxu0  ;;  %v2925_v39 = vpop.f32.mrf.mxu1  ;;  %3304 = vmatpush.msra.mxu0 %v6217_v4  ;;  %v6226_v4 = vld [vmem:[%s11423_s6 + $0x8b8] sm:$0xff] }
 0x540   : > { %11547 = vst [vmem:[#allocation46_spill] sm:$0xff] %v9065_v28  ;;  %v2926_v59 = vadd.f32 %v2925_v39, %v2870_v8 }
 0x541   : > { %v9079_v7 = vpop.f32.mrf.mxu3  ;;  %3305 = vmatpush.msra.mxu0 %v6216_v0  ;;  %v6211_v0 = vld [vmem:[%s11424_s7 + $0x338] sm:$0xff] }
 0x542   : > { %2997 = vmatmul.f32.gmra.mxu0 %v2926_v59  ;;  %6198 = vmatmul.msk.f32.gmra.mxu1 %vm1102_vm5, %v6174_v19 }
 0x543   : > { %v9099_v8 = vpop.f32.mrf.mxu2 }
 0x544   : > { %3466 = vmatmul.f32.vlgmr.msra.gmra.mxu2 %v6220_v12  ;;  %v6214_v12 = vld [vmem:[%s11424_s7 + $0x350] sm:$0xff] }
 0x546   : > { %3522 = vmatmul.f32.vlgmr.msrb.gmra.mxu3 %v6221_v30 }
 0x547   : > { %v9081_v54 = vpop.f32.mrf.mxu0  ;;  %v2928_v37 = vpop.f32.mrf.mxu1 }
 0x548   : > { %11548 = vst [vmem:[#allocation49_spill] sm:$0xff] %v9081_v54  ;;  %v2929_v36 = vadd.f32 %v2928_v37, %v2873_v11  ;;  %v6224_v37 = vld [vmem:[%s11423_s6 + $0x8a8] sm:$0xff] }
 0x549   : > { %v9101_v39 = vpop.f32.mrf.mxu3 }
 0x54a   : > { %3000 = vmatmul.f32.gmra.mxu0 %v2929_v36  ;;  %6199 = vmatmul.msk.f32.gmra.mxu1 %vm1102_vm5, %v6177_v9  ;;  %v6215_v9 = vld [vmem:[%s11424_s7 + $0x358] sm:$0xff]  ;;  %v2879_v36 = vadd.f32 %v2878_v35, %v2822_v50  ;;  %v6213_v50 = vld [vmem:[%s11424_s7 + $0x348] sm:$0xff] }
 0x54b   : > { %3306 = vmatpush.msra.mxu0 %v6215_v9  ;;  %v9127_v30 = vpop.f32.mrf.mxu2 }
 0x54c   : > { %3469 = vmatmul.f32.gmra.mxu2 %v6223_v43  ;;  %v2882_v43 = vadd.f32 %v9063_v29, %v9061_v49  ;;  %v6209_v49 = vld [vmem:[%s11424_s7 + $0x328] sm:$0xff] }
 0x54d   : > { %3307 = vmatpush.msra.mxu0 %v6214_v12 }
 0x54e   : > { %3525 = vmatmul.f32.gmra.mxu3 %v6224_v37  ;;  %v6210_v37 = vld [vmem:[%s11424_s7 + $0x330] sm:$0xff] }
 0x54f   : > { %v9103_v19 = vpop.f32.mrf.mxu0  ;;  %v2931_v59 = vpop.f32.mrf.mxu1  ;;  %3308 = vmatpush.msra.mxu0 %v6213_v50  ;;  %v6208_v50 = vld [vmem:[%s11424_s7 + $0x320] sm:$0xff] }
 0x550   : > { %11549 = vst [vmem:[#allocation53_spill] sm:$0xff] %v9103_v19  ;;  %v2932_v11 = vadd.f32 %v2931_v59, %v2876_v23  ;;  %v6183_v59 = vld [vmem:[%s11423_s6 + $0x850] sm:$0xff] }
 0x551   : > { %v9129_v15 = vpop.f32.mrf.mxu3 }
 0x552   : > { %3003 = vmatmul.f32.gmra.mxu0 %v2932_v11  ;;  %6200 = vmatmul.msk.f32.gmra.mxu1 %vm1102_vm5, %v6180_v40  ;;  %v6212_v40 = vld [vmem:[%s11424_s7 + $0x340] sm:$0xff] }
 0x553   : > { %v6227_v11 = vld [vmem:[%s11423_s6 + $0x8c0] sm:$0xff]  ;;  %3309 = vmatpush.msra.mxu0 %v6212_v40  ;;  %v9157_v9 = vpop.f32.mrf.mxu2  ;;  %v6230_v40 = vld [vmem:[%s11423_s6 + $0x8d8] sm:$0xff] }
 0x554   : > { %3472 = vmatmul.f32.gmra.mxu2 %v6226_v4  ;;  %v6207_v4 = vld [vmem:[%s11424_s7 + $0x318] sm:$0xff] }
 0x555   : > { %3310 = vmatpush.msra.mxu0 %v6211_v0  ;;  %v6206_v0 = vld [vmem:[%s11424_s7 + $0x310] sm:$0xff] }
 0x556   : > { %3528 = vmatmul.f32.gmra.mxu3 %v6227_v11  ;;  %v2885_v11 = vadd.f32 %v9079_v7, %v9077_v61  ;;  %v6205_v61 = vld [vmem:[%s11424_s7 + $0x308] sm:$0xff] }
 0x557   : > { %v9131_v5 = vpop.f32.mrf.mxu0  ;;  %v2934_v23 = vpop.f32.mrf.mxu1  ;;  %3311 = vmatpush.msra.mxu0 %v6210_v37 }
 0x558   : > { %11550 = vst [vmem:[#allocation56_spill] sm:$0xff] %v9131_v5  ;;  %v2935_v35 = vadd.f32 %v2934_v23, %v2879_v36 }
 0x559   : > { %v2893_v36 = vpop.f32.mrf.mxu3  ;;  %3312 = vmatpush.msra.mxu0 %v6209_v49  ;;  %v6189_v49 = vld [vmem:[%s11423_s6 + $0x880] sm:$0xf] }
 0x55a   : > { %3006 = vmatmul.f32.gmra.mxu0 %v2935_v35  ;;  %6201 = vmatmul.msk.f32.gmra.mxu1 %vm1102_vm5, %v6183_v59  ;;  %v6186_v59 = vld [vmem:[%s11423_s6 + $0x868] sm:$0xff]  ;;  %v6229_v35 = vld [vmem:[%s11423_s6 + $0x8d0] sm:$0xff] }
 0x55b   : > { %3313 = vmatpush.msra.mxu0 %v6208_v50  ;;  %v6232_v50 = vld [vmem:[%s11423_s6 + $0x8e8] sm:$0xff] }
 0x55c   : > { %3475 = vmatmul.f32.gmra.mxu2 %v6229_v35  ;;  %v6233_v35 = vld [vmem:[%s11423_s6 + $0x8f0] sm:$0xff] }
 0x55d   : > { %3314 = vmatpush.msra.mxu0 %v6207_v4 }
 0x55e   : > { %3531 = vmatmul.f32.gmra.mxu3 %v6230_v40  ;;  %v2888_v40 = vadd.f32 %v9101_v39, %v9099_v8  ;;  %v6236_v8 = vld [vmem:[%s11423_s6 + $0x908] sm:$0xff]  ;;  %v2891_v39 = vadd.f32 %v9129_v15, %v9127_v30  ;;  %v6239_v30 = vld [vmem:[%s11423_s6 + $0x920] sm:$0xff]  ;;  %v2894_v15 = vadd.f32 %v2893_v36, %v9157_v9  ;;  %v6242_v9 = vld [vmem:[%s11423_s6 + $0x938] sm:$0xff] }
 0x55f   : > { %v9159_v12 = vpop.f32.mrf.mxu0  ;;  %v2937_v23 = vpop.f32.mrf.mxu1  ;;  %3315 = vmatpush.msra.mxu0 %v6206_v0 }
 0x560   : > { %11551 = vst [vmem:[#allocation59_spill] sm:$0xff] %v9159_v12  ;;  %v2938_v29 = vadd.f32 %v2937_v23, %v2882_v43  ;;  %v3134_v43 = vpop.f32.mrf.mxu2 }
 0x561   : > { %v3190_v37 = vpop.f32.mrf.mxu3  ;;  %3316 = vmatpush.msra.mxu0 %v6205_v61 }
 0x562   : > { %3009 = vmatmul.f32.gmra.mxu0 %v2938_v29  ;;  %6202 = vmatmul.msk.f32.gmra.mxu1 %vm1102_vm5, %v6186_v59  ;;  %v6204_v29 = vld [vmem:[%s11424_s7 + $0x300] sm:$0xff]  ;;  %v3191_v36 = vadd.f32 %v3190_v37, %v3134_v43  ;;  %v6245_v43 = vld [vmem:[%s11423_s6 + $0x950] sm:$0xff] }
 0x563   : > { %3317 = vmatpush.msra.mxu0 %v6204_v29 }
 0x564   : > { %3478 = vmatmul.f32.gmra.mxu2 %v6232_v50 }
 0x566   : > { %3534 = vmatmul.f32.gmra.mxu3 %v6233_v35 }
 0x567   : > { %v9185_v23 = vpop.f32.mrf.mxu0  ;;  %v2940_v59 = vpop.f32.mrf.mxu1 }
 0x568   : > { %11552 = vst [vmem:[#allocation62_spill] sm:$0xff] %v9185_v23  ;;  %v2941_v7 = vadd.f32 %v2940_v59, %v2885_v11  ;;  %v3137_v4 = vpop.f32.mrf.mxu2  ;;  %v6222_v59 = vld [vmem:[%s11423_s6 + $0x898] sm:$0xff] }
 0x569   : > { %v3193_v61 = vpop.f32.mrf.mxu3 }
 0x56a   : > { %3012 = vmatmul.f32.gmra.mxu0 %v2941_v7  ;;  %6203 = vmatmul.msk.f32.gmra.mxu1 %vm1102_vm5, %v6189_v49  ;;  %v6235_v7 = vld [vmem:[%s11423_s6 + $0x900] sm:$0xff]  ;;  %v3194_v37 = vadd.f32 %v3193_v61, %v3137_v4  ;;  %v6248_v4 = vld [vmem:[%s11423_s6 + $0x968] sm:$0xff] }
 0x56c   : > { %3481 = vmatmul.f32.gmra.mxu2 %v6235_v7 }
 0x56e   : > { %3537 = vmatmul.f32.gmra.mxu3 %v6236_v8 }
 0x56f   : > { %v9205_v11 = vpop.f32.mrf.mxu0  ;;  %v2943_v0 = vpop.f32.mrf.mxu1 }
 0x570   : > { %v2944_v49 = vadd.f32 %v2943_v0, %v2888_v40  ;;  %v3140_v29 = vpop.f32.mrf.mxu2  ;;  %v6225_v40 = vld [vmem:[%s11423_s6 + $0x8b0] sm:$0xff] }
 0x572   : > { %3015 = vmatmul.f32.gmra.mxu0 %v2944_v49  ;;  %6260 = vmatmul.msk.f32.vlgmr.msrb.gmra.mxu1 %vm1102_vm5, %v6222_v59  ;;  %v3196_v59 = vpop.f32.mrf.mxu3  ;;  %v6238_v49 = vld [vmem:[%s11423_s6 + $0x918] sm:$0xff] }
 0x573   : > { %v3197_v61 = vadd.f32 %v3196_v59, %v3140_v29  ;;  %v6251_v29 = vld [vmem:[%s11423_s6 + $0x980] sm:$0xff] }
 0x574   : > { %3484 = vmatmul.f32.gmra.mxu2 %v6238_v49  ;;  %v6241_v49 = vld [vmem:[%s11423_s6 + $0x930] sm:$0xff] }
 0x576   : > { %3540 = vmatmul.f32.gmra.mxu3 %v6239_v30 }
 0x577   : > { %v9219_v50 = vpop.f32.mrf.mxu0  ;;  %v2946_v35 = vpop.f32.mrf.mxu1 }
 0x578   : > { %v2947_v0 = vadd.f32 %v2946_v35, %v2891_v39  ;;  %v3143_v7 = vpop.f32.mrf.mxu2  ;;  %v6228_v35 = vld [vmem:[%s11423_s6 + $0x8c8] sm:$0xff] }
 0x57a   : > { %3018 = vmatmul.f32.gmra.mxu0 %v2947_v0  ;;  %6261 = vmatmul.msk.f32.gmra.mxu1 %vm1102_vm5, %v6225_v40  ;;  %v3199_v0 = vpop.f32.mrf.mxu3 }
 0x57b   : > { %v3200_v59 = vadd.f32 %v3199_v0, %v3143_v7  ;;  %v6254_v7 = vld [vmem:[%s11423_s6 + $0x998] sm:$0xff] }
 0x57c   : > { %3487 = vmatmul.f32.gmra.mxu2 %v6241_v49 }
 0x57e   : > { %3543 = vmatmul.f32.gmra.mxu3 %v6242_v9 }
 0x57f   : > { %v9232_v8 = vpop.f32.mrf.mxu0  ;;  %v2949_v39 = vpop.f32.mrf.mxu1 }
 0x580   : > { %v2950_v40 = vadd.f32 %v2949_v39, %v2894_v15  ;;  %v3146_v30 = vpop.f32.mrf.mxu2  ;;  %v6231_v15 = vld [vmem:[%s11423_s6 + $0x8e0] sm:$0xff] }
 0x582   : > { %3021 = vmatmul.f32.gmra.mxu0 %v2950_v40  ;;  %6262 = vmatmul.msk.f32.gmra.mxu1 %vm1102_vm5, %v6228_v35  ;;  %v3202_v35 = vpop.f32.mrf.mxu3  ;;  %v6244_v40 = vld [vmem:[%s11423_s6 + $0x948] sm:$0xff] }
 0x583   : > { %v3203_v0 = vadd.f32 %v3202_v35, %v3146_v30  ;;  %v6257_v30 = vld [vmem:[%s11423_s6 + $0x9b0] sm:$0xf] }
 0x584   : > { %3490 = vmatmul.f32.gmra.mxu2 %v6244_v40 }
 0x586   : > { %3546 = vmatmul.f32.gmra.mxu3 %v6245_v43 }
 0x587   : > { %v9244_v17 = vpop.f32.mrf.mxu0  ;;  %v3246_v28 = vpop.f32.mrf.mxu1 }
 0x588   : > { %v3247_v39 = vadd.f32 %v3246_v28, %v3191_v36  ;;  %v3149_v49 = vpop.f32.mrf.mxu2  ;;  %v6234_v28 = vld [vmem:[%s11423_s6 + $0x8f8] sm:$0xff] }
 0x58a   : > { %3318 = vmatmul.f32.vlgmr.msra.gmra.mxu0 %v3247_v39  ;;  %6263 = vmatmul.msk.f32.gmra.mxu1 %vm1102_vm5, %v6231_v15  ;;  %v3205_v15 = vpop.f32.mrf.mxu3  ;;  %v6247_v39 = vld [vmem:[%s11423_s6 + $0x960] sm:$0xff] }
 0x58b   : > { %v3206_v35 = vadd.f32 %v3205_v15, %v3149_v49  ;;  %v6289_v49 = vld [vmem:[%s11423_s6 + $0x9c0] sm:$0xff]  ;;  %v6290_v15 = vld [vmem:[%s11423_s6 + $0x9c8] sm:$0xff] }
 0x58c   : > { %3493 = vmatmul.f32.gmra.mxu2 %v6247_v39 }
 0x58e   : > { %3549 = vmatmul.f32.gmra.mxu3 %v6248_v4 }
 0x58f   : > { %v9256_v9 = vpop.f32.mrf.mxu0  ;;  %v3249_v27 = vpop.f32.mrf.mxu1 }
 0x590   : > { %v3250_v36 = vadd.f32 %v3249_v27, %v3194_v37  ;;  %v3152_v40 = vpop.f32.mrf.mxu2  ;;  %v6237_v27 = vld [vmem:[%s11423_s6 + $0x910] sm:$0xff] }
 0x592   : > { %3321 = vmatmul.f32.gmra.mxu0 %v3250_v36  ;;  %6264 = vmatmul.msk.f32.gmra.mxu1 %vm1102_vm5, %v6234_v28  ;;  %v3208_v28 = vpop.f32.mrf.mxu3  ;;  %v6250_v36 = vld [vmem:[%s11423_s6 + $0x978] sm:$0xff] }
 0x594   : > { %3496 = vmatmul.f32.gmra.mxu2 %v6250_v36 }
 0x596   : > { %3552 = vmatmul.f32.gmra.mxu3 %v6251_v29 }
 0x597   : > { %v9268_v43 = vpop.f32.mrf.mxu0  ;;  %v3252_v54 = vpop.f32.mrf.mxu1 }
 0x598   : > { %v3253_v37 = vadd.f32 %v3252_v54, %v3197_v61  ;;  %v3155_v39 = vpop.f32.mrf.mxu2  ;;  %v6240_v54 = vld [vmem:[%s11423_s6 + $0x928] sm:$0xff] }
 0x59a   : > { %3324 = vmatmul.f32.gmra.mxu0 %v3253_v37  ;;  %6265 = vmatmul.msk.f32.gmra.mxu1 %vm1102_vm5, %v6237_v27  ;;  %v3211_v27 = vpop.f32.mrf.mxu3  ;;  %v6253_v37 = vld [vmem:[%s11423_s6 + $0x990] sm:$0xff] }
 0x59c   : > { %3499 = vmatmul.f32.gmra.mxu2 %v6253_v37  ;;  %v6256_v37 = vld [vmem:[%s11423_s6 + $0x9a8] sm:$0xf] }
 0x59e   : > { %3555 = vmatmul.f32.gmra.mxu3 %v6254_v7 }
 0x59f   : > { %v9280_v4 = vpop.f32.mrf.mxu0  ;;  %v3255_v10 = vpop.f32.mrf.mxu1 }
 0x5a0   : > { %11553 = vst [vmem:[#allocation66_spill] sm:$0xff] %v9280_v4  ;;  %v3256_v61 = vadd.f32 %v3255_v10, %v3200_v59  ;;  %v9292_v36 = vpop.f32.mrf.mxu2  ;;  %v6243_v59 = vld [vmem:[%s11423_s6 + $0x940] sm:$0xff] }
 0x5a2   : > { %3327 = vmatmul.f32.gmra.mxu0 %v3256_v61  ;;  %6266 = vmatmul.msk.f32.gmra.mxu1 %vm1102_vm5, %v6240_v54  ;;  %v3214_v61 = vpop.f32.mrf.mxu3 }
 0x5a4   : > { %3502 = vmatmul.f32.gmra.mxu2 %v6256_v37  ;;  %v6288_v37 = vld [vmem:[%s11424_s7 + $0x3f8] sm:$0xff] }
 0x5a5   : > { %3635 = vmatpush.msrb.mxu0 %v6288_v37  ;;  %v3212_v37 = vadd.f32 %v3211_v27, %v3155_v39  ;;  %v6282_v39 = vld [vmem:[%s11424_s7 + $0x3c8] sm:$0xff] }
 0x5a6   : > { %3558 = vmatmul.f32.gmra.mxu3 %v6257_v30  ;;  %v6287_v30 = vld [vmem:[%s11424_s7 + $0x3f0] sm:$0xff] }
 0x5a7   : > { %v9294_v29 = vpop.f32.mrf.mxu0  ;;  %v3258_v10 = vpop.f32.mrf.mxu1  ;;  %3636 = vmatpush.msrb.mxu0 %v6287_v30 }
 0x5a8   : > { %11554 = vst [vmem:[#allocation69_spill] sm:$0xff] %v9294_v29  ;;  %v3259_v54 = vadd.f32 %v3258_v10, %v3203_v0  ;;  %v9306_v7 = vpop.f32.mrf.mxu2  ;;  %v6246_v10 = vld [vmem:[%s11423_s6 + $0x958] sm:$0xff]  ;;  %v6286_v29 = vld [vmem:[%s11424_s7 + $0x3e8] sm:$0xff] }
 0x5a9   : > { %3637 = vmatpush.msrb.mxu0 %v6286_v29  ;;  %v6284_v29 = vld [vmem:[%s11424_s7 + $0x3d8] sm:$0xff] }
 0x5aa   : > { %3330 = vmatmul.f32.gmra.mxu0 %v3259_v54  ;;  %6267 = vmatmul.msk.f32.gmra.mxu1 %vm1102_vm5, %v6243_v59  ;;  %v9313_v54 = vpop.f32.mrf.mxu3 }
 0x5ac   : > { %3799 = vmatmul.f32.vlgmr.msrb.gmra.mxu2 %v6289_v49  ;;  %v6249_v49 = vld [vmem:[%s11423_s6 + $0x970] sm:$0xff] }
 0x5ae   : > { %3855 = vmatmul.f32.vlgmr.msra.gmra.mxu3 %v6290_v15  ;;  %v6293_v15 = vld [vmem:[%s11423_s6 + $0x9e0] sm:$0xff] }
 0x5af   : > { %v9308_v4 = vpop.f32.mrf.mxu0  ;;  %v3261_v0 = vpop.f32.mrf.mxu1 }
 0x5b0   : > { %11555 = vst [vmem:[#allocation72_spill] sm:$0xff] %v9308_v4  ;;  %v3262_v59 = vadd.f32 %v3261_v0, %v3206_v35  ;;  %v3209_v35 = vadd.f32 %v3208_v28, %v3152_v40  ;;  %v9328_v0 = vpop.f32.mrf.mxu2  ;;  %v6285_v40 = vld [vmem:[%s11424_s7 + $0x3e0] sm:$0xff]  ;;  %v6292_v28 = vld [vmem:[%s11423_s6 + $0x9d8] sm:$0xff] }
 0x5b1   : > { %3638 = vmatpush.msrb.mxu0 %v6285_v40 }
 0x5b2   : > { %3333 = vmatmul.f32.gmra.mxu0 %v3262_v59  ;;  %6268 = vmatmul.msk.f32.gmra.mxu1 %vm1102_vm5, %v6246_v10  ;;  %v9338_v21 = vpop.f32.mrf.mxu3 }
 0x5b3   : > { %3639 = vmatpush.msrb.mxu0 %v6284_v29  ;;  %v6296_v29 = vld [vmem:[%s11423_s6 + $0x9f8] sm:$0xff] }
 0x5b4   : > { %3802 = vmatmul.f32.gmra.mxu2 %v6292_v28  ;;  %v6281_v28 = vld [vmem:[%s11424_s7 + $0x3c0] sm:$0xff] }
 0x5b6   : > { %3858 = vmatmul.f32.gmra.mxu3 %v6293_v15  ;;  %v6295_v15 = vld [vmem:[%s11423_s6 + $0x9f0] sm:$0xff] }
 0x5b7   : > { %v9330_v10 = vpop.f32.mrf.mxu0  ;;  %v3264_v59 = vpop.f32.mrf.mxu1 }
 0x5b8   : > { %11556 = vst [vmem:[#allocation77_spill] sm:$0xff] %v9330_v10  ;;  %v3265_v4 = vadd.f32 %v3264_v59, %v3209_v35  ;;  %v9356_v30 = vpop.f32.mrf.mxu2 }
 0x5ba   : > { %3336 = vmatmul.f32.gmra.mxu0 %v3265_v4  ;;  %6269 = vmatmul.msk.f32.gmra.mxu1 %vm1102_vm5, %v6249_v49  ;;  %v6283_v4 = vld [vmem:[%s11424_s7 + $0x3d0] sm:$0xff]  ;;  %v6252_v49 = vld [vmem:[%s11423_s6 + $0x988] sm:$0xff]  ;;  %v9366_v40 = vpop.f32.mrf.mxu3 }
 0x5bb   : > { %3640 = vmatpush.msrb.mxu0 %v6283_v4  ;;  %v3215_v4 = vadd.f32 %v3214_v61, %v9292_v36  ;;  %v6278_v36 = vld [vmem:[%s11424_s7 + $0x3a8] sm:$0xff] }
 0x5bc   : > { %3805 = vmatmul.f32.gmra.mxu2 %v6295_v15 }
 0x5bd   : > { %3641 = vmatpush.msrb.mxu0 %v6282_v39 }
 0x5be   : > { %3861 = vmatmul.f32.gmra.mxu3 %v6296_v29  ;;  %v6277_v29 = vld [vmem:[%s11424_s7 + $0x3a0] sm:$0xff] }
 0x5bf   : > { %v9358_v35 = vpop.f32.mrf.mxu0  ;;  %v3267_v59 = vpop.f32.mrf.mxu1  ;;  %3642 = vmatpush.msrb.mxu0 %v6281_v28  ;;  %v6255_v28 = vld [vmem:[%s11423_s6 + $0x9a0] sm:$0xff] }
 0x5c0   : > { %11557 = vst [vmem:[#allocation78_spill] sm:$0xff] %v9358_v35  ;;  %v3268_v27 = vadd.f32 %v3267_v59, %v3212_v37  ;;  %v6280_v37 = vld [vmem:[%s11424_s7 + $0x3b8] sm:$0xff]  ;;  %v6279_v59 = vld [vmem:[%s11424_s7 + $0x3b0] sm:$0xff] }
 0x5c1   : > { %3643 = vmatpush.msrb.mxu0 %v6280_v37  ;;  %v6298_v37 = vld [vmem:[%s11423_s6 + $0xa08] sm:$0xff] }
 0x5c2   : > { %3339 = vmatmul.f32.gmra.mxu0 %v3268_v27  ;;  %6270 = vmatmul.msk.f32.gmra.mxu1 %vm1102_vm5, %v6252_v49  ;;  %v9385_v49 = vpop.f32.mrf.mxu2  ;;  %v3226_v15 = vpop.f32.mrf.mxu3 }
 0x5c3   : > { %3644 = vmatpush.msrb.mxu0 %v6279_v59  ;;  %v6299_v59 = vld [vmem:[%s11423_s6 + $0xa10] sm:$0xff] }
 0x5c4   : > { %3808 = vmatmul.f32.gmra.mxu2 %v6298_v37  ;;  %v6274_v37 = vld [vmem:[%s11424_s7 + $0x388] sm:$0xff] }
 0x5c5   : > { %3645 = vmatpush.msrb.mxu0 %v6278_v36 }
 0x5c6   : > { %3864 = vmatmul.f32.gmra.mxu3 %v6299_v59  ;;  %v6273_v59 = vld [vmem:[%s11424_s7 + $0x380] sm:$0xff] }
 0x5c7   : > { %v9387_v39 = vpop.f32.mrf.mxu0  ;;  %v3270_v27 = vpop.f32.mrf.mxu1  ;;  %3646 = vmatpush.msrb.mxu0 %v6277_v29  ;;  %v6258_v29 = vld [vmem:[%s11423_s6 + $0x9b8] sm:$0xf] }
 0x5c8   : > { %11558 = vst [vmem:[#allocation79_spill] sm:$0xff] %v9387_v39  ;;  %v3271_v61 = vadd.f32 %v3270_v27, %v3215_v4  ;;  %v6276_v4 = vld [vmem:[%s11424_s7 + $0x398] sm:$0xff]  ;;  %v3218_v27 = vadd.f32 %v9313_v54, %v9306_v7 }
 0x5c9   : > { %3647 = vmatpush.msrb.mxu0 %v6276_v4  ;;  %v6301_v4 = vld [vmem:[%s11423_s6 + $0xa20] sm:$0xff] }
 0x5ca   : > { %3342 = vmatmul.f32.gmra.mxu0 %v3271_v61  ;;  %6271 = vmatmul.msk.f32.gmra.mxu1 %vm1102_vm5, %v6255_v28  ;;  %v6275_v28 = vld [vmem:[%s11424_s7 + $0x390] sm:$0xff]  ;;  %v3467_v36 = vpop.f32.mrf.mxu2  ;;  %v3523_v54 = vpop.f32.mrf.mxu3 }
 0x5cb   : > { %3648 = vmatpush.msrb.mxu0 %v6275_v28  ;;  %v6302_v28 = vld [vmem:[%s11423_s6 + $0xa28] sm:$0xff] }
 0x5cc   : > { %3811 = vmatmul.f32.gmra.mxu2 %v6301_v4 }
 0x5cd   : > { %3649 = vmatpush.msrb.mxu0 %v6274_v37 }
 0x5ce   : > { %3867 = vmatmul.f32.gmra.mxu3 %v6302_v28 }
 0x5cf   : > { %v9413_v61 = vpop.f32.mrf.mxu0  ;;  %v3273_v10 = vpop.f32.mrf.mxu1  ;;  %3650 = vmatpush.msrb.mxu0 %v6273_v59  ;;  %v6304_v59 = vld [vmem:[%s11423_s6 + $0xa38] sm:$0xff] }
 0x5d0   : > { %11559 = vst [vmem:[#allocation80_spill] sm:$0xff] %v9413_v61  ;;  %v3274_v7 = vadd.f32 %v3273_v10, %v3218_v27  ;;  %v3221_v10 = vadd.f32 %v9338_v21, %v9328_v0  ;;  %v6305_v21 = vld [vmem:[%s11423_s6 + $0xa40] sm:$0xff]  ;;  %v3224_v0 = vadd.f32 %v9366_v40, %v9356_v30  ;;  %v6308_v30 = vld [vmem:[%s11423_s6 + $0xa58] sm:$0xff]  ;;  %v3227_v40 = vadd.f32 %v3226_v15, %v9385_v49  ;;  %v6311_v49 = vld [vmem:[%s11423_s6 + $0xa70] sm:$0xff] }
 0x5d1   : > { %v3524_v15 = vadd.f32 %v3523_v54, %v3467_v36  ;;  %v6314_v36 = vld [vmem:[%s11423_s6 + $0xa88] sm:$0xff] }
 0x5d2   : > { %3345 = vmatmul.f32.gmra.mxu0 %v3274_v7  ;;  %6272 = vmatmul.msk.f32.gmra.mxu1 %vm1102_vm5, %v6258_v29  ;;  %v3470_v27 = vpop.f32.mrf.mxu2  ;;  %v6291_v29 = vld [vmem:[%s11423_s6 + $0x9d0] sm:$0xff]  ;;  %v3526_v19 = vpop.f32.mrf.mxu3 }
 0x5d3   : > { %v3527_v54 = vadd.f32 %v3526_v19, %v3470_v27  ;;  %v6317_v19 = vld [vmem:[%s11423_s6 + $0xaa0] sm:$0xff] }
 0x5d4   : > { %3814 = vmatmul.f32.gmra.mxu2 %v6304_v59  ;;  %v6307_v59 = vld [vmem:[%s11423_s6 + $0xa50] sm:$0xff] }
 0x5d6   : > { %3870 = vmatmul.f32.gmra.mxu3 %v6305_v21 }
 0x5d7   : > { %v9433_v35 = vpop.f32.mrf.mxu0  ;;  %v3276_v37 = vpop.f32.mrf.mxu1 }
 0x5d8   : > { %11560 = vst [vmem:[#allocation81_spill] sm:$0xff] %v9433_v35  ;;  %v3277_v7 = vadd.f32 %v3276_v37, %v3221_v10  ;;  %v6294_v37 = vld [vmem:[%s11423_s6 + $0x9e8] sm:$0xff] }
 0x5da   : > { %3348 = vmatmul.f32.gmra.mxu0 %v3277_v7  ;;  %6329 = vmatmul.msk.f32.vlgmr.msra.gmra.mxu1 %vm1102_vm5, %v6291_v29  ;;  %v3473_v4 = vpop.f32.mrf.mxu2  ;;  %v3529_v7 = vpop.f32.mrf.mxu3 }
 0x5db   : > { %v3530_v27 = vadd.f32 %v3529_v7, %v3473_v4  ;;  %v6320_v4 = vld [vmem:[%s11423_s6 + $0xab8] sm:$0xff] }
 0x5dc   : > { %3817 = vmatmul.f32.gmra.mxu2 %v6307_v59  ;;  %v6310_v59 = vld [vmem:[%s11423_s6 + $0xa68] sm:$0xff] }
 0x5de   : > { %3873 = vmatmul.f32.gmra.mxu3 %v6308_v30 }
 0x5df   : > { %v9447_v28 = vpop.f32.mrf.mxu0  ;;  %v3279_v10 = vpop.f32.mrf.mxu1 }
 0x5e0   : > { %v3280_v29 = vadd.f32 %v3279_v10, %v3224_v0  ;;  %v6297_v10 = vld [vmem:[%s11423_s6 + $0xa00] sm:$0xff] }
 0x5e2   : > { %3351 = vmatmul.f32.gmra.mxu0 %v3280_v29  ;;  %6330 = vmatmul.msk.f32.gmra.mxu1 %vm1102_vm5, %v6294_v37  ;;  %v3476_v21 = vpop.f32.mrf.mxu2  ;;  %v3532_v29 = vpop.f32.mrf.mxu3 }
 0x5e3   : > { %v3533_v7 = vadd.f32 %v3532_v29, %v3476_v21  ;;  %v6323_v21 = vld [vmem:[%s11423_s6 + $0xad0] sm:$0xff] }
 0x5e4   : > { %3820 = vmatmul.f32.gmra.mxu2 %v6310_v59 }
 0x5e6   : > { %3876 = vmatmul.f32.gmra.mxu3 %v6311_v49 }
 0x5e7   : > { %v9460_v51 = vpop.f32.mrf.mxu0  ;;  %v3282_v0 = vpop.f32.mrf.mxu1 }
 0x5e8   : > { %v3283_v37 = vadd.f32 %v3282_v0, %v3227_v40  ;;  %v6300_v40 = vld [vmem:[%s11423_s6 + $0xa18] sm:$0xff] }
 0x5ea   : > { %3354 = vmatmul.f32.gmra.mxu0 %v3283_v37  ;;  %6331 = vmatmul.msk.f32.gmra.mxu1 %vm1102_vm5, %v6297_v10  ;;  %v3479_v30 = vpop.f32.mrf.mxu2  ;;  %v3535_v10 = vpop.f32.mrf.mxu3  ;;  %v6313_v37 = vld [vmem:[%s11423_s6 + $0xa80] sm:$0xff] }
 0x5eb   : > { %v3536_v29 = vadd.f32 %v3535_v10, %v3479_v30  ;;  %v6326_v30 = vld [vmem:[%s11423_s6 + $0xae8] sm:$0xf] }
 0x5ec   : > { %3823 = vmatmul.f32.gmra.mxu2 %v6313_v37 }
 0x5ee   : > { %3879 = vmatmul.f32.gmra.mxu3 %v6314_v36 }
 0x5ef   : > { %v9472_v26 = vpop.f32.mrf.mxu0  ;;  %v3579_v39 = vpop.f32.mrf.mxu1 }
 0x5f0   : > { %v3580_v0 = vadd.f32 %v3579_v39, %v3524_v15  ;;  %v6303_v39 = vld [vmem:[%s11423_s6 + $0xa30] sm:$0xff] }
 0x5f2   : > { %3651 = vmatmul.f32.vlgmr.msrb.gmra.mxu0 %v3580_v0  ;;  %6332 = vmatmul.msk.f32.gmra.mxu1 %vm1102_vm5, %v6300_v40  ;;  %v3482_v59 = vpop.f32.mrf.mxu2  ;;  %v3538_v40 = vpop.f32.mrf.mxu3  ;;  %v6316_v0 = vld [vmem:[%s11423_s6 + $0xa98] sm:$0xff] }
 0x5f3   : > { %v3539_v10 = vadd.f32 %v3538_v40, %v3482_v59  ;;  %v6356_v59 = vld [vmem:[%s11424_s7 + $0x470] sm:$0xff] }
 0x5f4   : > { %3826 = vmatmul.f32.gmra.mxu2 %v6316_v0 }
 0x5f6   : > { %3882 = vmatmul.f32.gmra.mxu3 %v6317_v19 }
 0x5f7   : > { %v9484_v49 = vpop.f32.mrf.mxu0  ;;  %v3582_v5 = vpop.f32.mrf.mxu1 }
 0x5f8   : > { %v3583_v15 = vadd.f32 %v3582_v5, %v3527_v54  ;;  %v6306_v5 = vld [vmem:[%s11423_s6 + $0xa48] sm:$0xff] }
 0x5fa   : > { %3654 = vmatmul.f32.gmra.mxu0 %v3583_v15  ;;  %6333 = vmatmul.msk.f32.gmra.mxu1 %vm1102_vm5, %v6303_v39  ;;  %v3485_v37 = vpop.f32.mrf.mxu2  ;;  %v3541_v39 = vpop.f32.mrf.mxu3  ;;  %v6319_v15 = vld [vmem:[%s11423_s6 + $0xab0] sm:$0xff] }
 0x5fb   : > { %v3542_v40 = vadd.f32 %v3541_v39, %v3485_v37  ;;  %v6354_v37 = vld [vmem:[%s11424_s7 + $0x460] sm:$0xff]  ;;  %v6353_v39 = vld [vmem:[%s11424_s7 + $0x458] sm:$0xff] }
 0x5fc   : > { %3829 = vmatmul.f32.gmra.mxu2 %v6319_v15 }
 0x5fe   : > { %3885 = vmatmul.f32.gmra.mxu3 %v6320_v4 }
 0x5ff   : > { %v9496_v36 = vpop.f32.mrf.mxu0  ;;  %v3585_v60 = vpop.f32.mrf.mxu1 }
 0x600   : > { %v3586_v54 = vadd.f32 %v3585_v60, %v3530_v27  ;;  %v6309_v60 = vld [vmem:[%s11423_s6 + $0xa60] sm:$0xff] }
 0x602   : > { %3657 = vmatmul.f32.gmra.mxu0 %v3586_v54  ;;  %6334 = vmatmul.msk.f32.gmra.mxu1 %vm1102_vm5, %v6306_v5  ;;  %v3488_v0 = vpop.f32.mrf.mxu2  ;;  %v3544_v5 = vpop.f32.mrf.mxu3  ;;  %v6322_v54 = vld [vmem:[%s11423_s6 + $0xac8] sm:$0xff] }
 0x604   : > { %3832 = vmatmul.f32.gmra.mxu2 %v6322_v54 }
 0x606   : > { %3888 = vmatmul.f32.gmra.mxu3 %v6323_v21 }
 0x607   : > { %v9508_v19 = vpop.f32.mrf.mxu0  ;;  %v3588_v16 = vpop.f32.mrf.mxu1 }
 0x608   : > { %11561 = vst [vmem:[#allocation82_spill] sm:$0xff] %v9508_v19  ;;  %v3589_v27 = vadd.f32 %v3588_v16, %v3533_v7  ;;  %v6312_v16 = vld [vmem:[%s11423_s6 + $0xa78] sm:$0xff] }
 0x60a   : > { %3660 = vmatmul.f32.gmra.mxu0 %v3589_v27  ;;  %6335 = vmatmul.msk.f32.gmra.mxu1 %vm1102_vm5, %v6309_v60  ;;  %v3491_v15 = vpop.f32.mrf.mxu2  ;;  %v3547_v60 = vpop.f32.mrf.mxu3  ;;  %v6325_v27 = vld [vmem:[%s11423_s6 + $0xae0] sm:$0xf] }
 0x60c   : > { %3835 = vmatmul.f32.gmra.mxu2 %v6325_v27 }
 0x60e   : > { %3891 = vmatmul.f32.gmra.mxu3 %v6326_v30 }
 0x60f   : > { %v9520_v4 = vpop.f32.mrf.mxu0  ;;  %v3591_v19 = vpop.f32.mrf.mxu1 }
 0x610   : > { %11562 = vst [vmem:[#allocation83_spill] sm:$0xff] %v9520_v4  ;;  %v3592_v7 = vadd.f32 %v3591_v19, %v3536_v29  ;;  %v6315_v19 = vld [vmem:[%s11423_s6 + $0xa90] sm:$0xff] }
 0x612   : > { %3663 = vmatmul.f32.gmra.mxu0 %v3592_v7  ;;  %6336 = vmatmul.msk.f32.gmra.mxu1 %vm1102_vm5, %v6312_v16  ;;  %v3494_v54 = vpop.f32.mrf.mxu2  ;;  %v3550_v16 = vpop.f32.mrf.mxu3  ;;  %v6357_v7 = vld [vmem:[%s11424_s7 + $0x478] sm:$0xff] }
 0x613   : > { %3968 = vmatpush.msra.mxu0 %v6357_v7  ;;  %v3545_v7 = vadd.f32 %v3544_v5, %v3488_v0  ;;  %v6350_v5 = vld [vmem:[%s11424_s7 + $0x440] sm:$0xff] }
 0x615   : > { %3969 = vmatpush.msra.mxu0 %v6356_v59  ;;  %v6352_v59 = vld [vmem:[%s11424_s7 + $0x450] sm:$0xff] }
 0x617   : > { %v9532_v21 = vpop.f32.mrf.mxu0  ;;  %v3594_v4 = vpop.f32.mrf.mxu1 }
 0x618   : > { %11563 = vst [vmem:[#allocation84_spill] sm:$0xff] %v9532_v21  ;;  %v3595_v29 = vadd.f32 %v3594_v4, %v3539_v10  ;;  %v6318_v10 = vld [vmem:[%s11423_s6 + $0xaa8] sm:$0xff] }
 0x61a   : > { %3666 = vmatmul.f32.gmra.mxu0 %v3595_v29  ;;  %6337 = vmatmul.msk.f32.gmra.mxu1 %vm1102_vm5, %v6315_v19  ;;  %v9544_v27 = vpop.f32.mrf.mxu2  ;;  %v6355_v19 = vld [vmem:[%s11424_s7 + $0x468] sm:$0xff]  ;;  %v3553_v21 = vpop.f32.mrf.mxu3 }
 0x61b   : > { %3970 = vmatpush.msra.mxu0 %v6355_v19 }
 0x61d   : > { %3971 = vmatpush.msra.mxu0 %v6354_v37 }
 0x61f   : > { %v9546_v30 = vpop.f32.mrf.mxu0  ;;  %v3597_v4 = vpop.f32.mrf.mxu1  ;;  %3972 = vmatpush.msra.mxu0 %v6353_v39  ;;  %v6349_v39 = vld [vmem:[%s11424_s7 + $0x438] sm:$0xff] }
 0x620   : > { %11564 = vst [vmem:[#allocation85_spill] sm:$0xff] %v9546_v30  ;;  %v3598_v29 = vadd.f32 %v3597_v4, %v3542_v40  ;;  %v6348_v30 = vld [vmem:[%s11424_s7 + $0x430] sm:$0xff] }
 0x621   : > { %3973 = vmatpush.msra.mxu0 %v6352_v59  ;;  %v3548_v59 = vadd.f32 %v3547_v60, %v3491_v15  ;;  %v6346_v60 = vld [vmem:[%s11424_s7 + $0x420] sm:$0xff] }
 0x622   : > { %3669 = vmatmul.f32.gmra.mxu0 %v3598_v29  ;;  %6338 = vmatmul.msk.f32.gmra.mxu1 %vm1102_vm5, %v6318_v10  ;;  %v3500_v40 = vpop.f32.mrf.mxu2  ;;  %v6321_v29 = vld [vmem:[%s11423_s6 + $0xac0] sm:$0xff]  ;;  %v6351_v10 = vld [vmem:[%s11424_s7 + $0x448] sm:$0xff]  ;;  %v3556_v0 = vpop.f32.mrf.mxu3 }
 0x623   : > { %3974 = vmatpush.msra.mxu0 %v6351_v10  ;;  %v6324_v10 = vld [vmem:[%s11423_s6 + $0xad8] sm:$0xff] }
 0x625   : > { %3975 = vmatpush.msra.mxu0 %v6350_v5  ;;  %v6345_v5 = vld [vmem:[%s11424_s7 + $0x418] sm:$0xff] }
 0x627   : > { %v9564_v4 = vpop.f32.mrf.mxu0  ;;  %v3600_v19 = vpop.f32.mrf.mxu1  ;;  %3976 = vmatpush.msra.mxu0 %v6349_v39  ;;  %v6344_v39 = vld [vmem:[%s11424_s7 + $0x410] sm:$0xff] }
 0x628   : > { %11565 = vst [vmem:[#allocation86_spill] sm:$0xff] %v9564_v4  ;;  %v3601_v37 = vadd.f32 %v3600_v19, %v3545_v7 }
 0x629   : > { %3977 = vmatpush.msra.mxu0 %v6348_v30  ;;  %v3551_v30 = vadd.f32 %v3550_v16, %v3494_v54  ;;  %v6342_v16 = vld [vmem:[%s11424_s7 + $0x400] sm:$0xff] }
 0x62a   : > { %3672 = vmatmul.f32.gmra.mxu0 %v3601_v37  ;;  %6339 = vmatmul.msk.f32.gmra.mxu1 %vm1102_vm5, %v6321_v29  ;;  %v3503_v7 = vpop.f32.mrf.mxu2  ;;  %v6347_v29 = vld [vmem:[%s11424_s7 + $0x428] sm:$0xff]  ;;  %v3559_v15 = vpop.f32.mrf.mxu3 }
 0x62b   : > { %3978 = vmatpush.msra.mxu0 %v6347_v29  ;;  %v6327_v29 = vld [vmem:[%s11423_s6 + $0xaf0] sm:$0xf] }
 0x62d   : > { %3979 = vmatpush.msra.mxu0 %v6346_v60 }
 0x62f   : > { %v9582_v19 = vpop.f32.mrf.mxu0  ;;  %v3603_v4 = vpop.f32.mrf.mxu1  ;;  %3980 = vmatpush.msra.mxu0 %v6345_v5  ;;  %v3554_v5 = vadd.f32 %v3553_v21, %v9544_v27 }
 0x630   : > { %11566 = vst [vmem:[#allocation87_spill] sm:$0xff] %v9582_v19  ;;  %v3604_v37 = vadd.f32 %v3603_v4, %v3548_v59 }
 0x631   : > { %3981 = vmatpush.msra.mxu0 %v6344_v39 }
 0x632   : > { %3675 = vmatmul.f32.gmra.mxu0 %v3604_v37  ;;  %6340 = vmatmul.msk.f32.gmra.mxu1 %vm1102_vm5, %v6324_v10  ;;  %v6343_v10 = vld [vmem:[%s11424_s7 + $0x408] sm:$0xff]  ;;  %v3800_v60 = vpop.f32.mrf.mxu2  ;;  %v3856_v54 = vpop.f32.mrf.mxu3 }
 0x633   : > { %3982 = vmatpush.msra.mxu0 %v6343_v10  ;;  %v3560_v10 = vadd.f32 %v3559_v15, %v3503_v7  ;;  %v3857_v27 = vadd.f32 %v3856_v54, %v3800_v60 }
 0x635   : > { %3983 = vmatpush.msra.mxu0 %v6342_v16 }
 0x637   : > { %v9600_v4 = vpop.f32.mrf.mxu0  ;;  %v3606_v59 = vpop.f32.mrf.mxu1 }
 0x638   : > { %11567 = vst [vmem:[#allocation88_spill] sm:$0xff] %v9600_v4  ;;  %v3607_v37 = vadd.f32 %v3606_v59, %v3551_v30  ;;  %v3557_v59 = vadd.f32 %v3556_v0, %v3500_v40 }
 0x63a   : > { %3678 = vmatmul.f32.gmra.mxu0 %v3607_v37  ;;  %6341 = vmatmul.msk.f32.gmra.mxu1 %vm1102_vm5, %v6327_v29  ;;  %v3803_v61 = vpop.f32.mrf.mxu2  ;;  %v3859_v30 = vpop.f32.mrf.mxu3 }
 0x63b   : > { %v3860_v0 = vadd.f32 %v3859_v30, %v3803_v61 }
 0x63f   : > { %v9613_v19 = vpop.f32.mrf.mxu0  ;;  %v3609_v39 = vpop.f32.mrf.mxu1 }
 0x640   : > { %11568 = vst [vmem:[#allocation89_spill] sm:$0xff] %v9613_v19  ;;  %v3610_v4 = vadd.f32 %v3609_v39, %v3554_v5 }
 0x642   : > { %3681 = vmatmul.f32.gmra.mxu0 %v3610_v4  ;;  %v3806_v37 = vpop.f32.mrf.mxu2  ;;  %v3862_v35 = vpop.f32.mrf.mxu3 }
 0x647   : > { %v9615_v12 = vpop.f32.mrf.mxu0  ;;  %v3612_v42 = vpop.f32.mrf.mxu1 }
 0x648   : > { %11569 = vst [vmem:[#allocation90_spill] sm:$0xff] %v9615_v12  ;;  %v3613_v34 = vadd.f32 %v3612_v42, %v3557_v59  ;;  %v3863_v59 = vadd.f32 %v3862_v35, %v3806_v37 }
 0x64a   : > { %3684 = vmatmul.f32.gmra.mxu0 %v3613_v34  ;;  %v3809_v19 = vpop.f32.mrf.mxu2  ;;  %v3865_v5 = vpop.f32.mrf.mxu3 }
 0x64f   : > { %v9617_v29 = vpop.f32.mrf.mxu0  ;;  %v3615_v16 = vpop.f32.mrf.mxu1 }
 0x650   : > { %v3616_v21 = vadd.f32 %v3615_v16, %v3560_v10 }
 0x652   : > { %3687 = vmatmul.f32.gmra.mxu0 %v3616_v21  ;;  %v3812_v7 = vpop.f32.mrf.mxu2  ;;  %v3868_v15 = vpop.f32.mrf.mxu3  ;;  %v3866_v21 = vadd.f32 %v3865_v5, %v3809_v19 }
 0x653   : > { %v3869_v30 = vadd.f32 %v3868_v15, %v3812_v7 }
 0x657   : > { %v9619_v4 = vpop.f32.mrf.mxu0  ;;  %v3912_v39 = vpop.f32.mrf.mxu1 }
 0x658   : > { %v3913_v40 = vadd.f32 %v3912_v39, %v3857_v27 }
 0x65a   : > { %3984 = vmatmul.f32.vlgmr.msra.gmra.mxu0 %v3913_v40  ;;  %v3815_v54 = vpop.f32.mrf.mxu2  ;;  %v3871_v16 = vpop.f32.mrf.mxu3 }
 0x65b   : > { %v3872_v37 = vadd.f32 %v3871_v16, %v3815_v54 }
 0x65f   : > { %v9621_v12 = vpop.f32.mrf.mxu0  ;;  %v3915_v34 = vpop.f32.mrf.mxu1 }
 0x660   : > { %v3916_v42 = vadd.f32 %v3915_v34, %v3860_v0 }
 0x662   : > { %3987 = vmatmul.f32.gmra.mxu0 %v3916_v42  ;;  %v3818_v39 = vpop.f32.mrf.mxu2  ;;  %v3874_v40 = vpop.f32.mrf.mxu3 }
 0x663   : > { %v3875_v5 = vadd.f32 %v3874_v40, %v3818_v39 }
 0x667   : > { %v9623_v23 = vpop.f32.mrf.mxu0  ;;  %v3918_v10 = vpop.f32.mrf.mxu1 }
 0x668   : > { %v3919_v60 = vadd.f32 %v3918_v10, %v3863_v59 }
 0x66a   : > { %3990 = vmatmul.f32.gmra.mxu0 %v3919_v60  ;;  %v3821_v42 = vpop.f32.mrf.mxu2  ;;  %v3877_v59 = vpop.f32.mrf.mxu3 }
 0x66f   : > { %v9625_v63 = vpop.f32.mrf.mxu0  ;;  %v3921_v27 = vpop.f32.mrf.mxu1 }
 0x670   : > { %11570 = vst [vmem:[#allocation91_spill] sm:$0xff] %v9625_v63  ;;  %v3922_v61 = vadd.f32 %v3921_v27, %v3866_v21 }
 0x672   : > { %3993 = vmatmul.f32.gmra.mxu0 %v3922_v61  ;;  %v3824_v15 = vpop.f32.mrf.mxu2  ;;  %v3880_v27 = vpop.f32.mrf.mxu3  ;;  %v3878_v61 = vadd.f32 %v3877_v59, %v3821_v42 }
 0x677   : > { %v9627_v0 = vpop.f32.mrf.mxu0  ;;  %v3924_v34 = vpop.f32.mrf.mxu1 }
 0x678   : > { %11571 = vst [vmem:[#allocation92_spill] sm:$0xff] %v9627_v0  ;;  %v3925_v35 = vadd.f32 %v3924_v34, %v3869_v30 }
 0x67a   : > { %3996 = vmatmul.f32.gmra.mxu0 %v3925_v35  ;;  %v3827_v16 = vpop.f32.mrf.mxu2  ;;  %v3883_v34 = vpop.f32.mrf.mxu3  ;;  %v3881_v35 = vadd.f32 %v3880_v27, %v3824_v15 }
 0x67b   : > { %v3884_v40 = vadd.f32 %v3883_v34, %v3827_v16 }
 0x67f   : > { %v9629_v10 = vpop.f32.mrf.mxu0  ;;  %v3927_v60 = vpop.f32.mrf.mxu1 }
 0x680   : > { %11572 = vst [vmem:[#allocation93_spill] sm:$0xff] %v9629_v10  ;;  %v3928_v19 = vadd.f32 %v3927_v60, %v3872_v37 }
 0x682   : > { %3999 = vmatmul.f32.gmra.mxu0 %v3928_v19  ;;  %v3830_v60 = vpop.f32.mrf.mxu2  ;;  %v3886_v19 = vpop.f32.mrf.mxu3 }
 0x683   : > { %v3887_v59 = vadd.f32 %v3886_v19, %v3830_v60 }
 0x687   : > { %v9631_v63 = vpop.f32.mrf.mxu0  ;;  %v3930_v21 = vpop.f32.mrf.mxu1 }
 0x688   : > { %11573 = vst [vmem:[#allocation94_spill] sm:$0xff] %v9631_v63  ;;  %v3931_v7 = vadd.f32 %v3930_v21, %v3875_v5 }
 0x68a   : > { %4002 = vmatmul.f32.gmra.mxu0 %v3931_v7  ;;  %v3833_v7 = vpop.f32.mrf.mxu2 }
 0x68f   : > { %v9633_v0 = vpop.f32.mrf.mxu0  ;;  %v3933_v30 = vpop.f32.mrf.mxu1 }
 0x690   : > { %11574 = vst [vmem:[#allocation95_spill] sm:$0xff] %v9633_v0  ;;  %v3934_v54 = vadd.f32 %v3933_v30, %v3878_v61  ;;  %v3889_v61 = vpop.f32.mrf.mxu3 }
 0x691   : > { %v3890_v27 = vadd.f32 %v3889_v61, %v3833_v7 }
 0x692   : > { %4005 = vmatmul.f32.gmra.mxu0 %v3934_v54  ;;  %v3836_v34 = vpop.f32.mrf.mxu2 }
 0x697   : > { %v9635_v10 = vpop.f32.mrf.mxu0  ;;  %v3936_v37 = vpop.f32.mrf.mxu1 }
 0x698   : > { %11575 = vst [vmem:[#allocation96_spill] sm:$0xff] %v9635_v10  ;;  %v3937_v39 = vadd.f32 %v3936_v37, %v3881_v35  ;;  %v3892_v37 = vpop.f32.mrf.mxu3 }
 0x69a   : > { %4008 = vmatmul.f32.gmra.mxu0 %v3937_v39  ;;  %v3893_v39 = vadd.f32 %v3892_v37, %v3836_v34 }
 0x69f   : > { %v9637_v5 = vpop.f32.mrf.mxu0  ;;  %v3939_v21 = vpop.f32.mrf.mxu1 }
 0x6a0   : > { %11576 = vst [vmem:[#allocation97_spill] sm:$0xff] %v9637_v5  ;;  %v3940_v42 = vadd.f32 %v3939_v21, %v3884_v40 }
 0x6a2   : > { %4011 = vmatmul.f32.gmra.mxu0 %v3940_v42 }
 0x6a7   : > { %v9639_v30 = vpop.f32.mrf.mxu0  ;;  %v3942_v54 = vpop.f32.mrf.mxu1 }
 0x6a8   : > { %11577 = vst [vmem:[#allocation98_spill] sm:$0xff] %v9639_v30  ;;  %v3943_v15 = vadd.f32 %v3942_v54, %v3887_v59 }
 0x6aa   : > { %4014 = vmatmul.f32.gmra.mxu0 %v3943_v15 }
 0x6af   : > { %v9641_v63 = vpop.f32.mrf.mxu0  ;;  %v3945_v35 = vpop.f32.mrf.mxu1 }
 0x6b0   : > { %v3946_v16 = vadd.f32 %v3945_v35, %v3890_v27 }
 0x6b2   : > { %4017 = vmatmul.f32.gmra.mxu0 %v3946_v16 }
 0x6b7   : > { %v9643_v0 = vpop.f32.mrf.mxu0  ;;  %v3948_v40 = vpop.f32.mrf.mxu1 }
 0x6b8   : > { %v3949_v60 = vadd.f32 %v3948_v40, %v3893_v39  ;;  %v11587_v39 = vld [vmem:[#allocation71_spill] sm:$0xff] }
 0x6b9   : > { %v1701_v40 = vadd.f32 %v8617_v48, %v11587_v39  ;;  %v11591_v48 = vld [vmem:[#allocation42_spill] sm:$0xff]  ;;  %v11592_v39 = vld [vmem:[#allocation76_spill] sm:$0xff] }
 0x6ba   : > { %4020 = vmatmul.f32.gmra.mxu0 %v3949_v60  ;;  %v11588_v60 = vld [vmem:[#allocation75_spill] sm:$0xff]  ;;  %v9680_v30 = vadd.f32 %v11592_v39, %v11591_v48 }
 0x6bf   : > { %v3682_v19 = vpop.f32.mrf.mxu0 }
 0x6c7   : > { %v3685_v21 = vpop.f32.mrf.mxu0 }
 0x6cf   : > { %v3688_v42 = vpop.f32.mrf.mxu0 }
 0x6d7   : > { %v9645_v10 = vpop.f32.mrf.mxu0 }
 0x6d8   : > { %11578 = vst [vmem:[#allocation99_spill] sm:$0xff] %v9645_v10  ;;  %v1704_v10 = vadd.f32 %v8630_v14, %v11588_v60  ;;  %v11593_v14 = vld [vmem:[#allocation45_spill] sm:$0xff] }
 0x6df   : > { %v9647_v59 = vpop.f32.mrf.mxu0 }
 0x6e0   : > { %11579 = vst [vmem:[#allocation100_spill] sm:$0xff] %v9647_v59  ;;  %v11589_v59 = vld [vmem:[#allocation68_spill] sm:$0xff] }
 0x6e7   : > { %v9649_v7 = vpop.f32.mrf.mxu0 }
 0x6e8   : > { %11580 = vst [vmem:[#allocation101_spill] sm:$0xff] %v9649_v7  ;;  %v1698_v7 = vadd.f32 %v8601_v18, %v11589_v59  ;;  %v9684_v18 = vadd.f32 %v8364_v46, %v11593_v14  ;;  %v11595_v59 = vld [vmem:[#allocation48_spill] sm:$0xff]  ;;  %v11597_v46 = vld [vmem:[#allocation61_spill] sm:$0xff] }
 0x6ef   : > { %v9651_v61 = vpop.f32.mrf.mxu0 }
 0x6f0   : > { %11581 = vst [vmem:[#allocation102_spill] sm:$0xff] %v9651_v61  ;;  %v2037_v61 = vadd.f32 %v8819_v52, %v1701_v40  ;;  %v11594_v52 = vld [vmem:[#allocation64_spill] sm:$0xff] }
 0x6f2   : > { %v2370_v5 = vadd.f32 %v9025_v41, %v2037_v61  ;;  %v11596_v61 = vld [vmem:[#allocation51_spill] sm:$0xff] }
 0x6f4   : > { %v2703_v41 = vadd.f32 %v9256_v9, %v2370_v5 }
 0x6f7   : > { %v9653_v54 = vpop.f32.mrf.mxu0 }
 0x6f8   : > { %11582 = vst [vmem:[#allocation103_spill] sm:$0xff] %v9653_v54  ;;  %v2038_v54 = vadd.f32 %v8827_v3, %v1704_v10  ;;  %v1692_v3 = vadd.f32 %v8560_v62, %v11594_v52 }
 0x6fa   : > { %v2034_v62 = vadd.f32 %v8792_v33, %v1692_v3 }
 0x6ff   : > { %v9655_v15 = vpop.f32.mrf.mxu0 }
 0x700   : > { %11583 = vst [vmem:[#allocation104_spill] sm:$0xff] %v9655_v15  ;;  %v11590_v15 = vld [vmem:[#allocation65_spill] sm:$0xff] }
 0x707   : > { %v9657_v27 = vpop.f32.mrf.mxu0 }
 0x708   : > { %11584 = vst [vmem:[#allocation105_spill] sm:$0xff] %v9657_v27  ;;  %v1695_v27 = vadd.f32 %v8583_v20, %v11590_v15  ;;  %v1689_v15 = vadd.f32 %v8530_v13, %v11597_v46  ;;  %v2367_v13 = vadd.f32 %v8985_v31, %v2034_v62  ;;  %v11609_v46 = vld [vmem:[#allocation89_spill] sm:$0xff] }
 0x70a   : > { %v2035_v20 = vadd.f32 %v8803_v38, %v1695_v27 }
 0x70c   : > { %v2368_v40 = vadd.f32 %v9001_v22, %v2035_v20  ;;  %v11605_v20 = vld [vmem:[#allocation3_spill] sm:$0xff] }
 0x70e   : > { %v2701_v33 = vadd.f32 %v9232_v8, %v2368_v40 }
 0x70f   : > { %v9659_v35 = vpop.f32.mrf.mxu0 }
 0x710   : > { %11585 = vst [vmem:[#allocation106_spill] sm:$0xff] %v9659_v35  ;;  %v2036_v35 = vadd.f32 %v8811_v47, %v1698_v7  ;;  %v1674_v7 = vadd.f32 %v8389_v32, %v11595_v59  ;;  %v11599_v32 = vld [vmem:[#allocation58_spill] sm:$0xff] }
 0x711   : > { %v1686_v27 = vadd.f32 %v8496_v56, %v11599_v32  ;;  %v2700_v56 = vadd.f32 %v9219_v50, %v2367_v13  ;;  %v11615_v13 = vld [vmem:[#allocation98_spill] sm:$0xff] }
 0x712   : > { %v2369_v47 = vadd.f32 %v9013_v2, %v2036_v35  ;;  %v3036_v2 = vadd.f32 %v9484_v49, %v2703_v41  ;;  %v11600_v35 = vld [vmem:[#allocation55_spill] sm:$0xff] }
 0x713   : > { %v11606_v41 = vld [vmem:[#allocation39_spill] sm:$0xff] }
 0x714   : > { %v2702_v38 = vadd.f32 %v9244_v17, %v2369_v47  ;;  %v3369_v17 = vadd.f32 %v9621_v12, %v3036_v2  ;;  %v11611_v2 = vld [vmem:[#allocation6_spill] sm:$0xff] }
 0x716   : > { %v3035_v22 = vadd.f32 %v9472_v26, %v2702_v38  ;;  %v3702_v8 = vadd.f32 %v3685_v21, %v3369_v17  ;;  %v11617_v17 = vld [vmem:[#allocation73_spill] sm:$0xff] }
 0x717   : > { %v9661_v16 = vpop.f32.mrf.mxu0 }
 0x718   : > { %11586 = vst [vmem:[#allocation107_spill] sm:$0xff] %v9661_v16  ;;  %v2371_v16 = vadd.f32 %v9037_v44, %v2038_v54  ;;  %v1677_v54 = vadd.f32 %v8409_v45, %v11596_v61  ;;  %v2033_v45 = vadd.f32 %v8778_v53, %v1689_v15  ;;  %v3034_v53 = vadd.f32 %v9460_v51, %v2701_v33  ;;  %v9728_v51 = vld [vmem:[%s11425_s8] ss:$0 sm:$0xff] }
 0x719   : > { %v3368_v31 = vadd.f32 %v9619_v4, %v3035_v22 }
 0x71a   : > { %v2704_v44 = vadd.f32 %v9268_v43, %v2371_v16  ;;  %v11598_v43 = vld [vmem:[#allocation52_spill] sm:$0xff]  ;;  %v2366_v16 = vadd.f32 %v8967_v55, %v2033_v45  ;;  %v2029_v47 = vadd.f32 %v11605_v20, %v1677_v54 }
 0x71b   : > { %v1680_v5 = vadd.f32 %v8427_v6, %v11598_v43  ;;  %v2032_v6 = vadd.f32 %v8760_v57, %v1686_v27  ;;  %v3367_v57 = vadd.f32 %v9617_v29, %v3034_v53  ;;  %v3701_v55 = vadd.f32 %v3682_v19, %v3368_v31  ;;  %v11614_v27 = vld [vmem:[#allocation88_spill] sm:$0xff]  ;;  %v11621_v53 = vld [vmem:[#allocation87_spill] sm:$0xff] }
 0x71c   : > { %v3037_v9 = vadd.f32 %v9496_v36, %v2704_v44  ;;  %v1683_v36 = vadd.f32 %v8457_v24, %v11600_v35  ;;  %v3033_v24 = vadd.f32 %v9447_v28, %v2700_v56  ;;  %v11604_v28 = vld [vmem:[#allocation90_spill] sm:$0xff]  ;;  %v11607_v44 = vld [vmem:[#allocation59_spill] sm:$0xff]  ;;  %v2362_v54 = vadd.f32 %v11611_v2, %v2029_v47  ;;  %v11634_v47 = vld [vmem:[#allocation85_spill] sm:$0xff] }
 0x71d   : > { %v2365_v12 = vadd.f32 %v8947_v58, %v2032_v6  ;;  %v2030_v21 = vadd.f32 %v8713_v25, %v1680_v5  ;;  %v11602_v58 = vld [vmem:[#allocation62_spill] sm:$0xff]  ;;  %v3700_v29 = vadd.f32 %v9643_v0, %v3367_v57  ;;  %v11608_v25 = vld [vmem:[#allocation80_spill] sm:$0xff]  ;;  %v11613_v5 = vld [vmem:[#allocation79_spill] sm:$0xff] }
 0x71e   : > { %v3370_v49 = vadd.f32 %v9623_v23, %v3037_v9  ;;  %v2031_v26 = vadd.f32 %v8736_v1, %v1683_v36  ;;  %v2699_v23 = vadd.f32 %v9205_v11, %v2366_v16  ;;  %v11601_v1 = vld [vmem:[#allocation40_spill] sm:$0xff]  ;;  %v11603_v11 = vld [vmem:[#allocation81_spill] sm:$0xff]  ;;  %v3366_v52 = vadd.f32 %v11604_v28, %v3033_v24  ;;  %v11610_v0 = vld [vmem:[#allocation2_spill] sm:$0xff] }
 0x71f   : > { %v9663_v34 = vpop.f32.mrf.mxu0  ;;  %v2698_v39 = vadd.f32 %v11602_v58, %v2365_v12  ;;  %v11612_v9 = vld [vmem:[#allocation56_spill] sm:$0xff]  ;;  %v11616_v22 = vld [vmem:[#allocation107_spill] sm:$0xff]  ;;  %v11618_v35 = vld [vmem:[#allocation38_spill] sm:$0xff] }
 0x720   : > { %v3703_v60 = vadd.f32 %v3688_v42, %v3370_v49  ;;  %v2364_v42 = vadd.f32 %v11601_v1, %v2031_v26  ;;  %v3032_v14 = vadd.f32 %v11603_v11, %v2699_v23  ;;  %v3699_v62 = vadd.f32 %v9641_v63, %v3366_v52  ;;  %v11619_v36 = vld [vmem:[#allocation53_spill] sm:$0xff]  ;;  %v11620_v16 = vld [vmem:[#allocation78_spill] sm:$0xff]  ;;  %v11629_v58 = vld [vmem:[#allocation96_spill] sm:$0xff] }
 0x721   : > { %v3031_v61 = vadd.f32 %v11608_v25, %v2698_v39  ;;  %v4033_v40 = vadd.f32 %v9663_v34, %v3700_v29  ;;  %v2027_v49 = vadd.f32 %v11617_v17, %v9684_v18  ;;  %v2695_v6 = vadd.f32 %v11619_v36, %v2362_v54  ;;  %v11623_v26 = vld [vmem:[#allocation106_spill] sm:$0xff]  ;;  %v11624_v24 = vld [vmem:[#allocation37_spill] sm:$0xff]  ;;  %v11631_v52 = vld [vmem:[#allocation4_spill] sm:$0xff] }
 0x722   : > { %v2697_v59 = vadd.f32 %v11607_v44, %v2364_v42  ;;  %v3365_v15 = vadd.f32 %v11609_v46, %v3032_v14  ;;  %v4032_v63 = vadd.f32 %v11616_v22, %v3699_v62  ;;  %v11625_v57 = vld [vmem:[#allocation5_spill] sm:$0xff]  ;;  %v11628_v1 = vld [vmem:[#allocation86_spill] sm:$0xff]  ;;  %v11637_v46 = vld [vmem:[#allocation43_spill] sm:$0xff] }
 0x723   : > { %v3364_v45 = vadd.f32 %v11614_v27, %v3031_v61  ;;  %v4050_v23 = vadd.f32 %v9728_v51, %v4033_v40  ;;  %v2360_v18 = vadd.f32 %v11625_v57, %v2027_v49  ;;  %v11630_v11 = vld [vmem:[#allocation105_spill] sm:$0xff]  ;;  %v11641_v54 = vld [vmem:[#allocation103_spill] sm:$0xff]  ;;  %v11645_v22 = vld [vmem:[#allocation102_spill] sm:$0xff] }
 0x724   : > { %v3030_v32 = vadd.f32 %v11613_v5, %v2697_v59  ;;  %v3698_v33 = vadd.f32 %v11615_v13, %v3365_v15  ;;  %v4049_v28 = vadd.f32 %v9728_v51, %v4032_v63  ;;  %v11636_v59 = vld [vmem:[#allocation104_spill] sm:$0xff]  ;;  %v11638_v62 = vld [vmem:[#allocation69_spill] sm:$0xff]  ;;  %v11642_v5 = vld [vmem:[#allocation66_spill] sm:$0xff] }
 0x725   : > { %v11643_v27 = vld [vmem:[#allocation83_spill] sm:$0xff]  ;;  %v11644_v13 = vld [vmem:[#allocation93_spill] sm:$0xff]  ;;  %v11646_v17 = vld [vmem:[#allocation82_spill] sm:$0xff] }
 0x726   : > { %v3363_v31 = vadd.f32 %v11621_v53, %v3030_v32  ;;  %v4031_v12 = vadd.f32 %v11623_v26, %v3698_v33  ;;  %v11648_v36 = vld [vmem:[#allocation101_spill] sm:$0xff]  ;;  %v11651_v26 = vld [vmem:[#allocation99_spill] sm:$0xff]  ;;  %v4054_v57 = vld [vmem:[%s11426_s9] sm:$0xff] }
 0x727   : > { %v4015_v37 = vpop.f32.mrf.mxu0 }
 0x728   : > { %v4034_v19 = vadd.f32 %v4015_v37, %v3701_v55  ;;  %v2028_v37 = vadd.f32 %v11610_v0, %v1674_v7  ;;  %v11626_v55 = vld [vmem:[#allocation49_spill] sm:$0xff]  ;;  %v3696_v39 = vadd.f32 %v11629_v58, %v3363_v31  ;;  %v4048_v61 = vadd.f32 %v9728_v51, %v4031_v12  ;;  %v11650_v31 = vld [vmem:[#allocation100_spill] sm:$0xff]  ;;  %v4063_v58 = vld [vmem:[%s11426_s9 + $0x48] sm:$0xff] }
 0x72a   : > { %v4051_v34 = vadd.f32 %v9728_v51, %v4034_v19  ;;  %v2361_v7 = vadd.f32 %v11618_v35, %v2028_v37  ;;  %v11632_v19 = vld [vmem:[#allocation46_spill] sm:$0xff]  ;;  %v4029_v25 = vadd.f32 %v11636_v59, %v3696_v39  ;;  %v11647_v35 = vld [vmem:[#allocation92_spill] sm:$0xff] }
 0x72b   : > { %v11640_v37 = vld [vmem:[#allocation94_spill] sm:$0xff]  ;;  %v4064_v39 = vld [vmem:[%s11426_s9 + $0x50] sm:$0xff] }
 0x72c   : > { %v4074_v59 = vld [vmem:[%s11426_s9 + $0xa0] sm:$0xff] }
 0x72f   : > { %v4018_v10 = vpop.f32.mrf.mxu0 }
 0x730   : > { %v4035_v50 = vadd.f32 %v4018_v10, %v3702_v8  ;;  %v2363_v10 = vadd.f32 %v11606_v41, %v2030_v21  ;;  %v11622_v8 = vld [vmem:[#allocation97_spill] sm:$0xff] }
 0x732   : > { %v4052_v38 = vadd.f32 %v9728_v51, %v4035_v50  ;;  %v2696_v43 = vadd.f32 %v11612_v9, %v2363_v10  ;;  %v2694_v50 = vadd.f32 %v11626_v55, %v2361_v7  ;;  %v11635_v10 = vld [vmem:[#allocation95_spill] sm:$0xff]  ;;  %v4056_v55 = vld [vmem:[%s11426_s9 + $0x10] sm:$0xff] }
 0x734   : > { %v3029_v56 = vadd.f32 %v11620_v16, %v2696_v43 }
 0x736   : > { %v3362_v42 = vadd.f32 %v11628_v1, %v3029_v56  ;;  %v11649_v56 = vld [vmem:[#allocation91_spill] sm:$0xff]  ;;  %v4061_v1 = vld [vmem:[%s11426_s9 + $0x38] sm:$0xff] }
 0x737   : > { %v4021_v48 = vpop.f32.mrf.mxu0 }
 0x738   : > { %v4036_v4 = vadd.f32 %v4021_v48, %v3703_v60  ;;  %v3697_v60 = vadd.f32 %v11622_v8, %v3364_v45  ;;  %v2026_v48 = vadd.f32 %v11624_v24, %v9680_v30  ;;  %v11633_v30 = vld [vmem:[#allocation72_spill] sm:$0xff]  ;;  %v3695_v44 = vadd.f32 %v11635_v10, %v3362_v42  ;;  %v4062_v42 = vld [vmem:[%s11426_s9 + $0x40] sm:$0xff]  ;;  %v4073_v10 = vld [vmem:[%s11426_s9 + $0x98] sm:$0xff] }
 0x739   : > { %v3027_v20 = vadd.f32 %v11633_v30, %v2694_v50  ;;  %v4058_v50 = vld [vmem:[%s11426_s9 + $0x20] sm:$0xff]  ;;  %v4071_v30 = vld [vmem:[%s11426_s9 + $0x88] sm:$0xff] }
 0x73a   : > { %v4053_v3 = vadd.f32 %v9728_v51, %v4036_v4  ;;  %v11627_v4 = vld [vmem:[#allocation77_spill] sm:$0xff]  ;;  %v4030_v14 = vadd.f32 %v11630_v11, %v3697_v60  ;;  %v2359_v29 = vadd.f32 %v11631_v52, %v2026_v48  ;;  %v4028_v9 = vadd.f32 %v11641_v54, %v3695_v44  ;;  %v4068_v52 = vld [vmem:[%s11426_s9 + $0x70] sm:$0xff] }
 0x73b   : > { %v3028_v21 = vadd.f32 %v11627_v4, %v2695_v6  ;;  %v4059_v4 = vld [vmem:[%s11426_s9 + $0x28] sm:$0xff]  ;;  %v4065_v11 = vld [vmem:[%s11426_s9 + $0x58] sm:$0xff] }
 0x73c   : > { %6358 = vmatpush.msk.msra.mxu2 %vm630_vm2, %v4053_v3  ;;  %v2693_v3 = vadd.f32 %v11632_v19, %v2360_v18  ;;  %v2692_v15 = vadd.f32 %v11637_v46, %v2359_v29  ;;  %v4047_v43 = vadd.f32 %v9728_v51, %v4030_v14  ;;  %v4045_v16 = vadd.f32 %v9728_v51, %v4028_v9  ;;  %v4055_v18 = vld [vmem:[%s11426_s9 + $0x8] sm:$0xff]  ;;  %v4066_v14 = vld [vmem:[%s11426_s9 + $0x60] sm:$0xff]  ;;  %v4069_v29 = vld [vmem:[%s11426_s9 + $0x78] sm:$0xff] }
 0x73d   : > { %v3361_v41 = vadd.f32 %v11634_v47, %v3028_v21  ;;  %v4060_v21 = vld [vmem:[%s11426_s9 + $0x30] sm:$0xff]  ;;  %v4070_v19 = vld [vmem:[%s11426_s9 + $0x80] sm:$0xff] }
 0x73e   : > { %4226 = vmatpush.msra.mxu2 %v4052_v38  ;;  %v3026_v40 = vadd.f32 %v11638_v62, %v2693_v3  ;;  %v11639_v38 = vld [vmem:[#allocation84_spill] sm:$0xff]  ;;  %v3025_v32 = vadd.f32 %v11642_v5, %v2692_v15  ;;  %v4081_v5 = vld [vmem:[%s11426_s9 + $0xd8] sm:$0xff] }
 0x73f   : > { %v3360_v0 = vadd.f32 %v11639_v38, %v3027_v20  ;;  %v3694_v2 = vadd.f32 %v11640_v37, %v3361_v41  ;;  %v4072_v47 = vld [vmem:[%s11426_s9 + $0x90] sm:$0xff] }
 0x740   : > { %4227 = vmatpush.msra.mxu2 %v4051_v34  ;;  %v3359_v45 = vadd.f32 %v11643_v27, %v3026_v40  ;;  %v4046_v34 = vadd.f32 %v9728_v51, %v4029_v25  ;;  %v3358_v49 = vadd.f32 %v11646_v17, %v3025_v32  ;;  %v4076_v15 = vld [vmem:[%s11426_s9 + $0xb0] sm:$0xff]  ;;  %v4077_v40 = vld [vmem:[%s11426_s9 + $0xb8] sm:$0xff]  ;;  %v4082_v27 = vld [vmem:[%s11426_s9 + $0xe0] sm:$0xff] }
 0x741   : > { %v3693_v33 = vadd.f32 %v11644_v13, %v3360_v0  ;;  %v4027_v63 = vadd.f32 %v11645_v22, %v3694_v2  ;;  %v4078_v0 = vld [vmem:[%s11426_s9 + $0xc0] sm:$0xff]  ;;  %v4079_v2 = vld [vmem:[%s11426_s9 + $0xc8] sm:$0xff]  ;;  %v4080_v9 = vld [vmem:[%s11426_s9 + $0xd0] sm:$0xff] }
 0x742   : > { %4228 = vmatpush.msra.mxu2 %v4050_v23  ;;  %v3692_v7 = vadd.f32 %v11647_v35, %v3359_v45  ;;  %v3691_v53 = vadd.f32 %v11649_v56, %v3358_v49  ;;  %v4083_v13 = vld [vmem:[%s11426_s9 + $0xe8] sm:$0xff]  ;;  %v4084_v22 = vld [vmem:[%s11426_s9 + $0xf0] sm:$0xff]  ;;  %v9945_v17 = vld [vmem:[%s11420_s3] ss:$0 sm:$0xff] }
 0x743   : > { %v4026_v6 = vadd.f32 %v11648_v36, %v3693_v33  ;;  %v4044_v60 = vadd.f32 %v9728_v51, %v4027_v63  ;;  %v11652_v49 = vld [vmem:[#allocation21_spill] sm:$0xff] }
 0x744   : > { %4229 = vmatpush.msra.mxu2 %v4049_v28  ;;  %v4025_v8 = vadd.f32 %v11650_v31, %v3692_v7  ;;  %v4024_v12 = vadd.f32 %v11651_v26, %v3691_v53  ;;  %v4067_v28 = vld [vmem:[%s11426_s9 + $0x68] sm:$0xff]  ;;  %v694_v35 = vadd.f32 %v9945_v17, %v11652_v49  ;;  %v11653_v7 = vld [vmem:[#allocation22_spill] sm:$0xff] }
 0x745   : > { %v4043_v23 = vadd.f32 %v9728_v51, %v4026_v6  ;;  %v697_v36 = vadd.f32 %v9945_v17, %v11653_v7 }
 0x746   : > { %4230 = vmatpush.msra.mxu2 %v4048_v61  ;;  %v4042_v24 = vadd.f32 %v9728_v51, %v4025_v8  ;;  %v4041_v48 = vadd.f32 %v9728_v51, %v4024_v12  ;;  %v4057_v51 = vld [vmem:[%s11426_s9 + $0x18] sm:$0xff]  ;;  %v4075_v61 = vld [vmem:[%s11426_s9 + $0xa8] sm:$0xff]  ;;  %v4086_v8 = vld [vmem:[%s11426_s9 + $0x100] sm:$0xff] }
 0x748   : > { %4231 = vmatpush.msra.mxu2 %v4047_v43 }
 0x74a   : > { %4232 = vmatpush.msra.mxu2 %v4046_v34  ;;  %v4085_v34 = vld [vmem:[%s11426_s9 + $0xf8] sm:$0xff] }
 0x74c   : > { %4233 = vmatpush.msra.mxu2 %v4045_v16  ;;  %v11654_v16 = vld [vmem:[#allocation20_spill] sm:$0xff] }
 0x74d   : > { %v691_v56 = vadd.f32 %v9945_v17, %v11654_v16 }
 0x74e   : > { %4234 = vmatpush.msra.mxu2 %v4044_v60  ;;  %v11655_v60 = vld [vmem:[#allocation19_spill] sm:$0xff] }
 0x74f   : > { %v688_v26 = vadd.f32 %v9945_v17, %v11655_v60 }
 0x750   : > { %4235 = vmatpush.msra.mxu2 %v4043_v23 }
 0x752   : > { %4236 = vmatpush.msra.mxu2 %v4042_v24  ;;  %v11656_v24 = vld [vmem:[#allocation18_spill] sm:$0xff] }
 0x754   : > { %4237 = vmatpush.msra.mxu2 %v4041_v48  ;;  %v685_v48 = vadd.f32 %v9945_v17, %v11656_v24  ;;  %v4447_v24 = vld [vmem:[%s11427_s10 + $0x18] sm:$0xff] }
 0x755   : > { %6359 = vmatmul.msk.f32.vlgmr.msra.gmra.mxu2 %vm4095_vm6, %v4054_v57 }
 0x75d   : > { %6360 = vmatmul.msk.f32.gmra.mxu2 %vm4095_vm6, %v4055_v18 }
 0x765   : > { %6361 = vmatmul.msk.f32.gmra.mxu2 %vm4095_vm6, %v4056_v55  ;;  %v11657_v55 = vld [vmem:[#allocation17_spill] sm:$0xff] }
 0x76d   : > { %6362 = vmatmul.msk.f32.gmra.mxu2 %vm4095_vm6, %v4057_v51  ;;  %v682_v51 = vadd.f32 %v9945_v17, %v11657_v55  ;;  %v4450_v55 = vld [vmem:[%s11427_s10 + $0x30] sm:$0xff] }
 0x775   : > { %6363 = vmatmul.msk.f32.gmra.mxu2 %vm4095_vm6, %v4058_v50 }
 0x77d   : > { %6364 = vmatmul.msk.f32.gmra.mxu2 %vm4095_vm6, %v4059_v4 }
 0x785   : > { %6365 = vmatmul.msk.f32.gmra.mxu2 %vm4095_vm6, %v4060_v21 }
 0x78d   : > { %6366 = vmatmul.msk.f32.gmra.mxu2 %vm4095_vm6, %v4061_v1  ;;  %v11658_v1 = vld [vmem:[#allocation16_spill] sm:$0xff] }
 0x795   : > { %6367 = vmatmul.msk.f32.gmra.mxu2 %vm4095_vm6, %v4062_v42  ;;  %v679_v42 = vadd.f32 %v9945_v17, %v11658_v1  ;;  %v4453_v1 = vld [vmem:[%s11427_s10 + $0x48] sm:$0xff] }
 0x79d   : > { %6368 = vmatmul.msk.f32.gmra.mxu2 %vm4095_vm6, %v4063_v58 }
 0x7a5   : > { %6369 = vmatmul.msk.f32.gmra.mxu2 %vm4095_vm6, %v4064_v39 }
 0x7ad   : > { %6370 = vmatmul.msk.f32.gmra.mxu2 %vm4095_vm6, %v4065_v11  ;;  %v4087_v11 = vld [vmem:[%s11426_s9 + $0x108] sm:$0xff] }
 0x7b5   : > { %6371 = vmatmul.msk.f32.gmra.mxu2 %vm4095_vm6, %v4066_v14  ;;  %v11659_v14 = vld [vmem:[#allocation15_spill] sm:$0xff] }
 0x7bd   : > { %6372 = vmatmul.msk.f32.gmra.mxu2 %vm4095_vm6, %v4067_v28  ;;  %v676_v28 = vadd.f32 %v9945_v17, %v11659_v14  ;;  %v4094_v14 = vld [vmem:[%s11426_s9 + $0x140] sm:$0xf] }
 0x7c5   : > { %6373 = vmatmul.msk.f32.gmra.mxu2 %vm4095_vm6, %v4068_v52 }
 0x7cd   : > { %6374 = vmatmul.msk.f32.gmra.mxu2 %vm4095_vm6, %v4069_v29 }
 0x7d5   : > { %6375 = vmatmul.msk.f32.gmra.mxu2 %vm4095_vm6, %v4070_v19  ;;  %v11660_v19 = vld [vmem:[#allocation14_spill] sm:$0xff] }
 0x7d8   : > { %v9869_v3 = vpop.f32.mrf.mxu2 }
 0x7dd   : > { %6376 = vmatmul.msk.f32.gmra.mxu2 %vm4095_vm6, %v4071_v30  ;;  %v673_v30 = vadd.f32 %v9945_v17, %v11660_v19 }
 0x7e0   : > { %v9875_v20 = vpop.f32.mrf.mxu2 }
 0x7e5   : > { %6377 = vmatmul.msk.f32.gmra.mxu2 %vm4095_vm6, %v4072_v47 }
 0x7e8   : > { %v9881_v41 = vpop.f32.mrf.mxu2 }
 0x7ed   : > { %6378 = vmatmul.msk.f32.gmra.mxu2 %vm4095_vm6, %v4073_v10 }
 0x7f0   : > { %v9887_v44 = vpop.f32.mrf.mxu2 }
 0x7f5   : > { %6379 = vmatmul.msk.f32.gmra.mxu2 %vm4095_vm6, %v4074_v59  ;;  %v11661_v59 = vld [vmem:[#allocation13_spill] sm:$0xff] }
 0x7f8   : > { %v9893_v25 = vpop.f32.mrf.mxu2 }
 0x7fd   : > { %6380 = vmatmul.msk.f32.gmra.mxu2 %vm4095_vm6, %v4075_v61  ;;  %v670_v61 = vadd.f32 %v9945_v17, %v11661_v59  ;;  %v4465_v59 = vld [vmem:[%s11427_s10 + $0xa8] sm:$0xff] }
 0x800   : > { %v9899_v46 = vpop.f32.mrf.mxu2 }
 0x805   : > { %6381 = vmatmul.msk.f32.gmra.mxu2 %vm4095_vm6, %v4076_v15 }
 0x808   : > { %v9905_v62 = vpop.f32.mrf.mxu2 }
 0x80d   : > { %6382 = vmatmul.msk.f32.gmra.mxu2 %vm4095_vm6, %v4077_v40 }
 0x810   : > { %v4260_v38 = vpop.f32.mrf.mxu2 }
 0x811   : > { %v4369_v15 = vadd.f32 %v4260_v38, %v673_v30  ;;  %v11663_v38 = vld [vmem:[#allocation11_spill] sm:$0xff]  ;;  %v4462_v30 = vld [vmem:[%s11427_s10 + $0x90] sm:$0xff] }
 0x815   : > { %6383 = vmatmul.msk.f32.gmra.mxu2 %vm4095_vm6, %v4078_v0 }
 0x818   : > { %v4263_v37 = vpop.f32.mrf.mxu2 }
 0x819   : > { %v4370_v47 = vadd.f32 %v4263_v37, %v676_v28  ;;  %v4368_v37 = vadd.f32 %v9905_v62, %v670_v61 }
 0x81d   : > { %6384 = vmatmul.msk.f32.gmra.mxu2 %vm4095_vm6, %v4079_v2  ;;  %v11662_v2 = vld [vmem:[#allocation12_spill] sm:$0xff] }
 0x820   : > { %v4266_v54 = vpop.f32.mrf.mxu2 }
 0x821   : > { %v4371_v52 = vadd.f32 %v4266_v54, %v679_v42  ;;  %v667_v54 = vadd.f32 %v9945_v17, %v11662_v2  ;;  %v4093_v42 = vld [vmem:[%s11426_s9 + $0x138] sm:$0xff] }
 0x823   : > { %v9995_v40 = vmax.f32 %v4371_v52, 0.0  ;;  %v4459_v52 = vld [vmem:[%s11427_s10 + $0x78] sm:$0xff] }
 0x825   : > { %6385 = vmatmul.msk.f32.gmra.mxu2 %vm4095_vm6, %v4080_v9  ;;  %v10003_v9 = vmax.f32 %v4370_v47, 0.0 }
 0x828   : > { %v4269_v43 = vpop.f32.mrf.mxu2 }
 0x829   : > { %v4372_v58 = vadd.f32 %v4269_v43, %v682_v51  ;;  %v4088_v43 = vld [vmem:[%s11426_s9 + $0x110] sm:$0xff] }
 0x82a   : > { %v4092_v51 = vld [vmem:[%s11426_s9 + $0x130] sm:$0xff] }
 0x82b   : > { %v9989_v10 = vmax.f32 %v4372_v58, 0.0 }
 0x82d   : > { %6386 = vmatmul.msk.f32.gmra.mxu2 %vm4095_vm6, %v4081_v5  ;;  %v664_v5 = vadd.f32 %v9945_v17, %v11663_v38 }
 0x830   : > { %v4272_v32 = vpop.f32.mrf.mxu2 }
 0x831   : > { %v4373_v50 = vadd.f32 %v4272_v32, %v685_v48  ;;  %v4367_v32 = vadd.f32 %v9899_v46, %v667_v54  ;;  %v4091_v48 = vld [vmem:[%s11426_s9 + $0x128] sm:$0xff]  ;;  %v4471_v54 = vld [vmem:[%s11427_s10 + $0xd8] sm:$0xff] }
 0x833   : > { %v9984_v29 = vmax.f32 %v4373_v50, 0.0 }
 0x835   : > { %6387 = vmatmul.msk.f32.gmra.mxu2 %vm4095_vm6, %v4082_v27  ;;  %v10012_v27 = vmax.f32 %v4369_v15, 0.0  ;;  %v4468_v15 = vld [vmem:[%s11427_s10 + $0xc0] sm:$0xff] }
 0x838   : > { %v4275_v45 = vpop.f32.mrf.mxu2 }
 0x839   : > { %v4374_v57 = vadd.f32 %v4275_v45, %v688_v26  ;;  %v11664_v45 = vld [vmem:[#allocation10_spill] sm:$0xff] }
 0x83a   : > { %v661_v62 = vadd.f32 %v9945_v17, %v11664_v45 }
 0x83b   : > { %v9976_v39 = vmax.f32 %v4374_v57, 0.0 }
 0x83c   : > { %v4365_v46 = vadd.f32 %v9887_v44, %v661_v62  ;;  %v11667_v44 = vld [vmem:[#allocation7_spill] sm:$0xff]  ;;  %v11669_v62 = vld [vmem:[#allocation44_spill] sm:$0xff] }
 0x83d   : > { %6388 = vmatmul.msk.f32.gmra.mxu2 %vm4095_vm6, %v4083_v13  ;;  %v4366_v13 = vadd.f32 %v9893_v25, %v664_v5  ;;  %v652_v16 = vadd.f32 %v9945_v17, %v11667_v44  ;;  %v4477_v5 = vld [vmem:[%s11427_s10 + $0x108] sm:$0xff] }
 0x840   : > { %v4278_v33 = vpop.f32.mrf.mxu2 }
 0x841   : > { %v4375_v12 = vadd.f32 %v4278_v33, %v691_v56  ;;  %v10018_v33 = vmax.f32 %v4368_v37, 0.0 }
 0x843   : > { %v9969_v4 = vmax.f32 %v4375_v12, 0.0 }
 0x845   : > { %6389 = vmatmul.msk.f32.gmra.mxu2 %vm4095_vm6, %v4084_v22  ;;  %v11665_v22 = vld [vmem:[#allocation9_spill] sm:$0xff] }
 0x848   : > { %v4281_v63 = vpop.f32.mrf.mxu2 }
 0x849   : > { %v4376_v53 = vadd.f32 %v4281_v63, %v694_v35  ;;  %v658_v63 = vadd.f32 %v9945_v17, %v11665_v22  ;;  %v11666_v35 = vld [vmem:[#allocation8_spill] sm:$0xff] }
 0x84a   : > { %v655_v25 = vadd.f32 %v9945_v17, %v11666_v35 }
 0x84b   : > { %v9963_v18 = vmax.f32 %v4376_v53, 0.0  ;;  %v4364_v7 = vadd.f32 %v9881_v41, %v658_v63  ;;  %v10042_v53 = vmax.f32 %v4365_v46, 0.0  ;;  %v11670_v63 = vld [vmem:[#allocation36_spill] sm:$0xff] }
 0x84c   : > { %v4363_v56 = vadd.f32 %v9875_v20, %v655_v25  ;;  %v4090_v20 = vld [vmem:[%s11426_s9 + $0x120] sm:$0xff]  ;;  %v739_v46 = vadd.f32 %v9945_v17, %v11670_v63 }
 0x84d   : > { %6390 = vmatmul.msk.f32.gmra.mxu2 %vm4095_vm6, %v4085_v34  ;;  %v10025_v34 = vmax.f32 %v4367_v32, 0.0  ;;  %v10046_v41 = vmax.f32 %v4364_v7, 0.0  ;;  %v11668_v32 = vld [vmem:[#allocation41_spill] sm:$0xff]  ;;  %v4480_v7 = vld [vmem:[%s11427_s10 + $0x120] sm:$0xf] }
 0x84e   : > { %v742_v45 = vadd.f32 %v9945_v17, %v11668_v32 }
 0x850   : > { %v4284_v6 = vpop.f32.mrf.mxu2 }
 0x851   : > { %v4377_v31 = vadd.f32 %v4284_v6, %v697_v36  ;;  %v10033_v36 = vmax.f32 %v4366_v13, 0.0  ;;  %v4089_v6 = vld [vmem:[%s11426_s9 + $0x118] sm:$0xff]  ;;  %v745_v13 = vadd.f32 %v9945_v17, %v11669_v62  ;;  %v11678_v62 = vld [vmem:[#allocation28_spill] sm:$0xff] }
 0x853   : > { %v9959_v23 = vmax.f32 %v4377_v31, 0.0  ;;  %v4362_v31 = vadd.f32 %v9869_v3, %v652_v16  ;;  %v4444_v3 = vld [vmem:[%s11427_s10] sm:$0xff] }
 0x855   : > { %6391 = vmatmul.msk.f32.gmra.mxu2 %vm4095_vm6, %v4086_v8  ;;  %4526 = vmatpush.msrb.mxu3 %v9959_v23  ;;  %v10050_v8 = vmax.f32 %v4363_v56, 0.0  ;;  %v10055_v26 = vmax.f32 %v4362_v31, 0.0  ;;  %v11672_v31 = vld [vmem:[#allocation34_spill] sm:$0xff] }
 0x857   : > { %4527 = vmatpush.msrb.mxu3 %v9963_v18 }
 0x858   : > { %v9972_v21 = vpop.f32.mrf.mxu2 }
 0x859   : > { %4528 = vmatpush.msrb.mxu3 %v9969_v4 }
 0x85b   : > { %4529 = vmatpush.msrb.mxu3 %v9976_v39 }
 0x85d   : > { %6392 = vmatmul.msk.f32.gmra.mxu2 %vm4095_vm6, %v4087_v11  ;;  %4530 = vmatpush.msrb.mxu3 %v9984_v29  ;;  %v4456_v11 = vld [vmem:[%s11427_s10 + $0x60] sm:$0xff] }
 0x85f   : > { %4531 = vmatpush.msrb.mxu3 %v9989_v10 }
 0x860   : > { %v9998_v0 = vpop.f32.mrf.mxu2 }
 0x861   : > { %4532 = vmatpush.msrb.mxu3 %v9995_v40 }
 0x863   : > { %4533 = vmatpush.msrb.mxu3 %v10003_v9 }
 0x865   : > { %6393 = vmatmul.msk.f32.gmra.mxu2 %vm4095_vm6, %v4088_v43  ;;  %4534 = vmatpush.msrb.mxu3 %v10012_v27  ;;  %v4474_v43 = vld [vmem:[%s11427_s10 + $0xf0] sm:$0xff] }
 0x867   : > { %4535 = vmatpush.msrb.mxu3 %v10018_v33 }
 0x868   : > { %v10028_v49 = vpop.f32.mrf.mxu2 }
 0x869   : > { %4536 = vmatpush.msrb.mxu3 %v10025_v34 }
 0x86b   : > { %4537 = vmatpush.msrb.mxu3 %v10033_v36 }
 0x86d   : > { %6394 = vmatmul.msk.f32.gmra.mxu2 %vm4095_vm6, %v4089_v6  ;;  %4538 = vmatpush.msrb.mxu3 %v10042_v53  ;;  %v11671_v6 = vld [vmem:[#allocation35_spill] sm:$0xff] }
 0x86e   : > { %v736_v44 = vadd.f32 %v9945_v17, %v11671_v6 }
 0x86f   : > { %4539 = vmatpush.msrb.mxu3 %v10046_v41 }
 0x870   : > { %v10053_v60 = vpop.f32.mrf.mxu2 }
 0x871   : > { %4540 = vmatpush.msrb.mxu3 %v10050_v8 }
 0x873   : > { %4541 = vmatpush.msrb.mxu3 %v10055_v26 }
 0x874   : > { %4542 = vmatmul.f32.vlgmr.msrb.gmra.mxu3 %v4444_v3  ;;  %v733_v3 = vadd.f32 %v9945_v17, %v11672_v31 }
 0x875   : > { %4773 = vmatpush.msra.mxu3 %v9959_v23  ;;  %6395 = vmatmul.msk.f32.gmra.mxu2 %vm4095_vm6, %v4090_v20 }
 0x877   : > { %4774 = vmatpush.msra.mxu3 %v9963_v18 }
 0x878   : > { %v10068_v12 = vpop.f32.mrf.mxu2 }
 0x879   : > { %4775 = vmatpush.msra.mxu3 %v9969_v4 }
 0x87b   : > { %4776 = vmatpush.msra.mxu3 %v9976_v39 }
 0x87c   : > { %4545 = vmatmul.f32.gmra.mxu3 %v4447_v24 }
 0x87d   : > { %4777 = vmatpush.msra.mxu3 %v9984_v29  ;;  %6396 = vmatmul.msk.f32.gmra.mxu2 %vm4095_vm6, %v4091_v48  ;;  %v11673_v48 = vld [vmem:[#allocation33_spill] sm:$0xff] }
 0x87f   : > { %4778 = vmatpush.msra.mxu3 %v9989_v10 }
 0x880   : > { %v10081_v57 = vpop.f32.mrf.mxu2 }
 0x881   : > { %4779 = vmatpush.msra.mxu3 %v9995_v40 }
 0x883   : > { %4780 = vmatpush.msra.mxu3 %v10003_v9 }
 0x884   : > { %4548 = vmatmul.f32.gmra.mxu3 %v4450_v55  ;;  %v730_v55 = vadd.f32 %v9945_v17, %v11673_v48 }
 0x885   : > { %4781 = vmatpush.msra.mxu3 %v10012_v27  ;;  %6397 = vmatmul.msk.f32.gmra.mxu2 %vm4095_vm6, %v4092_v51 }
 0x887   : > { %4782 = vmatpush.msra.mxu3 %v10018_v33 }
 0x888   : > { %v10094_v50 = vpop.f32.mrf.mxu2 }
 0x889   : > { %4783 = vmatpush.msra.mxu3 %v10025_v34 }
 0x88b   : > { %4784 = vmatpush.msra.mxu3 %v10033_v36 }
 0x88c   : > { %4551 = vmatmul.f32.gmra.mxu3 %v4453_v1 }
 0x88d   : > { %4785 = vmatpush.msra.mxu3 %v10042_v53  ;;  %6398 = vmatmul.msk.f32.gmra.mxu2 %vm4095_vm6, %v4093_v42 }
 0x88f   : > { %4786 = vmatpush.msra.mxu3 %v10046_v41 }
 0x890   : > { %v10107_v58 = vpop.f32.mrf.mxu2 }
 0x891   : > { %4787 = vmatpush.msra.mxu3 %v10050_v8 }
 0x893   : > { %4788 = vmatpush.msra.mxu3 %v10055_v26 }
 0x894   : > { %4554 = vmatmul.f32.gmra.mxu3 %v4456_v11  ;;  %v11674_v11 = vld [vmem:[#allocation32_spill] sm:$0xff] }
 0x895   : > { %5033 = vmatpush.msrb.mxu3 %v9959_v23  ;;  %6399 = vmatmul.msk.f32.gmra.mxu2 %vm4095_vm6, %v4094_v14  ;;  %v727_v14 = vadd.f32 %v9945_v17, %v11674_v11  ;;  %v11685_v11 = vld [vmem:[#allocation74_spill] sm:$0xff] }
 0x897   : > { %5034 = vmatpush.msrb.mxu3 %v9963_v18 }
 0x898   : > { %v10121_v28 = vpop.f32.mrf.mxu2 }
 0x899   : > { %5035 = vmatpush.msrb.mxu3 %v9969_v4 }
 0x89b   : > { %5036 = vmatpush.msrb.mxu3 %v9976_v39 }
 0x89c   : > { %4557 = vmatmul.f32.gmra.mxu3 %v4459_v52 }
 0x89d   : > { %5037 = vmatpush.msrb.mxu3 %v9984_v29 }
 0x89f   : > { %5038 = vmatpush.msrb.mxu3 %v9989_v10 }
 0x8a0   : > { %v4314_v19 = vpop.f32.mrf.mxu2 }
 0x8a1   : > { %5039 = vmatpush.msrb.mxu3 %v9995_v40 }
 0x8a3   : > { %5040 = vmatpush.msrb.mxu3 %v10003_v9 }
 0x8a4   : > { %4560 = vmatmul.f32.gmra.mxu3 %v4462_v30 }
 0x8a5   : > { %5041 = vmatpush.msrb.mxu3 %v10012_v27 }
 0x8a7   : > { %5042 = vmatpush.msrb.mxu3 %v10018_v33 }
 0x8a8   : > { %v4317_v47 = vpop.f32.mrf.mxu2 }
 0x8a9   : > { %5043 = vmatpush.msrb.mxu3 %v10025_v34  ;;  %v4388_v52 = vadd.f32 %v4317_v47, %v730_v55  ;;  %v11676_v47 = vld [vmem:[#allocation30_spill] sm:$0xff] }
 0x8aa   : > { %v11684_v55 = vld [vmem:[#allocation70_spill] sm:$0xff] }
 0x8ab   : > { %5044 = vmatpush.msrb.mxu3 %v10033_v36 }
 0x8ac   : > { %4563 = vmatmul.f32.gmra.mxu3 %v4465_v59  ;;  %v6414_v59 = vld [vmem:[%s11427_s10 + $0x138] sm:$0xff] }
 0x8ad   : > { %5045 = vmatpush.msrb.mxu3 %v10042_v53 }
 0x8af   : > { %5046 = vmatpush.msrb.mxu3 %v10046_v41 }
 0x8b0   : > { %v4320_v61 = vpop.f32.mrf.mxu2 }
 0x8b1   : > { %5047 = vmatpush.msrb.mxu3 %v10050_v8  ;;  %v4389_v51 = vadd.f32 %v4320_v61, %v733_v3  ;;  %v11675_v61 = vld [vmem:[#allocation31_spill] sm:$0xff] }
 0x8b3   : > { %5048 = vmatpush.msrb.mxu3 %v10055_v26 }
 0x8b4   : > { %4566 = vmatmul.f32.gmra.mxu3 %v4468_v15  ;;  %v724_v15 = vadd.f32 %v9945_v17, %v11675_v61 }
 0x8b8   : > { %v4323_v2 = vpop.f32.mrf.mxu2 }
 0x8b9   : > { %v4390_v20 = vadd.f32 %v4323_v2, %v736_v44  ;;  %v4387_v2 = vadd.f32 %v4314_v19, %v727_v14  ;;  %v11677_v19 = vld [vmem:[#allocation29_spill] sm:$0xff]  ;;  %v11682_v44 = vld [vmem:[#allocation24_spill] sm:$0xff]  ;;  %v772_v14 = vadd.f32 %v9945_v17, %v11685_v11 }
 0x8bb   : > { %v10186_v30 = vmax.f32 %v4390_v20, 0.0 }
 0x8bc   : > { %4569 = vmatmul.f32.gmra.mxu3 %v4471_v54  ;;  %v10195_v54 = vmax.f32 %v4389_v51, 0.0  ;;  %v769_v51 = vadd.f32 %v9945_v17, %v11684_v55  ;;  %v4467_v55 = vld [vmem:[%s11427_s10 + $0xb8] sm:$0xff] }
 0x8c0   : > { %v4326_v37 = vpop.f32.mrf.mxu2 }
 0x8c1   : > { %v4391_v16 = vadd.f32 %v4326_v37, %v739_v46  ;;  %v721_v37 = vadd.f32 %v9945_v17, %v11676_v47  ;;  %v11687_v47 = vld [vmem:[#allocation63_spill] sm:$0xff] }
 0x8c3   : > { %v10178_v1 = vmax.f32 %v4391_v16, 0.0  ;;  %v4385_v32 = vadd.f32 %v10107_v58, %v721_v37  ;;  %v11679_v58 = vld [vmem:[#allocation27_spill] sm:$0xff] }
 0x8c4   : > { %4572 = vmatmul.f32.gmra.mxu3 %v4474_v43  ;;  %v4386_v43 = vadd.f32 %v10121_v28, %v724_v15 }
 0x8c5   : > { %v10228_v46 = vmax.f32 %v4385_v32, 0.0 }
 0x8c8   : > { %v4329_v38 = vpop.f32.mrf.mxu2 }
 0x8c9   : > { %v4392_v35 = vadd.f32 %v4329_v38, %v742_v45  ;;  %v10202_v38 = vmax.f32 %v4388_v52, 0.0  ;;  %v10210_v45 = vmax.f32 %v4387_v2, 0.0 }
 0x8cb   : > { %v10172_v24 = vmax.f32 %v4392_v35, 0.0 }
 0x8cc   : > { %4575 = vmatmul.f32.gmra.mxu3 %v4477_v5  ;;  %v718_v5 = vadd.f32 %v9945_v17, %v11677_v19  ;;  %v11688_v19 = vld [vmem:[#allocation60_spill] sm:$0xff] }
 0x8d0   : > { %v4332_v22 = vpop.f32.mrf.mxu2 }
 0x8d1   : > { %v4393_v25 = vadd.f32 %v4332_v22, %v745_v13  ;;  %v4384_v13 = vadd.f32 %v10094_v50, %v718_v5  ;;  %v10220_v22 = vmax.f32 %v4386_v43, 0.0  ;;  %v11680_v50 = vld [vmem:[#allocation26_spill] sm:$0xff]  ;;  %v760_v5 = vadd.f32 %v9945_v17, %v11688_v19 }
 0x8d2   : > { %v709_v35 = vadd.f32 %v9945_v17, %v11680_v50  ;;  %v11691_v50 = vld [vmem:[#allocation50_spill] sm:$0xff] }
 0x8d3   : > { %v10168_v56 = vmax.f32 %v4393_v25, 0.0  ;;  %v10236_v25 = vmax.f32 %v4384_v13, 0.0  ;;  %v6427_v19 = vld [vmem:[%s11427_s10 + $0x1a0] sm:$0xff] }
 0x8d4   : > { %4578 = vmatmul.f32.gmra.mxu3 %v4480_v7 }
 0x8d5   : > { %4582 = vmatpush.msrb.mxu1 %v10168_v56  ;;  %5349 = vmatpush.msrb.mxu2 %v10168_v56 }
 0x8d7   : > { %4583 = vmatpush.msrb.mxu1 %v10172_v24  ;;  %5350 = vmatpush.msrb.mxu2 %v10172_v24 }
 0x8d8   : > { %v10182_v42 = vpop.f32.mrf.mxu2 }
 0x8d9   : > { %4584 = vmatpush.msrb.mxu1 %v10178_v1  ;;  %5351 = vmatpush.msrb.mxu2 %v10178_v1 }
 0x8db   : > { %4585 = vmatpush.msrb.mxu1 %v10186_v30  ;;  %5352 = vmatpush.msrb.mxu2 %v10186_v30 }
 0x8dc   : > { %4789 = vmatmul.f32.vlgmr.msra.gmra.mxu3 %v6414_v59  ;;  %v11686_v59 = vld [vmem:[#allocation67_spill] sm:$0xff] }
 0x8dd   : > { %4586 = vmatpush.msrb.mxu1 %v10195_v54  ;;  %5293 = vmatpush.msra.mxu3 %v9959_v23  ;;  %v715_v23 = vadd.f32 %v9945_v17, %v11678_v62  ;;  %v766_v61 = vadd.f32 %v9945_v17, %v11686_v59  ;;  %v6438_v59 = vld [vmem:[%s11427_s10 + $0x1f8] sm:$0xff] }
 0x8de   : > { %5353 = vmatpush.msrb.mxu2 %v10195_v54 }
 0x8df   : > { %4587 = vmatpush.msrb.mxu1 %v10202_v38  ;;  %5294 = vmatpush.msra.mxu3 %v9963_v18  ;;  %v712_v18 = vadd.f32 %v9945_v17, %v11679_v58  ;;  %v4383_v63 = vadd.f32 %v10081_v57, %v715_v23  ;;  %v11681_v57 = vld [vmem:[#allocation25_spill] sm:$0xff]  ;;  %v11690_v58 = vld [vmem:[#allocation54_spill] sm:$0xff] }
 0x8e0   : > { %5354 = vmatpush.msrb.mxu2 %v10202_v38  ;;  %v10215_v28 = vpop.f32.mrf.mxu2  ;;  %v706_v7 = vadd.f32 %v9945_v17, %v11681_v57 }
 0x8e1   : > { %4588 = vmatpush.msrb.mxu1 %v10210_v45  ;;  %5295 = vmatpush.msra.mxu3 %v9969_v4  ;;  %v4382_v4 = vadd.f32 %v10068_v12, %v712_v18  ;;  %v10244_v6 = vmax.f32 %v4383_v63, 0.0  ;;  %v754_v18 = vadd.f32 %v9945_v17, %v11690_v58  ;;  %v4479_v58 = vld [vmem:[%s11427_s10 + $0x118] sm:$0xff] }
 0x8e2   : > { %5355 = vmatpush.msrb.mxu2 %v10210_v45  ;;  %v4380_v16 = vadd.f32 %v10028_v49, %v706_v7  ;;  %v11692_v7 = vld [vmem:[#allocation47_spill] sm:$0xff] }
 0x8e3   : > { %4589 = vmatpush.msrb.mxu1 %v10220_v22  ;;  %5296 = vmatpush.msra.mxu3 %v9976_v39  ;;  %v4381_v39 = vadd.f32 %v10053_v60, %v709_v35  ;;  %v10254_v31 = vmax.f32 %v4382_v4, 0.0  ;;  %v11683_v60 = vld [vmem:[#allocation23_spill] sm:$0xff]  ;;  %v751_v35 = vadd.f32 %v9945_v17, %v11691_v50 }
 0x8e4   : > { %5356 = vmatpush.msrb.mxu2 %v10220_v22  ;;  %v10268_v48 = vmax.f32 %v4380_v16, 0.0  ;;  %v4472_v16 = vld [vmem:[%s11427_s10 + $0xe0] sm:$0xff] }
 0x8e5   : > { %4590 = vmatpush.msrb.mxu1 %v10228_v46  ;;  %5297 = vmatpush.msra.mxu3 %v9984_v29  ;;  %v703_v29 = vadd.f32 %v9945_v17, %v11682_v44  ;;  %v10262_v20 = vmax.f32 %v4381_v39, 0.0  ;;  %v4395_v39 = vadd.f32 %v10215_v28, %v751_v35  ;;  %v4446_v28 = vld [vmem:[%s11427_s10 + $0x10] sm:$0xff] }
 0x8e6   : > { %5357 = vmatpush.msrb.mxu2 %v10228_v46  ;;  %v6433_v35 = vld [vmem:[%s11427_s10 + $0x1d0] sm:$0xff] }
 0x8e7   : > { %4591 = vmatpush.msrb.mxu1 %v10236_v25  ;;  %5298 = vmatpush.msra.mxu3 %v9989_v10  ;;  %v700_v10 = vadd.f32 %v9945_v17, %v11683_v60  ;;  %v4379_v3 = vadd.f32 %v9998_v0, %v703_v29  ;;  %v10382_v29 = vmax.f32 %v4395_v39, 0.0  ;;  %v6420_v60 = vld [vmem:[%s11427_s10 + $0x168] sm:$0xff] }
 0x8e8   : > { %5358 = vmatpush.msrb.mxu2 %v10236_v25  ;;  %v10249_v12 = vpop.f32.mrf.mxu2  ;;  %v6436_v39 = vld [vmem:[%s11427_s10 + $0x1e8] sm:$0xff] }
 0x8e9   : > { %4592 = vmatpush.msrb.mxu1 %v10244_v6  ;;  %5299 = vmatpush.msra.mxu3 %v9995_v40  ;;  %v4378_v49 = vadd.f32 %v9972_v21, %v700_v10  ;;  %v10273_v40 = vmax.f32 %v4379_v3, 0.0  ;;  %v4445_v21 = vld [vmem:[%s11427_s10 + $0x8] sm:$0xff]  ;;  %v4396_v4 = vadd.f32 %v10249_v12, %v754_v18  ;;  %v4475_v10 = vld [vmem:[%s11427_s10 + $0xf8] sm:$0xff]  ;;  %v6447_v18 = vld [vmem:[%s11427_s10 + $0x240] sm:$0xff] }
 0x8ea   : > { %5359 = vmatpush.msrb.mxu2 %v10244_v6  ;;  %v4455_v3 = vld [vmem:[%s11427_s10 + $0x58] sm:$0xff] }
 0x8eb   : > { %4593 = vmatpush.msrb.mxu1 %v10254_v31  ;;  %5300 = vmatpush.msra.mxu3 %v10003_v9  ;;  %v10280_v9 = vmax.f32 %v4378_v49, 0.0  ;;  %v10378_v12 = vmax.f32 %v4396_v4, 0.0  ;;  %v4482_v4 = vld [vmem:[%s11427_s10 + $0x130] sm:$0xf] }
 0x8ec   : > { %5360 = vmatpush.msrb.mxu2 %v10254_v31 }
 0x8ed   : > { %4594 = vmatpush.msrb.mxu1 %v10262_v20  ;;  %5301 = vmatpush.msra.mxu3 %v10012_v27 }
 0x8ee   : > { %5361 = vmatpush.msrb.mxu2 %v10262_v20 }
 0x8ef   : > { %4595 = vmatpush.msrb.mxu1 %v10268_v48  ;;  %5302 = vmatpush.msra.mxu3 %v10018_v33  ;;  %v4448_v33 = vld [vmem:[%s11427_s10 + $0x20] sm:$0xff] }
 0x8f0   : > { %5362 = vmatpush.msrb.mxu2 %v10268_v48  ;;  %v10278_v0 = vpop.f32.mrf.mxu2 }
 0x8f1   : > { %4596 = vmatpush.msrb.mxu1 %v10273_v40  ;;  %5303 = vmatpush.msra.mxu3 %v10025_v34 }
 0x8f2   : > { %5363 = vmatpush.msrb.mxu2 %v10273_v40 }
 0x8f3   : > { %4597 = vmatpush.msrb.mxu1 %v10280_v9  ;;  %5304 = vmatpush.msra.mxu3 %v10033_v36  ;;  %v4451_v36 = vld [vmem:[%s11427_s10 + $0x38] sm:$0xff] }
 0x8f4   : > { %5364 = vmatpush.msrb.mxu2 %v10280_v9  ;;  %4598 = vmatmul.f32.vlgmr.msrb.gmra.mxu1 %v4445_v21  ;;  %v4481_v21 = vld [vmem:[%s11427_s10 + $0x128] sm:$0xf] }
 0x8f5   : > { %4829 = vmatpush.msra.mxu1 %v10168_v56  ;;  %5305 = vmatpush.msra.mxu3 %v10042_v53 }
 0x8f7   : > { %4830 = vmatpush.msra.mxu1 %v10172_v24  ;;  %5306 = vmatpush.msra.mxu3 %v10046_v41  ;;  %v4454_v41 = vld [vmem:[%s11427_s10 + $0x50] sm:$0xff]  ;;  %v10448_v49 = vpop.f32.mrf.mxu3 }
 0x8f8   : > { %v4347_v27 = vpop.f32.mrf.mxu2 }
 0x8f9   : > { %4831 = vmatpush.msra.mxu1 %v10178_v1  ;;  %5307 = vmatpush.msra.mxu3 %v10050_v8 }
 0x8fb   : > { %4832 = vmatpush.msra.mxu1 %v10186_v30  ;;  %5308 = vmatpush.msra.mxu3 %v10055_v26  ;;  %v4457_v26 = vld [vmem:[%s11427_s10 + $0x68] sm:$0xff] }
 0x8fc   : > { %4601 = vmatmul.f32.gmra.mxu1 %v4448_v33  ;;  %v6429_v33 = vld [vmem:[%s11427_s10 + $0x1b0] sm:$0xff] }
 0x8fd   : > { %4833 = vmatpush.msra.mxu1 %v10195_v54 }
 0x8ff   : > { %4834 = vmatpush.msra.mxu1 %v10202_v38 }
 0x900   : > { %v4350_v34 = vpop.f32.mrf.mxu2 }
 0x901   : > { %4835 = vmatpush.msra.mxu1 %v10210_v45 }
 0x903   : > { %4836 = vmatpush.msra.mxu1 %v10220_v22 }
 0x904   : > { %4604 = vmatmul.f32.gmra.mxu1 %v4451_v36  ;;  %v6415_v36 = vld [vmem:[%s11427_s10 + $0x140] sm:$0xff] }
 0x905   : > { %4837 = vmatpush.msra.mxu1 %v10228_v46 }
 0x907   : > { %4838 = vmatpush.msra.mxu1 %v10236_v25 }
 0x908   : > { %v4353_v53 = vpop.f32.mrf.mxu2 }
 0x909   : > { %4839 = vmatpush.msra.mxu1 %v10244_v6  ;;  %v4400_v37 = vadd.f32 %v4353_v53, %v766_v61  ;;  %v4464_v53 = vld [vmem:[%s11427_s10 + $0xa0] sm:$0xff] }
 0x90b   : > { %4840 = vmatpush.msra.mxu1 %v10254_v31  ;;  %v10349_v13 = vmax.f32 %v4400_v37, 0.0 }
 0x90c   : > { %4607 = vmatmul.f32.gmra.mxu1 %v4454_v41  ;;  %v6432_v41 = vld [vmem:[%s11427_s10 + $0x1c8] sm:$0xff] }
 0x90d   : > { %4841 = vmatpush.msra.mxu1 %v10262_v20 }
 0x90f   : > { %4842 = vmatpush.msra.mxu1 %v10268_v48 }
 0x910   : > { %v4356_v8 = vpop.f32.mrf.mxu2 }
 0x911   : > { %4843 = vmatpush.msra.mxu1 %v10273_v40  ;;  %v4401_v15 = vadd.f32 %v4356_v8, %v769_v51  ;;  %v6435_v51 = vld [vmem:[%s11427_s10 + $0x1e0] sm:$0xff] }
 0x913   : > { %4844 = vmatpush.msra.mxu1 %v10280_v9  ;;  %v10342_v62 = vmax.f32 %v4401_v15, 0.0 }
 0x914   : > { %4610 = vmatmul.f32.gmra.mxu1 %v4457_v26  ;;  %v6418_v26 = vld [vmem:[%s11427_s10 + $0x158] sm:$0xff] }
 0x915   : > { %5089 = vmatpush.msrb.mxu1 %v10168_v56  ;;  %v763_v56 = vadd.f32 %v9945_v17, %v11687_v47  ;;  %v4473_v47 = vld [vmem:[%s11427_s10 + $0xe8] sm:$0xff] }
 0x917   : > { %5090 = vmatpush.msrb.mxu1 %v10172_v24  ;;  %v4460_v24 = vld [vmem:[%s11427_s10 + $0x80] sm:$0xff]  ;;  %v4399_v32 = vadd.f32 %v4350_v34, %v763_v56  ;;  %v6441_v56 = vld [vmem:[%s11427_s10 + $0x210] sm:$0xff] }
 0x918   : > { %v4359_v52 = vpop.f32.mrf.mxu2 }
 0x919   : > { %5091 = vmatpush.msrb.mxu1 %v10178_v1  ;;  %v4402_v2 = vadd.f32 %v4359_v52, %v772_v14  ;;  %v11689_v1 = vld [vmem:[#allocation57_spill] sm:$0xff]  ;;  %v6421_v14 = vld [vmem:[%s11427_s10 + $0x170] sm:$0xff] }
 0x91a   : > { %v757_v23 = vadd.f32 %v9945_v17, %v11689_v1  ;;  %v4470_v52 = vld [vmem:[%s11427_s10 + $0xd0] sm:$0xff] }
 0x91b   : > { %v10334_v43 = vmax.f32 %v4402_v2, 0.0  ;;  %5092 = vmatpush.msrb.mxu1 %v10186_v30  ;;  %v4398_v30 = vadd.f32 %v4347_v27, %v760_v5  ;;  %v4461_v27 = vld [vmem:[%s11427_s10 + $0x88] sm:$0xff]  ;;  %v4476_v5 = vld [vmem:[%s11427_s10 + $0x100] sm:$0xff] }
 0x91c   : > { %4613 = vmatmul.f32.gmra.mxu1 %v4460_v24  ;;  %v4397_v63 = vadd.f32 %v10278_v0, %v757_v23  ;;  %v6426_v0 = vld [vmem:[%s11427_s10 + $0x198] sm:$0xff]  ;;  %v6424_v2 = vld [vmem:[%s11427_s10 + $0x188] sm:$0xff] }
 0x91d   : > { %5093 = vmatpush.msrb.mxu1 %v10195_v54  ;;  %6400 = vmatpush.msk.msrb.mxu0 %vm630_vm2, %v10334_v43  ;;  %v10356_v54 = vmax.f32 %v4399_v32, 0.0  ;;  %v10363_v57 = vmax.f32 %v4398_v30, 0.0  ;;  %v6444_v32 = vld [vmem:[%s11427_s10 + $0x228] sm:$0xff]  ;;  %v6430_v30 = vld [vmem:[%s11427_s10 + $0x1b8] sm:$0xff] }
 0x91e   : > { %v10373_v44 = vmax.f32 %v4397_v63, 0.0 }
 0x91f   : > { %5094 = vmatpush.msrb.mxu1 %v10202_v38  ;;  %4646 = vmatpush.msrb.mxu0 %v10342_v62  ;;  %v4463_v38 = vld [vmem:[%s11427_s10 + $0x98] sm:$0xff] }
 0x921   : > { %5095 = vmatpush.msrb.mxu1 %v10210_v45  ;;  %4647 = vmatpush.msrb.mxu0 %v10349_v13  ;;  %v748_v45 = vadd.f32 %v9945_v17, %v11692_v7 }
 0x923   : > { %5096 = vmatpush.msrb.mxu1 %v10220_v22  ;;  %4648 = vmatpush.msrb.mxu0 %v10356_v54  ;;  %v4394_v22 = vadd.f32 %v10182_v42, %v748_v45  ;;  %v4466_v42 = vld [vmem:[%s11427_s10 + $0xb0] sm:$0xff] }
 0x924   : > { %4616 = vmatmul.f32.gmra.mxu1 %v4463_v38  ;;  %v6450_v38 = vld [vmem:[%s11427_s10 + $0x258] sm:$0xf] }
 0x925   : > { %5097 = vmatpush.msrb.mxu1 %v10228_v46  ;;  %4649 = vmatpush.msrb.mxu0 %v10363_v57  ;;  %v10386_v17 = vmax.f32 %v4394_v22, 0.0  ;;  %v4469_v46 = vld [vmem:[%s11427_s10 + $0xc8] sm:$0xff] }
 0x926   : > { %v6416_v22 = vld [vmem:[%s11427_s10 + $0x148] sm:$0xff] }
 0x927   : > { %5098 = vmatpush.msrb.mxu1 %v10236_v25  ;;  %4650 = vmatpush.msrb.mxu0 %v10373_v44  ;;  %v4449_v25 = vld [vmem:[%s11427_s10 + $0x28] sm:$0xff] }
 0x929   : > { %5099 = vmatpush.msrb.mxu1 %v10244_v6  ;;  %4651 = vmatpush.msrb.mxu0 %v10378_v12  ;;  %v6417_v6 = vld [vmem:[%s11427_s10 + $0x150] sm:$0xff] }
 0x92a   : > { %4792 = vmatmul.f32.gmra.mxu3 %v6417_v6  ;;  %v6419_v6 = vld [vmem:[%s11427_s10 + $0x160] sm:$0xff] }
 0x92b   : > { %5100 = vmatpush.msrb.mxu1 %v10254_v31  ;;  %4652 = vmatpush.msrb.mxu0 %v10382_v29  ;;  %v4452_v31 = vld [vmem:[%s11427_s10 + $0x40] sm:$0xff] }
 0x92c   : > { %4619 = vmatmul.f32.gmra.mxu1 %v4466_v42  ;;  %v6467_v42 = vld [vmem:[%s11427_s10 + $0x270] sm:$0xff] }
 0x92d   : > { %5101 = vmatpush.msrb.mxu1 %v10262_v20  ;;  %4653 = vmatpush.msrb.mxu0 %v10386_v17  ;;  %v6423_v20 = vld [vmem:[%s11427_s10 + $0x180] sm:$0xff] }
 0x92e   : > { %6401 = vmatmul.msk.f32.vlgmr.msrb.gmra.mxu0 %vm4483_vm7, %v4446_v28 }
 0x92f   : > { %5102 = vmatpush.msrb.mxu1 %v10268_v48  ;;  %6453 = vmatpush.msk.msra.mxu0 %vm630_vm2, %v10334_v43  ;;  %v4478_v48 = vld [vmem:[%s11427_s10 + $0x110] sm:$0xff] }
 0x931   : > { %5103 = vmatpush.msrb.mxu1 %v10273_v40  ;;  %4893 = vmatpush.msra.mxu0 %v10342_v62  ;;  %v4458_v40 = vld [vmem:[%s11427_s10 + $0x70] sm:$0xff] }
 0x932   : > { %4795 = vmatmul.f32.gmra.mxu3 %v6420_v60  ;;  %v6445_v60 = vld [vmem:[%s11427_s10 + $0x230] sm:$0xff] }
 0x933   : > { %5104 = vmatpush.msrb.mxu1 %v10280_v9  ;;  %4894 = vmatpush.msra.mxu0 %v10349_v13  ;;  %v10464_v9 = vpop.f32.mrf.mxu3 }
 0x934   : > { %4622 = vmatmul.f32.gmra.mxu1 %v4469_v46 }
 0x935   : > { %4895 = vmatpush.msra.mxu0 %v10356_v54 }
 0x936   : > { %6402 = vmatmul.msk.f32.gmra.mxu0 %vm4483_vm7, %v4449_v25  ;;  %v6439_v25 = vld [vmem:[%s11427_s10 + $0x200] sm:$0xff] }
 0x937   : > { %4896 = vmatpush.msra.mxu0 %v10363_v57 }
 0x939   : > { %4897 = vmatpush.msra.mxu0 %v10373_v44 }
 0x93a   : > { %4798 = vmatmul.f32.gmra.mxu3 %v6423_v20 }
 0x93b   : > { %4898 = vmatpush.msra.mxu0 %v10378_v12  ;;  %v10476_v34 = vpop.f32.mrf.mxu3 }
 0x93c   : > { %4625 = vmatmul.f32.gmra.mxu1 %v4472_v16  ;;  %v6442_v16 = vld [vmem:[%s11427_s10 + $0x218] sm:$0xff] }
 0x93d   : > { %4899 = vmatpush.msra.mxu0 %v10382_v29 }
 0x93e   : > { %6403 = vmatmul.msk.f32.gmra.mxu0 %vm4483_vm7, %v4452_v31 }
 0x93f   : > { %4900 = vmatpush.msra.mxu0 %v10386_v17 }
 0x941   : > { %6506 = vmatpush.msk.msrb.mxu0 %vm630_vm2, %v10334_v43 }
 0x942   : > { %4801 = vmatmul.f32.gmra.mxu3 %v6426_v0  ;;  %v6479_v0 = vld [vmem:[%s11427_s10 + $0x2d0] sm:$0xff] }
 0x943   : > { %5153 = vmatpush.msrb.mxu0 %v10342_v62  ;;  %v10491_v8 = vpop.f32.mrf.mxu3 }
 0x944   : > { %4628 = vmatmul.f32.gmra.mxu1 %v4475_v10  ;;  %v6425_v10 = vld [vmem:[%s11427_s10 + $0x190] sm:$0xff] }
 0x945   : > { %5154 = vmatpush.msrb.mxu0 %v10349_v13 }
 0x946   : > { %6404 = vmatmul.msk.f32.gmra.mxu0 %vm4483_vm7, %v4455_v3 }
 0x947   : > { %5155 = vmatpush.msrb.mxu0 %v10356_v54 }
 0x949   : > { %5156 = vmatpush.msrb.mxu0 %v10363_v57 }
 0x94a   : > { %4804 = vmatmul.f32.gmra.mxu3 %v6429_v33 }
 0x94b   : > { %5157 = vmatpush.msrb.mxu0 %v10373_v44  ;;  %v10507_v11 = vpop.f32.mrf.mxu3 }
 0x94c   : > { %4631 = vmatmul.f32.gmra.mxu1 %v4478_v48  ;;  %v6448_v48 = vld [vmem:[%s11427_s10 + $0x248] sm:$0xff] }
 0x94d   : > { %5158 = vmatpush.msrb.mxu0 %v10378_v12 }
 0x94e   : > { %6405 = vmatmul.msk.f32.gmra.mxu0 %vm4483_vm7, %v4458_v40  ;;  %v6428_v40 = vld [vmem:[%s11427_s10 + $0x1a8] sm:$0xff] }
 0x94f   : > { %5159 = vmatpush.msrb.mxu0 %v10382_v29 }
 0x951   : > { %5160 = vmatpush.msrb.mxu0 %v10386_v17 }
 0x952   : > { %4807 = vmatmul.f32.gmra.mxu3 %v6432_v41  ;;  %v6482_v41 = vld [vmem:[%s11427_s10 + $0x2e8] sm:$0xff] }
 0x953   : > { %v10522_v61 = vpop.f32.mrf.mxu3 }
 0x954   : > { %4634 = vmatmul.f32.gmra.mxu1 %v4481_v21 }
 0x956   : > { %6406 = vmatmul.msk.f32.gmra.mxu0 %vm4483_vm7, %v4461_v27 }
 0x95a   : > { %4810 = vmatmul.f32.gmra.mxu3 %v6435_v51  ;;  %v6468_v51 = vld [vmem:[%s11427_s10 + $0x278] sm:$0xff] }
 0x95b   : > { %v10536_v37 = vpop.f32.mrf.mxu3 }
 0x95c   : > { %4845 = vmatmul.f32.vlgmr.msra.gmra.mxu1 %v6415_v36  ;;  %v6451_v36 = vld [vmem:[%s11427_s10 + $0x260] sm:$0xf] }
 0x95d   : > { %6605 = vmatpush.msk.msra.mxu1 %vm630_vm2, %v10334_v43 }
 0x95e   : > { %6407 = vmatmul.msk.f32.gmra.mxu0 %vm4483_vm7, %v4464_v53  ;;  %v6431_v53 = vld [vmem:[%s11427_s10 + $0x1c0] sm:$0xff] }
 0x95f   : > { %6606 = vmatpush.msra.mxu1 %v10342_v62 }
 0x961   : > { %6607 = vmatpush.msra.mxu1 %v10349_v13 }
 0x962   : > { %4813 = vmatmul.f32.gmra.mxu3 %v6438_v59  ;;  %v6485_v59 = vld [vmem:[%s11427_s10 + $0x300] sm:$0xff] }
 0x963   : > { %6608 = vmatpush.msra.mxu1 %v10356_v54  ;;  %v10550_v1 = vpop.f32.mrf.mxu3 }
 0x964   : > { %4848 = vmatmul.f32.gmra.mxu1 %v6418_v26 }
 0x965   : > { %6609 = vmatpush.msra.mxu1 %v10363_v57 }
 0x966   : > { %6408 = vmatmul.msk.f32.gmra.mxu0 %vm4483_vm7, %v4467_v55 }
 0x967   : > { %6610 = vmatpush.msra.mxu1 %v10373_v44 }
 0x969   : > { %6611 = vmatpush.msra.mxu1 %v10378_v12 }
 0x96a   : > { %4816 = vmatmul.f32.gmra.mxu3 %v6441_v56  ;;  %v6471_v56 = vld [vmem:[%s11427_s10 + $0x290] sm:$0xff] }
 0x96b   : > { %6612 = vmatpush.msra.mxu1 %v10382_v29  ;;  %v10564_v63 = vpop.f32.mrf.mxu3 }
 0x96c   : > { %4851 = vmatmul.f32.gmra.mxu1 %v6421_v14 }
 0x96d   : > { %6613 = vmatpush.msra.mxu1 %v10386_v17 }
 0x96e   : > { %6409 = vmatmul.msk.f32.gmra.mxu0 %vm4483_vm7, %v4470_v52  ;;  %v6434_v52 = vld [vmem:[%s11427_s10 + $0x1d8] sm:$0xff] }
 0x971   : > { %v10524_v15 = vpop.f32.mrf.mxu1 }
 0x972   : > { %4819 = vmatmul.f32.gmra.mxu3 %v6444_v32  ;;  %v6488_v32 = vld [vmem:[%s11427_s10 + $0x318] sm:$0xff] }
 0x973   : > { %v10578_v7 = vpop.f32.mrf.mxu3 }
 0x974   : > { %4854 = vmatmul.f32.gmra.mxu1 %v6424_v2 }
 0x976   : > { %6410 = vmatmul.msk.f32.gmra.mxu0 %vm4483_vm7, %v4473_v47 }
 0x979   : > { %v10538_v24 = vpop.f32.mrf.mxu1 }
 0x97a   : > { %4822 = vmatmul.f32.gmra.mxu3 %v6447_v18  ;;  %v6474_v18 = vld [vmem:[%s11427_s10 + $0x2a8] sm:$0xff] }
 0x97b   : > { %v10594_v28 = vpop.f32.mrf.mxu3 }
 0x97c   : > { %4857 = vmatmul.f32.gmra.mxu1 %v6427_v19 }
 0x97e   : > { %6411 = vmatmul.msk.f32.gmra.mxu0 %vm4483_vm7, %v4476_v5  ;;  %v6437_v5 = vld [vmem:[%s11427_s10 + $0x1f0] sm:$0xff] }
 0x981   : > { %v10552_v23 = vpop.f32.mrf.mxu1 }
 0x982   : > { %4825 = vmatmul.f32.gmra.mxu3 %v6450_v38  ;;  %v6491_v38 = vld [vmem:[%s11427_s10 + $0x330] sm:$0xff] }
 0x984   : > { %4860 = vmatmul.f32.gmra.mxu1 %v6430_v30 }
 0x986   : > { %6412 = vmatmul.msk.f32.gmra.mxu0 %vm4483_vm7, %v4479_v58 }
 0x989   : > { %v10566_v50 = vpop.f32.mrf.mxu1 }
 0x98a   : > { %5049 = vmatmul.f32.vlgmr.msrb.gmra.mxu3 %v6467_v42  ;;  %v6477_v42 = vld [vmem:[%s11427_s10 + $0x2c0] sm:$0xff] }
 0x98c   : > { %4863 = vmatmul.f32.gmra.mxu1 %v6433_v35 }
 0x98e   : > { %6413 = vmatmul.msk.f32.gmra.mxu0 %vm4483_vm7, %v4482_v4  ;;  %v6440_v4 = vld [vmem:[%s11427_s10 + $0x208] sm:$0xff] }
 0x991   : > { %v10580_v45 = vpop.f32.mrf.mxu1 }
 0x994   : > { %4866 = vmatmul.f32.gmra.mxu1 %v6436_v39 }
 0x996   : > { %6454 = vmatmul.msk.f32.vlgmr.msra.gmra.mxu0 %vm4483_vm7, %v6416_v22 }
 0x997   : > { %6559 = vmatpush.msk.msra.mxu0 %vm630_vm2, %v10334_v43  ;;  %v6470_v43 = vld [vmem:[%s11427_s10 + $0x288] sm:$0xff] }
 0x998   : > { %5052 = vmatmul.f32.gmra.mxu3 %v6470_v43  ;;  %v6494_v43 = vld [vmem:[%s11427_s10 + $0x348] sm:$0xff] }
 0x999   : > { %5413 = vmatpush.msra.mxu0 %v10342_v62  ;;  %v10597_v46 = vpop.f32.mrf.mxu1  ;;  %v10612_v62 = vpop.f32.mrf.mxu3 }
 0x99b   : > { %5414 = vmatpush.msra.mxu0 %v10349_v13 }
 0x99c   : > { %4869 = vmatmul.f32.gmra.mxu1 %v6439_v25 }
 0x99d   : > { %5415 = vmatpush.msra.mxu0 %v10356_v54  ;;  %v6422_v54 = vld [vmem:[%s11427_s10 + $0x178] sm:$0xff] }
 0x99e   : > { %6455 = vmatmul.msk.f32.gmra.mxu0 %vm4483_vm7, %v6419_v6  ;;  %v6443_v6 = vld [vmem:[%s11427_s10 + $0x220] sm:$0xff] }
 0x99f   : > { %5416 = vmatpush.msra.mxu0 %v10363_v57  ;;  %v6473_v57 = vld [vmem:[%s11427_s10 + $0x2a0] sm:$0xff] }
 0x9a0   : > { %5055 = vmatmul.f32.gmra.mxu3 %v6473_v57 }
 0x9a1   : > { %5417 = vmatpush.msra.mxu0 %v10373_v44  ;;  %v10615_v13 = vpop.f32.mrf.mxu1  ;;  %v10630_v44 = vpop.f32.mrf.mxu3 }
 0x9a2   : > { %11693 = vst [vmem:[#allocation71_spill] sm:$0xff] %v10630_v44 }
 0x9a3   : > { %5418 = vmatpush.msra.mxu0 %v10378_v12 }
 0x9a4   : > { %4872 = vmatmul.f32.gmra.mxu1 %v6442_v16 }
 0x9a5   : > { %5419 = vmatpush.msra.mxu0 %v10382_v29  ;;  %v6476_v29 = vld [vmem:[%s11427_s10 + $0x2b8] sm:$0xff] }
 0x9a6   : > { %6456 = vmatmul.msk.f32.gmra.mxu0 %vm4483_vm7, %v6422_v54  ;;  %v6480_v54 = vld [vmem:[%s11427_s10 + $0x2d8] sm:$0xff] }
 0x9a7   : > { %5420 = vmatpush.msra.mxu0 %v10386_v17 }
 0x9a8   : > { %5058 = vmatmul.f32.gmra.mxu3 %v6476_v29  ;;  %v6497_v29 = vld [vmem:[%s11427_s10 + $0x360] sm:$0xff] }
 0x9a9   : > { %v10632_v31 = vpop.f32.mrf.mxu1  ;;  %v10646_v17 = vpop.f32.mrf.mxu3 }
 0x9ab   : > { %v10634_v12 = vpop.f32.mrf.mxu0 }
 0x9ac   : > { %4875 = vmatmul.f32.gmra.mxu1 %v6445_v60 }
 0x9ae   : > { %6457 = vmatmul.msk.f32.gmra.mxu0 %vm4483_vm7, %v6425_v10  ;;  %v6446_v10 = vld [vmem:[%s11427_s10 + $0x238] sm:$0xff] }
 0x9b0   : > { %5061 = vmatmul.f32.gmra.mxu3 %v6479_v0 }
 0x9b1   : > { %v10648_v3 = vpop.f32.mrf.mxu1  ;;  %v10662_v21 = vpop.f32.mrf.mxu3 }
 0x9b3   : > { %v10650_v20 = vpop.f32.mrf.mxu0 }
 0x9b4   : > { %4878 = vmatmul.f32.gmra.mxu1 %v6448_v48 }
 0x9b6   : > { %6458 = vmatmul.msk.f32.gmra.mxu0 %vm4483_vm7, %v6428_v40  ;;  %v6483_v40 = vld [vmem:[%s11427_s10 + $0x2f0] sm:$0xff] }
 0x9b8   : > { %5064 = vmatmul.f32.gmra.mxu3 %v6482_v41  ;;  %v6500_v41 = vld [vmem:[%s11427_s10 + $0x378] sm:$0xff] }
 0x9b9   : > { %v10664_v27 = vpop.f32.mrf.mxu1  ;;  %v10678_v26 = vpop.f32.mrf.mxu3 }
 0x9bb   : > { %v10666_v33 = vpop.f32.mrf.mxu0 }
 0x9bc   : > { %4881 = vmatmul.f32.gmra.mxu1 %v6451_v36 }
 0x9be   : > { %6459 = vmatmul.msk.f32.gmra.mxu0 %vm4483_vm7, %v6431_v53  ;;  %v6449_v53 = vld [vmem:[%s11427_s10 + $0x250] sm:$0xff] }
 0x9c0   : > { %5067 = vmatmul.f32.gmra.mxu3 %v6485_v59 }
 0x9c1   : > { %v10680_v55 = vpop.f32.mrf.mxu1  ;;  %v10694_v2 = vpop.f32.mrf.mxu3 }
 0x9c3   : > { %v10685_v14 = vpop.f32.mrf.mxu0 }
 0x9c4   : > { %5105 = vmatmul.f32.vlgmr.msrb.gmra.mxu1 %v6468_v51 }
 0x9c6   : > { %6460 = vmatmul.msk.f32.gmra.mxu0 %vm4483_vm7, %v6434_v52  ;;  %v6486_v52 = vld [vmem:[%s11427_s10 + $0x308] sm:$0xff] }
 0x9c8   : > { %5070 = vmatmul.f32.gmra.mxu3 %v6488_v32  ;;  %v6503_v32 = vld [vmem:[%s11427_s10 + $0x390] sm:$0xf] }
 0x9c9   : > { %v10696_v47 = vpop.f32.mrf.mxu1  ;;  %v10710_v30 = vpop.f32.mrf.mxu3 }
 0x9cb   : > { %v10701_v19 = vpop.f32.mrf.mxu0 }
 0x9cc   : > { %5108 = vmatmul.f32.gmra.mxu1 %v6471_v56 }
 0x9ce   : > { %6461 = vmatmul.msk.f32.gmra.mxu0 %vm4483_vm7, %v6437_v5  ;;  %v6452_v5 = vld [vmem:[%s11427_s10 + $0x268] sm:$0xf] }
 0x9d0   : > { %5073 = vmatmul.f32.gmra.mxu3 %v6491_v38 }
 0x9d1   : > { %v10712_v58 = vpop.f32.mrf.mxu1  ;;  %v10726_v39 = vpop.f32.mrf.mxu3 }
 0x9d2   : > { %11694 = vst [vmem:[#allocation75_spill] sm:$0xff] %v10712_v58 }
 0x9d3   : > { %v10717_v35 = vpop.f32.mrf.mxu0 }
 0x9d4   : > { %5111 = vmatmul.f32.gmra.mxu1 %v6474_v18 }
 0x9d6   : > { %6462 = vmatmul.msk.f32.gmra.mxu0 %vm4483_vm7, %v6440_v4  ;;  %v6489_v4 = vld [vmem:[%s11427_s10 + $0x320] sm:$0xff] }
 0x9d8   : > { %5076 = vmatmul.f32.gmra.mxu3 %v6494_v43  ;;  %v6520_v43 = vld [vmem:[%s11427_s10 + $0x3a8] sm:$0xff] }
 0x9d9   : > { %v10728_v22 = vpop.f32.mrf.mxu1  ;;  %v10747_v57 = vpop.f32.mrf.mxu3 }
 0x9db   : > { %v10733_v25 = vpop.f32.mrf.mxu0 }
 0x9dc   : > { %5114 = vmatmul.f32.gmra.mxu1 %v6477_v42 }
 0x9de   : > { %6463 = vmatmul.msk.f32.gmra.mxu0 %vm4483_vm7, %v6443_v6  ;;  %v6469_v6 = vld [vmem:[%s11427_s10 + $0x280] sm:$0xff] }
 0x9e0   : > { %5079 = vmatmul.f32.gmra.mxu3 %v6497_v29  ;;  %v6492_v29 = vld [vmem:[%s11427_s10 + $0x338] sm:$0xff] }
 0x9e1   : > { %v10742_v16 = vpop.f32.mrf.mxu1  ;;  %v10763_v0 = vpop.f32.mrf.mxu3 }
 0x9e3   : > { %v10749_v60 = vpop.f32.mrf.mxu0 }
 0x9e4   : > { %5117 = vmatmul.f32.gmra.mxu1 %v6480_v54  ;;  %v6521_v54 = vld [vmem:[%s11427_s10 + $0x3b0] sm:$0xff] }
 0x9e5   : > { %5365 = vmatmul.f32.vlgmr.msrb.gmra.mxu2 %v6521_v54  ;;  %v6475_v54 = vld [vmem:[%s11427_s10 + $0x2b0] sm:$0xff] }
 0x9e6   : > { %6464 = vmatmul.msk.f32.gmra.mxu0 %vm4483_vm7, %v6446_v10 }
 0x9e8   : > { %5082 = vmatmul.f32.gmra.mxu3 %v6500_v41  ;;  %v6472_v41 = vld [vmem:[%s11427_s10 + $0x298] sm:$0xff] }
 0x9e9   : > { %v10758_v48 = vpop.f32.mrf.mxu1  ;;  %v10779_v59 = vpop.f32.mrf.mxu3 }
 0x9eb   : > { %v10765_v36 = vpop.f32.mrf.mxu0 }
 0x9ec   : > { %5120 = vmatmul.f32.gmra.mxu1 %v6483_v40 }
 0x9ee   : > { %6465 = vmatmul.msk.f32.gmra.mxu0 %vm4483_vm7, %v6449_v53 }
 0x9f0   : > { %5085 = vmatmul.f32.gmra.mxu3 %v6503_v32 }
 0x9f1   : > { %v10774_v51 = vpop.f32.mrf.mxu1  ;;  %v10795_v38 = vpop.f32.mrf.mxu3 }
 0x9f3   : > { %v10781_v56 = vpop.f32.mrf.mxu0 }
 0x9f4   : > { %5123 = vmatmul.f32.gmra.mxu1 %v6486_v52  ;;  %v6523_v52 = vld [vmem:[%s11427_s10 + $0x3c0] sm:$0xff] }
 0x9f6   : > { %6466 = vmatmul.msk.f32.gmra.mxu0 %vm4483_vm7, %v6452_v5  ;;  %v6524_v5 = vld [vmem:[%s11427_s10 + $0x3c8] sm:$0xff] }
 0x9f7   : > { %5368 = vmatmul.f32.gmra.mxu2 %v6524_v5  ;;  %v4847_v5 = vadd.f32 %v10728_v22, %v10646_v17  ;;  %v6530_v17 = vld [vmem:[%s11427_s10 + $0x3f8] sm:$0xff] }
 0x9f8   : > { %5309 = vmatmul.f32.vlgmr.msra.gmra.mxu3 %v6520_v43 }
 0x9f9   : > { %v10790_v18 = vpop.f32.mrf.mxu1  ;;  %v10814_v40 = vpop.f32.mrf.mxu3 }
 0x9fb   : > { %v10797_v42 = vpop.f32.mrf.mxu0 }
 0x9fc   : > { %5126 = vmatmul.f32.gmra.mxu1 %v6489_v4  ;;  %v6495_v4 = vld [vmem:[%s11427_s10 + $0x350] sm:$0xff] }
 0x9fe   : > { %6507 = vmatmul.msk.f32.vlgmr.msrb.gmra.mxu0 %vm4483_vm7, %v6469_v6 }
 0xa00   : > { %5312 = vmatmul.f32.gmra.mxu3 %v6523_v52  ;;  %v4600_v52 = vadd.f32 %v10524_v15, %v10448_v49  ;;  %v6529_v15 = vld [vmem:[%s11427_s10 + $0x3f0] sm:$0xff] }
 0xa01   : > { %v10809_v10 = vpop.f32.mrf.mxu1  ;;  %v10833_v6 = vpop.f32.mrf.mxu3 }
 0xa03   : > { %v10816_v53 = vpop.f32.mrf.mxu0 }
 0xa04   : > { %5129 = vmatmul.f32.gmra.mxu1 %v6492_v29  ;;  %v6526_v29 = vld [vmem:[%s11427_s10 + $0x3d8] sm:$0xff] }
 0xa06   : > { %6508 = vmatmul.msk.f32.gmra.mxu0 %vm4483_vm7, %v6472_v41  ;;  %v6527_v41 = vld [vmem:[%s11427_s10 + $0x3e0] sm:$0xff] }
 0xa07   : > { %5371 = vmatmul.f32.gmra.mxu2 %v6527_v41 }
 0xa08   : > { %5315 = vmatmul.f32.gmra.mxu3 %v6526_v29  ;;  %v10862_v29 = vadd.f32 %v10634_v12, %v4600_v52  ;;  %v4850_v12 = vadd.f32 %v10742_v16, %v10662_v21  ;;  %v6501_v52 = vld [vmem:[%s11427_s10 + $0x380] sm:$0xff]  ;;  %v6533_v21 = vld [vmem:[%s11427_s10 + $0x410] sm:$0xff] }
 0xa09   : > { %v10828_v32 = vpop.f32.mrf.mxu1  ;;  %v10856_v58 = vpop.f32.mrf.mxu3 }
 0xa0b   : > { %v10835_v43 = vpop.f32.mrf.mxu0 }
 0xa0c   : > { %11695 = vst [vmem:[#allocation68_spill] sm:$0xff] %v10835_v43  ;;  %5132 = vmatmul.f32.gmra.mxu1 %v6495_v4  ;;  %v6498_v4 = vld [vmem:[%s11427_s10 + $0x368] sm:$0xff] }
 0xa0e   : > { %6509 = vmatmul.msk.f32.gmra.mxu0 %vm4483_vm7, %v6475_v54  ;;  %v6478_v54 = vld [vmem:[%s11427_s10 + $0x2c8] sm:$0xff] }
 0xa0f   : > { %5374 = vmatmul.f32.gmra.mxu2 %v6530_v17  ;;  %v4853_v17 = vadd.f32 %v10758_v48, %v10678_v26  ;;  %v6536_v26 = vld [vmem:[%s11427_s10 + $0x428] sm:$0xff] }
 0xa10   : > { %5318 = vmatmul.f32.gmra.mxu3 %v6529_v15 }
 0xa11   : > { %v10851_v43 = vpop.f32.mrf.mxu1 }
 0xa13   : > { %v4902_v44 = vpop.f32.mrf.mxu0 }
 0xa14   : > { %v10864_v49 = vadd.f32 %v4902_v44, %v4847_v5  ;;  %5135 = vmatmul.f32.gmra.mxu1 %v6498_v4  ;;  %v4603_v44 = vadd.f32 %v10538_v24, %v10464_v9  ;;  %v10884_v5 = vpop.f32.mrf.mxu3  ;;  %v6532_v24 = vld [vmem:[%s11427_s10 + $0x408] sm:$0xff] }
 0xa16   : > { %v4941_v22 = vmax.f32 %v10862_v29, %v10864_v49  ;;  %6510 = vmatmul.msk.f32.gmra.mxu0 %vm4483_vm7, %v6478_v54  ;;  %v6481_v54 = vld [vmem:[%s11427_s10 + $0x2e0] sm:$0xff]  ;;  %v10890_v15 = vadd.f32 %v10650_v20, %v4603_v44  ;;  %v4606_v20 = vadd.f32 %v10552_v23, %v10476_v34 }
 0xa17   : > { %5377 = vmatmul.f32.gmra.mxu2 %v6533_v21  ;;  %v6535_v23 = vld [vmem:[%s11427_s10 + $0x420] sm:$0xff]  ;;  %v4856_v21 = vadd.f32 %v10774_v51, %v10694_v2 }
 0xa18   : > { %5321 = vmatmul.f32.gmra.mxu3 %v6532_v24  ;;  %v10918_v24 = vadd.f32 %v10666_v33, %v4606_v20  ;;  %v4609_v33 = vadd.f32 %v10566_v50, %v10491_v8  ;;  %v6538_v50 = vld [vmem:[%s11427_s10 + $0x438] sm:$0xff]  ;;  %v6539_v2 = vld [vmem:[%s11427_s10 + $0x440] sm:$0xff] }
 0xa19   : > { %v10879_v41 = vpop.f32.mrf.mxu1 }
 0xa1b   : > { %v4905_v4 = vpop.f32.mrf.mxu0 }
 0xa1c   : > { %v10892_v9 = vadd.f32 %v4905_v4, %v4850_v12  ;;  %5138 = vmatmul.f32.gmra.mxu1 %v6501_v52  ;;  %v6504_v12 = vld [vmem:[%s11427_s10 + $0x398] sm:$0xf]  ;;  %v10912_v52 = vpop.f32.mrf.mxu3 }
 0xa1e   : > { %v4942_v16 = vmax.f32 %v10890_v15, %v10892_v9  ;;  %6511 = vmatmul.msk.f32.gmra.mxu0 %vm4483_vm7, %v6481_v54  ;;  %v6484_v54 = vld [vmem:[%s11427_s10 + $0x2f8] sm:$0xff] }
 0xa1f   : > { %5380 = vmatmul.f32.gmra.mxu2 %v6536_v26  ;;  %v4859_v26 = vadd.f32 %v10790_v18, %v10710_v30  ;;  %v6542_v30 = vld [vmem:[%s11427_s10 + $0x458] sm:$0xff] }
 0xa20   : > { %5324 = vmatmul.f32.gmra.mxu3 %v6535_v23  ;;  %v10946_v23 = vadd.f32 %v10685_v14, %v4609_v33  ;;  %v4612_v14 = vadd.f32 %v10580_v45, %v10507_v11  ;;  %v6541_v45 = vld [vmem:[%s11427_s10 + $0x450] sm:$0xff] }
 0xa21   : > { %v10907_v44 = vpop.f32.mrf.mxu1 }
 0xa23   : > { %v4908_v4 = vpop.f32.mrf.mxu0 }
 0xa24   : > { %v10920_v34 = vadd.f32 %v4908_v4, %v4853_v17  ;;  %5141 = vmatmul.f32.gmra.mxu1 %v6504_v12  ;;  %v6525_v17 = vld [vmem:[%s11427_s10 + $0x3d0] sm:$0xff]  ;;  %v10940_v12 = vpop.f32.mrf.mxu3 }
 0xa26   : > { %v4943_v48 = vmax.f32 %v10918_v24, %v10920_v34  ;;  %6512 = vmatmul.msk.f32.gmra.mxu0 %vm4483_vm7, %v6484_v54  ;;  %v6487_v54 = vld [vmem:[%s11427_s10 + $0x310] sm:$0xff] }
 0xa27   : > { %5383 = vmatmul.f32.gmra.mxu2 %v6539_v2  ;;  %v4862_v2 = vadd.f32 %v10809_v10, %v10726_v39  ;;  %v6545_v39 = vld [vmem:[%s11427_s10 + $0x470] sm:$0xff] }
 0xa28   : > { %5327 = vmatmul.f32.gmra.mxu3 %v6538_v50  ;;  %v10975_v50 = vadd.f32 %v10701_v19, %v4612_v14  ;;  %v4615_v19 = vadd.f32 %v10597_v46, %v10522_v61  ;;  %v6544_v46 = vld [vmem:[%s11427_s10 + $0x468] sm:$0xff] }
 0xa29   : > { %v10935_v20 = vpop.f32.mrf.mxu1 }
 0xa2b   : > { %v4911_v4 = vpop.f32.mrf.mxu0 }
 0xa2c   : > { %v10948_v8 = vadd.f32 %v4911_v4, %v4856_v21  ;;  %6561 = vmatmul.msk.f32.vlgmr.msra.gmra.mxu1 %vm4483_vm7, %v6525_v17  ;;  %v6528_v21 = vld [vmem:[%s11427_s10 + $0x3e8] sm:$0xff]  ;;  %v10969_v17 = vpop.f32.mrf.mxu3 }
 0xa2e   : > { %v4944_v51 = vmax.f32 %v10946_v23, %v10948_v8  ;;  %6513 = vmatmul.msk.f32.gmra.mxu0 %vm4483_vm7, %v6487_v54  ;;  %v6490_v54 = vld [vmem:[%s11427_s10 + $0x328] sm:$0xff] }
 0xa2f   : > { %5386 = vmatmul.f32.gmra.mxu2 %v6542_v30  ;;  %v4865_v30 = vadd.f32 %v10828_v32, %v10747_v57  ;;  %v6548_v57 = vld [vmem:[%s11427_s10 + $0x488] sm:$0xff] }
 0xa30   : > { %5330 = vmatmul.f32.gmra.mxu3 %v6541_v45  ;;  %v11004_v45 = vadd.f32 %v10717_v35, %v4615_v19  ;;  %v4618_v35 = vadd.f32 %v10615_v13, %v10536_v37  ;;  %v6547_v13 = vld [vmem:[%s11427_s10 + $0x480] sm:$0xff] }
 0xa31   : > { %v10964_v33 = vpop.f32.mrf.mxu1 }
 0xa33   : > { %v4914_v4 = vpop.f32.mrf.mxu0 }
 0xa34   : > { %v10977_v11 = vadd.f32 %v4914_v4, %v4859_v26  ;;  %6562 = vmatmul.msk.f32.gmra.mxu1 %vm4483_vm7, %v6528_v21  ;;  %v6531_v26 = vld [vmem:[%s11427_s10 + $0x400] sm:$0xff]  ;;  %v10998_v21 = vpop.f32.mrf.mxu3 }
 0xa36   : > { %v4945_v18 = vmax.f32 %v10975_v50, %v10977_v11  ;;  %6514 = vmatmul.msk.f32.gmra.mxu0 %vm4483_vm7, %v6490_v54  ;;  %v6493_v54 = vld [vmem:[%s11427_s10 + $0x340] sm:$0xff] }
 0xa37   : > { %5389 = vmatmul.f32.gmra.mxu2 %v6545_v39  ;;  %v4868_v39 = vadd.f32 %v10851_v43, %v10763_v0  ;;  %v6550_v0 = vld [vmem:[%s11427_s10 + $0x498] sm:$0xff]  ;;  %v6551_v43 = vld [vmem:[%s11427_s10 + $0x4a0] sm:$0xff] }
 0xa38   : > { %5333 = vmatmul.f32.gmra.mxu3 %v6544_v46  ;;  %v11033_v46 = vadd.f32 %v10733_v25, %v4618_v35  ;;  %v4621_v25 = vadd.f32 %v10632_v31, %v10550_v1 }
 0xa39   : > { %v10993_v14 = vpop.f32.mrf.mxu1 }
 0xa3a   : > { %v11063_v1 = vadd.f32 %v10749_v60, %v4621_v25  ;;  %v4624_v60 = vadd.f32 %v10648_v3, %v10564_v63 }
 0xa3b   : > { %v4917_v4 = vpop.f32.mrf.mxu0 }
 0xa3c   : > { %v11006_v61 = vadd.f32 %v4917_v4, %v4862_v2  ;;  %6563 = vmatmul.msk.f32.gmra.mxu1 %vm4483_vm7, %v6531_v26  ;;  %v6534_v2 = vld [vmem:[%s11427_s10 + $0x418] sm:$0xff]  ;;  %v11027_v26 = vpop.f32.mrf.mxu3  ;;  %v11093_v63 = vadd.f32 %v10765_v36, %v4624_v60  ;;  %v4627_v36 = vadd.f32 %v10664_v27, %v10578_v7  ;;  %v6556_v27 = vld [vmem:[%s11427_s10 + $0x4c8] sm:$0xf] }
 0xa3e   : > { %v4946_v10 = vmax.f32 %v11004_v45, %v11006_v61  ;;  %6515 = vmatmul.msk.f32.gmra.mxu0 %vm4483_vm7, %v6493_v54  ;;  %v6496_v54 = vld [vmem:[%s11427_s10 + $0x358] sm:$0xff] }
 0xa3f   : > { %5392 = vmatmul.f32.gmra.mxu2 %v6548_v57 }
 0xa40   : > { %5336 = vmatmul.f32.gmra.mxu3 %v6547_v13  ;;  %v4871_v13 = vadd.f32 %v10879_v41, %v10779_v59  ;;  %v6553_v59 = vld [vmem:[%s11427_s10 + $0x4b0] sm:$0xff]  ;;  %v6554_v41 = vld [vmem:[%s11427_s10 + $0x4b8] sm:$0xff] }
 0xa41   : > { %v11022_v19 = vpop.f32.mrf.mxu1 }
 0xa43   : > { %v4920_v4 = vpop.f32.mrf.mxu0 }
 0xa44   : > { %v11035_v37 = vadd.f32 %v4920_v4, %v4865_v30  ;;  %6564 = vmatmul.msk.f32.gmra.mxu1 %vm4483_vm7, %v6534_v2  ;;  %v6537_v30 = vld [vmem:[%s11427_s10 + $0x430] sm:$0xff]  ;;  %v11054_v2 = vpop.f32.mrf.mxu3 }
 0xa46   : > { %6516 = vmatmul.msk.f32.gmra.mxu0 %vm4483_vm7, %v6496_v54  ;;  %v6499_v54 = vld [vmem:[%s11427_s10 + $0x370] sm:$0xff]  ;;  %v11699_v11 = vmax.f32 %v11033_v46, %v11035_v37 }
 0xa47   : > { %5395 = vmatmul.f32.gmra.mxu2 %v6551_v43  ;;  %v6543_v43 = vld [vmem:[%s11427_s10 + $0x460] sm:$0xff] }
 0xa48   : > { %5339 = vmatmul.f32.gmra.mxu3 %v6550_v0 }
 0xa49   : > { %v5109_v35 = vpop.f32.mrf.mxu1 }
 0xa4a   : > { %v11057_v4 = vadd.f32 %v5109_v35, %v10912_v52 }
 0xa4b   : > { %v4923_v32 = vpop.f32.mrf.mxu0 }
 0xa4c   : > { %v11065_v31 = vadd.f32 %v4923_v32, %v4868_v39  ;;  %6565 = vmatmul.msk.f32.gmra.mxu1 %vm4483_vm7, %v6537_v30  ;;  %v6540_v32 = vld [vmem:[%s11427_s10 + $0x448] sm:$0xff]  ;;  %v11084_v25 = vpop.f32.mrf.mxu3 }
 0xa4d   : > { %v6502_v30 = vld [vmem:[%s11427_s10 + $0x388] sm:$0xff] }
 0xa4e   : > { %v4948_v52 = vmax.f32 %v11063_v1, %v11065_v31  ;;  %6517 = vmatmul.msk.f32.gmra.mxu0 %vm4483_vm7, %v6499_v54  ;;  %v4874_v54 = vadd.f32 %v10907_v44, %v10795_v38  ;;  %v6557_v38 = vld [vmem:[%s11427_s10 + $0x4d0] sm:$0xf] }
 0xa4f   : > { %5398 = vmatmul.f32.gmra.mxu2 %v6554_v41 }
 0xa50   : > { %5342 = vmatmul.f32.gmra.mxu3 %v6553_v59  ;;  %v6546_v59 = vld [vmem:[%s11427_s10 + $0x478] sm:$0xff] }
 0xa51   : > { %v5112_v57 = vpop.f32.mrf.mxu1 }
 0xa52   : > { %v11087_v39 = vadd.f32 %v5112_v57, %v10940_v12 }
 0xa53   : > { %v4926_v35 = vpop.f32.mrf.mxu0 }
 0xa54   : > { %v11095_v3 = vadd.f32 %v4926_v35, %v4871_v13  ;;  %6566 = vmatmul.msk.f32.gmra.mxu1 %vm4483_vm7, %v6540_v32  ;;  %v5074_v60 = vpop.f32.mrf.mxu3  ;;  %v6505_v32 = vld [vmem:[%s11427_s10 + $0x3a0] sm:$0xf]  ;;  %v11121_v35 = vadd.f32 %v10781_v56, %v4627_v36  ;;  %v4630_v56 = vadd.f32 %v10680_v55, %v10594_v28 }
 0xa56   : > { %v4949_v12 = vmax.f32 %v11093_v63, %v11095_v3  ;;  %6518 = vmatmul.msk.f32.gmra.mxu0 %vm4483_vm7, %v6502_v30 }
 0xa57   : > { %5401 = vmatmul.f32.gmra.mxu2 %v6557_v38 }
 0xa58   : > { %5345 = vmatmul.f32.gmra.mxu3 %v6556_v27 }
 0xa59   : > { %v5115_v0 = vpop.f32.mrf.mxu1 }
 0xa5a   : > { %v11115_v13 = vadd.f32 %v5115_v0, %v10969_v17  ;;  %v4877_v17 = vadd.f32 %v10935_v20, %v10814_v40  ;;  %v6522_v0 = vld [vmem:[%s11427_s10 + $0x3b8] sm:$0xff]  ;;  %v4633_v40 = vadd.f32 %v10696_v47, %v10612_v62  ;;  %v4880_v20 = vadd.f32 %v10964_v33, %v10833_v6  ;;  %v11696_v47 = vld [vmem:[#allocation71_spill] sm:$0xff] }
 0xa5b   : > { %v4929_v57 = vpop.f32.mrf.mxu0  ;;  %v11697_v6 = vld [vmem:[#allocation75_spill] sm:$0xff] }
 0xa5c   : > { %v11123_v7 = vadd.f32 %v4929_v57, %v4874_v54  ;;  %6567 = vmatmul.msk.f32.gmra.mxu1 %vm4483_vm7, %v6543_v43  ;;  %v5077_v41 = vpop.f32.mrf.mxu3  ;;  %v11149_v43 = vadd.f32 %v10797_v42, %v4630_v56  ;;  %v6549_v42 = vld [vmem:[%s11427_s10 + $0x490] sm:$0xff]  ;;  %v11166_v38 = vadd.f32 %v10816_v53, %v4633_v40  ;;  %v4636_v33 = vadd.f32 %v11697_v6, %v11696_v47 }
 0xa5e   : > { %v4950_v44 = vmax.f32 %v11121_v35, %v11123_v7  ;;  %6519 = vmatmul.msk.f32.gmra.mxu0 %vm4483_vm7, %v6505_v32 }
 0xa61   : > { %v5118_v30 = vpop.f32.mrf.mxu1 }
 0xa62   : > { %v11143_v36 = vadd.f32 %v5118_v30, %v10998_v21 }
 0xa63   : > { %v4932_v54 = vpop.f32.mrf.mxu0 }
 0xa64   : > { %v11151_v28 = vadd.f32 %v4932_v54, %v4877_v17  ;;  %6568 = vmatmul.msk.f32.gmra.mxu1 %vm4483_vm7, %v6546_v59  ;;  %v5080_v57 = vpop.f32.mrf.mxu3  ;;  %v4883_v17 = vadd.f32 %v10993_v14, %v10856_v58  ;;  %v5107_v58 = vadd.f32 %v11022_v19, %v10884_v5  ;;  %v6558_v5 = vld [vmem:[%s11427_s10 + $0x4d8] sm:$0xf] }
 0xa66   : > { %v4951_v55 = vmax.f32 %v11149_v43, %v11151_v28  ;;  %6560 = vmatmul.msk.f32.vlgmr.msra.gmra.mxu0 %vm4483_vm7, %v6522_v0  ;;  %v11698_v0 = vld [vmem:[#allocation68_spill] sm:$0xff] }
 0xa67   : > { %v11182_v40 = vadd.f32 %v11698_v0, %v4636_v33 }
 0xa69   : > { %v5121_v21 = vpop.f32.mrf.mxu1 }
 0xa6a   : > { %v5122_v32 = vadd.f32 %v5121_v21, %v11027_v26  ;;  %v6552_v26 = vld [vmem:[%s11427_s10 + $0x4a8] sm:$0xff] }
 0xa6b   : > { %v4935_v27 = vpop.f32.mrf.mxu0 }
 0xa6c   : > { %v11168_v56 = vadd.f32 %v4935_v27, %v4880_v20  ;;  %6569 = vmatmul.msk.f32.gmra.mxu1 %vm4483_vm7, %v6549_v42  ;;  %v5083_v53 = vpop.f32.mrf.mxu3  ;;  %v6555_v42 = vld [vmem:[%s11427_s10 + $0x4c0] sm:$0xff] }
 0xa6e   : > { %v4952_v62 = vmax.f32 %v11166_v38, %v11168_v56  ;;  %v5478_v38 = vld [vmem:[%s11428_s11 + $0x8] sm:$0xff]  ;;  %v6574_v56 = vld [vmem:[%s11428_s11 + $0x70] sm:$0xff] }
 0xa71   : > { %v5124_v30 = vpop.f32.mrf.mxu1 }
 0xa72   : > { %v5125_v59 = vadd.f32 %v5124_v30, %v11054_v2 }
 0xa73   : > { %v4938_v54 = vpop.f32.mrf.mxu0 }
 0xa74   : > { %v11184_v20 = vadd.f32 %v4938_v54, %v4883_v17  ;;  %6570 = vmatmul.msk.f32.gmra.mxu1 %vm4483_vm7, %v6552_v26  ;;  %v5086_v2 = vpop.f32.mrf.mxu3  ;;  %v5366_v17 = vpop.f32.mrf.mxu2 }
 0xa76   : > { %v4953_v21 = vmax.f32 %v11182_v40, %v11184_v20  ;;  %v6587_v40 = vld [vmem:[%s11428_s11 + $0xd8] sm:$0xff]  ;;  %v5479_v20 = vld [vmem:[%s11428_s11 + $0x10] sm:$0xff] }
 0xa79   : > { %v5127_v14 = vpop.f32.mrf.mxu1 }
 0xa7a   : > { %v5128_v27 = vadd.f32 %v5127_v14, %v11084_v25 }
 0xa7b   : > { %v5162_v47 = vpop.f32.mrf.mxu0 }
 0xa7c   : > { %v5163_v6 = vadd.f32 %v5162_v47, %v5107_v58  ;;  %6571 = vmatmul.msk.f32.gmra.mxu1 %vm4483_vm7, %v6555_v42  ;;  %v5310_v19 = vpop.f32.mrf.mxu3  ;;  %v5369_v49 = vpop.f32.mrf.mxu2 }
 0xa7d   : > { %v11204_v0 = vadd.f32 %v5366_v17, %v5310_v19 }
 0xa7e   : > { %v11199_v33 = vmax.f32 %v4941_v22, %v5163_v6 }
 0xa81   : > { %v5130_v30 = vpop.f32.mrf.mxu1 }
 0xa82   : > { %v5131_v26 = vadd.f32 %v5130_v30, %v5074_v60 }
 0xa83   : > { %v5165_v54 = vpop.f32.mrf.mxu0 }
 0xa84   : > { %v5166_v25 = vadd.f32 %v5165_v54, %v11057_v4  ;;  %6572 = vmatmul.msk.f32.gmra.mxu1 %vm4483_vm7, %v6558_v5  ;;  %v5313_v58 = vpop.f32.mrf.mxu3 }
 0xa85   : > { %v5370_v47 = vadd.f32 %v5369_v49, %v5313_v58 }
 0xa86   : > { %v5202_v29 = vmax.f32 %v4942_v16, %v5166_v25 }
 0xa89   : > { %v5133_v22 = vpop.f32.mrf.mxu1 }
 0xa8a   : > { %v5134_v14 = vadd.f32 %v5133_v22, %v5077_v41  ;;  %v5372_v9 = vpop.f32.mrf.mxu2 }
 0xa8b   : > { %v5168_v42 = vpop.f32.mrf.mxu0 }
 0xa8c   : > { %v5169_v6 = vadd.f32 %v5168_v42, %v11087_v39  ;;  %v5316_v16 = vpop.f32.mrf.mxu3 }
 0xa8e   : > { %v11215_v60 = vmax.f32 %v4943_v48, %v5169_v6 }
 0xa91   : > { %v5136_v4 = vpop.f32.mrf.mxu1 }
 0xa92   : > { %v5137_v17 = vadd.f32 %v5136_v4, %v5080_v57  ;;  %v5375_v34 = vpop.f32.mrf.mxu2 }
 0xa93   : > { %v5171_v30 = vpop.f32.mrf.mxu0 }
 0xa94   : > { %v5172_v5 = vadd.f32 %v5171_v30, %v11115_v13  ;;  %v5319_v13 = vpop.f32.mrf.mxu3 }
 0xa96   : > { %v11221_v15 = vmax.f32 %v4944_v51, %v5172_v5 }
 0xa99   : > { %v5139_v41 = vpop.f32.mrf.mxu1 }
 0xa9a   : > { %v5140_v19 = vadd.f32 %v5139_v41, %v5083_v53 }
 0xa9b   : > { %v5174_v39 = vpop.f32.mrf.mxu0 }
 0xa9c   : > { %v5175_v54 = vadd.f32 %v5174_v39, %v11143_v36  ;;  %v5378_v36 = vpop.f32.mrf.mxu2  ;;  %v5322_v58 = vpop.f32.mrf.mxu3 }
 0xa9e   : > { %v11227_v24 = vmax.f32 %v4945_v18, %v5175_v54 }
 0xaa1   : > { %v5142_v48 = vpop.f32.mrf.mxu1 }
 0xaa2   : > { %v5143_v57 = vadd.f32 %v5142_v48, %v5086_v2 }
 0xaa3   : > { %v5177_v25 = vpop.f32.mrf.mxu0 }
 0xaa4   : > { %v5178_v23 = vadd.f32 %v5177_v25, %v5122_v32  ;;  %v5381_v6 = vpop.f32.mrf.mxu2  ;;  %v5325_v61 = vpop.f32.mrf.mxu3 }
 0xaa6   : > { %v11232_v8 = vmax.f32 %v4946_v10, %v5178_v23 }
 0xaa9   : > { %v5425_v51 = vpop.f32.mrf.mxu1 }
 0xaaa   : > { %v5426_v53 = vadd.f32 %v5425_v51, %v5370_v47 }
 0xaab   : > { %v5180_v49 = vpop.f32.mrf.mxu0 }
 0xaac   : > { %v5181_v22 = vadd.f32 %v5180_v49, %v5125_v59  ;;  %v11234_v50 = vmax.f32 %v5202_v29, %v5426_v53  ;;  %v5384_v46 = vpop.f32.mrf.mxu2  ;;  %v5328_v37 = vpop.f32.mrf.mxu3  ;;  %v5382_v53 = vadd.f32 %v5381_v6, %v5325_v61 }
 0xaae   : > { %v11239_v18 = vmax.f32 %v11699_v11, %v5181_v22  ;;  %v6586_v22 = vld [vmem:[%s11428_s11 + $0xd0] sm:$0xff]  ;;  %v5544_v11 = vmul.f32 %v6574_v56, %v11234_v50 }
 0xab1   : > { %v5428_v2 = vpop.f32.mrf.mxu1 }
 0xab3   : > { %v5183_v32 = vpop.f32.mrf.mxu0 }
 0xab4   : > { %v5184_v42 = vadd.f32 %v5183_v32, %v5128_v27  ;;  %v5387_v31 = vpop.f32.mrf.mxu2  ;;  %v5331_v5 = vpop.f32.mrf.mxu3 }
 0xab6   : > { %v11244_v45 = vmax.f32 %v4948_v52, %v5184_v42  ;;  %v5597_v42 = vmul.f32 %v6587_v40, %v11234_v50 }
 0xab9   : > { %v5431_v10 = vpop.f32.mrf.mxu1 }
 0xabb   : > { %v5186_v59 = vpop.f32.mrf.mxu0 }
 0xabc   : > { %v5187_v47 = vadd.f32 %v5186_v59, %v5131_v26  ;;  %v5390_v39 = vpop.f32.mrf.mxu2 }
 0xabe   : > { %v11249_v29 = vmax.f32 %v4949_v12, %v5187_v47  ;;  %v6576_v47 = vld [vmem:[%s11428_s11 + $0x80] sm:$0xff] }
 0xac1   : > { %v5434_v4 = vpop.f32.mrf.mxu1 }
 0xac3   : > { %v5189_v30 = vpop.f32.mrf.mxu0 }
 0xac4   : > { %v5190_v27 = vadd.f32 %v5189_v30, %v5134_v14  ;;  %v5334_v14 = vpop.f32.mrf.mxu3  ;;  %v5393_v23 = vpop.f32.mrf.mxu2 }
 0xac6   : > { %v11254_v1 = vmax.f32 %v4950_v44, %v5190_v27  ;;  %v5373_v44 = vadd.f32 %v5372_v9, %v5316_v16 }
 0xac9   : > { %v5437_v52 = vpop.f32.mrf.mxu1 }
 0xacb   : > { %v5192_v41 = vpop.f32.mrf.mxu0 }
 0xacc   : > { %v5193_v26 = vadd.f32 %v5192_v41, %v5137_v17  ;;  %v5376_v17 = vadd.f32 %v5375_v34, %v5319_v13  ;;  %v5337_v28 = vpop.f32.mrf.mxu3  ;;  %v5396_v59 = vpop.f32.mrf.mxu2  ;;  %v5391_v41 = vadd.f32 %v5390_v39, %v5334_v14 }
 0xacd   : > { %v5394_v14 = vadd.f32 %v5393_v23, %v5337_v28  ;;  %v6579_v23 = vld [vmem:[%s11428_s11 + $0x98] sm:$0xff] }
 0xace   : > { %v11259_v63 = vmax.f32 %v4951_v55, %v5193_v26  ;;  %v5429_v55 = vadd.f32 %v5428_v2, %v5373_v44  ;;  %v5432_v51 = vadd.f32 %v5431_v10, %v5376_v17  ;;  %v5438_v2 = vadd.f32 %v5437_v52, %v5382_v53  ;;  %v6577_v26 = vld [vmem:[%s11428_s11 + $0x88] sm:$0xff] }
 0xacf   : > { %v5388_v10 = vadd.f32 %v5387_v31, %v5331_v5  ;;  %v5481_v31 = vld [vmem:[%s11428_s11 + $0x20] sm:$0xff] }
 0xad0   : > { %v5464_v13 = vmax.f32 %v11221_v15, %v5432_v51  ;;  %v5480_v15 = vld [vmem:[%s11428_s11 + $0x18] sm:$0xff]  ;;  %v6578_v51 = vld [vmem:[%s11428_s11 + $0x90] sm:$0xff] }
 0xad1   : > { %v5440_v3 = vpop.f32.mrf.mxu1 }
 0xad2   : > { %v5546_v17 = vmul.f32 %v6576_v47, %v5464_v13 }
 0xad3   : > { %v5195_v12 = vpop.f32.mrf.mxu0 }
 0xad4   : > { %v5196_v54 = vadd.f32 %v5195_v12, %v5140_v19  ;;  %v5379_v19 = vadd.f32 %v5378_v36, %v5322_v58  ;;  %v6573_v36 = vld [vmem:[%s11428_s11 + $0x68] sm:$0xff]  ;;  %v5491_v58 = vmul.f32 %v5478_v38, %v11234_v50  ;;  %v5493_v50 = vmul.f32 %v5480_v15, %v5464_v13 }
 0xad5   : > { %v5466_v12 = vmax.f32 %v11232_v8, %v5438_v2 }
 0xad6   : > { %v11264_v35 = vmax.f32 %v4952_v62, %v5196_v54  ;;  %v5463_v62 = vmax.f32 %v11215_v60, %v5429_v55  ;;  %v5435_v16 = vadd.f32 %v5434_v4, %v5379_v19  ;;  %v5477_v60 = vld [vmem:[%s11428_s11] sm:$0xff] }
 0xad8   : > { %v5492_v6 = vmul.f32 %v5479_v20, %v5463_v62 }
 0xad9   : > { %v5443_v7 = vpop.f32.mrf.mxu1 }
 0xada   : > { %v5444_v39 = vadd.f32 %v5443_v7, %v5388_v10  ;;  %v5483_v7 = vld [vmem:[%s11428_s11 + $0x30] sm:$0xff]  ;;  %v5485_v10 = vld [vmem:[%s11428_s11 + $0x40] sm:$0xff] }
 0xadb   : > { %v5198_v48 = vpop.f32.mrf.mxu0 }
 0xadc   : > { %v5199_v25 = vadd.f32 %v5198_v48, %v5143_v57  ;;  %v5385_v57 = vadd.f32 %v5384_v46, %v5328_v37  ;;  %v6589_v46 = vld [vmem:[%s11428_s11 + $0xe8] sm:$0xff]  ;;  %v5465_v37 = vmax.f32 %v11227_v24, %v5435_v16  ;;  %v6590_v24 = vld [vmem:[%s11428_s11 + $0xf0] sm:$0xff] }
 0xadd   : > { %v5599_v55 = vmul.f32 %v6589_v46, %v5464_v13  ;;  %v5548_v13 = vmul.f32 %v6578_v51, %v5466_v12 }
 0xade   : > { %v11269_v43 = vmax.f32 %v4953_v21, %v5199_v25  ;;  %v6575_v21 = vld [vmem:[%s11428_s11 + $0x78] sm:$0xff]  ;;  %v5441_v5 = vadd.f32 %v5440_v3, %v5385_v57  ;;  %v5482_v3 = vld [vmem:[%s11428_s11 + $0x28] sm:$0xff]  ;;  %v5494_v19 = vmul.f32 %v5481_v31, %v5465_v37  ;;  %v5547_v56 = vmul.f32 %v6577_v26, %v5465_v37  ;;  %v6592_v57 = vld [vmem:[%s11428_s11 + $0x100] sm:$0xff] }
 0xadf   : > { %v5545_v61 = vmul.f32 %v6575_v21, %v5463_v62  ;;  %v5495_v21 = vmul.f32 %v5482_v3, %v5466_v12 }
 0xae0   : > { %v5467_v40 = vmax.f32 %v11239_v18, %v5441_v5  ;;  %v5468_v18 = vmax.f32 %v11244_v45, %v5444_v39  ;;  %v6593_v45 = vld [vmem:[%s11428_s11 + $0x108] sm:$0xff] }
 0xae1   : > { %v5446_v49 = vpop.f32.mrf.mxu1  ;;  %v5486_v5 = vld [vmem:[%s11428_s11 + $0x48] sm:$0xff] }
 0xae2   : > { %v5447_v20 = vadd.f32 %v5446_v49, %v5391_v41  ;;  %v5496_v2 = vmul.f32 %v5483_v7, %v5467_v40  ;;  %v5603_v31 = vmul.f32 %v6593_v45, %v5468_v18  ;;  %v6582_v41 = vld [vmem:[%s11428_s11 + $0xb0] sm:$0xff] }
 0xae3   : > { %v5422_v9 = vpop.f32.mrf.mxu0 }
 0xae4   : > { %v5423_v34 = vadd.f32 %v5422_v9, %v11204_v0  ;;  %v6588_v0 = vld [vmem:[%s11428_s11 + $0xe0] sm:$0xff]  ;;  %v6591_v9 = vld [vmem:[%s11428_s11 + $0xf8] sm:$0xff] }
 0xae5   : > { %v5598_v52 = vmul.f32 %v6588_v0, %v5463_v62  ;;  %v5600_v62 = vmul.f32 %v6590_v24, %v5465_v37 }
 0xae6   : > { %v5461_v32 = vmax.f32 %v11199_v33, %v5423_v34  ;;  %v5340_v33 = vpop.f32.mrf.mxu3 }
 0xae8   : > { %v5490_v4 = vmul.f32 %v5477_v60, %v5461_v32  ;;  %v5543_v30 = vmul.f32 %v6573_v36, %v5461_v32  ;;  %v5596_v27 = vmul.f32 %v6586_v22, %v5461_v32  ;;  %v5397_v60 = vadd.f32 %v5396_v59, %v5340_v33  ;;  %v5484_v22 = vld [vmem:[%s11428_s11 + $0x38] sm:$0xff]  ;;  %v6581_v59 = vld [vmem:[%s11428_s11 + $0xa8] sm:$0xff] }
 0xae9   : > { %v5449_v25 = vpop.f32.mrf.mxu1  ;;  %v5601_v36 = vmul.f32 %v6591_v9, %v5466_v12  ;;  %v5549_v32 = vmul.f32 %v6579_v23, %v5467_v40 }
 0xaea   : > { %v5503_v54 = vadd.f32 %v5491_v58, %v5490_v4  ;;  %v5556_v44 = vadd.f32 %v5544_v11, %v5543_v30  ;;  %v5609_v48 = vadd.f32 %v5597_v42, %v5596_v27  ;;  %v5450_v49 = vadd.f32 %v5449_v25, %v5394_v14  ;;  %v6580_v58 = vld [vmem:[%s11428_s11 + $0xa0] sm:$0xff] }
 0xaeb   : > { %v5469_v42 = vmax.f32 %v11249_v29, %v5447_v20  ;;  %v5497_v27 = vmul.f32 %v5484_v22, %v5468_v18  ;;  %v5550_v33 = vmul.f32 %v6580_v58, %v5468_v18  ;;  %v6594_v29 = vld [vmem:[%s11428_s11 + $0x110] sm:$0xff] }
 0xaec   : > { %v5504_v53 = vadd.f32 %v5503_v54, %v5492_v6  ;;  %v5557_v38 = vadd.f32 %v5556_v44, %v5545_v61  ;;  %v5610_v8 = vadd.f32 %v5609_v48, %v5598_v52  ;;  %v5399_v6 = vpop.f32.mrf.mxu2  ;;  %v5602_v61 = vmul.f32 %v6592_v57, %v5467_v40  ;;  %v6595_v48 = vld [vmem:[%s11428_s11 + $0x118] sm:$0xff]  ;;  %v6597_v57 = vld [vmem:[%s11428_s11 + $0x128] sm:$0xff] }
 0xaed   : > { %v5470_v52 = vmax.f32 %v11254_v1, %v5450_v49  ;;  %v5498_v54 = vmul.f32 %v5485_v10, %v5469_v42  ;;  %v5551_v44 = vmul.f32 %v6581_v59, %v5469_v42  ;;  %v5604_v25 = vmul.f32 %v6594_v29, %v5469_v42  ;;  %v5488_v49 = vld [vmem:[%s11428_s11 + $0x58] sm:$0xff]  ;;  %v6598_v10 = vld [vmem:[%s11428_s11 + $0x130] sm:$0xf]  ;;  %v5489_v59 = vld [vmem:[%s11428_s11 + $0x60] sm:$0xf] }
 0xaee   : > { %v5505_v28 = vadd.f32 %v5504_v53, %v5493_v50  ;;  %v5558_v16 = vadd.f32 %v5557_v38, %v5546_v17  ;;  %v5611_v34 = vadd.f32 %v5610_v8, %v5599_v55  ;;  %v5343_v46 = vpop.f32.mrf.mxu3  ;;  %v6583_v17 = vld [vmem:[%s11428_s11 + $0xb8] sm:$0xff]  ;;  %v6596_v55 = vld [vmem:[%s11428_s11 + $0x120] sm:$0xff]  ;;  %v5487_v38 = vld [vmem:[%s11428_s11 + $0x50] sm:$0xff] }
 0xaef   : > { %v5552_v51 = vmul.f32 %v6582_v41, %v5470_v52  ;;  %v5400_v53 = vadd.f32 %v5399_v6, %v5343_v46 }
 0xaf0   : > { %v5506_v11 = vadd.f32 %v5505_v28, %v5494_v19  ;;  %v5559_v0 = vadd.f32 %v5558_v16, %v5547_v56  ;;  %v5612_v15 = vadd.f32 %v5611_v34, %v5600_v62  ;;  %v5499_v19 = vmul.f32 %v5486_v5, %v5470_v52 }
 0xaf1   : > { %v5452_v47 = vpop.f32.mrf.mxu1 }
 0xaf2   : > { %v5613_v37 = vadd.f32 %v5612_v15, %v5601_v36  ;;  %v5507_v4 = vadd.f32 %v5506_v11, %v5495_v21  ;;  %v5560_v30 = vadd.f32 %v5559_v0, %v5548_v13  ;;  %v5453_v50 = vadd.f32 %v5452_v47, %v5397_v60  ;;  %v6584_v36 = vld [vmem:[%s11428_s11 + $0xc0] sm:$0xff] }
 0xaf4   : > { %v5614_v26 = vadd.f32 %v5613_v37, %v5602_v61  ;;  %v5508_v24 = vadd.f32 %v5507_v4, %v5496_v2  ;;  %v5561_v12 = vadd.f32 %v5560_v30, %v5549_v32  ;;  %v5471_v1 = vmax.f32 %v11259_v63, %v5453_v50  ;;  %v5402_v13 = vpop.f32.mrf.mxu2 }
 0xaf5   : > { %v5605_v63 = vmul.f32 %v6595_v48, %v5470_v52 }
 0xaf6   : > { %v5615_v3 = vadd.f32 %v5614_v26, %v5603_v31  ;;  %v5509_v39 = vadd.f32 %v5508_v24, %v5497_v27  ;;  %v5562_v14 = vadd.f32 %v5561_v12, %v5550_v33  ;;  %v5553_v9 = vmul.f32 %v6583_v17, %v5471_v1  ;;  %v5346_v34 = vpop.f32.mrf.mxu3 }
 0xaf7   : > { %v5606_v40 = vmul.f32 %v6596_v55, %v5471_v1  ;;  %v5500_v7 = vmul.f32 %v5487_v38, %v5471_v1  ;;  %v5403_v11 = vadd.f32 %v5402_v13, %v5346_v34 }
 0xaf8   : > { %v5616_v8 = vadd.f32 %v5615_v3, %v5604_v25  ;;  %v5510_v56 = vadd.f32 %v5509_v39, %v5498_v54  ;;  %v5563_v62 = vadd.f32 %v5562_v14, %v5551_v44 }
 0xaf9   : > { %v5455_v20 = vpop.f32.mrf.mxu1 }
 0xafa   : > { %v5617_v21 = vadd.f32 %v5616_v8, %v5605_v63  ;;  %v5511_v23 = vadd.f32 %v5510_v56, %v5499_v19  ;;  %v5564_v28 = vadd.f32 %v5563_v62, %v5552_v51  ;;  %v5456_v16 = vadd.f32 %v5455_v20, %v5400_v53  ;;  %v5476_v62 = vld [vmem:[%s11429_s12] sm:$0x1] }
 0xafb   : > { %v5474_v63 = vlaneseq }
 0xafc   : > { %v5618_v18 = vadd.f32 %v5617_v21, %v5606_v40  ;;  %v5512_v60 = vadd.f32 %v5511_v23, %v5500_v7  ;;  %v5565_v22 = vadd.f32 %v5564_v28, %v5553_v9  ;;  %v5472_v58 = vmax.f32 %v11264_v35, %v5456_v16  ;;  %v6585_v35 = vld [vmem:[%s11428_s11 + $0xc8] sm:$0xf] }
 0xafd   : > { %v5475_v8 = vand.u32 127, %v5474_v63 }
 0xafe   : > { %v5607_v0 = vmul.f32 %v6597_v57, %v5472_v58  ;;  %v5501_v15 = vmul.f32 %v5488_v49, %v5472_v58  ;;  %v5554_v2 = vmul.f32 %v6584_v36, %v5472_v58 }
 0xaff   : > { %vm5525_vm8 = vcmp.eq.s32.totalorder %v5475_v8, 0  ;;  %vm5578_vm9 = vcmp.eq.s32.totalorder %v5475_v8, 1  ;;  %vm5631_vm10 = vcmp.eq.s32.totalorder %v5475_v8, 2 }
 0xb00   : > { %v5619_v32 = vadd.f32 %v5618_v18, %v5607_v0  ;;  %v5513_v45 = vadd.f32 %v5512_v60, %v5501_v15  ;;  %v5566_v42 = vadd.f32 %v5565_v22, %v5554_v2 }
 0xb01   : > { %v5458_v6 = vpop.f32.mrf.mxu1 }
 0xb02   : > { %v5459_v61 = vadd.f32 %v5458_v6, %v5403_v11 }
 0xb04   : > { %v5473_v47 = vmax.f32 %v11269_v43, %v5459_v61 }
 0xb06   : > { %v5608_v46 = vmul.f32 %v6598_v10, %v5473_v47  ;;  %v5502_v37 = vmul.f32 %v5489_v59, %v5473_v47  ;;  %v5555_v4 = vmul.f32 %v6585_v35, %v5473_v47 }
 0xb08   : > { %v5620_v30 = vsel %vm630_vm2, %v5608_v46, 0.0  ;;  %v5514_v27 = vsel %vm630_vm2, %v5502_v37, 0.0  ;;  %v5567_v33 = vsel %vm630_vm2, %v5555_v4, 0.0 }
 0xb09   : > { %v5621_v29 = vadd.f32 %v5620_v30, %v5619_v32  ;;  %v5515_v52 = vadd.f32 %v5514_v27, %v5513_v45  ;;  %v5568_v50 = vadd.f32 %v5567_v33, %v5566_v42 }
 0xb0b   : > { %5622 = vadd.xlane.f32.xlu1 %v5621_v29  ;;  %5516 = vadd.xlane.f32.xlu0 %v5515_v52 }
 0xb13   : > { %5569 = vadd.xlane.f32.xlu0 %v5568_v50 }
 0xb7e   : > { %v5623_v31 = vpop.xlane.xlu1 %5622  ;;  %v5517_v5 = vpop.xlane.xlu0 %5516 }
 0xb7f   : > { %v5624_v41 = vrot.slane %v5623_v31, 4  ;;  %v5518_v26 = vrot.slane %v5517_v5, 4 }
 0xb81   : > { %v5519_v43 = vadd.f32 %v5518_v26, %v5517_v5  ;;  %v5625_v24 = vadd.f32 %v5624_v41, %v5623_v31 }
 0xb83   : > { %v5520_v12 = vrot.slane %v5519_v43, 2  ;;  %v5626_v44 = vrot.slane %v5625_v24, 2 }
 0xb85   : > { %v5521_v54 = vadd.f32 %v5520_v12, %v5519_v43  ;;  %v5627_v3 = vadd.f32 %v5626_v44, %v5625_v24 }
 0xb86   : > { %v5570_v48 = vpop.xlane.xlu0 %5569 }
 0xb87   : > { %v5571_v1 = vrot.slane %v5570_v48, 4  ;;  %v5522_v25 = vrot.slane %v5521_v54, 1  ;;  %v5628_v19 = vrot.slane %v5627_v3, 1 }
 0xb89   : > { %v5572_v17 = vadd.f32 %v5571_v1, %v5570_v48  ;;  %v5523_v55 = vadd.f32 %v5522_v25, %v5521_v54  ;;  %v5629_v38 = vadd.f32 %v5628_v19, %v5627_v3 }
 0xb8b   : > { %v5573_v39 = vrot.slane %v5572_v17, 2  ;;  %6616 = vpush %v5523_v55 }
 0xb8d   : > { %v5574_v14 = vadd.f32 %v5573_v39, %v5572_v17 }
 0xb8f   : > { %v5575_v51 = vrot.slane %v5574_v14, 1 }
 0xb91   : > { %v5576_v53 = vadd.f32 %v5575_v51, %v5574_v14 }
 0xb93   : > { %6618 = vpush %v5576_v53 }
 0xb94   : > { %6620 = vpush %v5629_v38 }
 0xbbc   : > { %s6617_s22 = spop %6616 }
 0xbbd   : > { %v5526_v56 = vstv %s6617_s22 }
 0xbbe   : > { %v5527_v9 = vsel %vm5525_vm8, %v5526_v56, 0.0 }
 0xbbf   : > { %v5528_v40 = vadd.f32 %v5527_v9, %v5476_v62 }
 0xbc4   : > { %s6619_s27 = spop %6618 }
 0xbc5   : > { %v5579_v20 = vstv %s6619_s27  ;;  %s6621_s28 = spop %6620 }
 0xbc6   : > { %v5580_v21 = vsel %vm5578_vm9, %v5579_v20, 0.0  ;;  %v5632_v7 = vstv %s6621_s28 }
 0xbc7   : > { %v5581_v23 = vadd.f32 %v5580_v21, %v5528_v40  ;;  %v5633_v28 = vsel %vm5631_vm10, %v5632_v7, 0.0 }
 0xbc9   : > { %v5634_v16 = vadd.f32 %v5633_v28, %v5581_v23 }
 0xbcb   : > { %v5636_v34 = vperm.slane %v5634_v16, 0 }
 0xbcd   : > { %5638 = vst [vmem:[%s458_s16] sm:$0xff] %v5636_v34 }
 0xbce PF: > { %s23_s25 = sadd.s32 1, %s6639_s25  }
 0xbcf   : > { %p20_p4 = scmp.ge.s32.totalorder %s23_s25, 4  }
 0xbd1   :  { %22 = sbr.rel (!%p20_p4) target bundleno = 1 (0x1), region = 126 }

</bundles_post_ra>
